<compile_context>
chip_gen: v6e
topology: v6e:2x2x1
jax: 0.10.0
libtpu: 0.0.40
codegen_flags: <defaults>
</compile_context>

<pallas_src>
import jax
import jax.numpy as jnp
from jax import lax
from jax.experimental import pallas as pl
from jax.experimental.pallas import tpu as pltpu

STATE_DIM = 32
ACT_DIM = 8
VALUE_DIM = 1
LATENT = 256          # GRU hidden size (fixed in the module)
T = 8                 # sequence length
B = 2                 # batch
BPAD = 8              # batch padded to a full sublane tile inside the kernel
HEAD_W = 2 * ACT_DIM  # fused head width: [mu | log_sigma] (critic value head padded)
EPS_OBS = 1e-5
CLAMP = 5.0


def _relu6(x):
    return jnp.clip(x, 0.0, 6.0)


# --------------------------------------------------------------------------
# Fused kernel: obs-normalization + GRU + last-valid-frame select + MLP head.
# grid=(2,):  program_id(0)==0 -> actor branch, ==1 -> critic branch.
# --------------------------------------------------------------------------
def ac_fused_kernel(x_ref, idx_ref, mean_ref, var_ref,
                    wih_ref, whh_ref, bih_ref, bhh_ref,
                    b1_ref, b2_ref, b3_ref, wh_ref, bh_ref,
                    w1_hbm, w2_hbm, w3_hbm,
                    out_ref,
                    w1_v, w2_v, w3_v, dma_sem):
    H = LATENT
    br = pl.program_id(0)
    is_actor = br == 0

    # Kick off the MLP-trunk weight streams immediately (bf16, ~3.5 MiB/branch) so
    # the DMA is hidden under the serial GRU recurrence below.
    cp1 = pltpu.make_async_copy(w1_hbm.at[br], w1_v, dma_sem.at[0])
    cp2 = pltpu.make_async_copy(w2_hbm.at[br], w2_v, dma_sem.at[1])
    cp3 = pltpu.make_async_copy(w3_hbm.at[br], w3_v, dma_sem.at[2])
    cp1.start()
    cp2.start()
    cp3.start()

    # RunningMeanStd.forward (norm path, clamp=5) applied to all T*BPAD rows, then
    # the GRU input projection hoisted out of the recurrence as one bf16 MXU matmul.
    xn = (x_ref[...] - mean_ref[...]) * lax.rsqrt(var_ref[...] + EPS_OBS)
    xn = jnp.clip(xn, -CLAMP, CLAMP)
    gi_all = jnp.dot(xn.astype(jnp.bfloat16), wih_ref[...],
                     preferred_element_type=jnp.float32) + bih_ref[...]

    whh = whh_ref[...]                               # bf16, consumed by MXU directly
    bhh = bhh_ref[...]                               # f32
    idx = idx_ref[...]                               # (BPAD, 1) int32, pre-clipped

    h = jnp.zeros((BPAD, H), jnp.float32)
    sel = jnp.zeros((BPAD, H), jnp.float32)
    # Statically unrolled T-step recurrence; hidden state carried in values, gate
    # math in f32 (v5e-safe), only the MXU operands in bf16.
    for t in range(T):
        gi = gi_all[t * BPAD:(t + 1) * BPAD, :]      # aligned (8, 3H) tile
        gh = jnp.dot(h.astype(jnp.bfloat16), whh,
                     preferred_element_type=jnp.float32) + bhh
        rz = jax.nn.sigmoid(gi[:, :2 * H] + gh[:, :2 * H])   # fused r|z gate
        r = rz[:, :H]
        z = rz[:, H:]
        n = jnp.tanh(gi[:, 2 * H:] + r * gh[:, 2 * H:])
        h = (1.0 - z) * n + z * h
        sel = jnp.where(idx == t, h, sel)            # select the seq_end_frame row

    # MLP trunk: wait on each weight stream right before its matmul.
    cp1.wait()
    x1 = _relu6(jnp.dot(sel.astype(jnp.bfloat16), w1_v[...],
                        preferred_element_type=jnp.float32) + b1_ref[...])
    cp2.wait()
    x2 = _relu6(jnp.dot(x1.astype(jnp.bfloat16), w2_v[...],
                        preferred_element_type=jnp.float32) + b2_ref[...])
    cp3.wait()
    x3 = jnp.dot(x2.astype(jnp.bfloat16), w3_v[...],
                 preferred_element_type=jnp.float32) + b3_ref[...]

    # Branch-specific epilogue; tiny precision-sensitive heads stay f32.
    @pl.when(is_actor)
    def _():
        head = jnp.dot(x3, wh_ref[...],
                       preferred_element_type=jnp.float32) + bh_ref[...]
        out_ref[:, :ACT_DIM] = head[:, :ACT_DIM]                   # mu
        out_ref[:, ACT_DIM:] = jnp.exp(head[:, ACT_DIM:]) + 1e-8   # sigma

    @pl.when(jnp.logical_not(is_actor))
    def _():
        xf = _relu6(x3)
        out_ref[...] = jnp.dot(xf, wh_ref[...],
                               preferred_element_type=jnp.float32) + bh_ref[...]


# --------------------------------------------------------------------------
# ACModel.forward wrapper
# --------------------------------------------------------------------------
def acmodel_forward(packed, obs, seq_end_frame):
    B_ = obs.shape[0]
    s = obs.reshape(B_, -1, STATE_DIM)                       # observe(): (B, T, D)
    T_ = s.shape[1]

    # Time-major rows, batch zero-padded to a full 8-row sublane tile per step.
    x_tbd = jnp.transpose(s, (1, 0, 2)).astype(jnp.float32)  # (T, B, D)
    x_pad = jnp.zeros((T_, BPAD, STATE_DIM), jnp.float32).at[:, :B_, :].set(x_tbd)
    x_flat = x_pad.reshape(T_ * BPAD, STATE_DIM)

    idx = jnp.minimum(seq_end_frame, T_ - 1)                 # torch.clip(..., max=T-1)
    idx = jnp.where(idx < 0, idx + T_, idx)                  # torch negative indexing
    idx = jnp.clip(idx, 0, T_ - 1)                           # safety clamp
    idx_pad = jnp.full((BPAD, 1), -1, jnp.int32).at[:B_, 0].set(idx.astype(jnp.int32))

    D3 = 3 * LATENT
    in_specs = [
        pl.BlockSpec((T_ * BPAD, STATE_DIM), lambda i: (0, 0)),    # x (normalized in-kernel)
        pl.BlockSpec((BPAD, 1), lambda i: (0, 0)),                 # idx
        pl.BlockSpec((1, STATE_DIM), lambda i: (0, 0)),            # ob mean
        pl.BlockSpec((1, STATE_DIM), lambda i: (0, 0)),            # ob var
        pl.BlockSpec((None, STATE_DIM, D3), lambda i: (i, 0, 0)),  # GRU W_ih (bf16)
        pl.BlockSpec((None, LATENT, D3), lambda i: (i, 0, 0)),     # GRU W_hh (bf16)
        pl.BlockSpec((None, 1, D3), lambda i: (i, 0, 0)),          # GRU b_ih
        pl.BlockSpec((None, 1, D3), lambda i: (i, 0, 0)),          # GRU b_hh
        pl.BlockSpec((None, 1, 1024), lambda i: (i, 0, 0)),        # b1
        pl.BlockSpec((None, 1, 1024), lambda i: (i, 0, 0)),        # b2
        pl.BlockSpec((None, 1, 512), lambda i: (i, 0, 0)),         # b3
        pl.BlockSpec((None, 512, HEAD_W), lambda i: (i, 0, 0)),    # head W (f32, tiny)
        pl.BlockSpec((None, 1, HEAD_W), lambda i: (i, 0, 0)),      # head b
        pl.BlockSpec(memory_space=pl.ANY),                         # W1 (bf16, manual DMA)
        pl.BlockSpec(memory_space=pl.ANY),                         # W2 (bf16, manual DMA)
        pl.BlockSpec(memory_space=pl.ANY),                         # W3 (bf16, manual DMA)
    ]

    grid_spec = pltpu.PrefetchScalarGridSpec(
        num_scalar_prefetch=0,
        grid=(2,),
        in_specs=in_specs,
        out_specs=pl.BlockSpec((None, BPAD, HEAD_W), lambda i: (i, 0, 0)),
        scratch_shapes=[
            pltpu.VMEM((LATENT, 1024), jnp.bfloat16),   # W1 landing buffer
            pltpu.VMEM((1024, 1024), jnp.bfloat16),     # W2 landing buffer
            pltpu.VMEM((1024, 512), jnp.bfloat16),      # W3 landing buffer
            pltpu.SemaphoreType.DMA((3,)),
        ],
    )

    out = pl.pallas_call(
        ac_fused_kernel,
        grid_spec=grid_spec,
        out_shape=jax.ShapeDtypeStruct((2, BPAD, HEAD_W), jnp.float32),
        compiler_params=pltpu.CompilerParams(
            dimension_semantics=("parallel",),          # actor/critic on separate TCs (v7x)
            vmem_limit_bytes=32 * 1024 * 1024),
    )(x_flat, idx_pad, packed["ob_mean"], packed["ob_var"],
      packed["wih"], packed["whh"], packed["bih"], packed["bhh"],
      packed["b1"], packed["b2"], packed["b3"], packed["wh"], packed["bh"],
      packed["w1"], packed["w2"], packed["w3"])

    mu = out[0, :B_, :ACT_DIM]
    sigma = out[0, :B_, ACT_DIM:HEAD_W]
    v = out[1, :B_, :VALUE_DIM]
    return (mu, sigma), v


# --------------------------------------------------------------------------
# Deterministic parameter construction (mirrors module __init__ shapes/inits)
# --------------------------------------------------------------------------
def _uniform(key, shape, lo, hi):
    return jax.random.uniform(key, shape, jnp.float32, lo, hi)


def init_linear(key, fan_in, fan_out, w_range=None, bias_value=None):
    kw, kb = jax.random.split(key)
    k = 1.0 / float(fan_in) ** 0.5
    wr = k if w_range is None else w_range
    w = _uniform(kw, (fan_in, fan_out), -wr, wr)              # stored (in, out)
    if bias_value is None:
        b = _uniform(kb, (1, fan_out), -k, k)
    else:
        b = jnp.full((1, fan_out), bias_value, jnp.float32)
    return w, b


def init_gru(key, input_dim, hidden):
    k = 1.0 / float(hidden) ** 0.5
    k1, k2, k3, k4 = jax.random.split(key, 4)
    wih = _uniform(k1, (input_dim, 3 * hidden), -k, k)        # [r|z|n] columns
    whh = _uniform(k2, (hidden, 3 * hidden), -k, k)
    bih = _uniform(k3, (1, 3 * hidden), -k, k)
    bhh = _uniform(k4, (1, 3 * hidden), -k, k)
    return wih, whh, bih, bhh


def make_params(key):
    keys = jax.random.split(key, 12)
    return {
        # RunningMeanStd buffers (mean=0, var=1, count=1 at init)
        "ob_mean": jnp.zeros((1, STATE_DIM), jnp.float32),
        "ob_var": jnp.ones((1, STATE_DIM), jnp.float32),
        "actor_gru": init_gru(keys[0], STATE_DIM, LATENT),
        "critic_gru": init_gru(keys[1], STATE_DIM, LATENT),
        "actor": {
            "mlp1": init_linear(keys[2], LATENT, 1024),
            "mlp2": init_linear(keys[3], 1024, 1024),
            "mlp3": init_linear(keys[4], 1024, 512),
            "mu": init_linear(keys[5], 512, ACT_DIM),
            # init_sigma=None: weight ~ U(-1e-4, 1e-4), bias = -3
            "log_sigma": init_linear(keys[6], 512, ACT_DIM,
                                     w_range=1e-4, bias_value=-3.0),
        },
        "critic": {
            # Critic.__init__: mlp weights ~ U(-1e-4, 1e-4), biases = 0
            "mlp1": init_linear(keys[7], LATENT, 1024, w_range=1e-4, bias_value=0.0),
            "mlp2": init_linear(keys[8], 1024, 1024, w_range=1e-4, bias_value=0.0),
            "mlp3": init_linear(keys[9], 1024, 512, w_range=1e-4, bias_value=0.0),
            "mlp4": init_linear(keys[10], 512, VALUE_DIM, w_range=1e-4, bias_value=0.0),
        },
    }


def pack_params(params):
    """Stack actor/critic weights along a leading branch axis; bf16 the big matrices."""
    a, c = params["actor"], params["critic"]
    ag, cg = params["actor_gru"], params["critic_gru"]

    # Fused actor head [mu | log_sigma]; critic value head zero-padded to same width.
    wh_a = jnp.concatenate([a["mu"][0], a["log_sigma"][0]], axis=1)
    bh_a = jnp.concatenate([a["mu"][1], a["log_sigma"][1]], axis=1)
    wh_c = jnp.pad(c["mlp4"][0], ((0, 0), (0, HEAD_W - VALUE_DIM)))
    bh_c = jnp.pad(c["mlp4"][1], ((0, 0), (0, HEAD_W - VALUE_DIM)))

    return {
        "ob_mean": params["ob_mean"],
        "ob_var": params["ob_var"],
        "wih": jnp.stack([ag[0], cg[0]]).astype(jnp.bfloat16),
        "whh": jnp.stack([ag[1], cg[1]]).astype(jnp.bfloat16),
        "bih": jnp.stack([ag[2], cg[2]]),
        "bhh": jnp.stack([ag[3], cg[3]]),
        "w1": jnp.stack([a["mlp1"][0], c["mlp1"][0]]).astype(jnp.bfloat16),
        "b1": jnp.stack([a["mlp1"][1], c["mlp1"][1]]),
        "w2": jnp.stack([a["mlp2"][0], c["mlp2"][0]]).astype(jnp.bfloat16),
        "b2": jnp.stack([a["mlp2"][1], c["mlp2"][1]]),
        "w3": jnp.stack([a["mlp3"][0], c["mlp3"][0]]).astype(jnp.bfloat16),
        "b3": jnp.stack([a["mlp3"][1], c["mlp3"][1]]),
        "wh": jnp.stack([wh_a, wh_c]),        # tiny, precision-sensitive heads stay f32
        "bh": jnp.stack([bh_a, bh_c]),
    }


# --------------------------------------------------------------------------
# Pure-JAX reference with identical numerics (same bf16 weights / activation
# casts / f32 accumulation) for sanity checking the kernel structure.
# --------------------------------------------------------------------------
def _forward_ref(packed, obs, seq_end_frame):
    B_ = obs.shape[0]
    s = obs.reshape(B_, -1, STATE_DIM)
    T_ = s.shape[1]
    x_tbd = jnp.transpose(s, (1, 0, 2)).astype(jnp.float32)
    idx = jnp.minimum(seq_end_frame, T_ - 1)
    idx = jnp.where(idx < 0, idx + T_, idx)
    idx = jnp.clip(idx, 0, T_ - 1)
    rows = jnp.arange(B_)
    mean, var = packed["ob_mean"], packed["ob_var"]

    def branch(i, final_relu):
        wih, whh = packed["wih"][i], packed["whh"][i]       # bf16
        bih, bhh = packed["bih"][i], packed["bhh"][i]
        H = LATENT

        def step(h, x_t):
            xn = jnp.clip((x_t - mean) * lax.rsqrt(var + EPS_OBS), -CLAMP, CLAMP)
            gi = jnp.dot(xn.astype(jnp.bfloat16), wih,
                         preferred_element_type=jnp.float32) + bih
            gh = jnp.dot(h.astype(jnp.bfloat16), whh,
                         preferred_element_type=jnp.float32) + bhh
            r = jax.nn.sigmoid(gi[:, :H] + gh[:, :H])
            z = jax.nn.sigmoid(gi[:, H:2 * H] + gh[:, H:2 * H])
            n = jnp.tanh(gi[:, 2 * H:] + r * gh[:, 2 * H:])
            h_new = (1.0 - z) * n + z * h
            return h_new, h_new

        _, hs = lax.scan(step, jnp.zeros((B_, H), jnp.float32), x_tbd)
        h = hs[idx, rows]
        x = _relu6(jnp.dot(h.astype(jnp.bfloat16), packed["w1"][i],
                           preferred_element_type=jnp.float32) + packed["b1"][i])
        x = _relu6(jnp.dot(x.astype(jnp.bfloat16), packed["w2"][i],
                           preferred_element_type=jnp.float32) + packed["b2"][i])
        x = jnp.dot(x.astype(jnp.bfloat16), packed["w3"][i],
                    preferred_element_type=jnp.float32) + packed["b3"][i]
        if final_relu:
            x = _relu6(x)
        return jnp.dot(x, packed["wh"][i],
                       preferred_element_type=jnp.float32) + packed["bh"][i]

    a_out = branch(0, False)
    c_out = branch(1, True)
    mu = a_out[:, :ACT_DIM]
    sigma = jnp.exp(a_out[:, ACT_DIM:]) + 1e-8
    v = c_out[:, :VALUE_DIM]
    return (mu, sigma), v


if __name__ == "__main__":
    key = jax.random.PRNGKey(0)
    k_param, k_obs = jax.random.split(key)
    packed = pack_params(make_params(k_param))

    obs = jax.random.normal(k_obs, (B, T * STATE_DIM), jnp.float32)
    seq_end_frame = jnp.array([3, 100], dtype=jnp.int32)   # second one exercises clipping

    (mu, sigma), v = jax.block_until_ready(acmodel_forward(packed, obs, seq_end_frame))
    (mu_r, sigma_r), v_r = jax.block_until_ready(_forward_ref(packed, obs, seq_end_frame))

    assert mu.shape == (B, ACT_DIM) and sigma.shape == (B, ACT_DIM) and v.shape == (B, VALUE_DIM)
    assert jnp.allclose(mu, mu_r, rtol=1e-2, atol=1e-3), (mu, mu_r)
    assert jnp.allclose(sigma, sigma_r, rtol=1e-2, atol=1e-3), (sigma, sigma_r)
    assert jnp.allclose(v, v_r, rtol=1e-2, atol=1e-3), (v, v_r)

    # TODO(synk): DiagonalPopArt unnorm path and goal embedding are not exercised by
    # forward() with goal_dim=(0,0)/unnorm=False and are intentionally not implemented.
    print("KERNEL_OK")
</pallas_src>

<mosaic_0001>
module attributes {stable_mosaic.version = 11 : i64} {
  func.func @ac_fused_kernel(%arg0: i32, %arg1: memref<64x32xf32, #tpu.memory_space<vmem>>, %arg2: memref<8x1xi32, #tpu.memory_space<vmem>>, %arg3: memref<1x32xf32, #tpu.memory_space<vmem>>, %arg4: memref<1x32xf32, #tpu.memory_space<vmem>>, %arg5: memref<1x32x768xbf16, #tpu.memory_space<vmem>>, %arg6: memref<1x256x768xbf16, #tpu.memory_space<vmem>>, %arg7: memref<1x1x768xf32, #tpu.memory_space<vmem>>, %arg8: memref<1x1x768xf32, #tpu.memory_space<vmem>>, %arg9: memref<1x1x1024xf32, #tpu.memory_space<vmem>>, %arg10: memref<1x1x1024xf32, #tpu.memory_space<vmem>>, %arg11: memref<1x1x512xf32, #tpu.memory_space<vmem>>, %arg12: memref<1x512x16xf32, #tpu.memory_space<vmem>>, %arg13: memref<1x1x16xf32, #tpu.memory_space<vmem>>, %arg14: memref<2x256x1024xbf16, #tpu.memory_space<any>>, %arg15: memref<2x1024x1024xbf16, #tpu.memory_space<any>>, %arg16: memref<2x1024x512xbf16, #tpu.memory_space<any>>, %arg17: memref<1x8x16xf32, #tpu.memory_space<vmem>>, %arg18: memref<256x1024xbf16, #tpu.memory_space<vmem>>, %arg19: memref<1024x1024xbf16, #tpu.memory_space<vmem>>, %arg20: memref<1024x512xbf16, #tpu.memory_space<vmem>>, %arg21: memref<3x!tpu.dma_semaphore, #tpu.memory_space<semaphore_mem>>) attributes {dimension_semantics = [#tpu.dimension_semantics<parallel>], iteration_bounds = array<i64: 2>, scalar_prefetch = 0 : i64, scratch_operands = 4 : i64, tpu.core_type = #tpu.core_type<tc>, window_params = [{pipeline_mode = #tpu.pipeline_mode<synchronous>, transform_indices = @transform_0, window_bounds = array<i64: 64, 32>}, {pipeline_mode = #tpu.pipeline_mode<synchronous>, transform_indices = @transform_1, window_bounds = array<i64: 8, 1>}, {pipeline_mode = #tpu.pipeline_mode<synchronous>, transform_indices = @transform_2, window_bounds = array<i64: 1, 32>}, {pipeline_mode = #tpu.pipeline_mode<synchronous>, transform_indices = @transform_3, window_bounds = array<i64: 1, 32>}, {transform_indices = @transform_4, window_bounds = array<i64: 1, 32, 768>}, {transform_indices = @transform_5, window_bounds = array<i64: 1, 256, 768>}, {transform_indices = @transform_6, window_bounds = array<i64: 1, 1, 768>}, {transform_indices = @transform_7, window_bounds = array<i64: 1, 1, 768>}, {transform_indices = @transform_8, window_bounds = array<i64: 1, 1, 1024>}, {transform_indices = @transform_9, window_bounds = array<i64: 1, 1, 1024>}, {transform_indices = @transform_10, window_bounds = array<i64: 1, 1, 512>}, {transform_indices = @transform_11, window_bounds = array<i64: 1, 512, 16>}, {transform_indices = @transform_12, window_bounds = array<i64: 1, 1, 16>}, {}, {}, {}, {transform_indices = @transform_16, window_bounds = array<i64: 1, 8, 16>}]} {
    %c0_i32 = arith.constant 0 : i32
    %0 = arith.cmpi eq, %arg0, %c0_i32 : i32
    %c0_i32_0 = arith.constant 0 : i32
    %c0_i32_1 = arith.constant 0 : i32
    %c0_i32_2 = arith.constant 0 : i32
    %1 = tpu.memref_slice %arg14[%arg0, %c0_i32_1, %c0_i32_2] : memref<2x256x1024xbf16, #tpu.memory_space<any>> -> memref<1x256x1024xbf16, #tpu.memory_space<any>>
    %2 = tpu.memref_squeeze %1 : memref<1x256x1024xbf16, #tpu.memory_space<any>> -> memref<256x1024xbf16, #tpu.memory_space<any>>
    %3 = tpu.memref_slice %arg21[%c0_i32_0] : memref<3x!tpu.dma_semaphore, #tpu.memory_space<semaphore_mem>> -> memref<1x!tpu.dma_semaphore, #tpu.memory_space<semaphore_mem>>
    %4 = tpu.memref_squeeze %3 : memref<1x!tpu.dma_semaphore, #tpu.memory_space<semaphore_mem>> -> memref<!tpu.dma_semaphore, #tpu.memory_space<semaphore_mem>>
    tpu.enqueue_dma source(%2 : memref<256x1024xbf16, #tpu.memory_space<any>>) target(%arg18 : memref<256x1024xbf16, #tpu.memory_space<vmem>>) target_semaphore(%4 : memref<!tpu.dma_semaphore, #tpu.memory_space<semaphore_mem>>)
    %c1_i32 = arith.constant 1 : i32
    %c0_i32_3 = arith.constant 0 : i32
    %c0_i32_4 = arith.constant 0 : i32
    %5 = tpu.memref_slice %arg15[%arg0, %c0_i32_3, %c0_i32_4] : memref<2x1024x1024xbf16, #tpu.memory_space<any>> -> memref<1x1024x1024xbf16, #tpu.memory_space<any>>
    %6 = tpu.memref_squeeze %5 : memref<1x1024x1024xbf16, #tpu.memory_space<any>> -> memref<1024x1024xbf16, #tpu.memory_space<any>>
    %7 = tpu.memref_slice %arg21[%c1_i32] : memref<3x!tpu.dma_semaphore, #tpu.memory_space<semaphore_mem>> -> memref<1x!tpu.dma_semaphore, #tpu.memory_space<semaphore_mem>>
    %8 = tpu.memref_squeeze %7 : memref<1x!tpu.dma_semaphore, #tpu.memory_space<semaphore_mem>> -> memref<!tpu.dma_semaphore, #tpu.memory_space<semaphore_mem>>
    tpu.enqueue_dma source(%6 : memref<1024x1024xbf16, #tpu.memory_space<any>>) target(%arg19 : memref<1024x1024xbf16, #tpu.memory_space<vmem>>) target_semaphore(%8 : memref<!tpu.dma_semaphore, #tpu.memory_space<semaphore_mem>>)
    %c2_i32 = arith.constant 2 : i32
    %c0_i32_5 = arith.constant 0 : i32
    %c0_i32_6 = arith.constant 0 : i32
    %9 = tpu.memref_slice %arg16[%arg0, %c0_i32_5, %c0_i32_6] : memref<2x1024x512xbf16, #tpu.memory_space<any>> -> memref<1x1024x512xbf16, #tpu.memory_space<any>>
    %10 = tpu.memref_squeeze %9 : memref<1x1024x512xbf16, #tpu.memory_space<any>> -> memref<1024x512xbf16, #tpu.memory_space<any>>
    %11 = tpu.memref_slice %arg21[%c2_i32] : memref<3x!tpu.dma_semaphore, #tpu.memory_space<semaphore_mem>> -> memref<1x!tpu.dma_semaphore, #tpu.memory_space<semaphore_mem>>
    %12 = tpu.memref_squeeze %11 : memref<1x!tpu.dma_semaphore, #tpu.memory_space<semaphore_mem>> -> memref<!tpu.dma_semaphore, #tpu.memory_space<semaphore_mem>>
    tpu.enqueue_dma source(%10 : memref<1024x512xbf16, #tpu.memory_space<any>>) target(%arg20 : memref<1024x512xbf16, #tpu.memory_space<vmem>>) target_semaphore(%12 : memref<!tpu.dma_semaphore, #tpu.memory_space<semaphore_mem>>)
    %c0 = arith.constant 0 : index
    %c0_7 = arith.constant 0 : index
    %13 = vector.load %arg1[%c0, %c0_7] : memref<64x32xf32, #tpu.memory_space<vmem>>, vector<64x32xf32>
    %c0_8 = arith.constant 0 : index
    %c0_9 = arith.constant 0 : index
    %14 = vector.load %arg3[%c0_8, %c0_9] : memref<1x32xf32, #tpu.memory_space<vmem>>, vector<1x32xf32>
    %15 = vector.broadcast %14 : vector<1x32xf32> to vector<64x32xf32>
    %16 = arith.subf %13, %15 : vector<64x32xf32>
    %c0_10 = arith.constant 0 : index
    %c0_11 = arith.constant 0 : index
    %17 = vector.load %arg4[%c0_10, %c0_11] : memref<1x32xf32, #tpu.memory_space<vmem>>, vector<1x32xf32>
    %cst = arith.constant 9.99999974E-6 : f32
    %18 = vector.broadcast %cst : f32 to vector<1x32xf32>
    %19 = arith.addf %17, %18 : vector<1x32xf32>
    %20 = math.rsqrt %19 : vector<1x32xf32>
    %21 = vector.broadcast %20 : vector<1x32xf32> to vector<64x32xf32>
    %22 = arith.mulf %16, %21 : vector<64x32xf32>
    %cst_12 = arith.constant -5.000000e+00 : f32
    %cst_13 = arith.constant 5.000000e+00 : f32
    %23 = vector.broadcast %cst_12 : f32 to vector<64x32xf32>
    %24 = arith.maximumf %23, %22 : vector<64x32xf32>
    %25 = vector.broadcast %cst_13 : f32 to vector<64x32xf32>
    %26 = arith.minimumf %25, %24 : vector<64x32xf32>
    %27 = arith.truncf %26 : vector<64x32xf32> to vector<64x32xbf16>
    %c0_14 = arith.constant 0 : index
    %c0_15 = arith.constant 0 : index
    %c0_16 = arith.constant 0 : index
    %28 = vector.load %arg5[%c0_14, %c0_15, %c0_16] : memref<1x32x768xbf16, #tpu.memory_space<vmem>>, vector<1x32x768xbf16>
    %29 = vector.shape_cast %28 : vector<1x32x768xbf16> to vector<32x768xbf16>
    %cst_17 = arith.constant dense<0.000000e+00> : vector<64x768xf32>
    %30 = tpu.matmul %27, %29, %cst_17 {dimension_numbers = #tpu.dot_dimension_numbers<[1], [0], [0], [1], [0, 0, 1, 1], [], []>} : vector<64x32xbf16>, vector<32x768xbf16>, vector<64x768xf32> -> vector<64x768xf32>
    %c0_18 = arith.constant 0 : index
    %c0_19 = arith.constant 0 : index
    %c0_20 = arith.constant 0 : index
    %31 = vector.load %arg7[%c0_18, %c0_19, %c0_20] : memref<1x1x768xf32, #tpu.memory_space<vmem>>, vector<1x1x768xf32>
    %32 = vector.shape_cast %31 : vector<1x1x768xf32> to vector<1x768xf32>
    %33 = vector.broadcast %32 : vector<1x768xf32> to vector<64x768xf32>
    %34 = arith.addf %30, %33 : vector<64x768xf32>
    %c0_21 = arith.constant 0 : index
    %c0_22 = arith.constant 0 : index
    %c0_23 = arith.constant 0 : index
    %35 = vector.load %arg6[%c0_21, %c0_22, %c0_23] : memref<1x256x768xbf16, #tpu.memory_space<vmem>>, vector<1x256x768xbf16>
    %36 = vector.shape_cast %35 : vector<1x256x768xbf16> to vector<256x768xbf16>
    %c0_24 = arith.constant 0 : index
    %c0_25 = arith.constant 0 : index
    %c0_26 = arith.constant 0 : index
    %37 = vector.load %arg8[%c0_24, %c0_25, %c0_26] : memref<1x1x768xf32, #tpu.memory_space<vmem>>, vector<1x1x768xf32>
    %38 = vector.shape_cast %37 : vector<1x1x768xf32> to vector<1x768xf32>
    %c0_27 = arith.constant 0 : index
    %c0_28 = arith.constant 0 : index
    %39 = vector.load %arg2[%c0_27, %c0_28] : memref<8x1xi32, #tpu.memory_space<vmem>>, vector<8x1xi32>
    %cst_29 = arith.constant 0.000000e+00 : f32
    %40 = vector.broadcast %cst_29 : f32 to vector<8x256xf32>
    %cst_30 = arith.constant 0.000000e+00 : f32
    %41 = vector.broadcast %cst_30 : f32 to vector<8x256xf32>
    %42 = vector.extract_strided_slice %34 {offsets = [0, 0], sizes = [8, 768], strides = [1, 1]} : vector<64x768xf32> to vector<8x768xf32>
    %43 = arith.truncf %40 : vector<8x256xf32> to vector<8x256xbf16>
    %cst_31 = arith.constant dense<0.000000e+00> : vector<8x768xf32>
    %44 = tpu.matmul %43, %36, %cst_31 {dimension_numbers = #tpu.dot_dimension_numbers<[1], [0], [0], [1], [0, 0, 1, 1], [], []>} : vector<8x256xbf16>, vector<256x768xbf16>, vector<8x768xf32> -> vector<8x768xf32>
    %45 = vector.broadcast %38 : vector<1x768xf32> to vector<8x768xf32>
    %46 = arith.addf %44, %45 : vector<8x768xf32>
    %47 = vector.extract_strided_slice %42 {offsets = [0, 0], sizes = [8, 512], strides = [1, 1]} : vector<8x768xf32> to vector<8x512xf32>
    %48 = vector.extract_strided_slice %46 {offsets = [0, 0], sizes = [8, 512], strides = [1, 1]} : vector<8x768xf32> to vector<8x512xf32>
    %49 = arith.addf %47, %48 : vector<8x512xf32>
    %50 = arith.negf %49 : vector<8x512xf32>
    %51 = math.exp %50 : vector<8x512xf32>
    %cst_32 = arith.constant 1.000000e+00 : f32
    %52 = vector.broadcast %cst_32 : f32 to vector<8x512xf32>
    %53 = arith.addf %52, %51 : vector<8x512xf32>
    %54 = arith.divf %52, %53 : vector<8x512xf32>
    %55 = vector.extract_strided_slice %54 {offsets = [0, 0], sizes = [8, 256], strides = [1, 1]} : vector<8x512xf32> to vector<8x256xf32>
    %56 = vector.extract_strided_slice %54 {offsets = [0, 256], sizes = [8, 256], strides = [1, 1]} : vector<8x512xf32> to vector<8x256xf32>
    %57 = vector.extract_strided_slice %42 {offsets = [0, 512], sizes = [8, 256], strides = [1, 1]} : vector<8x768xf32> to vector<8x256xf32>
    %58 = vector.extract_strided_slice %46 {offsets = [0, 512], sizes = [8, 256], strides = [1, 1]} : vector<8x768xf32> to vector<8x256xf32>
    %59 = arith.mulf %55, %58 : vector<8x256xf32>
    %60 = arith.addf %57, %59 : vector<8x256xf32>
    %61 = math.tanh %60 : vector<8x256xf32>
    %cst_33 = arith.constant 1.000000e+00 : f32
    %62 = vector.broadcast %cst_33 : f32 to vector<8x256xf32>
    %63 = arith.subf %62, %56 : vector<8x256xf32>
    %64 = arith.mulf %63, %61 : vector<8x256xf32>
    %65 = arith.mulf %56, %40 : vector<8x256xf32>
    %66 = arith.addf %64, %65 : vector<8x256xf32>
    %c0_i32_34 = arith.constant 0 : i32
    %67 = vector.broadcast %c0_i32_34 : i32 to vector<8x1xi32>
    %68 = arith.cmpi eq, %39, %67 : vector<8x1xi32>
    %69 = vector.shape_cast %68 : vector<8x1xi1> to vector<8x1xi1>
    %70 = vector.broadcast %69 : vector<8x1xi1> to vector<8x256xi1>
    %71 = arith.select %70, %66, %41 : vector<8x256xi1>, vector<8x256xf32>
    %72 = vector.extract_strided_slice %34 {offsets = [8, 0], sizes = [8, 768], strides = [1, 1]} : vector<64x768xf32> to vector<8x768xf32>
    %73 = arith.truncf %66 : vector<8x256xf32> to vector<8x256xbf16>
    %cst_35 = arith.constant dense<0.000000e+00> : vector<8x768xf32>
    %74 = tpu.matmul %73, %36, %cst_35 {dimension_numbers = #tpu.dot_dimension_numbers<[1], [0], [0], [1], [0, 0, 1, 1], [], []>} : vector<8x256xbf16>, vector<256x768xbf16>, vector<8x768xf32> -> vector<8x768xf32>
    %75 = vector.broadcast %38 : vector<1x768xf32> to vector<8x768xf32>
    %76 = arith.addf %74, %75 : vector<8x768xf32>
    %77 = vector.extract_strided_slice %72 {offsets = [0, 0], sizes = [8, 512], strides = [1, 1]} : vector<8x768xf32> to vector<8x512xf32>
    %78 = vector.extract_strided_slice %76 {offsets = [0, 0], sizes = [8, 512], strides = [1, 1]} : vector<8x768xf32> to vector<8x512xf32>
    %79 = arith.addf %77, %78 : vector<8x512xf32>
    %80 = arith.negf %79 : vector<8x512xf32>
    %81 = math.exp %80 : vector<8x512xf32>
    %cst_36 = arith.constant 1.000000e+00 : f32
    %82 = vector.broadcast %cst_36 : f32 to vector<8x512xf32>
    %83 = arith.addf %82, %81 : vector<8x512xf32>
    %84 = arith.divf %82, %83 : vector<8x512xf32>
    %85 = vector.extract_strided_slice %84 {offsets = [0, 0], sizes = [8, 256], strides = [1, 1]} : vector<8x512xf32> to vector<8x256xf32>
    %86 = vector.extract_strided_slice %84 {offsets = [0, 256], sizes = [8, 256], strides = [1, 1]} : vector<8x512xf32> to vector<8x256xf32>
    %87 = vector.extract_strided_slice %72 {offsets = [0, 512], sizes = [8, 256], strides = [1, 1]} : vector<8x768xf32> to vector<8x256xf32>
    %88 = vector.extract_strided_slice %76 {offsets = [0, 512], sizes = [8, 256], strides = [1, 1]} : vector<8x768xf32> to vector<8x256xf32>
    %89 = arith.mulf %85, %88 : vector<8x256xf32>
    %90 = arith.addf %87, %89 : vector<8x256xf32>
    %91 = math.tanh %90 : vector<8x256xf32>
    %cst_37 = arith.constant 1.000000e+00 : f32
    %92 = vector.broadcast %cst_37 : f32 to vector<8x256xf32>
    %93 = arith.subf %92, %86 : vector<8x256xf32>
    %94 = arith.mulf %93, %91 : vector<8x256xf32>
    %95 = arith.mulf %86, %66 : vector<8x256xf32>
    %96 = arith.addf %94, %95 : vector<8x256xf32>
    %c1_i32_38 = arith.constant 1 : i32
    %97 = vector.broadcast %c1_i32_38 : i32 to vector<8x1xi32>
    %98 = arith.cmpi eq, %39, %97 : vector<8x1xi32>
    %99 = vector.shape_cast %98 : vector<8x1xi1> to vector<8x1xi1>
    %100 = vector.broadcast %99 : vector<8x1xi1> to vector<8x256xi1>
    %101 = arith.select %100, %96, %71 : vector<8x256xi1>, vector<8x256xf32>
    %102 = vector.extract_strided_slice %34 {offsets = [16, 0], sizes = [8, 768], strides = [1, 1]} : vector<64x768xf32> to vector<8x768xf32>
    %103 = arith.truncf %96 : vector<8x256xf32> to vector<8x256xbf16>
    %cst_39 = arith.constant dense<0.000000e+00> : vector<8x768xf32>
    %104 = tpu.matmul %103, %36, %cst_39 {dimension_numbers = #tpu.dot_dimension_numbers<[1], [0], [0], [1], [0, 0, 1, 1], [], []>} : vector<8x256xbf16>, vector<256x768xbf16>, vector<8x768xf32> -> vector<8x768xf32>
    %105 = vector.broadcast %38 : vector<1x768xf32> to vector<8x768xf32>
    %106 = arith.addf %104, %105 : vector<8x768xf32>
    %107 = vector.extract_strided_slice %102 {offsets = [0, 0], sizes = [8, 512], strides = [1, 1]} : vector<8x768xf32> to vector<8x512xf32>
    %108 = vector.extract_strided_slice %106 {offsets = [0, 0], sizes = [8, 512], strides = [1, 1]} : vector<8x768xf32> to vector<8x512xf32>
    %109 = arith.addf %107, %108 : vector<8x512xf32>
    %110 = arith.negf %109 : vector<8x512xf32>
    %111 = math.exp %110 : vector<8x512xf32>
    %cst_40 = arith.constant 1.000000e+00 : f32
    %112 = vector.broadcast %cst_40 : f32 to vector<8x512xf32>
    %113 = arith.addf %112, %111 : vector<8x512xf32>
    %114 = arith.divf %112, %113 : vector<8x512xf32>
    %115 = vector.extract_strided_slice %114 {offsets = [0, 0], sizes = [8, 256], strides = [1, 1]} : vector<8x512xf32> to vector<8x256xf32>
    %116 = vector.extract_strided_slice %114 {offsets = [0, 256], sizes = [8, 256], strides = [1, 1]} : vector<8x512xf32> to vector<8x256xf32>
    %117 = vector.extract_strided_slice %102 {offsets = [0, 512], sizes = [8, 256], strides = [1, 1]} : vector<8x768xf32> to vector<8x256xf32>
    %118 = vector.extract_strided_slice %106 {offsets = [0, 512], sizes = [8, 256], strides = [1, 1]} : vector<8x768xf32> to vector<8x256xf32>
    %119 = arith.mulf %115, %118 : vector<8x256xf32>
    %120 = arith.addf %117, %119 : vector<8x256xf32>
    %121 = math.tanh %120 : vector<8x256xf32>
    %cst_41 = arith.constant 1.000000e+00 : f32
    %122 = vector.broadcast %cst_41 : f32 to vector<8x256xf32>
    %123 = arith.subf %122, %116 : vector<8x256xf32>
    %124 = arith.mulf %123, %121 : vector<8x256xf32>
    %125 = arith.mulf %116, %96 : vector<8x256xf32>
    %126 = arith.addf %124, %125 : vector<8x256xf32>
    %c2_i32_42 = arith.constant 2 : i32
    %127 = vector.broadcast %c2_i32_42 : i32 to vector<8x1xi32>
    %128 = arith.cmpi eq, %39, %127 : vector<8x1xi32>
    %129 = vector.shape_cast %128 : vector<8x1xi1> to vector<8x1xi1>
    %130 = vector.broadcast %129 : vector<8x1xi1> to vector<8x256xi1>
    %131 = arith.select %130, %126, %101 : vector<8x256xi1>, vector<8x256xf32>
    %132 = vector.extract_strided_slice %34 {offsets = [24, 0], sizes = [8, 768], strides = [1, 1]} : vector<64x768xf32> to vector<8x768xf32>
    %133 = arith.truncf %126 : vector<8x256xf32> to vector<8x256xbf16>
    %cst_43 = arith.constant dense<0.000000e+00> : vector<8x768xf32>
    %134 = tpu.matmul %133, %36, %cst_43 {dimension_numbers = #tpu.dot_dimension_numbers<[1], [0], [0], [1], [0, 0, 1, 1], [], []>} : vector<8x256xbf16>, vector<256x768xbf16>, vector<8x768xf32> -> vector<8x768xf32>
    %135 = vector.broadcast %38 : vector<1x768xf32> to vector<8x768xf32>
    %136 = arith.addf %134, %135 : vector<8x768xf32>
    %137 = vector.extract_strided_slice %132 {offsets = [0, 0], sizes = [8, 512], strides = [1, 1]} : vector<8x768xf32> to vector<8x512xf32>
    %138 = vector.extract_strided_slice %136 {offsets = [0, 0], sizes = [8, 512], strides = [1, 1]} : vector<8x768xf32> to vector<8x512xf32>
    %139 = arith.addf %137, %138 : vector<8x512xf32>
    %140 = arith.negf %139 : vector<8x512xf32>
    %141 = math.exp %140 : vector<8x512xf32>
    %cst_44 = arith.constant 1.000000e+00 : f32
    %142 = vector.broadcast %cst_44 : f32 to vector<8x512xf32>
    %143 = arith.addf %142, %141 : vector<8x512xf32>
    %144 = arith.divf %142, %143 : vector<8x512xf32>
    %145 = vector.extract_strided_slice %144 {offsets = [0, 0], sizes = [8, 256], strides = [1, 1]} : vector<8x512xf32> to vector<8x256xf32>
    %146 = vector.extract_strided_slice %144 {offsets = [0, 256], sizes = [8, 256], strides = [1, 1]} : vector<8x512xf32> to vector<8x256xf32>
    %147 = vector.extract_strided_slice %132 {offsets = [0, 512], sizes = [8, 256], strides = [1, 1]} : vector<8x768xf32> to vector<8x256xf32>
    %148 = vector.extract_strided_slice %136 {offsets = [0, 512], sizes = [8, 256], strides = [1, 1]} : vector<8x768xf32> to vector<8x256xf32>
    %149 = arith.mulf %145, %148 : vector<8x256xf32>
    %150 = arith.addf %147, %149 : vector<8x256xf32>
    %151 = math.tanh %150 : vector<8x256xf32>
    %cst_45 = arith.constant 1.000000e+00 : f32
    %152 = vector.broadcast %cst_45 : f32 to vector<8x256xf32>
    %153 = arith.subf %152, %146 : vector<8x256xf32>
    %154 = arith.mulf %153, %151 : vector<8x256xf32>
    %155 = arith.mulf %146, %126 : vector<8x256xf32>
    %156 = arith.addf %154, %155 : vector<8x256xf32>
    %c3_i32 = arith.constant 3 : i32
    %157 = vector.broadcast %c3_i32 : i32 to vector<8x1xi32>
    %158 = arith.cmpi eq, %39, %157 : vector<8x1xi32>
    %159 = vector.shape_cast %158 : vector<8x1xi1> to vector<8x1xi1>
    %160 = vector.broadcast %159 : vector<8x1xi1> to vector<8x256xi1>
    %161 = arith.select %160, %156, %131 : vector<8x256xi1>, vector<8x256xf32>
    %162 = vector.extract_strided_slice %34 {offsets = [32, 0], sizes = [8, 768], strides = [1, 1]} : vector<64x768xf32> to vector<8x768xf32>
    %163 = arith.truncf %156 : vector<8x256xf32> to vector<8x256xbf16>
    %cst_46 = arith.constant dense<0.000000e+00> : vector<8x768xf32>
    %164 = tpu.matmul %163, %36, %cst_46 {dimension_numbers = #tpu.dot_dimension_numbers<[1], [0], [0], [1], [0, 0, 1, 1], [], []>} : vector<8x256xbf16>, vector<256x768xbf16>, vector<8x768xf32> -> vector<8x768xf32>
    %165 = vector.broadcast %38 : vector<1x768xf32> to vector<8x768xf32>
    %166 = arith.addf %164, %165 : vector<8x768xf32>
    %167 = vector.extract_strided_slice %162 {offsets = [0, 0], sizes = [8, 512], strides = [1, 1]} : vector<8x768xf32> to vector<8x512xf32>
    %168 = vector.extract_strided_slice %166 {offsets = [0, 0], sizes = [8, 512], strides = [1, 1]} : vector<8x768xf32> to vector<8x512xf32>
    %169 = arith.addf %167, %168 : vector<8x512xf32>
    %170 = arith.negf %169 : vector<8x512xf32>
    %171 = math.exp %170 : vector<8x512xf32>
    %cst_47 = arith.constant 1.000000e+00 : f32
    %172 = vector.broadcast %cst_47 : f32 to vector<8x512xf32>
    %173 = arith.addf %172, %171 : vector<8x512xf32>
    %174 = arith.divf %172, %173 : vector<8x512xf32>
    %175 = vector.extract_strided_slice %174 {offsets = [0, 0], sizes = [8, 256], strides = [1, 1]} : vector<8x512xf32> to vector<8x256xf32>
    %176 = vector.extract_strided_slice %174 {offsets = [0, 256], sizes = [8, 256], strides = [1, 1]} : vector<8x512xf32> to vector<8x256xf32>
    %177 = vector.extract_strided_slice %162 {offsets = [0, 512], sizes = [8, 256], strides = [1, 1]} : vector<8x768xf32> to vector<8x256xf32>
    %178 = vector.extract_strided_slice %166 {offsets = [0, 512], sizes = [8, 256], strides = [1, 1]} : vector<8x768xf32> to vector<8x256xf32>
    %179 = arith.mulf %175, %178 : vector<8x256xf32>
    %180 = arith.addf %177, %179 : vector<8x256xf32>
    %181 = math.tanh %180 : vector<8x256xf32>
    %cst_48 = arith.constant 1.000000e+00 : f32
    %182 = vector.broadcast %cst_48 : f32 to vector<8x256xf32>
    %183 = arith.subf %182, %176 : vector<8x256xf32>
    %184 = arith.mulf %183, %181 : vector<8x256xf32>
    %185 = arith.mulf %176, %156 : vector<8x256xf32>
    %186 = arith.addf %184, %185 : vector<8x256xf32>
    %c4_i32 = arith.constant 4 : i32
    %187 = vector.broadcast %c4_i32 : i32 to vector<8x1xi32>
    %188 = arith.cmpi eq, %39, %187 : vector<8x1xi32>
    %189 = vector.shape_cast %188 : vector<8x1xi1> to vector<8x1xi1>
    %190 = vector.broadcast %189 : vector<8x1xi1> to vector<8x256xi1>
    %191 = arith.select %190, %186, %161 : vector<8x256xi1>, vector<8x256xf32>
    %192 = vector.extract_strided_slice %34 {offsets = [40, 0], sizes = [8, 768], strides = [1, 1]} : vector<64x768xf32> to vector<8x768xf32>
    %193 = arith.truncf %186 : vector<8x256xf32> to vector<8x256xbf16>
    %cst_49 = arith.constant dense<0.000000e+00> : vector<8x768xf32>
    %194 = tpu.matmul %193, %36, %cst_49 {dimension_numbers = #tpu.dot_dimension_numbers<[1], [0], [0], [1], [0, 0, 1, 1], [], []>} : vector<8x256xbf16>, vector<256x768xbf16>, vector<8x768xf32> -> vector<8x768xf32>
    %195 = vector.broadcast %38 : vector<1x768xf32> to vector<8x768xf32>
    %196 = arith.addf %194, %195 : vector<8x768xf32>
    %197 = vector.extract_strided_slice %192 {offsets = [0, 0], sizes = [8, 512], strides = [1, 1]} : vector<8x768xf32> to vector<8x512xf32>
    %198 = vector.extract_strided_slice %196 {offsets = [0, 0], sizes = [8, 512], strides = [1, 1]} : vector<8x768xf32> to vector<8x512xf32>
    %199 = arith.addf %197, %198 : vector<8x512xf32>
    %200 = arith.negf %199 : vector<8x512xf32>
    %201 = math.exp %200 : vector<8x512xf32>
    %cst_50 = arith.constant 1.000000e+00 : f32
    %202 = vector.broadcast %cst_50 : f32 to vector<8x512xf32>
    %203 = arith.addf %202, %201 : vector<8x512xf32>
    %204 = arith.divf %202, %203 : vector<8x512xf32>
    %205 = vector.extract_strided_slice %204 {offsets = [0, 0], sizes = [8, 256], strides = [1, 1]} : vector<8x512xf32> to vector<8x256xf32>
    %206 = vector.extract_strided_slice %204 {offsets = [0, 256], sizes = [8, 256], strides = [1, 1]} : vector<8x512xf32> to vector<8x256xf32>
    %207 = vector.extract_strided_slice %192 {offsets = [0, 512], sizes = [8, 256], strides = [1, 1]} : vector<8x768xf32> to vector<8x256xf32>
    %208 = vector.extract_strided_slice %196 {offsets = [0, 512], sizes = [8, 256], strides = [1, 1]} : vector<8x768xf32> to vector<8x256xf32>
    %209 = arith.mulf %205, %208 : vector<8x256xf32>
    %210 = arith.addf %207, %209 : vector<8x256xf32>
    %211 = math.tanh %210 : vector<8x256xf32>
    %cst_51 = arith.constant 1.000000e+00 : f32
    %212 = vector.broadcast %cst_51 : f32 to vector<8x256xf32>
    %213 = arith.subf %212, %206 : vector<8x256xf32>
    %214 = arith.mulf %213, %211 : vector<8x256xf32>
    %215 = arith.mulf %206, %186 : vector<8x256xf32>
    %216 = arith.addf %214, %215 : vector<8x256xf32>
    %c5_i32 = arith.constant 5 : i32
    %217 = vector.broadcast %c5_i32 : i32 to vector<8x1xi32>
    %218 = arith.cmpi eq, %39, %217 : vector<8x1xi32>
    %219 = vector.shape_cast %218 : vector<8x1xi1> to vector<8x1xi1>
    %220 = vector.broadcast %219 : vector<8x1xi1> to vector<8x256xi1>
    %221 = arith.select %220, %216, %191 : vector<8x256xi1>, vector<8x256xf32>
    %222 = vector.extract_strided_slice %34 {offsets = [48, 0], sizes = [8, 768], strides = [1, 1]} : vector<64x768xf32> to vector<8x768xf32>
    %223 = arith.truncf %216 : vector<8x256xf32> to vector<8x256xbf16>
    %cst_52 = arith.constant dense<0.000000e+00> : vector<8x768xf32>
    %224 = tpu.matmul %223, %36, %cst_52 {dimension_numbers = #tpu.dot_dimension_numbers<[1], [0], [0], [1], [0, 0, 1, 1], [], []>} : vector<8x256xbf16>, vector<256x768xbf16>, vector<8x768xf32> -> vector<8x768xf32>
    %225 = vector.broadcast %38 : vector<1x768xf32> to vector<8x768xf32>
    %226 = arith.addf %224, %225 : vector<8x768xf32>
    %227 = vector.extract_strided_slice %222 {offsets = [0, 0], sizes = [8, 512], strides = [1, 1]} : vector<8x768xf32> to vector<8x512xf32>
    %228 = vector.extract_strided_slice %226 {offsets = [0, 0], sizes = [8, 512], strides = [1, 1]} : vector<8x768xf32> to vector<8x512xf32>
    %229 = arith.addf %227, %228 : vector<8x512xf32>
    %230 = arith.negf %229 : vector<8x512xf32>
    %231 = math.exp %230 : vector<8x512xf32>
    %cst_53 = arith.constant 1.000000e+00 : f32
    %232 = vector.broadcast %cst_53 : f32 to vector<8x512xf32>
    %233 = arith.addf %232, %231 : vector<8x512xf32>
    %234 = arith.divf %232, %233 : vector<8x512xf32>
    %235 = vector.extract_strided_slice %234 {offsets = [0, 0], sizes = [8, 256], strides = [1, 1]} : vector<8x512xf32> to vector<8x256xf32>
    %236 = vector.extract_strided_slice %234 {offsets = [0, 256], sizes = [8, 256], strides = [1, 1]} : vector<8x512xf32> to vector<8x256xf32>
    %237 = vector.extract_strided_slice %222 {offsets = [0, 512], sizes = [8, 256], strides = [1, 1]} : vector<8x768xf32> to vector<8x256xf32>
    %238 = vector.extract_strided_slice %226 {offsets = [0, 512], sizes = [8, 256], strides = [1, 1]} : vector<8x768xf32> to vector<8x256xf32>
    %239 = arith.mulf %235, %238 : vector<8x256xf32>
    %240 = arith.addf %237, %239 : vector<8x256xf32>
    %241 = math.tanh %240 : vector<8x256xf32>
    %cst_54 = arith.constant 1.000000e+00 : f32
    %242 = vector.broadcast %cst_54 : f32 to vector<8x256xf32>
    %243 = arith.subf %242, %236 : vector<8x256xf32>
    %244 = arith.mulf %243, %241 : vector<8x256xf32>
    %245 = arith.mulf %236, %216 : vector<8x256xf32>
    %246 = arith.addf %244, %245 : vector<8x256xf32>
    %c6_i32 = arith.constant 6 : i32
    %247 = vector.broadcast %c6_i32 : i32 to vector<8x1xi32>
    %248 = arith.cmpi eq, %39, %247 : vector<8x1xi32>
    %249 = vector.shape_cast %248 : vector<8x1xi1> to vector<8x1xi1>
    %250 = vector.broadcast %249 : vector<8x1xi1> to vector<8x256xi1>
    %251 = arith.select %250, %246, %221 : vector<8x256xi1>, vector<8x256xf32>
    %252 = vector.extract_strided_slice %34 {offsets = [56, 0], sizes = [8, 768], strides = [1, 1]} : vector<64x768xf32> to vector<8x768xf32>
    %253 = arith.truncf %246 : vector<8x256xf32> to vector<8x256xbf16>
    %cst_55 = arith.constant dense<0.000000e+00> : vector<8x768xf32>
    %254 = tpu.matmul %253, %36, %cst_55 {dimension_numbers = #tpu.dot_dimension_numbers<[1], [0], [0], [1], [0, 0, 1, 1], [], []>} : vector<8x256xbf16>, vector<256x768xbf16>, vector<8x768xf32> -> vector<8x768xf32>
    %255 = vector.broadcast %38 : vector<1x768xf32> to vector<8x768xf32>
    %256 = arith.addf %254, %255 : vector<8x768xf32>
    %257 = vector.extract_strided_slice %252 {offsets = [0, 0], sizes = [8, 512], strides = [1, 1]} : vector<8x768xf32> to vector<8x512xf32>
    %258 = vector.extract_strided_slice %256 {offsets = [0, 0], sizes = [8, 512], strides = [1, 1]} : vector<8x768xf32> to vector<8x512xf32>
    %259 = arith.addf %257, %258 : vector<8x512xf32>
    %260 = arith.negf %259 : vector<8x512xf32>
    %261 = math.exp %260 : vector<8x512xf32>
    %cst_56 = arith.constant 1.000000e+00 : f32
    %262 = vector.broadcast %cst_56 : f32 to vector<8x512xf32>
    %263 = arith.addf %262, %261 : vector<8x512xf32>
    %264 = arith.divf %262, %263 : vector<8x512xf32>
    %265 = vector.extract_strided_slice %264 {offsets = [0, 0], sizes = [8, 256], strides = [1, 1]} : vector<8x512xf32> to vector<8x256xf32>
    %266 = vector.extract_strided_slice %264 {offsets = [0, 256], sizes = [8, 256], strides = [1, 1]} : vector<8x512xf32> to vector<8x256xf32>
    %267 = vector.extract_strided_slice %252 {offsets = [0, 512], sizes = [8, 256], strides = [1, 1]} : vector<8x768xf32> to vector<8x256xf32>
    %268 = vector.extract_strided_slice %256 {offsets = [0, 512], sizes = [8, 256], strides = [1, 1]} : vector<8x768xf32> to vector<8x256xf32>
    %269 = arith.mulf %265, %268 : vector<8x256xf32>
    %270 = arith.addf %267, %269 : vector<8x256xf32>
    %271 = math.tanh %270 : vector<8x256xf32>
    %cst_57 = arith.constant 1.000000e+00 : f32
    %272 = vector.broadcast %cst_57 : f32 to vector<8x256xf32>
    %273 = arith.subf %272, %266 : vector<8x256xf32>
    %274 = arith.mulf %273, %271 : vector<8x256xf32>
    %275 = arith.mulf %266, %246 : vector<8x256xf32>
    %276 = arith.addf %274, %275 : vector<8x256xf32>
    %c7_i32 = arith.constant 7 : i32
    %277 = vector.broadcast %c7_i32 : i32 to vector<8x1xi32>
    %278 = arith.cmpi eq, %39, %277 : vector<8x1xi32>
    %279 = vector.shape_cast %278 : vector<8x1xi1> to vector<8x1xi1>
    %280 = vector.broadcast %279 : vector<8x1xi1> to vector<8x256xi1>
    %281 = arith.select %280, %276, %251 : vector<8x256xi1>, vector<8x256xf32>
    %c0_i32_58 = arith.constant 0 : i32
    %c0_i32_59 = arith.constant 0 : i32
    %c0_i32_60 = arith.constant 0 : i32
    %282 = tpu.memref_slice %arg14[%arg0, %c0_i32_59, %c0_i32_60] : memref<2x256x1024xbf16, #tpu.memory_space<any>> -> memref<1x256x1024xbf16, #tpu.memory_space<any>>
    %283 = tpu.memref_squeeze %282 : memref<1x256x1024xbf16, #tpu.memory_space<any>> -> memref<256x1024xbf16, #tpu.memory_space<any>>
    %284 = tpu.memref_slice %arg21[%c0_i32_58] : memref<3x!tpu.dma_semaphore, #tpu.memory_space<semaphore_mem>> -> memref<1x!tpu.dma_semaphore, #tpu.memory_space<semaphore_mem>>
    %285 = tpu.memref_squeeze %284 : memref<1x!tpu.dma_semaphore, #tpu.memory_space<semaphore_mem>> -> memref<!tpu.dma_semaphore, #tpu.memory_space<semaphore_mem>>
    tpu.wait_dma2 semaphore(%285 : memref<!tpu.dma_semaphore, #tpu.memory_space<semaphore_mem>>) src(%283 : memref<256x1024xbf16, #tpu.memory_space<any>>) dst(%arg18 : memref<256x1024xbf16, #tpu.memory_space<vmem>>)
    %286 = arith.truncf %281 : vector<8x256xf32> to vector<8x256xbf16>
    %c0_61 = arith.constant 0 : index
    %c0_62 = arith.constant 0 : index
    %287 = vector.load %arg18[%c0_61, %c0_62] : memref<256x1024xbf16, #tpu.memory_space<vmem>>, vector<256x1024xbf16>
    %cst_63 = arith.constant dense<0.000000e+00> : vector<8x1024xf32>
    %288 = tpu.matmul %286, %287, %cst_63 {dimension_numbers = #tpu.dot_dimension_numbers<[1], [0], [0], [1], [0, 0, 1, 1], [], []>} : vector<8x256xbf16>, vector<256x1024xbf16>, vector<8x1024xf32> -> vector<8x1024xf32>
    %c0_64 = arith.constant 0 : index
    %c0_65 = arith.constant 0 : index
    %c0_66 = arith.constant 0 : index
    %289 = vector.load %arg9[%c0_64, %c0_65, %c0_66] : memref<1x1x1024xf32, #tpu.memory_space<vmem>>, vector<1x1x1024xf32>
    %290 = vector.shape_cast %289 : vector<1x1x1024xf32> to vector<1x1024xf32>
    %291 = vector.broadcast %290 : vector<1x1024xf32> to vector<8x1024xf32>
    %292 = arith.addf %288, %291 : vector<8x1024xf32>
    %cst_67 = arith.constant 0.000000e+00 : f32
    %cst_68 = arith.constant 6.000000e+00 : f32
    %293 = vector.broadcast %cst_67 : f32 to vector<8x1024xf32>
    %294 = arith.maximumf %293, %292 : vector<8x1024xf32>
    %295 = vector.broadcast %cst_68 : f32 to vector<8x1024xf32>
    %296 = arith.minimumf %295, %294 : vector<8x1024xf32>
    %c1_i32_69 = arith.constant 1 : i32
    %c0_i32_70 = arith.constant 0 : i32
    %c0_i32_71 = arith.constant 0 : i32
    %297 = tpu.memref_slice %arg15[%arg0, %c0_i32_70, %c0_i32_71] : memref<2x1024x1024xbf16, #tpu.memory_space<any>> -> memref<1x1024x1024xbf16, #tpu.memory_space<any>>
    %298 = tpu.memref_squeeze %297 : memref<1x1024x1024xbf16, #tpu.memory_space<any>> -> memref<1024x1024xbf16, #tpu.memory_space<any>>
    %299 = tpu.memref_slice %arg21[%c1_i32_69] : memref<3x!tpu.dma_semaphore, #tpu.memory_space<semaphore_mem>> -> memref<1x!tpu.dma_semaphore, #tpu.memory_space<semaphore_mem>>
    %300 = tpu.memref_squeeze %299 : memref<1x!tpu.dma_semaphore, #tpu.memory_space<semaphore_mem>> -> memref<!tpu.dma_semaphore, #tpu.memory_space<semaphore_mem>>
    tpu.wait_dma2 semaphore(%300 : memref<!tpu.dma_semaphore, #tpu.memory_space<semaphore_mem>>) src(%298 : memref<1024x1024xbf16, #tpu.memory_space<any>>) dst(%arg19 : memref<1024x1024xbf16, #tpu.memory_space<vmem>>)
    %301 = arith.truncf %296 : vector<8x1024xf32> to vector<8x1024xbf16>
    %c0_72 = arith.constant 0 : index
    %c0_73 = arith.constant 0 : index
    %302 = vector.load %arg19[%c0_72, %c0_73] : memref<1024x1024xbf16, #tpu.memory_space<vmem>>, vector<1024x1024xbf16>
    %cst_74 = arith.constant dense<0.000000e+00> : vector<8x1024xf32>
    %303 = tpu.matmul %301, %302, %cst_74 {dimension_numbers = #tpu.dot_dimension_numbers<[1], [0], [0], [1], [0, 0, 1, 1], [], []>} : vector<8x1024xbf16>, vector<1024x1024xbf16>, vector<8x1024xf32> -> vector<8x1024xf32>
    %c0_75 = arith.constant 0 : index
    %c0_76 = arith.constant 0 : index
    %c0_77 = arith.constant 0 : index
    %304 = vector.load %arg10[%c0_75, %c0_76, %c0_77] : memref<1x1x1024xf32, #tpu.memory_space<vmem>>, vector<1x1x1024xf32>
    %305 = vector.shape_cast %304 : vector<1x1x1024xf32> to vector<1x1024xf32>
    %306 = vector.broadcast %305 : vector<1x1024xf32> to vector<8x1024xf32>
    %307 = arith.addf %303, %306 : vector<8x1024xf32>
    %cst_78 = arith.constant 0.000000e+00 : f32
    %cst_79 = arith.constant 6.000000e+00 : f32
    %308 = vector.broadcast %cst_78 : f32 to vector<8x1024xf32>
    %309 = arith.maximumf %308, %307 : vector<8x1024xf32>
    %310 = vector.broadcast %cst_79 : f32 to vector<8x1024xf32>
    %311 = arith.minimumf %310, %309 : vector<8x1024xf32>
    %c2_i32_80 = arith.constant 2 : i32
    %c0_i32_81 = arith.constant 0 : i32
    %c0_i32_82 = arith.constant 0 : i32
    %312 = tpu.memref_slice %arg16[%arg0, %c0_i32_81, %c0_i32_82] : memref<2x1024x512xbf16, #tpu.memory_space<any>> -> memref<1x1024x512xbf16, #tpu.memory_space<any>>
    %313 = tpu.memref_squeeze %312 : memref<1x1024x512xbf16, #tpu.memory_space<any>> -> memref<1024x512xbf16, #tpu.memory_space<any>>
    %314 = tpu.memref_slice %arg21[%c2_i32_80] : memref<3x!tpu.dma_semaphore, #tpu.memory_space<semaphore_mem>> -> memref<1x!tpu.dma_semaphore, #tpu.memory_space<semaphore_mem>>
    %315 = tpu.memref_squeeze %314 : memref<1x!tpu.dma_semaphore, #tpu.memory_space<semaphore_mem>> -> memref<!tpu.dma_semaphore, #tpu.memory_space<semaphore_mem>>
    tpu.wait_dma2 semaphore(%315 : memref<!tpu.dma_semaphore, #tpu.memory_space<semaphore_mem>>) src(%313 : memref<1024x512xbf16, #tpu.memory_space<any>>) dst(%arg20 : memref<1024x512xbf16, #tpu.memory_space<vmem>>)
    %316 = arith.truncf %311 : vector<8x1024xf32> to vector<8x1024xbf16>
    %c0_83 = arith.constant 0 : index
    %c0_84 = arith.constant 0 : index
    %317 = vector.load %arg20[%c0_83, %c0_84] : memref<1024x512xbf16, #tpu.memory_space<vmem>>, vector<1024x512xbf16>
    %cst_85 = arith.constant dense<0.000000e+00> : vector<8x512xf32>
    %318 = tpu.matmul %316, %317, %cst_85 {dimension_numbers = #tpu.dot_dimension_numbers<[1], [0], [0], [1], [0, 0, 1, 1], [], []>} : vector<8x1024xbf16>, vector<1024x512xbf16>, vector<8x512xf32> -> vector<8x512xf32>
    %c0_86 = arith.constant 0 : index
    %c0_87 = arith.constant 0 : index
    %c0_88 = arith.constant 0 : index
    %319 = vector.load %arg11[%c0_86, %c0_87, %c0_88] : memref<1x1x512xf32, #tpu.memory_space<vmem>>, vector<1x1x512xf32>
    %320 = vector.shape_cast %319 : vector<1x1x512xf32> to vector<1x512xf32>
    %321 = vector.broadcast %320 : vector<1x512xf32> to vector<8x512xf32>
    %322 = arith.addf %318, %321 : vector<8x512xf32>
    %323 = arith.extui %0 : i1 to i32
    %c0_i32_89 = arith.constant 0 : i32
    %324 = arith.cmpi ne, %323, %c0_i32_89 : i32
    scf.if %324 {
      %c0_91 = arith.constant 0 : index
      %c0_92 = arith.constant 0 : index
      %c0_93 = arith.constant 0 : index
      %328 = vector.load %arg12[%c0_91, %c0_92, %c0_93] : memref<1x512x16xf32, #tpu.memory_space<vmem>>, vector<1x512x16xf32>
      %329 = vector.shape_cast %328 : vector<1x512x16xf32> to vector<512x16xf32>
      %cst_94 = arith.constant dense<0.000000e+00> : vector<8x16xf32>
      %330 = tpu.matmul %322, %329, %cst_94 {dimension_numbers = #tpu.dot_dimension_numbers<[1], [0], [0], [1], [0, 0, 1, 1], [], []>} : vector<8x512xf32>, vector<512x16xf32>, vector<8x16xf32> -> vector<8x16xf32>
      %c0_95 = arith.constant 0 : index
      %c0_96 = arith.constant 0 : index
      %c0_97 = arith.constant 0 : index
      %331 = vector.load %arg13[%c0_95, %c0_96, %c0_97] : memref<1x1x16xf32, #tpu.memory_space<vmem>>, vector<1x1x16xf32>
      %332 = vector.shape_cast %331 : vector<1x1x16xf32> to vector<1x16xf32>
      %333 = vector.broadcast %332 : vector<1x16xf32> to vector<8x16xf32>
      %334 = arith.addf %330, %333 : vector<8x16xf32>
      %335 = vector.extract_strided_slice %334 {offsets = [0, 0], sizes = [8, 8], strides = [1, 1]} : vector<8x16xf32> to vector<8x8xf32>
      %c0_98 = arith.constant 0 : index
      %c0_99 = arith.constant 0 : index
      %c0_100 = arith.constant 0 : index
      %336 = vector.load %arg17[%c0_98, %c0_99, %c0_100] : memref<1x8x16xf32, #tpu.memory_space<vmem>>, vector<1x8x8xf32>
      %337 = vector.shape_cast %336 : vector<1x8x8xf32> to vector<8x8xf32>
      %338 = vector.shape_cast %335 : vector<8x8xf32> to vector<1x8x8xf32>
      tpu.vector_store %arg17[%c0_98, %c0_99, %c0_100], %338 {strides = array<i32>} : memref<1x8x16xf32, #tpu.memory_space<vmem>>, vector<1x8x8xf32>,
      %339 = vector.extract_strided_slice %334 {offsets = [0, 8], sizes = [8, 8], strides = [1, 1]} : vector<8x16xf32> to vector<8x8xf32>
      %340 = math.exp %339 : vector<8x8xf32>
      %cst_101 = arith.constant 9.99999993E-9 : f32
      %341 = vector.broadcast %cst_101 : f32 to vector<8x8xf32>
      %342 = arith.addf %340, %341 : vector<8x8xf32>
      %c0_102 = arith.constant 0 : index
      %c0_103 = arith.constant 0 : index
      %c8 = arith.constant 8 : index
      %343 = vector.load %arg17[%c0_102, %c0_103, %c8] : memref<1x8x16xf32, #tpu.memory_space<vmem>>, vector<1x8x8xf32>
      %344 = vector.shape_cast %343 : vector<1x8x8xf32> to vector<8x8xf32>
      %345 = vector.shape_cast %342 : vector<8x8xf32> to vector<1x8x8xf32>
      tpu.vector_store %arg17[%c0_102, %c0_103, %c8], %345 {strides = array<i32>} : memref<1x8x16xf32, #tpu.memory_space<vmem>>, vector<1x8x8xf32>,
    } else {
    }
    %true = arith.constant true
    %325 = arith.xori %0, %true : i1
    %326 = arith.extui %325 : i1 to i32
    %c0_i32_90 = arith.constant 0 : i32
    %327 = arith.cmpi ne, %326, %c0_i32_90 : i32
    scf.if %327 {
      %cst_91 = arith.constant 0.000000e+00 : f32
      %cst_92 = arith.constant 6.000000e+00 : f32
      %328 = vector.broadcast %cst_91 : f32 to vector<8x512xf32>
      %329 = arith.maximumf %328, %322 : vector<8x512xf32>
      %330 = vector.broadcast %cst_92 : f32 to vector<8x512xf32>
      %331 = arith.minimumf %330, %329 : vector<8x512xf32>
      %c0_93 = arith.constant 0 : index
      %c0_94 = arith.constant 0 : index
      %c0_95 = arith.constant 0 : index
      %332 = vector.load %arg12[%c0_93, %c0_94, %c0_95] : memref<1x512x16xf32, #tpu.memory_space<vmem>>, vector<1x512x16xf32>
      %333 = vector.shape_cast %332 : vector<1x512x16xf32> to vector<512x16xf32>
      %cst_96 = arith.constant dense<0.000000e+00> : vector<8x16xf32>
      %334 = tpu.matmul %331, %333, %cst_96 {dimension_numbers = #tpu.dot_dimension_numbers<[1], [0], [0], [1], [0, 0, 1, 1], [], []>} : vector<8x512xf32>, vector<512x16xf32>, vector<8x16xf32> -> vector<8x16xf32>
      %c0_97 = arith.constant 0 : index
      %c0_98 = arith.constant 0 : index
      %c0_99 = arith.constant 0 : index
      %335 = vector.load %arg13[%c0_97, %c0_98, %c0_99] : memref<1x1x16xf32, #tpu.memory_space<vmem>>, vector<1x1x16xf32>
      %336 = vector.shape_cast %335 : vector<1x1x16xf32> to vector<1x16xf32>
      %337 = vector.broadcast %336 : vector<1x16xf32> to vector<8x16xf32>
      %338 = arith.addf %334, %337 : vector<8x16xf32>
      %c0_100 = arith.constant 0 : index
      %c0_101 = arith.constant 0 : index
      %c0_102 = arith.constant 0 : index
      %339 = vector.load %arg17[%c0_100, %c0_101, %c0_102] : memref<1x8x16xf32, #tpu.memory_space<vmem>>, vector<1x8x16xf32>
      %340 = vector.shape_cast %339 : vector<1x8x16xf32> to vector<8x16xf32>
      %341 = vector.shape_cast %338 : vector<8x16xf32> to vector<1x8x16xf32>
      tpu.vector_store %arg17[%c0_100, %c0_101, %c0_102], %341 {strides = array<i32>} : memref<1x8x16xf32, #tpu.memory_space<vmem>>, vector<1x8x16xf32>,
    } else {
    }
    return
  }
  func.func @transform_0(%arg0: i32) -> (i32, i32) {
    %c0_i32 = arith.constant 0 : i32
    %c0_i32_0 = arith.constant 0 : i32
    %c0_i32_1 = arith.constant 0 : i32
    return %c0_i32, %c0_i32_0 : i32, i32
  }
  func.func @transform_1(%arg0: i32) -> (i32, i32) {
    %c0_i32 = arith.constant 0 : i32
    %c0_i32_0 = arith.constant 0 : i32
    %c0_i32_1 = arith.constant 0 : i32
    return %c0_i32, %c0_i32_0 : i32, i32
  }
  func.func @transform_2(%arg0: i32) -> (i32, i32) {
    %c0_i32 = arith.constant 0 : i32
    %c0_i32_0 = arith.constant 0 : i32
    %c0_i32_1 = arith.constant 0 : i32
    return %c0_i32, %c0_i32_0 : i32, i32
  }
  func.func @transform_3(%arg0: i32) -> (i32, i32) {
    %c0_i32 = arith.constant 0 : i32
    %c0_i32_0 = arith.constant 0 : i32
    %c0_i32_1 = arith.constant 0 : i32
    return %c0_i32, %c0_i32_0 : i32, i32
  }
  func.func @transform_4(%arg0: i32) -> (i32, i32, i32) {
    %c0_i32 = arith.constant 0 : i32
    %c0_i32_0 = arith.constant 0 : i32
    %c0_i32_1 = arith.constant 0 : i32
    return %arg0, %c0_i32, %c0_i32_0 : i32, i32, i32
  }
  func.func @transform_5(%arg0: i32) -> (i32, i32, i32) {
    %c0_i32 = arith.constant 0 : i32
    %c0_i32_0 = arith.constant 0 : i32
    %c0_i32_1 = arith.constant 0 : i32
    return %arg0, %c0_i32, %c0_i32_0 : i32, i32, i32
  }
  func.func @transform_6(%arg0: i32) -> (i32, i32, i32) {
    %c0_i32 = arith.constant 0 : i32
    %c0_i32_0 = arith.constant 0 : i32
    %c0_i32_1 = arith.constant 0 : i32
    return %arg0, %c0_i32, %c0_i32_0 : i32, i32, i32
  }
  func.func @transform_7(%arg0: i32) -> (i32, i32, i32) {
    %c0_i32 = arith.constant 0 : i32
    %c0_i32_0 = arith.constant 0 : i32
    %c0_i32_1 = arith.constant 0 : i32
    return %arg0, %c0_i32, %c0_i32_0 : i32, i32, i32
  }
  func.func @transform_8(%arg0: i32) -> (i32, i32, i32) {
    %c0_i32 = arith.constant 0 : i32
    %c0_i32_0 = arith.constant 0 : i32
    %c0_i32_1 = arith.constant 0 : i32
    return %arg0, %c0_i32, %c0_i32_0 : i32, i32, i32
  }
  func.func @transform_9(%arg0: i32) -> (i32, i32, i32) {
    %c0_i32 = arith.constant 0 : i32
    %c0_i32_0 = arith.constant 0 : i32
    %c0_i32_1 = arith.constant 0 : i32
    return %arg0, %c0_i32, %c0_i32_0 : i32, i32, i32
  }
  func.func @transform_10(%arg0: i32) -> (i32, i32, i32) {
    %c0_i32 = arith.constant 0 : i32
    %c0_i32_0 = arith.constant 0 : i32
    %c0_i32_1 = arith.constant 0 : i32
    return %arg0, %c0_i32, %c0_i32_0 : i32, i32, i32
  }
  func.func @transform_11(%arg0: i32) -> (i32, i32, i32) {
    %c0_i32 = arith.constant 0 : i32
    %c0_i32_0 = arith.constant 0 : i32
    %c0_i32_1 = arith.constant 0 : i32
    return %arg0, %c0_i32, %c0_i32_0 : i32, i32, i32
  }
  func.func @transform_12(%arg0: i32) -> (i32, i32, i32) {
    %c0_i32 = arith.constant 0 : i32
    %c0_i32_0 = arith.constant 0 : i32
    %c0_i32_1 = arith.constant 0 : i32
    return %arg0, %c0_i32, %c0_i32_0 : i32, i32, i32
  }
  func.func @transform_16(%arg0: i32) -> (i32, i32, i32) {
    %c0_i32 = arith.constant 0 : i32
    %c0_i32_0 = arith.constant 0 : i32
    %c0_i32_1 = arith.constant 0 : i32
    return %arg0, %c0_i32, %c0_i32_0 : i32, i32, i32
  }
}

</mosaic_0001>

<bundles_post_ra>
// kernel: tpu_custom_call.1
= control target key start
LH: loop header
LB: loop body
LE: loop exit
PB: predicated region body
PF: predicated region fallthrough
CT: control target
= control target key end

     0   :  { %s16113_s0 = inlined_call_operand.vmem [shape: f32[64,32], index: 0, kind: input, shape index: {}]   ;;  %s16114_s1 = inlined_call_operand.vmem [shape: s32[8,1], index: 1, kind: input, shape index: {}]   ;;  %s16115_s2 = inlined_call_operand.hbm [shape: f32[1,32], index: 2, kind: input, shape index: {}]   ;;  %s16116_s3 = inlined_call_operand.hbm [shape: f32[1,32], index: 3, kind: input, shape index: {}]   ;;  %s16117_s4 = inlined_call_operand.hbm [shape: bf16[2,32,768], index: 4, kind: input, shape index: {}]   ;;  %s16118_s5 = inlined_call_operand.hbm [shape: bf16[2,256,768], index: 5, kind: input, shape index: {}]   ;;  %s16119_s6 = inlined_call_operand.hbm [shape: f32[2,1,768], index: 6, kind: input, shape index: {}]   ;;  %s16120_s7 = inlined_call_operand.hbm [shape: f32[2,1,768], index: 7, kind: input, shape index: {}]   ;;  %s16121_s8 = inlined_call_operand.hbm [shape: f32[2,1,1024], index: 8, kind: input, shape index: {}]   ;;  %s16122_s9 = inlined_call_operand.hbm [shape: f32[2,1,1024], index: 9, kind: input, shape index: {}]   ;;  %s16123_s10 = inlined_call_operand.hbm [shape: f32[2,1,512], index: 10, kind: input, shape index: {}]   ;;  %s16124_s11 = inlined_call_operand.vmem [shape: f32[2,512,16], index: 11, kind: input, shape index: {}]   ;;  %s16125_s12 = inlined_call_operand.hbm [shape: f32[2,1,16], index: 12, kind: input, shape index: {}]   ;;  %s16126_s13 = inlined_call_operand.hbm [shape: bf16[2,256,1024], index: 13, kind: input, shape index: {}]   ;;  %s16127_s14 = inlined_call_operand.hbm [shape: bf16[2,1024,1024], index: 14, kind: input, shape index: {}]   ;;  %s16128_s15 = inlined_call_operand.hbm [shape: bf16[2,1024,512], index: 15, kind: input, shape index: {}]   ;;  %s16129_s16 = inlined_call_operand.hbm [shape: f32[2,8,16], index: 16, kind: output, shape index: {}]  }
   0x1   :  { %16386 = sst [smem:[#allocation152_spill]] %s16113_s0 }
   0x2   :  { %16387 = sst [smem:[#allocation153_spill]] %s16114_s1 }
   0x3   :  { %16388 = sst [smem:[#allocation154_spill]] %s16115_s2 }
   0x4   :  { %16389 = sst [smem:[#allocation155_spill]] %s16116_s3 }
   0x5   :  { %16390 = sst [smem:[#allocation156_spill]] %s16117_s4 }
   0x6   :  { %16391 = sst [smem:[#allocation157_spill]] %s16118_s5 }
   0x7   :  { %16392 = sst [smem:[#allocation158_spill]] %s16119_s6 }
   0x8   :  { %16393 = sst [smem:[#allocation159_spill]] %s16124_s11 }
   0x9   :  { %16394 = sst [smem:[#allocation160_spill]] %s16126_s13 }
   0xa   :  { %16395 = sst [smem:[#allocation161_spill]] %s16127_s14 }
   0xb   :  { %16396 = sst [smem:[#allocation162_spill]] %s16128_s15 }
   0xc   :  { %16397 = sst [smem:[#allocation163_spill]] %s16129_s16 }
   0xd   :  { %21 = vsyncpa [#allocation7], 0 }
   0xe   :  { %22 = vsyncpa [#allocation10], 0 }
   0xf   :  { %23 = vsyncpa [#allocation8], 0 }
  0x10   :  { %25 = vsyncpa [#allocation8 + $0x1], 0  ;;  %s13415_s21 = smov 0   ;;  %s13417_s22 = smov 0  }
  0x11   :  { %s13419_s23 = smov 0   ;;  %s13421_s24 = smov 0  }
  0x12 LB: > { %16398 = sst [smem:[#allocation35_spill]] %s13299_s21  ;;  %s13436_s25 = sadd.s32 4294967295, %s13311_s24   ;;  %s13311_s24 = sphi %s13421_s24, %s16910_s24   ;;  %s13307_s23 = sphi %s13419_s23, %s16912_s23   ;;  %s13303_s22 = sphi %s13417_s22, %s16914_s22   ;;  %s13299_s21 = sphi %s13415_s21, %s16913_s21  }
  0x13   : > { %16399 = sst [smem:[#allocation36_spill]] %s13307_s23  ;;  %s10612_s26 = sadd.s32 4294967294, %s13311_s24  }
  0x14   : > { %s13440_s27 = sadd.s32 1, %s13311_s24   ;;  %s122_s28 = sadd.s32 1, %s13307_s23 }
  0x15   : > { %16400 = sst [smem:[#allocation37_spill]] %s13440_s27  ;;  %s119_s29 = ssub.s32 %s13311_s24, %s13440_s27 }
  0x16   : > { %p129_p0 = scmp.ne.s32.totalorder %s13307_s23, %s13303_s22  ;;  %p120_p1 = scmp.eq.s32.totalorder %s119_s29, 0 }
  0x17   : > { %p130_p2 = scmp.eq.s32.totalorder %s13311_s24, 0  ;;  %p135_p3 = scmp.ne.s32.totalorder %s13303_s22, %s13299_s21 }
  0x18   : > { %p16131_p4 = scmp.eq.s32.totalorder %s13436_s25, 0  ;;  %p367_p7 = scmp.eq.s32.totalorder %s13436_s25, 1 }
  0x19   : > { %s13452_s30 = scalar_select %p120_p1, %s13307_s23, %s122_s28  }
  0x1a   : > { %p13454_p5 = por %p130_p2, %p129_p0  ;;  %p13460_p6 = por %p16131_p4, %p135_p3 }
  0x1b   : > { %16401 = sst [smem:[#allocation38_spill]] %s13452_s30  ;;  %p373_p8 = scmp.eq.s32.totalorder %s10612_s26, 1 }
  0x1c   : > { %s16403_s17 = scalar_select %p13460_p6, 1, 0 }
  0x1d   : > { %p10613_p9 = scmp.ge.s32.totalorder %s13311_s24, 1  ;;  %p380_p10 = scmp.lt.s32.totalorder %s13311_s24, 3 }
  0x1e   : > { %16404 = sst [smem:[#allocation39_spill]] %s16403_s17  ;;  %p13467_p11 = por %p367_p7, %p129_p0 }
  0x1f   : > { %p13471_p12 = por %p373_p8, %p135_p3  ;;  %p13475_p13 = pnand %p10613_p9, %p380_p10 }
  0x20   : > { %s16405_s18 = scalar_select %p13467_p11, 1, 0 }
  0x21   : > { %s16407_s19 = scalar_select %p13471_p12, 1, 0 }
  0x22   : > { %16406 = sst [smem:[#allocation40_spill]] %s16405_s18  ;;  %p11902_p4 = pneg %p13475_p13 }
  0x23   : > { %16408 = sst [smem:[#allocation41_spill]] %s16407_s19  ;;  %s13313_s26 = smov [#allocation6]  }
  0x24   : > { %s16409_s20 = scalar_select %p13475_p13, 1, 0 }
  0x25   : > { %s399_s28 = sshll.u32 %s13313_s26, 4  ;;  %p11940_p0 = scmp.lt.s32.totalorder %s13311_s24, 2  ;;  %s400_s28 = int_to_ptr.vmem [resolvable:$true] %s399_s28 }
  0x26   : > { %p16410_p7 = scmp.eq.s32.totalorder %s13436_s25, 0  ;;  %s13491_s30 = sand.u32 1, %s13307_s23  }
  0x27   : > { %p13495_p3 = pnand %p11940_p0, %p13454_p5  ;;  %s421_s19 = sand.u32 1, %s13311_s24  }
  0x28   : > { %p13486_p6 = pnand %p11902_p4, %p16410_p7  ;;  %s12902_s26 = scalar_lea.vmem %s400_s28, 16 }
  0x29   : > { %p12903_p9 = scmp.ne.s32.totalorder %s400_s28, %s12902_s26  ;;  %s12909_s21 = scalar_lea.vmem %s400_s28, 32 }
  0x2a   : > { %s16411_s29 = scalar_select %p13486_p6, 1, 0 }
  0x2b   : > { %p16144_p8 = pneg %p13486_p6  ;;  %p12910_p7 = scmp.lt.s32.totalorder %s400_s28, %s400_s28 }
  0x2c   : > { %p12911_p2 = scmp.lt.s32.totalorder %s12909_s21, %s12902_s26 }
  0x2d   : > { %p12905_p4 = pnand %p12903_p9, %p16144_p8 }
  0x2e   : > { %p12912_p1 = por %p12911_p2, %p12910_p7 }
  0x2f   : > { %p12906_p10 = pneg %p12905_p4 }
  0x31   : > { %p12913_p12 = pnand %p12912_p1, %p12906_p10 }
  0x33   : > { %12916 = shalt.err (!%p12913_p12)
}
  0x34   : > { %s16413_s2 = sld [smem:[#allocation154_spill]]  ;;  %s11865_s16 = smul.u32 96, %s13491_s30 }
  0x35   : > { %s11866_s18 = smul.u32 1536, %s13311_s24  ;;  %s16414_s4 = sld [smem:[#allocation156_spill]] }
  0x36   : > { %s425_s21 = scalar_lea.vmem [#allocation11], %s11865_s16  ;;  %s13520_s0 = scalar_lea.sflag [#allocation7], %s421_s19 }
  0x37   : > { %s432_s26 = sshll.u32 %s425_s21, 4  ;;  %p13526_p12 = pneg %p13495_p3  ;;  %s13517_s26 = int_to_ptr.vmem [resolvable:$true] %s432_s26 }
  0x3a   : > { %11905 = dma.hbm_to_vmem [thread:$0]  (!%p13486_p6), %s16413_s2, 16, %s400_s28, [#allocation7]  }
  0x3b   : > { %s13515_s11 = scalar_lea.hbm %s16414_s4, %s11866_s18  ;;  %s12922_s16 = scalar_lea.hbm %s16414_s4, 3072 }
  0x3c   : > { %s12917_s13 = scalar_lea.hbm %s13515_s11, 1536  ;;  %p12923_p0 = scmp.lt.s32.totalorder %s13515_s11, %s16414_s4 }
  0x3d   : > { %p12918_p5 = scmp.ne.s32.totalorder %s13515_s11, %s12917_s13  ;;  %p12924_p9 = scmp.lt.s32.totalorder %s12922_s16, %s12917_s13 }
  0x3f   : > { %p12920_p1 = pnand %p13526_p12, %p12918_p5  ;;  %p12925_p4 = por %p12924_p9, %p12923_p0 }
  0x41   : > { %p12921_p2 = pneg %p12920_p1 }
  0x43   : > { %p12926_p10 = pnand %p12925_p4, %p12921_p2 }
  0x45   : > { %12929 = shalt.err (!%p12926_p10)
}
  0x46   : > { %s12930_s19 = scalar_lea.vmem %s13517_s26, 1536  ;;  %s13314_s23 = smov [#allocation11]  }
  0x47   : > { %p12931_p7 = scmp.ne.s32.totalorder %s13517_s26, %s12930_s19  ;;  %s12935_s14 = sshll.u32 %s13314_s23, 4  ;;  %s12936_s14 = int_to_ptr.vmem [resolvable:$false] %s12935_s14 }
  0x48   : > { %s12937_s15 = scalar_lea.vmem %s12936_s14, 3072  ;;  %p12938_p8 = scmp.lt.s32.totalorder %s13517_s26, %s12936_s14 }
  0x49   : > { %p12933_p5 = pnand %p12931_p7, %p13526_p12  ;;  %p12939_p11 = scmp.lt.s32.totalorder %s12937_s15, %s12930_s19 }
  0x4b   : > { %p12934_p1 = pneg %p12933_p5  ;;  %p12940_p13 = por %p12939_p11, %p12938_p8 }
  0x4d   : > { %p12941_p6 = pnand %p12940_p13, %p12934_p1 }
  0x4f   : > { %12944 = shalt.err (!%p12941_p6)
}
  0x50   : > { %s16150_s13 = smov 384   ;;  %s13316_s16 = smov 24  }
  0x51   : > { %11912 = dma.hbm_to_vmem [thread:$0]  (!%p13495_p3), %s13515_s11, 1536, %s13517_s26, %s13520_s0, %s16150_s13, %s16150_s13, %s13316_s16  }
  0x52   : > { %s11868_s23 = smul.u32 12288, %s13311_s24  ;;  %s16417_s5 = sld [smem:[#allocation157_spill]] }
  0x53   : > { %s16416_s18 = smul.u32 768, %s13491_s30 }
  0x55   : > { %s446_s21 = scalar_lea.vmem [#allocation12], %s16416_s18 }
  0x56   : > { %s453_s19 = sshll.u32 %s446_s21, 4  ;;  %s454_s19 = int_to_ptr.vmem [resolvable:$true] %s453_s19 }
  0x58   : > { %s13559_s4 = scalar_lea.hbm %s16417_s5, %s11868_s23  ;;  %s12950_s18 = scalar_lea.hbm %s16417_s5, 24576 }
  0x59   : > { %s12945_s1 = scalar_lea.hbm %s13559_s4, 12288  ;;  %p12951_p8 = scmp.lt.s32.totalorder %s13559_s4, %s16417_s5 }
  0x5a   : > { %p12946_p6 = scmp.ne.s32.totalorder %s13559_s4, %s12945_s1  ;;  %p12952_p2 = scmp.lt.s32.totalorder %s12950_s18, %s12945_s1 }
  0x5c   : > { %p12948_p11 = pnand %p12946_p6, %p13526_p12  ;;  %p12953_p0 = por %p12952_p2, %p12951_p8 }
  0x5e   : > { %p12949_p13 = pneg %p12948_p11 }
  0x60   : > { %p12954_p9 = pnand %p12953_p0, %p12949_p13 }
  0x62   : > { %12957 = shalt.err (!%p12954_p9)
}
  0x63   : > { %s12958_s2 = scalar_lea.vmem %s454_s19, 12288  ;;  %s13317_s23 = smov [#allocation12]  }
  0x64   : > { %p12959_p4 = scmp.ne.s32.totalorder %s454_s19, %s12958_s2  ;;  %s12963_s15 = sshll.u32 %s13317_s23, 4  ;;  %s12964_s15 = int_to_ptr.vmem [resolvable:$false] %s12963_s15 }
  0x65   : > { %s12965_s13 = scalar_lea.vmem %s12964_s15, 24576  ;;  %p12966_p5 = scmp.lt.s32.totalorder %s454_s19, %s12964_s15 }
  0x66   : > { %p12961_p10 = pnand %p12959_p4, %p13526_p12  ;;  %p12967_p1 = scmp.lt.s32.totalorder %s12965_s13, %s12958_s2 }
  0x68   : > { %p12962_p7 = pneg %p12961_p10  ;;  %p12968_p6 = por %p12967_p1, %p12966_p5 }
  0x6a   : > { %p12969_p11 = pnand %p12968_p6, %p12962_p7 }
  0x6c   : > { %12972 = shalt.err (!%p12969_p11)
}
  0x6d   : > { %s16418_s1 = smov 384   ;;  %s11870_s14 = smul.u32 96, %s13311_s24 }
  0x6e   : > { %11915 = dma.hbm_to_vmem [thread:$0]  (!%p13495_p3), %s13559_s4, 12288, %s454_s19, %s13520_s0, %s16418_s1, %s16418_s1, %s13316_s16  }
  0x6f   : > { %s16419_s11 = smul.u32 6, %s13491_s30  ;;  %s16420_s6 = sld [smem:[#allocation158_spill]] }
  0x71   : > { %s467_s26 = scalar_lea.vmem [#allocation13], %s16419_s11 }
  0x72   : > { %s475_s18 = sshll.u32 %s467_s26, 4  ;;  %s476_s18 = int_to_ptr.vmem [resolvable:$true] %s475_s18 }
  0x75   : > { %s473_s2 = scalar_lea.hbm %s16420_s6, %s11870_s14  ;;  %s12978_s17 = scalar_lea.hbm %s16420_s6, 192 }
  0x76   : > { %s12973_s23 = scalar_lea.hbm %s473_s2, 96  ;;  %p12979_p0 = scmp.lt.s32.totalorder %s473_s2, %s16420_s6 }
  0x77   : > { %p12974_p13 = scmp.ne.s32.totalorder %s473_s2, %s12973_s23  ;;  %p12980_p9 = scmp.lt.s32.totalorder %s12978_s17, %s12973_s23 }
  0x79   : > { %p12976_p8 = pnand %p12974_p13, %p13526_p12  ;;  %p12981_p4 = por %p12980_p9, %p12979_p0 }
  0x7b   : > { %p12977_p2 = pneg %p12976_p8 }
  0x7d   : > { %p12982_p10 = pnand %p12981_p4, %p12977_p2 }
  0x7f   : > { %12985 = shalt.err (!%p12982_p10)
}
  0x80   : > { %s12986_s19 = scalar_lea.vmem %s476_s18, 96  ;;  %s13318_s1 = smov [#allocation13]  }
  0x81   : > { %p12987_p7 = scmp.ne.s32.totalorder %s476_s18, %s12986_s19  ;;  %s12991_s11 = sshll.u32 %s13318_s1, 4  ;;  %s12992_s11 = int_to_ptr.vmem [resolvable:$false] %s12991_s11 }
  0x82   : > { %s12993_s26 = scalar_lea.vmem %s12992_s11, 192  ;;  %p12994_p6 = scmp.lt.s32.totalorder %s476_s18, %s12992_s11 }
  0x83   : > { %p12989_p5 = pnand %p12987_p7, %p13526_p12  ;;  %p12995_p11 = scmp.lt.s32.totalorder %s12993_s26, %s12986_s19 }
  0x85   : > { %p12990_p1 = pneg %p12989_p5  ;;  %p12996_p13 = por %p12995_p11, %p12994_p6 }
  0x87   : > { %p12997_p8 = pnand %p12996_p13, %p12990_p1 }
  0x89   : > { %13000 = shalt.err (!%p12997_p8)
}
  0x8a   : > { %11918 = dma.hbm_to_vmem [thread:$0]  (!%p13495_p3), %s473_s2, 96, %s476_s18, %s13520_s0  }
  0x8b   : > { %s13607_s13 = scalar_lea.hbm %s16120_s7, %s11870_s14  ;;  %s16421_s21 = smul.u32 6, %s13491_s30 }
  0x8c   : > { %s10621_s4 = sshll.u32 %s13491_s30, 3  ;;  %s13001_s16 = scalar_lea.hbm %s13607_s13, 96 }
  0x8d   : > { %s486_s23 = scalar_lea.vmem [#allocation14], %s16421_s21  ;;  %p13002_p2 = scmp.ne.s32.totalorder %s13607_s13, %s13001_s16 }
  0x8e   : > { %s494_s15 = sshll.u32 %s486_s23, 4  ;;  %s13006_s19 = scalar_lea.hbm %s16120_s7, 192  ;;  %s495_s15 = int_to_ptr.vmem [resolvable:$true] %s494_s15 }
  0x8f   : > { %p13004_p0 = pnand %p13002_p2, %p13526_p12  ;;  %p13007_p4 = scmp.lt.s32.totalorder %s13607_s13, %s16120_s7 }
  0x90   : > { %p13008_p10 = scmp.lt.s32.totalorder %s13006_s19, %s13001_s16 }
  0x91   : > { %p13005_p9 = pneg %p13004_p0 }
  0x92   : > { %p13009_p7 = por %p13008_p10, %p13007_p4 }
  0x94   : > { %p13010_p5 = pnand %p13009_p7, %p13005_p9 }
  0x96   : > { %13013 = shalt.err (!%p13010_p5)
}
  0x97   : > { %s13014_s11 = scalar_lea.vmem %s495_s15, 96  ;;  %s13319_s26 = smov [#allocation14]  }
  0x98   : > { %p13015_p1 = scmp.ne.s32.totalorder %s495_s15, %s13014_s11  ;;  %s13019_s5 = sshll.u32 %s13319_s26, 4  ;;  %s13020_s5 = int_to_ptr.vmem [resolvable:$false] %s13019_s5 }
  0x99   : > { %s13021_s17 = scalar_lea.vmem %s13020_s5, 192  ;;  %p13022_p13 = scmp.lt.s32.totalorder %s495_s15, %s13020_s5 }
  0x9a   : > { %p13017_p6 = pnand %p13015_p1, %p13526_p12  ;;  %p13023_p8 = scmp.lt.s32.totalorder %s13021_s17, %s13014_s11 }
  0x9c   : > { %p13018_p11 = pneg %p13017_p6  ;;  %p13024_p2 = por %p13023_p8, %p13022_p13 }
  0x9e   : > { %p13025_p0 = pnand %p13024_p2, %p13018_p11 }
  0xa0   : > { %13028 = shalt.err (!%p13025_p0)
}
  0xa1   : > { %11921 = dma.hbm_to_vmem [thread:$0]  (!%p13495_p3), %s13607_s13, 96, %s495_s15, %s13520_s0  }
  0xa2   : > { %s11714_s21 = sshll.u32 %s13311_s24, 7  ;;  %s505_s2 = scalar_lea.vmem [#allocation15], %s10621_s4 }
  0xa3   : > { %s511_s18 = scalar_lea.hbm %s16121_s8, %s11714_s21  ;;  %s513_s19 = sshll.u32 %s505_s2, 4  ;;  %s514_s19 = int_to_ptr.vmem [resolvable:$true] %s513_s19 }
  0xa4   : > { %s13029_s1 = scalar_lea.hbm %s511_s18, 128  ;;  %s13034_s26 = scalar_lea.hbm %s16121_s8, 256 }
  0xa5   : > { %p13030_p9 = scmp.ne.s32.totalorder %s511_s18, %s13029_s1  ;;  %p13035_p7 = scmp.lt.s32.totalorder %s511_s18, %s16121_s8 }
  0xa6   : > { %p13036_p5 = scmp.lt.s32.totalorder %s13034_s26, %s13029_s1 }
  0xa7   : > { %p13032_p4 = pnand %p13030_p9, %p13526_p12 }
  0xa8   : > { %p13037_p1 = por %p13036_p5, %p13035_p7 }
  0xa9   : > { %p13033_p10 = pneg %p13032_p4 }
  0xab   : > { %p13038_p6 = pnand %p13037_p1, %p13033_p10 }
  0xad   : > { %13041 = shalt.err (!%p13038_p6)
}
  0xae   : > { %s13042_s5 = scalar_lea.vmem %s514_s19, 128  ;;  %s13320_s17 = smov [#allocation15]  }
  0xaf   : > { %p13043_p11 = scmp.ne.s32.totalorder %s514_s19, %s13042_s5  ;;  %s13047_s23 = sshll.u32 %s13320_s17, 4  ;;  %s13048_s23 = int_to_ptr.vmem [resolvable:$false] %s13047_s23 }
  0xb0   : > { %s13049_s16 = scalar_lea.vmem %s13048_s23, 256  ;;  %p13050_p2 = scmp.lt.s32.totalorder %s514_s19, %s13048_s23 }
  0xb1   : > { %p13045_p13 = pnand %p13043_p11, %p13526_p12  ;;  %p13051_p0 = scmp.lt.s32.totalorder %s13049_s16, %s13042_s5 }
  0xb3   : > { %p13046_p8 = pneg %p13045_p13  ;;  %p13052_p9 = por %p13051_p0, %p13050_p2 }
  0xb5   : > { %p13053_p4 = pnand %p13052_p9, %p13046_p8 }
  0xb7   : > { %13056 = shalt.err (!%p13053_p4)
}
  0xb8   : > { %11924 = dma.hbm_to_vmem [thread:$0]  (!%p13495_p3), %s511_s18, 128, %s514_s19, %s13520_s0  }
  0xb9   : > { %s13655_s14 = scalar_lea.hbm %s16122_s9, %s11714_s21  ;;  %s524_s11 = scalar_lea.vmem [#allocation16], %s10621_s4 }
  0xba   : > { %s532_s26 = sshll.u32 %s524_s11, 4  ;;  %s10627_s13 = sshll.u32 %s13491_s30, 2  ;;  %s533_s26 = int_to_ptr.vmem [resolvable:$true] %s532_s26 }
  0xbb   : > { %s13057_s15 = scalar_lea.hbm %s13655_s14, 128  ;;  %s13062_s5 = scalar_lea.hbm %s16122_s9, 256 }
  0xbc   : > { %p13058_p10 = scmp.ne.s32.totalorder %s13655_s14, %s13057_s15  ;;  %p13063_p1 = scmp.lt.s32.totalorder %s13655_s14, %s16122_s9 }
  0xbd   : > { %p13064_p6 = scmp.lt.s32.totalorder %s13062_s5, %s13057_s15 }
  0xbe   : > { %p13060_p7 = pnand %p13058_p10, %p13526_p12 }
  0xbf   : > { %p13065_p11 = por %p13064_p6, %p13063_p1 }
  0xc0   : > { %p13061_p5 = pneg %p13060_p7 }
  0xc2   : > { %p13066_p13 = pnand %p13065_p11, %p13061_p5 }
  0xc4   : > { %13069 = shalt.err (!%p13066_p13)
}
  0xc5   : > { %s13070_s4 = scalar_lea.vmem %s533_s26, 128  ;;  %s13321_s23 = smov [#allocation16]  }
  0xc6   : > { %p13071_p8 = scmp.ne.s32.totalorder %s533_s26, %s13070_s4  ;;  %s13075_s16 = sshll.u32 %s13321_s23, 4  ;;  %s13076_s16 = int_to_ptr.vmem [resolvable:$false] %s13075_s16 }
  0xc7   : > { %s13077_s2 = scalar_lea.vmem %s13076_s16, 256  ;;  %p13078_p9 = scmp.lt.s32.totalorder %s533_s26, %s13076_s16 }
  0xc8   : > { %p13073_p2 = pnand %p13071_p8, %p13526_p12  ;;  %p13079_p4 = scmp.lt.s32.totalorder %s13077_s2, %s13070_s4 }
  0xca   : > { %p13074_p0 = pneg %p13073_p2  ;;  %p13080_p10 = por %p13079_p4, %p13078_p9 }
  0xcc   : > { %p13081_p7 = pnand %p13080_p10, %p13074_p0 }
  0xce   : > { %13084 = shalt.err (!%p13081_p7)
}
  0xcf   : > { %11927 = dma.hbm_to_vmem [thread:$0]  (!%p13495_p3), %s13655_s14, 128, %s533_s26, %s13520_s0  }
  0xd0   : > { %s11716_s1 = sshll.u32 %s13311_s24, 6  ;;  %s543_s19 = scalar_lea.vmem [#allocation17], %s10627_s13 }
  0xd1   : > { %s549_s18 = scalar_lea.hbm %s16123_s10, %s11716_s1  ;;  %s551_s5 = sshll.u32 %s543_s19, 4  ;;  %s552_s5 = int_to_ptr.vmem [resolvable:$true] %s551_s5 }
  0xd2   : > { %s13085_s17 = scalar_lea.hbm %s549_s18, 64  ;;  %s13090_s23 = scalar_lea.hbm %s16123_s10, 128 }
  0xd3   : > { %p13086_p5 = scmp.ne.s32.totalorder %s549_s18, %s13085_s17  ;;  %p13091_p11 = scmp.lt.s32.totalorder %s549_s18, %s16123_s10 }
  0xd4   : > { %p13092_p13 = scmp.lt.s32.totalorder %s13090_s23, %s13085_s17 }
  0xd5   : > { %p13088_p1 = pnand %p13086_p5, %p13526_p12 }
  0xd6   : > { %p13093_p8 = por %p13092_p13, %p13091_p11 }
  0xd7   : > { %p13089_p6 = pneg %p13088_p1 }
  0xd9   : > { %p13094_p2 = pnand %p13093_p8, %p13089_p6 }
  0xdb   : > { %13097 = shalt.err (!%p13094_p2)
}
  0xdc   : > { %s13098_s14 = scalar_lea.vmem %s552_s5, 64  ;;  %s13322_s26 = smov [#allocation17]  }
  0xdd   : > { %p13099_p0 = scmp.ne.s32.totalorder %s552_s5, %s13098_s14  ;;  %s13103_s13 = sshll.u32 %s13322_s26, 4  ;;  %s13104_s13 = int_to_ptr.vmem [resolvable:$false] %s13103_s13 }
  0xde   : > { %s13105_s1 = scalar_lea.vmem %s13104_s13, 128  ;;  %p13106_p10 = scmp.lt.s32.totalorder %s552_s5, %s13104_s13 }
  0xdf   : > { %p13101_p9 = pnand %p13099_p0, %p13526_p12  ;;  %p13107_p7 = scmp.lt.s32.totalorder %s13105_s1, %s13098_s14 }
  0xe1   : > { %p13102_p4 = pneg %p13101_p9  ;;  %p13108_p5 = por %p13107_p7, %p13106_p10 }
  0xe3   : > { %p13109_p1 = pnand %p13108_p5, %p13102_p4 }
  0xe5   : > { %13112 = shalt.err (!%p13109_p1)
}
  0xe6   : > { %11930 = dma.hbm_to_vmem [thread:$0]  (!%p13495_p3), %s549_s18, 64, %s552_s5, %s13520_s0  }
  0xe7   : > { %s13323_s11 = smov [#allocation9]   ;;  %s10630_s19 = sshll.u32 %s13311_s24, 4 }
  0xe8   : > { %s410_s15 = sshll.u32 %s13323_s11, 4  ;;  %p16422_p11 = scmp.ne.s32.totalorder %s16411_s29, 0  ;;  %s411_s15 = int_to_ptr.vmem [resolvable:$true] %s410_s15 }
  0xe9   : > { %s13124_s17 = scalar_lea.vmem %s411_s15, 16  ;;  %s13131_s21 = scalar_lea.vmem %s411_s15, 32 }
  0xea   : > { %p13125_p6 = scmp.ne.s32.totalorder %s411_s15, %s13124_s17  ;;  %p16423_p13 = pneg %p16422_p11 }
  0xeb   : > { %p13132_p0 = scmp.lt.s32.totalorder %s411_s15, %s411_s15  ;;  %p13133_p9 = scmp.lt.s32.totalorder %s13131_s21, %s13124_s17 }
  0xec   : > { %p13127_p8 = pnand %p13125_p6, %p16423_p13 }
  0xed   : > { %p13134_p4 = por %p13133_p9, %p13132_p0 }
  0xee   : > { %p13128_p2 = pneg %p13127_p8 }
  0xf0   : > { %p13135_p10 = pnand %p13134_p4, %p13128_p2 }
  0xf2   : > { %13138 = shalt.err (!%p13135_p10)
}
  0xf3   : > { %s16424_s3 = sld [smem:[#allocation155_spill]]  ;;  %s574_s16 = scalar_lea.hbm %s16125_s12, %s10630_s19 }
  0xf4   : > { %s569_s2 = scalar_lea.vmem [#allocation18], %s13491_s30  ;;  %s13139_s26 = scalar_lea.hbm %s574_s16, 16 }
  0xf5   : > { %s576_s14 = sshll.u32 %s569_s2, 4  ;;  %p13140_p7 = scmp.ne.s32.totalorder %s574_s16, %s13139_s26  ;;  %s577_s14 = int_to_ptr.vmem [resolvable:$true] %s576_s14 }
  0xf6   : > { %s13144_s1 = scalar_lea.hbm %s16125_s12, 32  ;;  %p13145_p6 = scmp.lt.s32.totalorder %s574_s16, %s16125_s12 }
  0xf7   : > { %p13142_p5 = pnand %p13140_p7, %p13526_p12 }
  0xf9   : > { %11908 = dma.hbm_to_vmem [thread:$0]  (!%p16422_p11), %s16424_s3, 16, %s411_s15, [#allocation10]  }
  0xfa   : > { %p13143_p1 = pneg %p13142_p5  ;;  %p13146_p11 = scmp.lt.s32.totalorder %s13144_s1, %s13139_s26 }
  0xfc   : > { %p13147_p13 = por %p13146_p11, %p13145_p6 }
  0xfe   : > { %p13148_p8 = pnand %p13147_p13, %p13143_p1 }
 0x100   : > { %13151 = shalt.err (!%p13148_p8)
}
 0x101   : > { %s13152_s30 = scalar_lea.vmem %s577_s14, 16  ;;  %s13324_s15 = smov [#allocation18]  }
 0x102   : > { %p13153_p2 = scmp.ne.s32.totalorder %s577_s14, %s13152_s30  ;;  %s13157_s19 = sshll.u32 %s13324_s15, 4  ;;  %s13158_s19 = int_to_ptr.vmem [resolvable:$false] %s13157_s19 }
 0x103   : > { %s13159_s21 = scalar_lea.vmem %s13158_s19, 32  ;;  %p13160_p4 = scmp.lt.s32.totalorder %s577_s14, %s13158_s19 }
 0x104   : > { %p13155_p0 = pnand %p13153_p2, %p13526_p12  ;;  %p13161_p10 = scmp.lt.s32.totalorder %s13159_s21, %s13152_s30 }
 0x106   : > { %p13156_p9 = pneg %p13155_p0  ;;  %p13162_p7 = por %p13161_p10, %p13160_p4 }
 0x108   : > { %p13163_p5 = pnand %p13162_p7, %p13156_p9 }
 0x10a   : > { %13166 = shalt.err (!%p13163_p5)
}
 0x10b   : > { %11933 = dma.hbm_to_vmem [thread:$0]  (!%p13495_p3), %s574_s16, 16, %s577_s14, %s13520_s0  }
 0x10c   : > { %p16425_p1 = scmp.ne.s32.totalorder %s16409_s20, 0 }
 0x10e   : > { %585 = sbr.rel (%p16425_p1) target bundleno = 4719 (0x126f), region = 72 }
 0x113   : > { %p16426_p6 = scmp.eq.s32.totalorder %s13436_s25, 0 }
 0x115   : > { %13276 = dma.done.wait (%p16426_p6), [#allocation7], 16   ;;  %p16427_p12 = pmov %p16426_p6 }
 0x116   : > { %p16428_p11 = pmov %p16426_p6 }
 0x117   : > { %13278 = vsyncadd (%p16427_p12), [#allocation7], 4294967280 }
 0x118   : > { %13280 = dma.done.wait (%p16428_p11), [#allocation10], 16   ;;  %p16429_p13 = pmov %p16426_p6 }
 0x119   : > { %s16430_s27 = sld [smem:[#allocation39_spill]]  ;;  %s595_s28 = sand.u32 1, %s13436_s25  }
 0x11a   : > { %13282 = vsyncadd (%p16429_p13), [#allocation10], 4294967280  ;;  %s13732_s0 = sand.u32 1, %s13303_s22   ;;  %s596_s4 = scalar_lea.sflag [#allocation7], %s595_s28 }
 0x11b   : > { %s11873_s20 = smul.u32 96, %s13732_s0 }
 0x11d   : > { %s13735_s18 = scalar_lea.vmem [#allocation11], %s11873_s20 }
 0x11f   : > { %p16431_p3 = scmp.ne.s32.totalorder %s16430_s27, 0 }
 0x121   : > { %13284 = dma.done.wait (%p16431_p3), %s596_s4, 14352  }
 0x122   : > { %13286 = vsyncadd (%p16431_p3), %s596_s4, 4294952944  ;;  %v16153_v0 = vmov 0   ;;  %v11986_v1 = vld [vmem:[%s13735_s18 + $0x34] ss:$24 sps:$4 sm:$0xff]   ;;  %v11988_v2 = vld [vmem:[%s13735_s18 + $0x30] ss:$24 sps:$4 sm:$0xff]   ;;  %v821_v9 = vlaneseq }
 0x123   : > { %1003 = vmatprep.mubr.bf16.mxu0 %v16153_v0  ;;  %1023 = vmatprep.mubr.bf16.mxu1 %v16153_v0  ;;  %v11989_v3 = vld [vmem:[%s13735_s18 + $0x4] ss:$24 sps:$4 sm:$0xff]   ;;  %v11991_v4 = vld [vmem:[%s13735_s18] ss:$24 sps:$4 sm:$0xff]   ;;  %s11874_s5 = smul.u32 768, %s13732_s0  ;;  %s16433_s14 = sld [smem:[#allocation152_spill]] }
 0x124   : > { %11984 = vset.pattern.permute.xlu0 %v16153_v0  ;;  %11985 = vset.pattern.permute.xlu1 %v16153_v0  ;;  %v11994_v5 = vld [vmem:[%s13735_s18 + $0x3c] ss:$24 sps:$4 sm:$0xff]   ;;  %v13754_v10 = vshrl.u32 %v821_v9, 7  ;;  %v11992_v43 = vld [vmem:[%s13735_s18 + $0x38] ss:$24 sps:$4 sm:$0xff]   ;;  %vm958_vm0 = vcmask 261120  }
 0x125   : > { %11861 = vmatprep.subr.bf16.mxu1 %v11986_v1  ;;  %983 = vmatprep.subr.bf16.mxu0 %v11986_v1  ;;  %v817_v6 = vld [vmem:[#allocation9] sm:$0x1]  ;;  %s13752_s23 = scalar_lea.vmem [#allocation12], %s11874_s5  ;;  %v10646_v13 = vld [vmem:[#allocation6] ss:$0 sm:$0xff]  ;;  %s16482_s16 = sld [smem:[#allocation153_spill]] }
 0x126   : > { %11863 = vmatpush1.bf16.msra.mxu1 %v11988_v2  ;;  %984 = vmatpush1.bf16.msra.mxu0 %v11988_v2  ;;  %v818_v7 = vadd.f32 1e-05, %v817_v6  ;;  %v12000_v8 = vld [vmem:[%s13735_s18 + $0x44] ss:$24 sps:$4 sm:$0xff]   ;;  %16432 = vst [vmem:[#allocation42_spill] sm:$0xff] %v13754_v10  ;;  %v13775_v18 = vsub.s32 0, %v13754_v10 }
 0x127   : > { %11862 = vmatprep.subr.bf16.mxu1 %v11989_v3  ;;  %985 = vmatprep.subr.bf16.mxu0 %v11989_v3  ;;  %v11997_v46 = vld [vmem:[%s13735_s18 + $0xc] ss:$24 sps:$4 sm:$0xff]   ;;  %v11998_v47 = vld [vmem:[%s13735_s18 + $0x40] ss:$24 sps:$4 sm:$0xff]   ;;  %v12001_v55 = vld [vmem:[%s13735_s18 + $0x10] ss:$24 sps:$4 sm:$0xff]  }
 0x128   : > { %12148 = vrsqrt.f32 %v818_v7  ;;  %16434 = vst [vmem:[#allocation43_spill] sm:$0xff] %v13775_v18  ;;  %v12003_v52 = vld [vmem:[%s13735_s18 + $0x14] ss:$24 sps:$4 sm:$0xff]   ;;  %v11995_v53 = vld [vmem:[%s13735_s18 + $0x8] ss:$24 sps:$4 sm:$0xff]   ;;  %s11875_s2 = smul.u32 6, %s13732_s0 }
 0x129   : > { %v794_v11 = vld [vmem:[%s16433_s14] sm:$0xff]  ;;  %v795_v12 = vld [vmem:[%s16433_s14 + $0x8] sm:$0xff]  ;;  %v796_v16 = vld [vmem:[%s16433_s14 + $0x10] sm:$0xff]  ;;  %p743_p8 = scmp.lt.s32.totalorder %s13436_s25, 1  ;;  %s11718_s30 = sshll.u32 %s13436_s25, 14 }
 0x12a   : > { %11864 = vmatpush1.bf16.msra.mxu1 %v11991_v4  ;;  %986 = vmatpush1.bf16.msra.mxu0 %v11991_v4  ;;  %v798_v14 = vld [vmem:[%s16433_s14 + $0x20] sm:$0xff]  ;;  %v799_v15 = vld [vmem:[%s16433_s14 + $0x28] sm:$0xff]  ;;  %v797_v17 = vld [vmem:[%s16433_s14 + $0x18] sm:$0xff]  ;;  %v809_v21 = vsub.f32 %v794_v11, %v10646_v13  ;;  %v810_v22 = vsub.f32 %v795_v12, %v10646_v13  ;;  %v811_v26 = vsub.f32 %v796_v16, %v10646_v13  ;;  %s617_s26 = scalar_lea.vmem [#allocation13], %s11875_s2  ;;  %s626_s13 = scalar_lea.vmem [#allocation14], %s11875_s2 }
 0x12b   : > { %1056 = vmatprep.subr.bf16.mxu1 %v11994_v5  ;;  %1129 = vmatprep.subr.bf16.mxu0 %v12000_v8  ;;  %v800_v19 = vld [vmem:[%s16433_s14 + $0x30] sm:$0xff]  ;;  %v801_v20 = vld [vmem:[%s16433_s14 + $0x38] sm:$0xff]  ;;  %v813_v23 = vsub.f32 %v798_v14, %v10646_v13  ;;  %v814_v24 = vsub.f32 %v799_v15, %v10646_v13  ;;  %v812_v27 = vsub.f32 %v797_v17, %v10646_v13  ;;  %v13819_v61 = vld [vmem:[%s13752_s23 + $0x124] ss:$24 sps:$4 sm:$0xff]   ;;  %s13326_s15 = smov [#allocation2]   ;;  %s16874_s20 = sld [smem:[#allocation160_spill]] }
 0x12c   : > { %v815_v28 = vsub.f32 %v800_v19, %v10646_v13  ;;  %v816_v29 = vsub.f32 %v801_v20, %v10646_v13  ;;  %v13797_v54 = vld [vmem:[%s13752_s23 + $0x154] ss:$24 sps:$4 sm:$0xff]   ;;  %v13813_v59 = vld [vmem:[%s13752_s23 + $0x150] ss:$24 sps:$4 sm:$0xff]   ;;  %v13827_v63 = vld [vmem:[%s13752_s23 + $0x120] ss:$24 sps:$4 sm:$0xff]  }
 0x12d   : > { %16435 = vst [vmem:[#allocation44_spill] sm:$0xff] %v13797_v54  ;;  %v13804_v58 = vld [vmem:[%s13752_s23 + $0x15c] ss:$24 sps:$4 sm:$0xff]   ;;  %v13816_v60 = vld [vmem:[%s13752_s23 + $0x158] ss:$24 sps:$4 sm:$0xff]   ;;  %s760_s19 = sshll.u32 %s13326_s15, 4  ;;  %s761_s19 = int_to_ptr.vmem [resolvable:$true] %s760_s19 }
 0x12e   : > { %v13822_v62 = vld [vmem:[%s13752_s23 + $0x12c] ss:$24 sps:$4 sm:$0xff]   ;;  %v13830_v1 = vld [vmem:[%s13752_s23 + $0x128] ss:$24 sps:$4 sm:$0xff]   ;;  %v13840_v3 = vld [vmem:[%s13752_s23 + $0xfc] ss:$24 sps:$4 sm:$0xff]  }
 0x12f   : > { %v13835_v2 = vld [vmem:[%s13752_s23 + $0xf4] ss:$24 sps:$4 sm:$0xff]   ;;  %v13845_v4 = vld [vmem:[%s13752_s23 + $0xf0] ss:$24 sps:$4 sm:$0xff]   ;;  %v13853_v6 = vld [vmem:[%s13752_s23 + $0xc4] ss:$24 sps:$4 sm:$0xff]  }
 0x130   : > { %16436 = vst [vmem:[#allocation45_spill] sm:$0xff] %v13835_v2  ;;  %v13850_v5 = vld [vmem:[%s13752_s23 + $0xf8] ss:$24 sps:$4 sm:$0xff]   ;;  %16437 = vst [vmem:[#allocation46_spill] sm:$0xff] %v13853_v6  ;;  %v13858_v7 = vld [vmem:[%s13752_s23 + $0xcc] ss:$24 sps:$4 sm:$0xff]  }
 0x131   : > { %v13861_v8 = vld [vmem:[%s13752_s23 + $0xc0] ss:$24 sps:$4 sm:$0xff]   ;;  %v13871_v11 = vld [vmem:[%s13752_s23 + $0x94] ss:$24 sps:$4 sm:$0xff]   ;;  %v13881_v13 = vld [vmem:[%s13752_s23 + $0x90] ss:$24 sps:$4 sm:$0xff]   ;;  %s752_s4 = scalar_lea.hbm %s16874_s20, %s11718_s30 }
 0x132   : > { %16438 = vst [vmem:[#allocation47_spill] sm:$0xff] %v13861_v8  ;;  %v13864_v9 = vld [vmem:[%s13752_s23 + $0xc8] ss:$24 sps:$4 sm:$0xff]   ;;  %16439 = vst [vmem:[#allocation48_spill] sm:$0xff] %v13871_v11  ;;  %v13876_v12 = vld [vmem:[%s13752_s23 + $0x9c] ss:$24 sps:$4 sm:$0xff]   ;;  %p13170_p0 = scmp.lt.s32.totalorder %s752_s4, %s16874_s20 }
 0x133   : > { %16440 = vst [vmem:[#allocation49_spill] sm:$0xff] %v13881_v13  ;;  %v13884_v14 = vld [vmem:[%s13752_s23 + $0x98] ss:$24 sps:$4 sm:$0xff]   ;;  %v13889_v15 = vld [vmem:[%s13752_s23 + $0x64] ss:$24 sps:$4 sm:$0xff]   ;;  %s744_s21 = scalar_select %p743_p8, %s13436_s25, 1 }
 0x134   : > { %16441 = vst [vmem:[#allocation50_spill] sm:$0xff] %v13889_v15  ;;  %v13894_v16 = vld [vmem:[%s13752_s23 + $0x6c] ss:$24 sps:$4 sm:$0xff]   ;;  %v13897_v17 = vld [vmem:[%s13752_s23 + $0x60] ss:$24 sps:$4 sm:$0xff]   ;;  %s15639_s18 = sshll.u32 %s13732_s0, 3 }
 0x135   : > { %v12149_v25 = vpop.eup %12148  ;;  %16442 = vst [vmem:[#allocation51_spill] sm:$0xff] %v13897_v17  ;;  %v13900_v19 = vld [vmem:[%s13752_s23 + $0x68] ss:$24 sps:$4 sm:$0xff]   ;;  %v13909_v20 = vld [vmem:[%s13752_s23 + $0x34] ss:$24 sps:$4 sm:$0xff]   ;;  %s11717_s2 = sshll.u32 %s744_s21, 9 }
 0x136   : > { %v824_v30 = vrot.slane %v12149_v25, %v13775_v18  ;;  %16443 = vst [vmem:[#allocation52_spill] sm:$0xff] %v13909_v20  ;;  %v13932_v25 = vld [vmem:[%s13752_s23 + $0xc] ss:$24 sps:$4 sm:$0xff]   ;;  %s11719_s1 = sshll.u32 %s13436_s25, 16  ;;  %s13167_s11 = scalar_lea.hbm %s752_s4, 16384 }
 0x137   : > { %16448 = vst [vmem:[#allocation57_spill] sm:$0xff] %v13932_v25  ;;  %p13168_p2 = scmp.ne.s32.totalorder %s752_s4, %s13167_s11  ;;  %s13169_s3 = scalar_lea.hbm %s16874_s20, 32768 }
 0x138   : > { %v826_v31 = vmul.f32 %v824_v30, %v809_v21  ;;  %v827_v32 = vmul.f32 %v824_v30, %v810_v22  ;;  %v830_v33 = vmul.f32 %v824_v30, %v813_v23  ;;  %v831_v34 = vmul.f32 %v824_v30, %v814_v24  ;;  %v13914_v21 = vld [vmem:[%s13752_s23 + $0x3c] ss:$24 sps:$4 sm:$0xff]   ;;  %v13919_v22 = vld [vmem:[%s13752_s23 + $0x30] ss:$24 sps:$4 sm:$0xff]   ;;  %p13171_p9 = scmp.lt.s32.totalorder %s13169_s3, %s13167_s11 }
 0x139   : > { %v828_v35 = vmul.f32 %v824_v30, %v811_v26  ;;  %v829_v36 = vmul.f32 %v824_v30, %v812_v27  ;;  %v832_v37 = vmul.f32 %v824_v30, %v815_v28  ;;  %v833_v38 = vmul.f32 %v824_v30, %v816_v29  ;;  %16444 = vst [vmem:[#allocation53_spill] sm:$0xff] %v13914_v21  ;;  %v13922_v23 = vld [vmem:[%s13752_s23 + $0x38] ss:$24 sps:$4 sm:$0xff]   ;;  %v13927_v24 = vld [vmem:[%s13752_s23 + $0x4] ss:$24 sps:$4 sm:$0xff]  }
 0x13a   : > { %v10647_v39 = vclamps-f32 %v826_v31, 5.0  ;;  %v10648_v40 = vclamps-f32 %v827_v32, 5.0  ;;  %v10651_v41 = vclamps-f32 %v830_v33, 5.0  ;;  %v10652_v42 = vclamps-f32 %v831_v34, 5.0  ;;  %16445 = vst [vmem:[#allocation54_spill] sm:$0xff] %v13919_v22  ;;  %16446 = vst [vmem:[#allocation55_spill] sm:$0xff] %v13922_v23  ;;  %p13172_p4 = por %p13171_p9, %p13170_p0 }
 0x13b   : > { %v10649_v48 = vclamps-f32 %v828_v35, 5.0  ;;  %v10650_v49 = vclamps-f32 %v829_v36, 5.0  ;;  %v10653_v50 = vclamps-f32 %v832_v37, 5.0  ;;  %v10654_v51 = vclamps-f32 %v833_v38, 5.0  ;;  %16447 = vst [vmem:[#allocation56_spill] sm:$0xff] %v13927_v24 }
 0x13c   : > { %v850_v44 = vpack.c.bf16 %v10648_v40, %v10647_v39  ;;  %v13785_v45 = vpack.c.bf16 %v10652_v42, %v10651_v41  ;;  %v13935_v26 = vld [vmem:[%s13752_s23] ss:$24 sps:$4 sm:$0xff]   ;;  %v13947_v28 = vld [vmem:[%s13752_s23 + $0x2d4] ss:$24 sps:$4 sm:$0xff]   ;;  %v13957_v30 = vld [vmem:[%s13752_s23 + $0x2d0] ss:$24 sps:$4 sm:$0xff]   ;;  %p13173_p10 = pnand %p13172_p4, %p13168_p2 }
 0x13d   : > { %v851_v56 = vpack.c.bf16 %v10650_v49, %v10649_v48  ;;  %v13800_v57 = vpack.c.bf16 %v10654_v51, %v10653_v50  ;;  %16449 = vst [vmem:[#allocation58_spill] sm:$0xff] %v13935_v26  ;;  %v13938_v27 = vld [vmem:[%s13752_s23 + $0x8] ss:$24 sps:$4 sm:$0xff]   ;;  %16451 = vst [vmem:[#allocation60_spill] sm:$0xff] %v13947_v28  ;;  %v13952_v29 = vld [vmem:[%s13752_s23 + $0x2dc] ss:$24 sps:$4 sm:$0xff]  }
 0x13e   : > { %10667 = vmatmul.mubr.msk.bf16.vlgmr.msra.gmra.mxu0 %vm958_vm0, %v850_v44  ;;  %10669 = vmatmul.mubr.msk.bf16.vlgmr.msra.gmra.mxu1 %vm958_vm0, %v13785_v45  ;;  %16450 = vst [vmem:[#allocation59_spill] sm:$0xff] %v13938_v27  ;;  %16452 = vst [vmem:[#allocation61_spill] sm:$0xff] %v13952_v29  ;;  %v13962_v31 = vld [vmem:[%s13752_s23 + $0x2d8] ss:$24 sps:$4 sm:$0xff]   ;;  %v13967_v32 = vld [vmem:[%s13752_s23 + $0x2a4] ss:$24 sps:$4 sm:$0xff]  }
 0x13f   : > { %1057 = vmatpush1.bf16.msra.mxu1 %v11992_v43  ;;  %1013 = vmatprep.mubr.bf16.mxu0 %v16153_v0  ;;  %16453 = vst [vmem:[#allocation62_spill] sm:$0xff] %v13957_v30  ;;  %16454 = vst [vmem:[#allocation63_spill] sm:$0xff] %v13962_v31  ;;  %v13970_v33 = vld [vmem:[%s13752_s23 + $0x2ac] ss:$24 sps:$4 sm:$0xff]   ;;  %v13975_v34 = vld [vmem:[%s13752_s23 + $0x2a0] ss:$24 sps:$4 sm:$0xff]  }
 0x140   : > { %1033 = vmatprep.mubr.bf16.mxu1 %v16153_v0  ;;  %1058 = vmatprep.subr.bf16.mxu1 %v11997_v46  ;;  %16455 = vst [vmem:[#allocation64_spill] sm:$0xff] %v13967_v32  ;;  %16456 = vst [vmem:[#allocation65_spill] sm:$0xff] %v13970_v33  ;;  %v13978_v35 = vld [vmem:[%s13752_s23 + $0x2a8] ss:$24 sps:$4 sm:$0xff]   ;;  %v13983_v36 = vld [vmem:[%s13752_s23 + $0x274] ss:$24 sps:$4 sm:$0xff]  }
 0x141   : > { %1130 = vmatpush1.bf16.msra.mxu0 %v11998_v47  ;;  %16457 = vst [vmem:[#allocation66_spill] sm:$0xff] %v13975_v34  ;;  %16458 = vst [vmem:[#allocation67_spill] sm:$0xff] %v13978_v35  ;;  %v13986_v37 = vld [vmem:[%s13752_s23 + $0x27c] ss:$24 sps:$4 sm:$0xff]   ;;  %v13991_v38 = vld [vmem:[%s13752_s23 + $0x270] ss:$24 sps:$4 sm:$0xff]  }
 0x142   : > { %1131 = vmatprep.subr.bf16.mxu0 %v12003_v52  ;;  %16459 = vst [vmem:[#allocation68_spill] sm:$0xff] %v13983_v36  ;;  %16460 = vst [vmem:[#allocation69_spill] sm:$0xff] %v13986_v37  ;;  %v13994_v39 = vld [vmem:[%s13752_s23 + $0x278] ss:$24 sps:$4 sm:$0xff]   ;;  %v13999_v40 = vld [vmem:[%s13752_s23 + $0x244] ss:$24 sps:$4 sm:$0xff]  }
 0x143   : > { %1059 = vmatpush1.bf16.msra.mxu1 %v11995_v53  ;;  %16461 = vst [vmem:[#allocation70_spill] sm:$0xff] %v13994_v39  ;;  %16462 = vst [vmem:[#allocation71_spill] sm:$0xff] %v13999_v40  ;;  %v14002_v41 = vld [vmem:[%s13752_s23 + $0x24c] ss:$24 sps:$4 sm:$0xff]   ;;  %v14007_v42 = vld [vmem:[%s13752_s23 + $0x240] ss:$24 sps:$4 sm:$0xff]  }
 0x144   : > { %1799 = vmatprep.subr.bf16.mxu1 %v13797_v54  ;;  %16463 = vst [vmem:[#allocation72_spill] sm:$0xff] %v14002_v41  ;;  %16464 = vst [vmem:[#allocation73_spill] sm:$0xff] %v14007_v42  ;;  %v14010_v43 = vld [vmem:[%s13752_s23 + $0x248] ss:$24 sps:$4 sm:$0xff]   ;;  %v14026_v47 = vld [vmem:[%s13752_s23 + $0x218] ss:$24 sps:$4 sm:$0xff]  }
 0x145   : > { %1132 = vmatpush1.bf16.msra.mxu0 %v12001_v55  ;;  %16465 = vst [vmem:[#allocation74_spill] sm:$0xff] %v14010_v43  ;;  %v14023_v46 = vld [vmem:[%s13752_s23 + $0x210] ss:$24 sps:$4 sm:$0xff]   ;;  %16467 = vst [vmem:[#allocation76_spill] sm:$0xff] %v14026_v47  ;;  %v14031_v48 = vld [vmem:[%s13752_s23 + $0x1e4] ss:$24 sps:$4 sm:$0xff]  }
 0x146   : > { %10668 = vmatmul.mubr.msk.bf16.gmra.mxu0 %vm958_vm0, %v851_v56  ;;  %10670 = vmatmul.mubr.msk.bf16.gmra.mxu1 %vm958_vm0, %v13800_v57  ;;  %v14034_v49 = vld [vmem:[%s13752_s23 + $0x1ec] ss:$24 sps:$4 sm:$0xff]   ;;  %v14039_v50 = vld [vmem:[%s13752_s23 + $0x1e0] ss:$24 sps:$4 sm:$0xff]   ;;  %v14050_v53 = vld [vmem:[%s13752_s23 + $0x1bc] ss:$24 sps:$4 sm:$0xff]  }
 0x147   : > { %1076 = vmatprep.mubr.bf16.mxu1 %v16153_v0  ;;  %1149 = vmatprep.mubr.bf16.mxu0 %v16153_v0  ;;  %16468 = vst [vmem:[#allocation77_spill] sm:$0xff] %v14034_v49  ;;  %v14042_v51 = vld [vmem:[%s13752_s23 + $0x1e8] ss:$24 sps:$4 sm:$0xff]   ;;  %v14047_v52 = vld [vmem:[%s13752_s23 + $0x1b4] ss:$24 sps:$4 sm:$0xff]   ;;  %16470 = vst [vmem:[#allocation79_spill] sm:$0xff] %v14050_v53 }
 0x148   : > { %1840 = vmatprep.subr.bf16.mxu0 %v13804_v58  ;;  %16469 = vst [vmem:[#allocation78_spill] sm:$0xff] %v14042_v51  ;;  %v14055_v55 = vld [vmem:[%s13752_s23 + $0x1b0] ss:$24 sps:$4 sm:$0xff]  }
 0x149   : > { %16471 = vst [vmem:[#allocation80_spill] sm:$0xff] %v14055_v55 }
 0x14e   : > { %10671 = vmatmul.mubr.msk.bf16.vlgmr.msra.gmra.mxu1 %vm958_vm0, %v850_v44  ;;  %10675 = vmatmul.mubr.msk.bf16.vlgmr.msra.gmra.mxu0 %vm958_vm0, %v850_v44  ;;  %v14015_v44 = vld [vmem:[%s13752_s23 + $0x214] ss:$24 sps:$4 sm:$0xff]  }
 0x14f   : > { %1800 = vmatpush1.bf16.msra.mxu1 %v13813_v59  ;;  %1841 = vmatpush1.bf16.msra.mxu0 %v13816_v60 }
 0x150   : > { %1801 = vmatprep.subr.bf16.mxu1 %v13819_v61  ;;  %1842 = vmatprep.subr.bf16.mxu0 %v13822_v62 }
 0x151   : > { %1086 = vmatprep.mubr.bf16.mxu1 %v16153_v0  ;;  %1159 = vmatprep.mubr.bf16.mxu0 %v16153_v0 }
 0x153   : > { %1802 = vmatpush1.bf16.msra.mxu1 %v13827_v63  ;;  %1843 = vmatpush1.bf16.msra.mxu0 %v13830_v1 }
 0x154   : > { %1803 = vmatprep.subr.bf16.mxu1 %v13835_v2  ;;  %1844 = vmatprep.subr.bf16.mxu0 %v13840_v3 }
 0x156   : > { %10672 = vmatmul.mubr.msk.bf16.gmra.mxu1 %vm958_vm0, %v851_v56  ;;  %10676 = vmatmul.mubr.msk.bf16.gmra.mxu0 %vm958_vm0, %v851_v56  ;;  %v14058_v56 = vld [vmem:[%s13752_s23 + $0x1b8] ss:$24 sps:$4 sm:$0xff]  }
 0x157   : > { %1804 = vmatpush1.bf16.msra.mxu1 %v13845_v4  ;;  %1845 = vmatpush1.bf16.msra.mxu0 %v13850_v5  ;;  %16472 = vst [vmem:[#allocation81_spill] sm:$0xff] %v14058_v56 }
 0x158   : > { %1805 = vmatprep.subr.bf16.mxu1 %v13853_v6  ;;  %1846 = vmatprep.subr.bf16.mxu0 %v13858_v7 }
 0x159   : > { %1096 = vmatprep.mubr.bf16.mxu1 %v16153_v0  ;;  %1169 = vmatprep.mubr.bf16.mxu0 %v16153_v0 }
 0x15b   : > { %1806 = vmatpush1.bf16.msra.mxu1 %v13861_v8  ;;  %1847 = vmatpush1.bf16.msra.mxu0 %v13864_v9 }
 0x15c   : > { %1807 = vmatprep.subr.bf16.mxu1 %v13871_v11  ;;  %1848 = vmatprep.subr.bf16.mxu0 %v13876_v12 }
 0x15e   : > { %10673 = vmatmul.mubr.msk.bf16.gmra.mxu1 %vm958_vm0, %v13785_v45  ;;  %10677 = vmatmul.mubr.msk.bf16.gmra.mxu0 %vm958_vm0, %v13785_v45  ;;  %v14018_v45 = vld [vmem:[%s13752_s23 + $0x21c] ss:$24 sps:$4 sm:$0xff]  }
 0x15f   : > { %1808 = vmatpush1.bf16.msra.mxu1 %v13881_v13  ;;  %1849 = vmatpush1.bf16.msra.mxu0 %v13884_v14  ;;  %16466 = vst [vmem:[#allocation75_spill] sm:$0xff] %v14018_v45 }
 0x160   : > { %1809 = vmatprep.subr.bf16.mxu1 %v13889_v15  ;;  %1850 = vmatprep.subr.bf16.mxu0 %v13894_v16 }
 0x161   : > { %1106 = vmatprep.mubr.bf16.mxu1 %v16153_v0  ;;  %1179 = vmatprep.mubr.bf16.mxu0 %v16153_v0 }
 0x163   : > { %1810 = vmatpush1.bf16.msra.mxu1 %v13897_v17  ;;  %1851 = vmatpush1.bf16.msra.mxu0 %v13900_v19 }
 0x164   : > { %1811 = vmatprep.subr.bf16.mxu1 %v13909_v20  ;;  %1852 = vmatprep.subr.bf16.mxu0 %v13914_v21 }
 0x166   : > { %10674 = vmatmul.mubr.msk.bf16.gmra.mxu1 %vm958_vm0, %v13800_v57  ;;  %10678 = vmatmul.mubr.msk.bf16.gmra.mxu0 %vm958_vm0, %v13800_v57  ;;  %v14063_v57 = vld [vmem:[%s13752_s23 + $0x184] ss:$24 sps:$4 sm:$0xff]  }
 0x167   : > { %1812 = vmatpush1.bf16.msra.mxu1 %v13919_v22  ;;  %1853 = vmatpush1.bf16.msra.mxu0 %v13922_v23  ;;  %16473 = vst [vmem:[#allocation82_spill] sm:$0xff] %v14063_v57 }
 0x168   : > { %1813 = vmatprep.subr.bf16.mxu1 %v13927_v24  ;;  %1854 = vmatprep.subr.bf16.mxu0 %v13932_v25 }
 0x169   : > { %1831 = vmatprep.mubr.bf16.mxu1 %v16153_v0  ;;  %1872 = vmatprep.mubr.bf16.mxu0 %v16153_v0  ;;  %v14066_v0 = vld [vmem:[%s13752_s23 + $0x18c] ss:$24 sps:$4 sm:$0xff]  }
 0x16a   : > { %16474 = vst [vmem:[#allocation83_spill] sm:$0xff] %v14066_v0 }
 0x16b   : > { %1814 = vmatpush1.bf16.msra.mxu1 %v13935_v26  ;;  %1855 = vmatpush1.bf16.msra.mxu0 %v13938_v27 }
 0x16c   : > { %1815 = vmatprep.subr.bf16.mxu1 %v13947_v28  ;;  %1856 = vmatprep.subr.bf16.mxu0 %v13952_v29 }
 0x16f   : > { %1816 = vmatpush2.bf16.msra.mxu1 %v13957_v30  ;;  %1857 = vmatpush2.bf16.msra.mxu0 %v13962_v31 }
 0x170   : > { %1817 = vmatprep.subr.bf16.mxu1 %v13967_v32  ;;  %1858 = vmatprep.subr.bf16.mxu0 %v13970_v33 }
 0x173   : > { %1818 = vmatpush2.bf16.msra.mxu1 %v13975_v34  ;;  %1859 = vmatpush2.bf16.msra.mxu0 %v13978_v35 }
 0x174   : > { %1819 = vmatprep.subr.bf16.mxu1 %v13983_v36  ;;  %1860 = vmatprep.subr.bf16.mxu0 %v13986_v37 }
 0x177   : > { %1820 = vmatpush2.bf16.msra.mxu1 %v13991_v38  ;;  %1861 = vmatpush2.bf16.msra.mxu0 %v13994_v39 }
 0x178   : > { %1821 = vmatprep.subr.bf16.mxu1 %v13999_v40  ;;  %1862 = vmatprep.subr.bf16.mxu0 %v14002_v41 }
 0x17b   : > { %1822 = vmatpush2.bf16.msra.mxu1 %v14007_v42  ;;  %1863 = vmatpush2.bf16.msra.mxu0 %v14010_v43 }
 0x17c   : > { %1823 = vmatprep.subr.bf16.mxu1 %v14015_v44  ;;  %1864 = vmatprep.subr.bf16.mxu0 %v14018_v45  ;;  %v16480_v45 = vmov 0  }
 0x17f   : > { %1824 = vmatpush2.bf16.msra.mxu1 %v14023_v46  ;;  %1865 = vmatpush2.bf16.msra.mxu0 %v14026_v47  ;;  %v14079_v47 = vld [vmem:[%s13752_s23 + $0x164] ss:$24 sps:$4 sm:$0xff]  }
 0x180   : > { %1825 = vmatprep.subr.bf16.mxu1 %v14031_v48  ;;  %1866 = vmatprep.subr.bf16.mxu0 %v14034_v49  ;;  %v14074_v49 = vld [vmem:[%s13752_s23 + $0x188] ss:$24 sps:$4 sm:$0xff]   ;;  %16477 = vst [vmem:[#allocation86_spill] sm:$0xff] %v14079_v47 }
 0x181   : > { %16476 = vst [vmem:[#allocation85_spill] sm:$0xff] %v14074_v49 }
 0x183   : > { %1826 = vmatpush2.bf16.msra.mxu1 %v14039_v50  ;;  %1867 = vmatpush2.bf16.msra.mxu0 %v14042_v51  ;;  %v14071_v51 = vld [vmem:[%s13752_s23 + $0x180] ss:$24 sps:$4 sm:$0xff]  }
 0x184   : > { %1827 = vmatprep.subr.bf16.mxu1 %v14047_v52  ;;  %1868 = vmatprep.subr.bf16.mxu0 %v14050_v53  ;;  %16475 = vst [vmem:[#allocation84_spill] sm:$0xff] %v14071_v51  ;;  %v14084_v53 = vld [vmem:[%s13752_s23 + $0x160] ss:$24 sps:$4 sm:$0xff]  }
 0x185   : > { %16478 = vst [vmem:[#allocation87_spill] sm:$0xff] %v14084_v53 }
 0x187   : > { %1828 = vmatpush2.bf16.msra.mxu1 %v14055_v55  ;;  %1869 = vmatpush2.bf16.msra.mxu0 %v14058_v56  ;;  %v14088_v56 = vld [vmem:[%s13752_s23 + $0x134] ss:$24 sps:$4 sm:$0xff]  }
 0x188   : > { %1829 = vmatprep.subr.bf16.mxu1 %v14063_v57  ;;  %1870 = vmatprep.subr.bf16.mxu0 %v14066_v0  ;;  %16479 = vst [vmem:[#allocation88_spill] sm:$0xff] %v14088_v56  ;;  %v14095_v0 = vld [vmem:[%s13752_s23 + $0x130] ss:$24 sps:$4 sm:$0xff]  }
 0x18b   : > { %1830 = vmatpush2.bf16.msra.mxu1 %v14071_v51  ;;  %1871 = vmatpush2.bf16.msra.mxu0 %v14074_v49  ;;  %v14100_v49 = vld [vmem:[%s13752_s23 + $0x104] ss:$24 sps:$4 sm:$0xff]  }
 0x18c   : > { %1881 = vmatprep.subr.bf16.mxu1 %v14079_v47  ;;  %1974 = vmatprep.subr.bf16.mxu0 %v13797_v54  ;;  %v14106_v54 = vld [vmem:[%s13752_s23 + $0x100] ss:$24 sps:$4 sm:$0xff]  }
 0x18d   : > { %16481 = vst [vmem:[#allocation89_spill] sm:$0xff] %v14106_v54 }
 0x18e   : > { %1832 = vmatmul.mubr.bf16.vlgmr.msra.gmra.mxu1 %v16480_v45  ;;  %1873 = vmatmul.mubr.bf16.vlgmr.msra.gmra.mxu0 %v16480_v45 }
 0x18f   : > { %1882 = vmatpush1.bf16.msra.mxu1 %v14084_v53  ;;  %1913 = vmatprep.mubr.bf16.mxu1 %v16480_v45  ;;  %v14110_v53 = vld [vmem:[%s13752_s23 + $0xd4] ss:$24 sps:$4 sm:$0xff]  }
 0x190   : > { %1883 = vmatprep.subr.bf16.mxu1 %v14088_v56  ;;  %1975 = vmatpush1.bf16.msra.mxu0 %v13813_v59  ;;  %v14116_v56 = vld [vmem:[%s16482_s16] sm:$0xff]  ;;  %v14122_v59 = vld [vmem:[%s13752_s23 + $0xd0] ss:$24 sps:$4 sm:$0xff]  }
 0x191   : > { %1976 = vmatprep.subr.bf16.mxu0 %v13819_v61  ;;  %vm1964_vm1 = vcmp.eq.s32.totalorder %v14116_v56, 0  ;;  %vm2139_vm2 = vcmp.eq.s32.totalorder %v14116_v56, 1  ;;  %vm2314_vm3 = vcmp.eq.s32.totalorder %v14116_v56, 2 }
 0x192   : > { %v1965_v61 = vsel %vm1964_vm1, 1, %v16480_v45 }
 0x193   : > { %1884 = vmatpush1.bf16.msra.mxu1 %v14095_v0  ;;  %1967 = vperm.xlu0 %11984, %v1965_v61   ;;  %v14143_v61 = vld [vmem:[%s13752_s23 + $0x70] ss:$24 sps:$4 sm:$0xff]  }
 0x194   : > { %1885 = vmatprep.subr.bf16.mxu1 %v14100_v49  ;;  %1977 = vmatpush1.bf16.msra.mxu0 %v13827_v63  ;;  %v14127_v63 = vld [vmem:[%s13752_s23 + $0xa4] ss:$24 sps:$4 sm:$0xff]  }
 0x195   : > { %1978 = vmatprep.subr.bf16.mxu0 %v13835_v2  ;;  %v14133_v2 = vld [vmem:[%s13752_s23 + $0xa0] ss:$24 sps:$4 sm:$0xff]  }
 0x197   : > { %1886 = vmatpush1.bf16.msra.mxu1 %v14106_v54  ;;  %v14137_v54 = vld [vmem:[%s13752_s23 + $0x74] ss:$24 sps:$4 sm:$0xff]  }
 0x198   : > { %1887 = vmatprep.subr.bf16.mxu1 %v14110_v53  ;;  %1979 = vmatpush1.bf16.msra.mxu0 %v13845_v4 }
 0x199   : > { %1980 = vmatprep.subr.bf16.mxu0 %v13853_v6  ;;  %v14147_v6 = vld [vmem:[%s13752_s23 + $0x44] ss:$24 sps:$4 sm:$0xff]  }
 0x19b   : > { %1888 = vmatpush1.bf16.msra.mxu1 %v14122_v59 }
 0x19c   : > { %1889 = vmatprep.subr.bf16.mxu1 %v14127_v63  ;;  %1981 = vmatpush1.bf16.msra.mxu0 %v13861_v8  ;;  %v14153_v8 = vld [vmem:[%s13752_s23 + $0x40] ss:$24 sps:$4 sm:$0xff]  }
 0x19d   : > { %1982 = vmatprep.subr.bf16.mxu0 %v13871_v11  ;;  %v14157_v11 = vld [vmem:[%s13752_s23 + $0x14] ss:$24 sps:$4 sm:$0xff]  }
 0x19f   : > { %1890 = vmatpush1.bf16.msra.mxu1 %v14133_v2 }
 0x1a0   : > { %1891 = vmatprep.subr.bf16.mxu1 %v14137_v54  ;;  %1983 = vmatpush1.bf16.msra.mxu0 %v13881_v13  ;;  %v14163_v13 = vld [vmem:[%s13752_s23 + $0x10] ss:$24 sps:$4 sm:$0xff]  }
 0x1a1   : > { %1984 = vmatprep.subr.bf16.mxu0 %v13889_v15  ;;  %v14167_v15 = vld [vmem:[%s13752_s23 + $0x2e4] ss:$24 sps:$4 sm:$0xff]  }
 0x1a3   : > { %1892 = vmatpush1.bf16.msra.mxu1 %v14143_v61 }
 0x1a4   : > { %1893 = vmatprep.subr.bf16.mxu1 %v14147_v6  ;;  %1985 = vmatpush1.bf16.msra.mxu0 %v13897_v17  ;;  %v14173_v17 = vld [vmem:[%s13752_s23 + $0x2e0] ss:$24 sps:$4 sm:$0xff]  }
 0x1a5   : > { %1986 = vmatprep.subr.bf16.mxu0 %v13909_v20  ;;  %v14177_v20 = vld [vmem:[%s13752_s23 + $0x2b4] ss:$24 sps:$4 sm:$0xff]  }
 0x1a7   : > { %1894 = vmatpush1.bf16.msra.mxu1 %v14153_v8 }
 0x1a8   : > { %1895 = vmatprep.subr.bf16.mxu1 %v14157_v11  ;;  %1987 = vmatpush1.bf16.msra.mxu0 %v13919_v22  ;;  %v14183_v22 = vld [vmem:[%s13752_s23 + $0x2b0] ss:$24 sps:$4 sm:$0xff]  }
 0x1a9   : > { %1988 = vmatprep.subr.bf16.mxu0 %v13927_v24  ;;  %v14187_v24 = vld [vmem:[%s13752_s23 + $0x284] ss:$24 sps:$4 sm:$0xff]  }
 0x1ab   : > { %1896 = vmatpush1.bf16.msra.mxu1 %v14163_v13 }
 0x1ac   : > { %1897 = vmatprep.subr.bf16.mxu1 %v14167_v15  ;;  %1989 = vmatpush1.bf16.msra.mxu0 %v13935_v26  ;;  %v14193_v26 = vld [vmem:[%s13752_s23 + $0x280] ss:$24 sps:$4 sm:$0xff]  }
 0x1ad   : > { %1990 = vmatprep.subr.bf16.mxu0 %v13947_v28  ;;  %v14197_v28 = vld [vmem:[%s13752_s23 + $0x254] ss:$24 sps:$4 sm:$0xff]  }
 0x1ae   : > { %16483 = vst [vmem:[#allocation90_spill] sm:$0xff] %v14197_v28 }
 0x1af   : > { %1898 = vmatpush2.bf16.msra.mxu1 %v14173_v17 }
 0x1b0   : > { %1899 = vmatprep.subr.bf16.mxu1 %v14177_v20  ;;  %1991 = vmatpush2.bf16.msra.mxu0 %v13957_v30  ;;  %v14203_v30 = vld [vmem:[%s13752_s23 + $0x250] ss:$24 sps:$4 sm:$0xff]  }
 0x1b1   : > { %1992 = vmatprep.subr.bf16.mxu0 %v13967_v32  ;;  %v14207_v32 = vld [vmem:[%s13752_s23 + $0x224] ss:$24 sps:$4 sm:$0xff]  }
 0x1b2   : > { %16484 = vst [vmem:[#allocation91_spill] sm:$0xff] %v14207_v32 }
 0x1b3   : > { %1900 = vmatpush2.bf16.msra.mxu1 %v14183_v22 }
 0x1b4   : > { %1901 = vmatprep.subr.bf16.mxu1 %v14187_v24  ;;  %1993 = vmatpush2.bf16.msra.mxu0 %v13975_v34  ;;  %v14213_v34 = vld [vmem:[%s13752_s23 + $0x220] ss:$24 sps:$4 sm:$0xff]  }
 0x1b5   : > { %1994 = vmatprep.subr.bf16.mxu0 %v13983_v36  ;;  %v14217_v36 = vld [vmem:[%s13752_s23 + $0x1f4] ss:$24 sps:$4 sm:$0xff]  }
 0x1b6   : > { %16485 = vst [vmem:[#allocation92_spill] sm:$0xff] %v14217_v36 }
 0x1b7   : > { %1902 = vmatpush2.bf16.msra.mxu1 %v14193_v26 }
 0x1b8   : > { %1903 = vmatprep.subr.bf16.mxu1 %v14197_v28  ;;  %1995 = vmatpush2.bf16.msra.mxu0 %v13991_v38  ;;  %v14223_v28 = vld [vmem:[%s13752_s23 + $0x1f0] ss:$24 sps:$4 sm:$0xff]  }
 0x1b9   : > { %1996 = vmatprep.subr.bf16.mxu0 %v13999_v40  ;;  %v14227_v40 = vld [vmem:[%s13752_s23 + $0x1c4] ss:$24 sps:$4 sm:$0xff]  }
 0x1bb   : > { %1904 = vmatpush2.bf16.msra.mxu1 %v14203_v30 }
 0x1bc   : > { %1905 = vmatprep.subr.bf16.mxu1 %v14207_v32  ;;  %1997 = vmatpush2.bf16.msra.mxu0 %v14007_v42  ;;  %v14233_v32 = vld [vmem:[%s13752_s23 + $0x1c0] ss:$24 sps:$4 sm:$0xff]   ;;  %v14237_v42 = vld [vmem:[%s13752_s23 + $0x194] ss:$24 sps:$4 sm:$0xff]  }
 0x1bd   : > { %1998 = vmatprep.subr.bf16.mxu0 %v14015_v44  ;;  %16486 = vst [vmem:[#allocation93_spill] sm:$0xff] %v14233_v32  ;;  %16487 = vst [vmem:[#allocation94_spill] sm:$0xff] %v14237_v42 }
 0x1bf   : > { %1906 = vmatpush2.bf16.msra.mxu1 %v14213_v34 }
 0x1c0   : > { %1907 = vmatprep.subr.bf16.mxu1 %v14217_v36  ;;  %1999 = vmatpush2.bf16.msra.mxu0 %v14023_v46  ;;  %v14243_v36 = vld [vmem:[%s13752_s23 + $0x190] ss:$24 sps:$4 sm:$0xff]  }
 0x1c1   : > { %2000 = vmatprep.subr.bf16.mxu0 %v14031_v48  ;;  %16488 = vst [vmem:[#allocation95_spill] sm:$0xff] %v14243_v36 }
 0x1c3   : > { %1908 = vmatpush2.bf16.msra.mxu1 %v14223_v28 }
 0x1c4   : > { %1909 = vmatprep.subr.bf16.mxu1 %v14227_v40  ;;  %2001 = vmatpush2.bf16.msra.mxu0 %v14039_v50 }
 0x1c5   : > { %2002 = vmatprep.subr.bf16.mxu0 %v14047_v52 }
 0x1c7   : > { %1910 = vmatpush2.bf16.msra.mxu1 %v14233_v32 }
 0x1c8   : > { %1911 = vmatprep.subr.bf16.mxu1 %v14237_v42  ;;  %2003 = vmatpush2.bf16.msra.mxu0 %v14055_v55 }
 0x1c9   : > { %2004 = vmatprep.subr.bf16.mxu0 %v14063_v57 }
 0x1cb   : > { %1912 = vmatpush2.bf16.msra.mxu1 %v14243_v36 }
 0x1cc   : > { %2015 = vmatprep.subr.bf16.mxu1 %v13804_v58  ;;  %2005 = vmatpush2.bf16.msra.mxu0 %v14071_v51  ;;  %v866_v58 = vld [vmem:[%s617_s26] sm:$0x3f] }
 0x1cd   : > { %2056 = vmatprep.subr.bf16.mxu0 %v14079_v47 }
 0x1ce   : > { %1914 = vmatmul.mubr.bf16.vlgmr.msra.gmra.mxu1 %v16480_v45 }
 0x1cf   : > { %2016 = vmatpush1.bf16.msra.mxu1 %v13816_v60  ;;  %v14279_v60 = vsub.s32 1, %v13754_v10 }
 0x1d0   : > { %2017 = vmatprep.subr.bf16.mxu1 %v13822_v62  ;;  %v14282_v62 = vrot.slane %v866_v58, %v13775_v18 }
 0x1d1   : > { %16489 = vst [vmem:[#allocation96_spill] sm:$0xff] %v14279_v60 }
 0x1d3   : > { %2018 = vmatpush1.bf16.msra.mxu1 %v13830_v1  ;;  %v16490_v1 = vld [vmem:[#allocation75_spill] sm:$0xff] }
 0x1d4   : > { %2019 = vmatprep.subr.bf16.mxu1 %v13840_v3  ;;  %v14287_v3 = vrot.slane %v866_v58, %v14279_v60 }
 0x1d7   : > { %2020 = vmatpush1.bf16.msra.mxu1 %v13850_v5 }
 0x1d8   : > { %2021 = vmatprep.subr.bf16.mxu1 %v13858_v7 }
 0x1db   : > { %2022 = vmatpush1.bf16.msra.mxu1 %v13864_v9 }
 0x1dc   : > { %2023 = vmatprep.subr.bf16.mxu1 %v13876_v12  ;;  %v16492_v12 = vld [vmem:[#allocation76_spill] sm:$0xff] }
 0x1df   : > { %2024 = vmatpush1.bf16.msra.mxu1 %v13884_v14 }
 0x1e0   : > { %2025 = vmatprep.subr.bf16.mxu1 %v13894_v16 }
 0x1e3   : > { %2026 = vmatpush1.bf16.msra.mxu1 %v13900_v19  ;;  %v16493_v19 = vld [vmem:[#allocation77_spill] sm:$0xff] }
 0x1e4   : > { %2027 = vmatprep.subr.bf16.mxu1 %v13914_v21 }
 0x1e7   : > { %2028 = vmatpush1.bf16.msra.mxu1 %v13922_v23 }
 0x1e8   : > { %2029 = vmatprep.subr.bf16.mxu1 %v13932_v25 }
 0x1eb   : > { %2030 = vmatpush1.bf16.msra.mxu1 %v13938_v27 }
 0x1ec   : > { %2031 = vmatprep.subr.bf16.mxu1 %v13952_v29 }
 0x1ef   : > { %2032 = vmatpush2.bf16.msra.mxu1 %v13962_v31  ;;  %v16504_v31 = vld [vmem:[#allocation83_spill] sm:$0xff] }
 0x1f0   : > { %2033 = vmatprep.subr.bf16.mxu1 %v13970_v33 }
 0x1f3   : > { %2034 = vmatpush2.bf16.msra.mxu1 %v13978_v35  ;;  %v16498_v35 = vld [vmem:[#allocation79_spill] sm:$0xff] }
 0x1f4   : > { %2035 = vmatprep.subr.bf16.mxu1 %v13986_v37 }
 0x1f7   : > { %2036 = vmatpush2.bf16.msra.mxu1 %v13994_v39 }
 0x1f8   : > { %2037 = vmatprep.subr.bf16.mxu1 %v14002_v41 }
 0x1fb   : > { %2038 = vmatpush2.bf16.msra.mxu1 %v14010_v43 }
 0x1fc   : > { %2039 = vmatprep.subr.bf16.mxu1 %v16490_v1 }
 0x1fe   : > { %v1025_v5 = vpop.f32.mrf.mxu1  ;;  %v14289_v7 = vpop.f32.mrf.mxu0 }
 0x1ff   : > { %v14292_v9 = vadd.f32 %v1025_v5, %v14282_v62  ;;  %2040 = vmatpush2.bf16.msra.mxu1 %v16492_v12  ;;  %v16497_v5 = vld [vmem:[#allocation78_spill] sm:$0xff] }
 0x200   : > { %v1027_v14 = vpop.f32.mrf.mxu1  ;;  %v14295_v16 = vpop.f32.mrf.mxu0  ;;  %2041 = vmatprep.subr.bf16.mxu1 %v16493_v19 }
 0x201   : > { %16491 = vst [vmem:[#allocation97_spill] sm:$0xff] %v14292_v9  ;;  %v14299_v43 = vadd.f32 %v1027_v14, %v14287_v3 }
 0x202   : > { %v1029_v1 = vpop.f32.mrf.mxu1  ;;  %v1009_v41 = vpop.f32.mrf.mxu0 }
 0x203   : > { %16494 = vst [vmem:[#allocation98_spill] sm:$0xff] %v14299_v43  ;;  %v14302_v39 = vadd.f32 %v1029_v1, %v14282_v62  ;;  %v14305_v37 = vadd.f32 %v1009_v41, %v14282_v62  ;;  %2042 = vmatpush2.bf16.msra.mxu1 %v16497_v5 }
 0x204   : > { %v1031_v9 = vpop.f32.mrf.mxu1  ;;  %v1011_v12 = vpop.f32.mrf.mxu0  ;;  %2043 = vmatprep.subr.bf16.mxu1 %v16498_v35 }
 0x205   : > { %16495 = vst [vmem:[#allocation99_spill] sm:$0xff] %v14302_v39  ;;  %16496 = vst [vmem:[#allocation100_spill] sm:$0xff] %v14305_v37  ;;  %v14310_v33 = vadd.f32 %v1031_v9, %v14287_v3  ;;  %v14313_v14 = vadd.f32 %v1011_v12, %v14287_v3  ;;  %v16503_v39 = vld [vmem:[#allocation81_spill] sm:$0xff] }
 0x206   : > { %v1035_v43 = vpop.f32.mrf.mxu1  ;;  %v1015_v19 = vpop.f32.mrf.mxu0 }
 0x207   : > { %16499 = vst [vmem:[#allocation101_spill] sm:$0xff] %v14310_v33  ;;  %16500 = vst [vmem:[#allocation102_spill] sm:$0xff] %v14313_v14  ;;  %v14316_v1 = vadd.f32 %v1035_v43, %v14282_v62  ;;  %v14319_v41 = vadd.f32 %v1015_v19, %v14282_v62  ;;  %2044 = vmatpush2.bf16.msra.mxu1 %v16503_v39 }
 0x208   : > { %v1037_v37 = vpop.f32.mrf.mxu1  ;;  %v1017_v5 = vpop.f32.mrf.mxu0  ;;  %2045 = vmatprep.subr.bf16.mxu1 %v16504_v31 }
 0x209   : > { %16501 = vst [vmem:[#allocation103_spill] sm:$0xff] %v14316_v1  ;;  %16502 = vst [vmem:[#allocation104_spill] sm:$0xff] %v14319_v41  ;;  %v14324_v9 = vadd.f32 %v1037_v37, %v14287_v3  ;;  %v14327_v12 = vadd.f32 %v1017_v5, %v14287_v3  ;;  %v14336_v1 = vsub.s32 4, %v13754_v10  ;;  %v16510_v41 = vld [vmem:[#allocation85_spill] sm:$0xff]  ;;  %v16511_v37 = vld [vmem:[#allocation44_spill] sm:$0xff] }
 0x20a   : > { %v1039_v33 = vpop.f32.mrf.mxu1  ;;  %v1019_v14 = vpop.f32.mrf.mxu0 }
 0x20b   : > { %16505 = vst [vmem:[#allocation105_spill] sm:$0xff] %v14324_v9  ;;  %16506 = vst [vmem:[#allocation106_spill] sm:$0xff] %v14327_v12  ;;  %v14330_v43 = vadd.f32 %v1039_v33, %v14282_v62  ;;  %v14333_v19 = vadd.f32 %v1019_v14, %v14282_v62  ;;  %2046 = vmatpush2.bf16.msra.mxu1 %v16510_v41  ;;  %v14344_v9 = vsub.s32 2, %v13754_v10  ;;  %v14350_v14 = vsub.s32 5, %v13754_v10 }
 0x20c   : > { %16509 = vst [vmem:[#allocation109_spill] sm:$0xff] %v14336_v1  ;;  %v1041_v31 = vpop.f32.mrf.mxu1  ;;  %v1021_v39 = vpop.f32.mrf.mxu0  ;;  %2149 = vmatprep.subr.bf16.mxu1 %v16511_v37  ;;  %v14357_v12 = vsub.s32 3, %v13754_v10  ;;  %v14360_v37 = vrot.slane %v866_v58, %v14336_v1 }
 0x20d   : > { %16507 = vst [vmem:[#allocation107_spill] sm:$0xff] %v14330_v43  ;;  %16508 = vst [vmem:[#allocation108_spill] sm:$0xff] %v14333_v19  ;;  %v14341_v5 = vadd.f32 %v1041_v31, %v14287_v3  ;;  %v14347_v33 = vadd.f32 %v1021_v39, %v14287_v3  ;;  %v14367_v39 = vrot.slane %v866_v58, %v14344_v9 }
 0x20e   : > { %16513 = vst [vmem:[#allocation110_spill] sm:$0xff] %v14344_v9  ;;  %16515 = vst [vmem:[#allocation112_spill] sm:$0xff] %v14350_v14  ;;  %v14352_v43 = vpop.f32.mrf.mxu1  ;;  %v14354_v19 = vpop.f32.mrf.mxu0  ;;  %v14373_v29 = vrot.slane %v866_v58, %v14357_v12 }
 0x20f   : > { %16512 = vst [vmem:[#allocation44_spill] sm:$0xff] %v14341_v5  ;;  %16514 = vst [vmem:[#allocation111_spill] sm:$0xff] %v14347_v33  ;;  %v14370_v33 = vrot.slane %v866_v58, %v14350_v14 }
 0x210   : > { %16516 = vst [vmem:[#allocation113_spill] sm:$0xff] %v14357_v12  ;;  %v14362_v31 = vpop.f32.mrf.mxu1  ;;  %v14364_v5 = vpop.f32.mrf.mxu0 }
 0x212   : > { %v1082_v41 = vpop.f32.mrf.mxu1  ;;  %v1155_v35 = vpop.f32.mrf.mxu0 }
 0x213   : > { %v14376_v10 = vadd.f32 %v1082_v41, %v14367_v39  ;;  %v14379_v27 = vadd.f32 %v1155_v35, %v14360_v37 }
 0x214   : > { %v1084_v25 = vpop.f32.mrf.mxu1  ;;  %v1157_v23 = vpop.f32.mrf.mxu0 }
 0x215   : > { %16517 = vst [vmem:[#allocation114_spill] sm:$0xff] %v14376_v10  ;;  %16518 = vst [vmem:[#allocation115_spill] sm:$0xff] %v14379_v27  ;;  %v14382_v21 = vadd.f32 %v1084_v25, %v14373_v29  ;;  %v14385_v47 = vadd.f32 %v1157_v23, %v14370_v33 }
 0x216   : > { %v1088_v51 = vpop.f32.mrf.mxu1  ;;  %v1161_v36 = vpop.f32.mrf.mxu0 }
 0x217   : > { %16519 = vst [vmem:[#allocation116_spill] sm:$0xff] %v14382_v21  ;;  %16520 = vst [vmem:[#allocation117_spill] sm:$0xff] %v14385_v47  ;;  %v14388_v57 = vadd.f32 %v1088_v51, %v14367_v39  ;;  %v14391_v58 = vadd.f32 %v1161_v36, %v14360_v37 }
 0x218   : > { %v1090_v41 = vpop.f32.mrf.mxu1  ;;  %v1163_v10 = vpop.f32.mrf.mxu0 }
 0x219   : > { %16521 = vst [vmem:[#allocation118_spill] sm:$0xff] %v14388_v57  ;;  %16522 = vst [vmem:[#allocation119_spill] sm:$0xff] %v14391_v58  ;;  %v14394_v35 = vadd.f32 %v1090_v41, %v14373_v29  ;;  %v14397_v27 = vadd.f32 %v1163_v10, %v14370_v33 }
 0x21a   : > { %v1092_v25 = vpop.f32.mrf.mxu1  ;;  %v1165_v21 = vpop.f32.mrf.mxu0 }
 0x21b   : > { %16523 = vst [vmem:[#allocation120_spill] sm:$0xff] %v14394_v35  ;;  %16524 = vst [vmem:[#allocation121_spill] sm:$0xff] %v14397_v27  ;;  %v14400_v23 = vadd.f32 %v1092_v25, %v14367_v39  ;;  %v14403_v47 = vadd.f32 %v1165_v21, %v14360_v37 }
 0x21c   : > { %v1094_v51 = vpop.f32.mrf.mxu1  ;;  %v1167_v57 = vpop.f32.mrf.mxu0 }
 0x21d   : > { %16525 = vst [vmem:[#allocation122_spill] sm:$0xff] %v14400_v23  ;;  %16526 = vst [vmem:[#allocation123_spill] sm:$0xff] %v14403_v47  ;;  %v14406_v36 = vadd.f32 %v1094_v51, %v14373_v29  ;;  %v14409_v58 = vadd.f32 %v1167_v57, %v14370_v33 }
 0x21e   : > { %v1098_v41 = vpop.f32.mrf.mxu1  ;;  %v1171_v35 = vpop.f32.mrf.mxu0 }
 0x21f   : > { %16527 = vst [vmem:[#allocation124_spill] sm:$0xff] %v14406_v36  ;;  %16528 = vst [vmem:[#allocation125_spill] sm:$0xff] %v14409_v58  ;;  %v14412_v10 = vadd.f32 %v1098_v41, %v14367_v39  ;;  %v14415_v27 = vadd.f32 %v1171_v35, %v14360_v37 }
 0x220   : > { %v1100_v25 = vpop.f32.mrf.mxu1  ;;  %v1173_v23 = vpop.f32.mrf.mxu0 }
 0x221   : > { %16529 = vst [vmem:[#allocation126_spill] sm:$0xff] %v14412_v10  ;;  %16530 = vst [vmem:[#allocation127_spill] sm:$0xff] %v14415_v27  ;;  %v14418_v21 = vadd.f32 %v1100_v25, %v14373_v29  ;;  %v14421_v47 = vadd.f32 %v1173_v23, %v14370_v33 }
 0x222   : > { %v1102_v51 = vpop.f32.mrf.mxu1  ;;  %v1175_v36 = vpop.f32.mrf.mxu0 }
 0x223   : > { %16531 = vst [vmem:[#allocation128_spill] sm:$0xff] %v14418_v21  ;;  %16532 = vst [vmem:[#allocation129_spill] sm:$0xff] %v14421_v47  ;;  %v14424_v57 = vadd.f32 %v1102_v51, %v14367_v39  ;;  %v14427_v58 = vadd.f32 %v1175_v36, %v14360_v37 }
 0x224   : > { %v1104_v41 = vpop.f32.mrf.mxu1  ;;  %v1177_v10 = vpop.f32.mrf.mxu0 }
 0x225   : > { %16533 = vst [vmem:[#allocation130_spill] sm:$0xff] %v14424_v57  ;;  %16534 = vst [vmem:[#allocation131_spill] sm:$0xff] %v14427_v58  ;;  %v14430_v35 = vadd.f32 %v1104_v41, %v14373_v29  ;;  %v14433_v27 = vadd.f32 %v1177_v10, %v14370_v33 }
 0x226   : > { %v1108_v25 = vpop.f32.mrf.mxu1  ;;  %v1181_v21 = vpop.f32.mrf.mxu0 }
 0x227   : > { %16535 = vst [vmem:[#allocation132_spill] sm:$0xff] %v14430_v35  ;;  %16536 = vst [vmem:[#allocation133_spill] sm:$0xff] %v14433_v27  ;;  %v14436_v23 = vadd.f32 %v1108_v25, %v14367_v39  ;;  %v14439_v47 = vadd.f32 %v1181_v21, %v14360_v37 }
 0x228   : > { %v1110_v51 = vpop.f32.mrf.mxu1  ;;  %v1183_v57 = vpop.f32.mrf.mxu0 }
 0x229   : > { %16537 = vst [vmem:[#allocation134_spill] sm:$0xff] %v14436_v23  ;;  %16538 = vst [vmem:[#allocation135_spill] sm:$0xff] %v14439_v47  ;;  %v14442_v36 = vadd.f32 %v1110_v51, %v14373_v29  ;;  %v14445_v58 = vadd.f32 %v1183_v57, %v14370_v33 }
 0x22a   : > { %v1112_v41 = vpop.f32.mrf.mxu1  ;;  %v1185_v10 = vpop.f32.mrf.mxu0 }
 0x22b   : > { %16539 = vst [vmem:[#allocation136_spill] sm:$0xff] %v14442_v36  ;;  %16540 = vst [vmem:[#allocation137_spill] sm:$0xff] %v14445_v58  ;;  %v14448_v27 = vadd.f32 %v1112_v41, %v14367_v39  ;;  %v14451_v25 = vadd.f32 %v1185_v10, %v14360_v37  ;;  %v1286_v10 = vld [vmem:[%s626_s13] sm:$0x3f] }
 0x22c   : > { %v1114_v23 = vpop.f32.mrf.mxu1  ;;  %v1187_v21 = vpop.f32.mrf.mxu0 }
 0x22d   : > { %16541 = vst [vmem:[#allocation138_spill] sm:$0xff] %v14448_v27  ;;  %16542 = vst [vmem:[#allocation139_spill] sm:$0xff] %v14451_v25  ;;  %v14454_v47 = vadd.f32 %v1114_v23, %v14373_v29  ;;  %v14457_v51 = vadd.f32 %v1187_v21, %v14370_v33  ;;  %v14462_v25 = vrot.slane %v1286_v10, %v13775_v18  ;;  %v2140_v27 = vsel %vm2139_vm2, 1, %v16480_v45 }
 0x22e   : > { %v14465_v23 = vrot.slane %v1286_v10, %v14279_v60  ;;  %v14475_v18 = vrot.slane %v1286_v10, %v14344_v9  ;;  %2142 = vperm.xlu0 %11984, %v2140_v27   ;;  %v16602_v9 = vld [vmem:[#allocation67_spill] sm:$0xff] }
 0x22f   : > { %16543 = vst [vmem:[#allocation140_spill] sm:$0xff] %v14454_v47  ;;  %16544 = vst [vmem:[#allocation141_spill] sm:$0xff] %v14457_v51  ;;  %v1006_v51 = vadd.f32 %v14289_v7, %v14282_v62  ;;  %v14479_v62 = vrot.slane %v1286_v10, %v14357_v12  ;;  %v16601_v12 = vld [vmem:[#allocation65_spill] sm:$0xff] }
 0x230   : > { %16545 = vst [vmem:[#allocation142_spill] sm:$0xff] %v14462_v25  ;;  %16546 = vst [vmem:[#allocation143_spill] sm:$0xff] %v14465_v23 }
 0x231   : > { %16547 = vst [vmem:[#allocation144_spill] sm:$0xff] %v14475_v18  ;;  %16548 = vst [vmem:[#allocation145_spill] sm:$0xff] %v14479_v62 }
 0x24e   : > { %v1833_v36 = vpop.f32.mrf.mxu1  ;;  %v1874_v57 = vpop.f32.mrf.mxu0 }
 0x24f   : > { %v1834_v21 = vadd.f32 %v1833_v36, %v14462_v25  ;;  %v1875_v7 = vadd.f32 %v1874_v57, %v14475_v18 }
 0x250   : > { %v1835_v58 = vpop.f32.mrf.mxu1  ;;  %v1876_v35 = vpop.f32.mrf.mxu0 }
 0x251   : > { %v1836_v47 = vadd.f32 %v1835_v58, %v14465_v23 }
 0x252   : > { %v1837_v55 = vpop.f32.mrf.mxu1  ;;  %v1878_v42 = vpop.f32.mrf.mxu0 }
 0x253   : > { %v1922_v42 = vadd.f32 %v1834_v21, %v1006_v51 }
 0x254   : > { %v1838_v32 = vpop.f32.mrf.mxu1  ;;  %v1879_v41 = vpop.f32.mrf.mxu0 }
 0x255   : > { %v1008_v32 = vadd.f32 %v14295_v16, %v14287_v3  ;;  %v10775_v41 = vmul.f32 -1.442695, %v1922_v42  ;;  %v1877_v3 = vadd.f32 %v1876_v35, %v14479_v62  ;;  %v1081_v16 = vadd.f32 %v14362_v31, %v14373_v29 }
 0x256   : > { %v14491_v29 = vrot.slane %v1286_v10, %v14350_v14  ;;  %v16599_v14 = vld [vmem:[#allocation61_spill] sm:$0xff] }
 0x257   : > { %v1923_v55 = vadd.f32 %v1836_v47, %v1008_v32  ;;  %12150 = vpow2.f32 %v10775_v41  ;;  %v1079_v47 = vadd.f32 %v14352_v43, %v14367_v39  ;;  %v1925_v36 = vadd.f32 %v1877_v3, %v1081_v16 }
 0x258   : > { %v14488_v43 = vrot.slane %v1286_v10, %v14336_v1  ;;  %v1152_v3 = vadd.f32 %v14354_v19, %v14360_v37  ;;  %v16600_v1 = vld [vmem:[#allocation63_spill] sm:$0xff] }
 0x259   : > { %v10776_v60 = vmul.f32 -1.442695, %v1923_v55  ;;  %v1924_v58 = vadd.f32 %v1875_v7, %v1079_v47  ;;  %v10778_v21 = vmul.f32 -1.442695, %v1925_v36 }
 0x25a   : > { %16549 = vst [vmem:[#allocation146_spill] sm:$0xff] %v14488_v43 }
 0x25b   : > { %12152 = vpow2.f32 %v10776_v60  ;;  %v10777_v51 = vmul.f32 -1.442695, %v1924_v58 }
 0x25d   : > { %12154 = vpow2.f32 %v10777_v51 }
 0x25e   : > { %12156 = vpow2.f32 %v10778_v21  ;;  %v1154_v21 = vadd.f32 %v14364_v5, %v14370_v33 }
 0x264   : > { %v12151_v27 = vpop.eup %12150 }
 0x265   : > { %v1938_v42 = vadd.f32 1.0, %v12151_v27 }
 0x267   : > { %12158 = vrcp.f32 %v1938_v42 }
 0x268   : > { %v12153_v32 = vpop.eup %12152 }
 0x269   : > { %v1939_v55 = vadd.f32 1.0, %v12153_v32 }
 0x26a   : > { %v12155_v60 = vpop.eup %12154 }
 0x26b   : > { %12160 = vrcp.f32 %v1939_v55  ;;  %v12157_v39 = vpop.eup %12156  ;;  %v1940_v35 = vadd.f32 1.0, %v12155_v60 }
 0x26c   : > { %v1941_v57 = vadd.f32 1.0, %v12157_v39 }
 0x26d   : > { %12162 = vrcp.f32 %v1940_v35 }
 0x26e   : > { %12164 = vrcp.f32 %v1941_v57 }
 0x274   : > { %v12159_v7 = vpop.eup %12158 }
 0x278   : > { %v12161_v36 = vpop.eup %12160 }
 0x27a   : > { %v12163_v55 = vpop.eup %12162 }
 0x27b   : > { %v12165_v60 = vpop.eup %12164  ;;  %v1956_v39 = vsub.f32 1.0, %v12163_v55 }
 0x27c   : > { %v1957_v37 = vsub.f32 1.0, %v12165_v60 }
 0x28e   : > { %v1915_v31 = vpop.f32.mrf.mxu1 }
 0x28f   : > { %v1916_v41 = vadd.f32 %v1915_v31, %v14488_v43  ;;  %v1960_v31 = vmul.f32 0.0, %v12163_v55  ;;  %v16558_v55 = vld [vmem:[#allocation48_spill] sm:$0xff] }
 0x290   : > { %v1917_v47 = vpop.f32.mrf.mxu1 }
 0x291   : > { %v1950_v16 = vmul.f32 %v12159_v7, %v1916_v41  ;;  %v1918_v58 = vadd.f32 %v1917_v47, %v14491_v29  ;;  %v1961_v47 = vmul.f32 0.0, %v12165_v60  ;;  %v16559_v60 = vld [vmem:[#allocation49_spill] sm:$0xff] }
 0x292   : > { %v1919_v51 = vpop.f32.mrf.mxu1 }
 0x293   : > { %v1952_v10 = vadd.f32 %v1950_v16, %v1152_v3  ;;  %v1951_v27 = vmul.f32 %v12161_v36, %v1918_v58  ;;  %v16552_v16 = vld [vmem:[#allocation87_spill] sm:$0xff]  ;;  %v16553_v58 = vld [vmem:[#allocation88_spill] sm:$0xff] }
 0x294   : > { %v1920_v32 = vpop.f32.mrf.mxu1  ;;  %v14514_v36 = vld [vmem:[%s13752_s23 + $0x150] ss:$24 sps:$4 sm:$0xff]   ;;  %v14518_v51 = vld [vmem:[%s13752_s23 + $0x124] ss:$24 sps:$4 sm:$0xff]  }
 0x295   : > { %12166 = vtanh.f32 %v1952_v10  ;;  %v1953_v42 = vadd.f32 %v1951_v27, %v1154_v21  ;;  %v14524_v21 = vld [vmem:[%s13752_s23 + $0x120] ss:$24 sps:$4 sm:$0xff]   ;;  %v16554_v10 = vld [vmem:[#allocation45_spill] sm:$0xff] }
 0x296   : > { %v16555_v27 = vld [vmem:[#allocation89_spill] sm:$0xff]  ;;  %v16556_v32 = vld [vmem:[#allocation46_spill] sm:$0xff] }
 0x297   : > { %12168 = vtanh.f32 %v1953_v42  ;;  %v16557_v42 = vld [vmem:[#allocation47_spill] sm:$0xff] }
 0x2a2   : > { %v12167_v19 = vpop.eup %12166 }
 0x2a3   : > { %v1958_v35 = vmul.f32 %v12167_v19, %v1956_v39  ;;  %v16560_v39 = vld [vmem:[#allocation50_spill] sm:$0xff]  ;;  %v16562_v19 = vld [vmem:[#allocation52_spill] sm:$0xff] }
 0x2a4   : > { %v12169_v41 = vpop.eup %12168 }
 0x2a5   : > { %v1959_v7 = vmul.f32 %v12169_v41, %v1957_v37  ;;  %v14499_v5 = vadd.f32 %v1960_v31, %v1958_v35  ;;  %v16563_v37 = vld [vmem:[#allocation54_spill] sm:$0xff]  ;;  %v16564_v35 = vld [vmem:[#allocation56_spill] sm:$0xff] }
 0x2a6   : > { %v16565_v31 = vld [vmem:[#allocation58_spill] sm:$0xff]  ;;  %v16566_v41 = vld [vmem:[#allocation60_spill] sm:$0xff] }
 0x2a7   : > { %16550 = vst [vmem:[#allocation147_spill] sm:$0xff] %v14499_v5  ;;  %v14501_v33 = vadd.f32 %v1961_v47, %v1959_v7  ;;  %v14507_v3 = vpack.c.bf16 %v14499_v5, %v14499_v5  ;;  %v16567_v7 = vld [vmem:[#allocation62_spill] sm:$0xff]  ;;  %v16568_v47 = vld [vmem:[#allocation64_spill] sm:$0xff] }
 0x2a9   : > { %16551 = vst [vmem:[#allocation148_spill] sm:$0xff] %v14501_v33  ;;  %v1973_v57 = vpack.c.bf16 %v14501_v33, %v14501_v33 }
 0x2ab   : > { %2006 = vmatprep.mubr.bf16.mxu0 %v1973_v57  ;;  %2047 = vmatprep.mubr.bf16.mxu1 %v1973_v57 }
 0x2ac   : > { %2007 = vmatmul.mubr.bf16.vlgmr.msra.gmra.mxu0 %v14507_v3  ;;  %2048 = vmatmul.mubr.bf16.vlgmr.msra.gmra.mxu1 %v14507_v3 }
 0x2ad   : > { %2057 = vmatpush1.bf16.msra.mxu0 %v16552_v16  ;;  %2088 = vmatprep.mubr.bf16.mxu0 %v1973_v57  ;;  %v16569_v57 = vld [vmem:[#allocation66_spill] sm:$0xff] }
 0x2ae   : > { %2058 = vmatprep.subr.bf16.mxu0 %v16553_v58  ;;  %2150 = vmatpush1.bf16.msra.mxu1 %v14514_v36 }
 0x2af   : > { %2151 = vmatprep.subr.bf16.mxu1 %v14518_v51 }
 0x2b1   : > { %2059 = vmatpush1.bf16.msra.mxu0 %v14095_v0 }
 0x2b2   : > { %2060 = vmatprep.subr.bf16.mxu0 %v14100_v49  ;;  %2152 = vmatpush1.bf16.msra.mxu1 %v14524_v21 }
 0x2b3   : > { %2153 = vmatprep.subr.bf16.mxu1 %v16554_v10  ;;  %v16570_v10 = vld [vmem:[#allocation68_spill] sm:$0xff] }
 0x2b5   : > { %2061 = vmatpush1.bf16.msra.mxu0 %v16555_v27 }
 0x2b6   : > { %2062 = vmatprep.subr.bf16.mxu0 %v14110_v53  ;;  %2154 = vmatpush1.bf16.msra.mxu1 %v13845_v4  ;;  %v16561_v4 = vld [vmem:[#allocation51_spill] sm:$0xff] }
 0x2b7   : > { %2155 = vmatprep.subr.bf16.mxu1 %v16556_v32  ;;  %v16571_v32 = vld [vmem:[#allocation90_spill] sm:$0xff] }
 0x2b9   : > { %2063 = vmatpush1.bf16.msra.mxu0 %v14122_v59 }
 0x2ba   : > { %2064 = vmatprep.subr.bf16.mxu0 %v14127_v63  ;;  %2156 = vmatpush1.bf16.msra.mxu1 %v16557_v42  ;;  %v16572_v42 = vld [vmem:[#allocation71_spill] sm:$0xff] }
 0x2bb   : > { %2157 = vmatprep.subr.bf16.mxu1 %v16558_v55  ;;  %v16573_v55 = vld [vmem:[#allocation91_spill] sm:$0xff] }
 0x2bd   : > { %2065 = vmatpush1.bf16.msra.mxu0 %v14133_v2 }
 0x2be   : > { %2066 = vmatprep.subr.bf16.mxu0 %v14137_v54  ;;  %2158 = vmatpush1.bf16.msra.mxu1 %v16559_v60  ;;  %v16574_v60 = vld [vmem:[#allocation73_spill] sm:$0xff] }
 0x2bf   : > { %2159 = vmatprep.subr.bf16.mxu1 %v16560_v39  ;;  %v16575_v39 = vld [vmem:[#allocation92_spill] sm:$0xff] }
 0x2c1   : > { %2067 = vmatpush1.bf16.msra.mxu0 %v14143_v61 }
 0x2c2   : > { %2068 = vmatprep.subr.bf16.mxu0 %v14147_v6  ;;  %2160 = vmatpush1.bf16.msra.mxu1 %v16561_v4  ;;  %v16578_v4 = vld [vmem:[#allocation80_spill] sm:$0xff] }
 0x2c3   : > { %2161 = vmatprep.subr.bf16.mxu1 %v16562_v19  ;;  %v14582_v19 = vld [vmem:[%s13752_s23 + $0x15c] ss:$24 sps:$4 sm:$0xff]  }
 0x2c4   : > { %16581 = vst [vmem:[#allocation87_spill] sm:$0xff] %v14582_v19 }
 0x2c5   : > { %2069 = vmatpush1.bf16.msra.mxu0 %v14153_v8 }
 0x2c6   : > { %2070 = vmatprep.subr.bf16.mxu0 %v14157_v11  ;;  %2162 = vmatpush1.bf16.msra.mxu1 %v16563_v37  ;;  %v14589_v37 = vld [vmem:[%s13752_s23 + $0x158] ss:$24 sps:$4 sm:$0xff]  }
 0x2c7   : > { %2163 = vmatprep.subr.bf16.mxu1 %v16564_v35  ;;  %16584 = vst [vmem:[#allocation88_spill] sm:$0xff] %v14589_v37  ;;  %v14593_v35 = vld [vmem:[%s13752_s23 + $0x12c] ss:$24 sps:$4 sm:$0xff]  }
 0x2c8   : > { %16585 = vst [vmem:[#allocation45_spill] sm:$0xff] %v14593_v35 }
 0x2c9   : > { %2071 = vmatpush1.bf16.msra.mxu0 %v14163_v13 }
 0x2ca   : > { %2072 = vmatprep.subr.bf16.mxu0 %v14167_v15  ;;  %2164 = vmatpush1.bf16.msra.mxu1 %v16565_v31  ;;  %v14597_v31 = vld [vmem:[%s13752_s23 + $0x128] ss:$24 sps:$4 sm:$0xff]  }
 0x2cb   : > { %2165 = vmatprep.subr.bf16.mxu1 %v16566_v41  ;;  %16586 = vst [vmem:[#allocation89_spill] sm:$0xff] %v14597_v31  ;;  %v14601_v41 = vld [vmem:[%s13752_s23 + $0xfc] ss:$24 sps:$4 sm:$0xff]  }
 0x2cc   : > { %16587 = vst [vmem:[#allocation46_spill] sm:$0xff] %v14601_v41 }
 0x2cd   : > { %2073 = vmatpush2.bf16.msra.mxu0 %v14173_v17 }
 0x2ce   : > { %2074 = vmatprep.subr.bf16.mxu0 %v14177_v20  ;;  %2166 = vmatpush2.bf16.msra.mxu1 %v16567_v7  ;;  %v14609_v7 = vld [vmem:[%s13752_s23 + $0xcc] ss:$24 sps:$4 sm:$0xff]  }
 0x2cf   : > { %2167 = vmatprep.subr.bf16.mxu1 %v16568_v47  ;;  %16589 = vst [vmem:[#allocation48_spill] sm:$0xff] %v14609_v7  ;;  %v14613_v47 = vld [vmem:[%s13752_s23 + $0xc8] ss:$24 sps:$4 sm:$0xff]  }
 0x2d0   : > { %16590 = vst [vmem:[#allocation49_spill] sm:$0xff] %v14613_v47 }
 0x2d1   : > { %2075 = vmatpush2.bf16.msra.mxu0 %v14183_v22 }
 0x2d2   : > { %2076 = vmatprep.subr.bf16.mxu0 %v14187_v24  ;;  %2168 = vmatpush2.bf16.msra.mxu1 %v16569_v57  ;;  %v14617_v57 = vld [vmem:[%s13752_s23 + $0x9c] ss:$24 sps:$4 sm:$0xff]  }
 0x2d3   : > { %2169 = vmatprep.subr.bf16.mxu1 %v16570_v10  ;;  %16591 = vst [vmem:[#allocation50_spill] sm:$0xff] %v14617_v57  ;;  %v14621_v10 = vld [vmem:[%s13752_s23 + $0x98] ss:$24 sps:$4 sm:$0xff]  }
 0x2d4   : > { %16592 = vst [vmem:[#allocation51_spill] sm:$0xff] %v14621_v10 }
 0x2d5   : > { %2077 = vmatpush2.bf16.msra.mxu0 %v14193_v26 }
 0x2d6   : > { %2078 = vmatprep.subr.bf16.mxu0 %v16571_v32  ;;  %2170 = vmatpush2.bf16.msra.mxu1 %v13991_v38  ;;  %v16576_v38 = vld [vmem:[#allocation93_spill] sm:$0xff] }
 0x2d7   : > { %2171 = vmatprep.subr.bf16.mxu1 %v16572_v42  ;;  %v14625_v42 = vld [vmem:[%s13752_s23 + $0x6c] ss:$24 sps:$4 sm:$0xff]  }
 0x2d8   : > { %16593 = vst [vmem:[#allocation52_spill] sm:$0xff] %v14625_v42 }
 0x2d9   : > { %2079 = vmatpush2.bf16.msra.mxu0 %v14203_v30 }
 0x2da   : > { %2080 = vmatprep.subr.bf16.mxu0 %v16573_v55  ;;  %2172 = vmatpush2.bf16.msra.mxu1 %v16574_v60  ;;  %v14629_v60 = vld [vmem:[%s13752_s23 + $0x68] ss:$24 sps:$4 sm:$0xff]  }
 0x2db   : > { %2173 = vmatprep.subr.bf16.mxu1 %v14015_v44  ;;  %v16577_v44 = vld [vmem:[#allocation94_spill] sm:$0xff]  ;;  %16594 = vst [vmem:[#allocation54_spill] sm:$0xff] %v14629_v60 }
 0x2dd   : > { %2081 = vmatpush2.bf16.msra.mxu0 %v14213_v34 }
 0x2de   : > { %2082 = vmatprep.subr.bf16.mxu0 %v16575_v39  ;;  %2174 = vmatpush2.bf16.msra.mxu1 %v14023_v46  ;;  %v16579_v46 = vld [vmem:[#allocation82_spill] sm:$0xff] }
 0x2df   : > { %2175 = vmatprep.subr.bf16.mxu1 %v14031_v48  ;;  %v16580_v48 = vld [vmem:[#allocation95_spill] sm:$0xff] }
 0x2e1   : > { %2083 = vmatpush2.bf16.msra.mxu0 %v14223_v28 }
 0x2e2   : > { %2084 = vmatprep.subr.bf16.mxu0 %v14227_v40  ;;  %2176 = vmatpush2.bf16.msra.mxu1 %v14039_v50  ;;  %v16582_v50 = vld [vmem:[#allocation84_spill] sm:$0xff] }
 0x2e3   : > { %2177 = vmatprep.subr.bf16.mxu1 %v14047_v52  ;;  %v16583_v52 = vld [vmem:[#allocation86_spill] sm:$0xff] }
 0x2e5   : > { %2085 = vmatpush2.bf16.msra.mxu0 %v16576_v38 }
 0x2e6   : > { %2086 = vmatprep.subr.bf16.mxu0 %v16577_v44  ;;  %2178 = vmatpush2.bf16.msra.mxu1 %v16578_v4  ;;  %v16595_v4 = vld [vmem:[#allocation53_spill] sm:$0xff] }
 0x2e7   : > { %2179 = vmatprep.subr.bf16.mxu1 %v16579_v46  ;;  %v16596_v46 = vld [vmem:[#allocation55_spill] sm:$0xff] }
 0x2e9   : > { %2087 = vmatpush2.bf16.msra.mxu0 %v16580_v48 }
 0x2ea   : > { %2190 = vmatprep.subr.bf16.mxu0 %v14582_v19  ;;  %2180 = vmatpush2.bf16.msra.mxu1 %v16582_v50  ;;  %v16597_v50 = vld [vmem:[#allocation57_spill] sm:$0xff] }
 0x2eb   : > { %2231 = vmatprep.subr.bf16.mxu1 %v16583_v52  ;;  %v16598_v52 = vld [vmem:[#allocation59_spill] sm:$0xff] }
 0x2ec   : > { %2089 = vmatmul.mubr.bf16.vlgmr.msra.gmra.mxu0 %v14507_v3  ;;  %v14605_v3 = vld [vmem:[%s13752_s23 + $0xf8] ss:$24 sps:$4 sm:$0xff]  }
 0x2ed   : > { %2191 = vmatpush1.bf16.msra.mxu0 %v14589_v37  ;;  %16588 = vst [vmem:[#allocation47_spill] sm:$0xff] %v14605_v3 }
 0x2ee   : > { %2192 = vmatprep.subr.bf16.mxu0 %v14593_v35 }
 0x2f1   : > { %2193 = vmatpush1.bf16.msra.mxu0 %v14597_v31  ;;  %v2315_v31 = vsel %vm2314_vm3, 1, %v16480_v45 }
 0x2f2   : > { %2194 = vmatprep.subr.bf16.mxu0 %v14601_v41  ;;  %2317 = vperm.xlu1 %11985, %v2315_v31  }
 0x2f5   : > { %2195 = vmatpush1.bf16.msra.mxu0 %v14605_v3  ;;  %v16617_v3 = vld [vmem:[#allocation102_spill] sm:$0xff] }
 0x2f6   : > { %2196 = vmatprep.subr.bf16.mxu0 %v14609_v7  ;;  %v16616_v7 = vld [vmem:[#allocation100_spill] sm:$0xff] }
 0x2f9   : > { %2197 = vmatpush1.bf16.msra.mxu0 %v14613_v47 }
 0x2fa   : > { %2198 = vmatprep.subr.bf16.mxu0 %v14617_v57 }
 0x2fd   : > { %2199 = vmatpush1.bf16.msra.mxu0 %v14621_v10  ;;  %v16610_v10 = vld [vmem:[#allocation78_spill] sm:$0xff] }
 0x2fe   : > { %2200 = vmatprep.subr.bf16.mxu0 %v14625_v42  ;;  %v16603_v42 = vld [vmem:[#allocation69_spill] sm:$0xff] }
 0x301   : > { %2201 = vmatpush1.bf16.msra.mxu0 %v14629_v60  ;;  %v16604_v60 = vld [vmem:[#allocation70_spill] sm:$0xff] }
 0x302   : > { %2202 = vmatprep.subr.bf16.mxu0 %v16595_v4  ;;  %v16605_v4 = vld [vmem:[#allocation72_spill] sm:$0xff] }
 0x305   : > { %2203 = vmatpush1.bf16.msra.mxu0 %v16596_v46  ;;  %v16606_v46 = vld [vmem:[#allocation74_spill] sm:$0xff] }
 0x306   : > { %2204 = vmatprep.subr.bf16.mxu0 %v16597_v50  ;;  %v16607_v50 = vld [vmem:[#allocation75_spill] sm:$0xff] }
 0x309   : > { %2205 = vmatpush1.bf16.msra.mxu0 %v16598_v52  ;;  %v16608_v52 = vld [vmem:[#allocation76_spill] sm:$0xff] }
 0x30a   : > { %2206 = vmatprep.subr.bf16.mxu0 %v16599_v14  ;;  %v16609_v14 = vld [vmem:[#allocation77_spill] sm:$0xff] }
 0x30d   : > { %2207 = vmatpush2.bf16.msra.mxu0 %v16600_v1  ;;  %v16611_v1 = vld [vmem:[#allocation79_spill] sm:$0xff] }
 0x30e   : > { %2208 = vmatprep.subr.bf16.mxu0 %v16601_v12  ;;  %v16612_v12 = vld [vmem:[#allocation81_spill] sm:$0xff] }
 0x311   : > { %2209 = vmatpush2.bf16.msra.mxu0 %v16602_v9  ;;  %v16613_v9 = vld [vmem:[#allocation83_spill] sm:$0xff] }
 0x312   : > { %2210 = vmatprep.subr.bf16.mxu0 %v16603_v42  ;;  %v16614_v42 = vld [vmem:[#allocation85_spill] sm:$0xff] }
 0x315   : > { %2211 = vmatpush2.bf16.msra.mxu0 %v16604_v60  ;;  %v14653_v60 = vld [vmem:[%s13752_s23 + $0x154] ss:$24 sps:$4 sm:$0xff]  }
 0x316   : > { %2212 = vmatprep.subr.bf16.mxu0 %v16605_v4  ;;  %16615 = vst [vmem:[#allocation56_spill] sm:$0xff] %v14653_v60 }
 0x319   : > { %2213 = vmatpush2.bf16.msra.mxu0 %v16606_v46 }
 0x31a   : > { %2214 = vmatprep.subr.bf16.mxu0 %v16607_v50 }
 0x31d   : > { %2215 = vmatpush2.bf16.msra.mxu0 %v16608_v52 }
 0x31e   : > { %2216 = vmatprep.subr.bf16.mxu0 %v16609_v14 }
 0x321   : > { %2217 = vmatpush2.bf16.msra.mxu0 %v16610_v10 }
 0x322   : > { %2218 = vmatprep.subr.bf16.mxu0 %v16611_v1 }
 0x325   : > { %2219 = vmatpush2.bf16.msra.mxu0 %v16612_v12 }
 0x326   : > { %2220 = vmatprep.subr.bf16.mxu0 %v16613_v9 }
 0x329   : > { %2221 = vmatpush2.bf16.msra.mxu0 %v16614_v42 }
 0x32a   : > { %2324 = vmatprep.subr.bf16.mxu0 %v14653_v60 }
 0x36c   : > { %v2008_v4 = vpop.f32.mrf.mxu0  ;;  %v2049_v46 = vpop.f32.mrf.mxu1 }
 0x36d   : > { %v2009_v1 = vadd.f32 %v2008_v4, %v14462_v25  ;;  %v16618_v4 = vld [vmem:[#allocation114_spill] sm:$0xff] }
 0x36e   : > { %v2010_v50 = vpop.f32.mrf.mxu0  ;;  %v2051_v52 = vpop.f32.mrf.mxu1 }
 0x36f   : > { %v2011_v12 = vadd.f32 %v2010_v50, %v14465_v23  ;;  %v2097_v9 = vadd.f32 %v2009_v1, %v16616_v7  ;;  %v16619_v50 = vld [vmem:[#allocation116_spill] sm:$0xff] }
 0x370   : > { %v2012_v57 = vpop.f32.mrf.mxu0  ;;  %v2053_v14 = vpop.f32.mrf.mxu1 }
 0x371   : > { %v2098_v42 = vadd.f32 %v2011_v12, %v16617_v3  ;;  %v10779_v41 = vmul.f32 -1.442695, %v2097_v9  ;;  %v2050_v57 = vadd.f32 %v2049_v46, %v14475_v18 }
 0x372   : > { %v2013_v47 = vpop.f32.mrf.mxu0  ;;  %v2054_v10 = vpop.f32.mrf.mxu1 }
 0x373   : > { %v10780_v60 = vmul.f32 -1.442695, %v2098_v42  ;;  %12170 = vpow2.f32 %v10779_v41  ;;  %v2052_v47 = vadd.f32 %v2051_v52, %v14479_v62  ;;  %v2099_v14 = vadd.f32 %v2050_v57, %v16618_v4 }
 0x375   : > { %12172 = vpow2.f32 %v10780_v60  ;;  %v2100_v10 = vadd.f32 %v2052_v47, %v16619_v50  ;;  %v10781_v7 = vmul.f32 -1.442695, %v2099_v14 }
 0x377   : > { %v10782_v1 = vmul.f32 -1.442695, %v2100_v10  ;;  %12174 = vpow2.f32 %v10781_v7  ;;  %v16620_v7 = vld [vmem:[#allocation115_spill] sm:$0xff] }
 0x379   : > { %12176 = vpow2.f32 %v10782_v1 }
 0x380   : > { %v12171_v3 = vpop.eup %12170 }
 0x381   : > { %v2113_v56 = vadd.f32 1.0, %v12171_v3 }
 0x382   : > { %v12173_v12 = vpop.eup %12172 }
 0x383   : > { %v2114_v9 = vadd.f32 1.0, %v12173_v12  ;;  %12178 = vrcp.f32 %v2113_v56  ;;  %v16621_v56 = vld [vmem:[#allocation117_spill] sm:$0xff] }
 0x384   : > { %v12175_v31 = vpop.eup %12174 }
 0x385   : > { %12180 = vrcp.f32 %v2114_v9  ;;  %v2115_v46 = vadd.f32 1.0, %v12175_v31 }
 0x386   : > { %v12177_v41 = vpop.eup %12176 }
 0x387   : > { %v2116_v42 = vadd.f32 1.0, %v12177_v41  ;;  %12182 = vrcp.f32 %v2115_v46 }
 0x389   : > { %12184 = vrcp.f32 %v2116_v42 }
 0x390   : > { %v12179_v57 = vpop.eup %12178 }
 0x392   : > { %v12181_v50 = vpop.eup %12180 }
 0x394   : > { %v12183_v31 = vpop.eup %12182 }
 0x396   : > { %v12185_v41 = vpop.eup %12184 }
 0x397   : > { %v2132_v62 = vsub.f32 1.0, %v12185_v41  ;;  %v2136_v42 = vmul.f32 %v12185_v41, %v14501_v33  ;;  %v14856_v41 = vld [vmem:[%s13752_s23 + $0xc] ss:$24 sps:$4 sm:$0xff]   ;;  %v14892_v33 = vld [vmem:[%s13752_s23 + $0x248] ss:$24 sps:$4 sm:$0xff]  }
 0x398   : > { %16650 = vst [vmem:[#allocation55_spill] sm:$0xff] %v14856_v41  ;;  %16659 = vst [vmem:[#allocation72_spill] sm:$0xff] %v14892_v33 }
 0x3ac   : > { %v2090_v60 = vpop.f32.mrf.mxu0 }
 0x3ad   : > { %v2091_v52 = vadd.f32 %v2090_v60, %v14488_v43  ;;  %v2131_v60 = vsub.f32 1.0, %v12183_v31 }
 0x3ae   : > { %v2092_v4 = vpop.f32.mrf.mxu0 }
 0x3af   : > { %v2125_v47 = vmul.f32 %v12179_v57, %v2091_v52  ;;  %v2093_v14 = vadd.f32 %v2092_v4, %v14491_v29  ;;  %v2135_v52 = vmul.f32 %v12183_v31, %v14499_v5  ;;  %v14852_v31 = vld [vmem:[%s13752_s23 + $0x38] ss:$24 sps:$4 sm:$0xff]   ;;  %v14896_v5 = vld [vmem:[%s13752_s23 + $0x21c] ss:$24 sps:$4 sm:$0xff]  }
 0x3b0   : > { %v2094_v10 = vpop.f32.mrf.mxu0  ;;  %16649 = vst [vmem:[#allocation53_spill] sm:$0xff] %v14852_v31  ;;  %16660 = vst [vmem:[#allocation74_spill] sm:$0xff] %v14896_v5 }
 0x3b1   : > { %v2127_v1 = vadd.f32 %v2125_v47, %v16620_v7  ;;  %v2126_v3 = vmul.f32 %v12181_v50, %v2093_v14  ;;  %v16643_v7 = vld [vmem:[#allocation49_spill] sm:$0xff] }
 0x3b2   : > { %v2095_v12 = vpop.f32.mrf.mxu0 }
 0x3b3   : > { %12186 = vtanh.f32 %v2127_v1  ;;  %v2128_v9 = vadd.f32 %v2126_v3, %v16621_v56  ;;  %v16644_v1 = vld [vmem:[#allocation50_spill] sm:$0xff]  ;;  %v16645_v3 = vld [vmem:[#allocation51_spill] sm:$0xff]  ;;  %v16646_v12 = vld [vmem:[#allocation52_spill] sm:$0xff] }
 0x3b4   : > { %v16647_v56 = vld [vmem:[#allocation54_spill] sm:$0xff] }
 0x3b5   : > { %12188 = vtanh.f32 %v2128_v9  ;;  %v14848_v9 = vld [vmem:[%s13752_s23 + $0x3c] ss:$24 sps:$4 sm:$0xff]  }
 0x3b6   : > { %16648 = vst [vmem:[#allocation86_spill] sm:$0xff] %v14848_v9 }
 0x3c0   : > { %v12187_v43 = vpop.eup %12186 }
 0x3c1   : > { %v2133_v46 = vmul.f32 %v12187_v43, %v2131_v60  ;;  %v14698_v43 = vld [vmem:[%s13752_s23 + $0xf0] ss:$24 sps:$4 sm:$0xff]  }
 0x3c2   : > { %v12189_v57 = vpop.eup %12188  ;;  %v14860_v60 = vld [vmem:[%s13752_s23 + $0x8] ss:$24 sps:$4 sm:$0xff]  }
 0x3c3   : > { %v2134_v4 = vmul.f32 %v12189_v57, %v2132_v62  ;;  %v14672_v10 = vadd.f32 %v2135_v52, %v2133_v46  ;;  %v14692_v62 = vld [vmem:[%s13752_s23 + $0xf4] ss:$24 sps:$4 sm:$0xff]   ;;  %16651 = vst [vmem:[#allocation57_spill] sm:$0xff] %v14860_v60  ;;  %v14868_v52 = vld [vmem:[%s13752_s23 + $0x2d8] ss:$24 sps:$4 sm:$0xff]  }
 0x3c4   : > { %v14864_v46 = vld [vmem:[%s13752_s23 + $0x2dc] ss:$24 sps:$4 sm:$0xff]   ;;  %16653 = vst [vmem:[#allocation61_spill] sm:$0xff] %v14868_v52  ;;  %v14872_v57 = vld [vmem:[%s13752_s23 + $0x2ac] ss:$24 sps:$4 sm:$0xff]  }
 0x3c5   : > { %16622 = vst [vmem:[#allocation58_spill] sm:$0xff] %v14672_v10  ;;  %v14674_v47 = vadd.f32 %v2136_v42, %v2134_v4  ;;  %v14680_v50 = vpack.c.bf16 %v14672_v10, %v14672_v10  ;;  %16652 = vst [vmem:[#allocation59_spill] sm:$0xff] %v14864_v46  ;;  %v14876_v4 = vld [vmem:[%s13752_s23 + $0x2a8] ss:$24 sps:$4 sm:$0xff]   ;;  %v14880_v42 = vld [vmem:[%s13752_s23 + $0x27c] ss:$24 sps:$4 sm:$0xff]  }
 0x3c6   : > { %16654 = vst [vmem:[#allocation63_spill] sm:$0xff] %v14872_v57  ;;  %16655 = vst [vmem:[#allocation65_spill] sm:$0xff] %v14876_v4 }
 0x3c7   : > { %16623 = vst [vmem:[#allocation60_spill] sm:$0xff] %v14674_v47  ;;  %v2148_v14 = vpack.c.bf16 %v14674_v47, %v14674_v47  ;;  %16656 = vst [vmem:[#allocation67_spill] sm:$0xff] %v14880_v42 }
 0x3c9   : > { %2181 = vmatprep.mubr.bf16.mxu1 %v2148_v14  ;;  %2222 = vmatprep.mubr.bf16.mxu0 %v2148_v14 }
 0x3ca   : > { %2182 = vmatmul.mubr.bf16.vlgmr.msra.gmra.mxu1 %v14680_v50  ;;  %2223 = vmatmul.mubr.bf16.vlgmr.msra.gmra.mxu0 %v14680_v50 }
 0x3cb   : > { %2232 = vmatpush1.bf16.msra.mxu1 %v16552_v16  ;;  %2263 = vmatprep.mubr.bf16.mxu1 %v2148_v14  ;;  %v14702_v16 = vld [vmem:[%s13752_s23 + $0xc4] ss:$24 sps:$4 sm:$0xff]   ;;  %v14884_v14 = vld [vmem:[%s13752_s23 + $0x278] ss:$24 sps:$4 sm:$0xff]  }
 0x3cc   : > { %2233 = vmatprep.subr.bf16.mxu1 %v16553_v58  ;;  %2325 = vmatpush1.bf16.msra.mxu0 %v14514_v36  ;;  %v14798_v58 = vld [vmem:[%s13752_s23 + $0x210] ss:$24 sps:$4 sm:$0xff]   ;;  %16657 = vst [vmem:[#allocation69_spill] sm:$0xff] %v14884_v14 }
 0x3cd   : > { %2326 = vmatprep.subr.bf16.mxu0 %v14518_v51  ;;  %16631 = vst [vmem:[#allocation73_spill] sm:$0xff] %v14798_v58 }
 0x3cf   : > { %2234 = vmatpush1.bf16.msra.mxu1 %v14095_v0  ;;  %v14708_v0 = vld [vmem:[%s13752_s23 + $0xc0] ss:$24 sps:$4 sm:$0xff]  }
 0x3d0   : > { %2235 = vmatprep.subr.bf16.mxu1 %v14100_v49  ;;  %2327 = vmatpush1.bf16.msra.mxu0 %v14524_v21  ;;  %v14712_v49 = vld [vmem:[%s13752_s23 + $0x94] ss:$24 sps:$4 sm:$0xff]  }
 0x3d1   : > { %2328 = vmatprep.subr.bf16.mxu0 %v14692_v62 }
 0x3d3   : > { %2236 = vmatpush1.bf16.msra.mxu1 %v16555_v27  ;;  %v14808_v27 = vld [vmem:[%s13752_s23 + $0x1e0] ss:$24 sps:$4 sm:$0xff]  }
 0x3d4   : > { %2237 = vmatprep.subr.bf16.mxu1 %v14110_v53  ;;  %2329 = vmatpush1.bf16.msra.mxu0 %v14698_v43  ;;  %v14718_v53 = vld [vmem:[%s13752_s23 + $0x90] ss:$24 sps:$4 sm:$0xff]   ;;  %16633 = vst [vmem:[#allocation93_spill] sm:$0xff] %v14808_v27 }
 0x3d5   : > { %2330 = vmatprep.subr.bf16.mxu0 %v14702_v16 }
 0x3d7   : > { %2238 = vmatpush1.bf16.msra.mxu1 %v14122_v59  ;;  %v14722_v59 = vld [vmem:[%s13752_s23 + $0x64] ss:$24 sps:$4 sm:$0xff]  }
 0x3d8   : > { %2239 = vmatprep.subr.bf16.mxu1 %v14127_v63  ;;  %2331 = vmatpush1.bf16.msra.mxu0 %v14708_v0  ;;  %v14728_v63 = vld [vmem:[%s13752_s23 + $0x60] ss:$24 sps:$4 sm:$0xff]  }
 0x3d9   : > { %2332 = vmatprep.subr.bf16.mxu0 %v14712_v49 }
 0x3db   : > { %2240 = vmatpush1.bf16.msra.mxu1 %v14133_v2  ;;  %v14732_v2 = vld [vmem:[%s13752_s23 + $0x34] ss:$24 sps:$4 sm:$0xff]  }
 0x3dc   : > { %2241 = vmatprep.subr.bf16.mxu1 %v14137_v54  ;;  %2333 = vmatpush1.bf16.msra.mxu0 %v14718_v53  ;;  %v14738_v54 = vld [vmem:[%s13752_s23 + $0x30] ss:$24 sps:$4 sm:$0xff]  }
 0x3dd   : > { %2334 = vmatprep.subr.bf16.mxu0 %v14722_v59 }
 0x3df   : > { %2242 = vmatpush1.bf16.msra.mxu1 %v14143_v61  ;;  %v14742_v61 = vld [vmem:[%s13752_s23 + $0x4] ss:$24 sps:$4 sm:$0xff]  }
 0x3e0   : > { %2243 = vmatprep.subr.bf16.mxu1 %v14147_v6  ;;  %2335 = vmatpush1.bf16.msra.mxu0 %v14728_v63  ;;  %v14748_v6 = vld [vmem:[%s13752_s23] ss:$24 sps:$4 sm:$0xff]  }
 0x3e1   : > { %2336 = vmatprep.subr.bf16.mxu0 %v14732_v2  ;;  %16624 = vst [vmem:[#allocation62_spill] sm:$0xff] %v14748_v6 }
 0x3e3   : > { %2244 = vmatpush1.bf16.msra.mxu1 %v14153_v8  ;;  %v14752_v8 = vld [vmem:[%s13752_s23 + $0x2d4] ss:$24 sps:$4 sm:$0xff]  }
 0x3e4   : > { %2245 = vmatprep.subr.bf16.mxu1 %v14157_v11  ;;  %2337 = vmatpush1.bf16.msra.mxu0 %v14738_v54  ;;  %v14758_v11 = vld [vmem:[%s13752_s23 + $0x2d0] ss:$24 sps:$4 sm:$0xff]  }
 0x3e5   : > { %2338 = vmatprep.subr.bf16.mxu0 %v14742_v61  ;;  %16625 = vst [vmem:[#allocation64_spill] sm:$0xff] %v14758_v11 }
 0x3e7   : > { %2246 = vmatpush1.bf16.msra.mxu1 %v14163_v13  ;;  %v14762_v13 = vld [vmem:[%s13752_s23 + $0x2a4] ss:$24 sps:$4 sm:$0xff]  }
 0x3e8   : > { %2247 = vmatprep.subr.bf16.mxu1 %v14167_v15  ;;  %2339 = vmatpush1.bf16.msra.mxu0 %v14748_v6  ;;  %v14768_v15 = vld [vmem:[%s13752_s23 + $0x2a0] ss:$24 sps:$4 sm:$0xff]  }
 0x3e9   : > { %2340 = vmatprep.subr.bf16.mxu0 %v14752_v8  ;;  %16626 = vst [vmem:[#allocation66_spill] sm:$0xff] %v14768_v15 }
 0x3eb   : > { %2248 = vmatpush2.bf16.msra.mxu1 %v14173_v17  ;;  %v14772_v17 = vld [vmem:[%s13752_s23 + $0x274] ss:$24 sps:$4 sm:$0xff]  }
 0x3ec   : > { %2249 = vmatprep.subr.bf16.mxu1 %v14177_v20  ;;  %2341 = vmatpush2.bf16.msra.mxu0 %v14758_v11  ;;  %v14778_v20 = vld [vmem:[%s13752_s23 + $0x270] ss:$24 sps:$4 sm:$0xff]  }
 0x3ed   : > { %2342 = vmatprep.subr.bf16.mxu0 %v14762_v13  ;;  %16627 = vst [vmem:[#allocation68_spill] sm:$0xff] %v14778_v20 }
 0x3ef   : > { %2250 = vmatpush2.bf16.msra.mxu1 %v14183_v22  ;;  %v14782_v22 = vld [vmem:[%s13752_s23 + $0x244] ss:$24 sps:$4 sm:$0xff]  }
 0x3f0   : > { %2251 = vmatprep.subr.bf16.mxu1 %v14187_v24  ;;  %2343 = vmatpush2.bf16.msra.mxu0 %v14768_v15  ;;  %16628 = vst [vmem:[#allocation90_spill] sm:$0xff] %v14782_v22  ;;  %v14788_v24 = vld [vmem:[%s13752_s23 + $0x240] ss:$24 sps:$4 sm:$0xff]  }
 0x3f1   : > { %2344 = vmatprep.subr.bf16.mxu0 %v14772_v17  ;;  %16629 = vst [vmem:[#allocation71_spill] sm:$0xff] %v14788_v24 }
 0x3f3   : > { %2252 = vmatpush2.bf16.msra.mxu1 %v14193_v26  ;;  %v14792_v26 = vld [vmem:[%s13752_s23 + $0x214] ss:$24 sps:$4 sm:$0xff]  }
 0x3f4   : > { %2253 = vmatprep.subr.bf16.mxu1 %v16571_v32  ;;  %2345 = vmatpush2.bf16.msra.mxu0 %v14778_v20  ;;  %16630 = vst [vmem:[#allocation91_spill] sm:$0xff] %v14792_v26  ;;  %v14818_v32 = vld [vmem:[%s13752_s23 + $0x1b0] ss:$24 sps:$4 sm:$0xff]  }
 0x3f5   : > { %2346 = vmatprep.subr.bf16.mxu0 %v14782_v22  ;;  %16635 = vst [vmem:[#allocation80_spill] sm:$0xff] %v14818_v32 }
 0x3f7   : > { %2254 = vmatpush2.bf16.msra.mxu1 %v14203_v30  ;;  %v14802_v30 = vld [vmem:[%s13752_s23 + $0x1e4] ss:$24 sps:$4 sm:$0xff]  }
 0x3f8   : > { %2255 = vmatprep.subr.bf16.mxu1 %v16573_v55  ;;  %2347 = vmatpush2.bf16.msra.mxu0 %v14788_v24  ;;  %16632 = vst [vmem:[#allocation92_spill] sm:$0xff] %v14802_v30  ;;  %v14832_v55 = vld [vmem:[%s13752_s23 + $0x164] ss:$24 sps:$4 sm:$0xff]  }
 0x3f9   : > { %2348 = vmatprep.subr.bf16.mxu0 %v14792_v26  ;;  %16638 = vst [vmem:[#allocation84_spill] sm:$0xff] %v14832_v55 }
 0x3fb   : > { %2256 = vmatpush2.bf16.msra.mxu1 %v14213_v34  ;;  %v14812_v34 = vld [vmem:[%s13752_s23 + $0x1b4] ss:$24 sps:$4 sm:$0xff]  }
 0x3fc   : > { %2257 = vmatprep.subr.bf16.mxu1 %v16575_v39  ;;  %2349 = vmatpush2.bf16.msra.mxu0 %v14798_v58  ;;  %16634 = vst [vmem:[#allocation94_spill] sm:$0xff] %v14812_v34  ;;  %v16639_v39 = vld [vmem:[#allocation89_spill] sm:$0xff] }
 0x3fd   : > { %2350 = vmatprep.subr.bf16.mxu0 %v14802_v30 }
 0x3ff   : > { %2258 = vmatpush2.bf16.msra.mxu1 %v14223_v28  ;;  %v14822_v28 = vld [vmem:[%s13752_s23 + $0x184] ss:$24 sps:$4 sm:$0xff]  }
 0x400   : > { %2259 = vmatprep.subr.bf16.mxu1 %v14227_v40  ;;  %2351 = vmatpush2.bf16.msra.mxu0 %v14808_v27  ;;  %16636 = vst [vmem:[#allocation82_spill] sm:$0xff] %v14822_v28  ;;  %v14828_v40 = vld [vmem:[%s13752_s23 + $0x180] ss:$24 sps:$4 sm:$0xff]  }
 0x401   : > { %2352 = vmatprep.subr.bf16.mxu0 %v14812_v34  ;;  %16637 = vst [vmem:[#allocation95_spill] sm:$0xff] %v14828_v40 }
 0x403   : > { %2260 = vmatpush2.bf16.msra.mxu1 %v16576_v38  ;;  %v16640_v38 = vld [vmem:[#allocation46_spill] sm:$0xff] }
 0x404   : > { %2261 = vmatprep.subr.bf16.mxu1 %v16577_v44  ;;  %2353 = vmatpush2.bf16.msra.mxu0 %v14818_v32  ;;  %v16641_v44 = vld [vmem:[#allocation47_spill] sm:$0xff] }
 0x405   : > { %2354 = vmatprep.subr.bf16.mxu0 %v14822_v28 }
 0x407   : > { %2262 = vmatpush2.bf16.msra.mxu1 %v16580_v48  ;;  %v16642_v48 = vld [vmem:[#allocation48_spill] sm:$0xff] }
 0x408   : > { %2365 = vmatprep.subr.bf16.mxu1 %v14582_v19  ;;  %2355 = vmatpush2.bf16.msra.mxu0 %v14828_v40 }
 0x409   : > { %2406 = vmatprep.subr.bf16.mxu0 %v14832_v55 }
 0x40a   : > { %2264 = vmatmul.mubr.bf16.vlgmr.msra.gmra.mxu1 %v14680_v50  ;;  %v14888_v50 = vld [vmem:[%s13752_s23 + $0x24c] ss:$24 sps:$4 sm:$0xff]  }
 0x40b   : > { %2366 = vmatpush1.bf16.msra.mxu1 %v14589_v37  ;;  %16658 = vst [vmem:[#allocation70_spill] sm:$0xff] %v14888_v50 }
 0x40c   : > { %2367 = vmatprep.subr.bf16.mxu1 %v14593_v35 }
 0x40f   : > { %2368 = vmatpush1.bf16.msra.mxu1 %v16639_v39 }
 0x410   : > { %2369 = vmatprep.subr.bf16.mxu1 %v16640_v38 }
 0x413   : > { %2370 = vmatpush1.bf16.msra.mxu1 %v16641_v44 }
 0x414   : > { %2371 = vmatprep.subr.bf16.mxu1 %v16642_v48 }
 0x417   : > { %2372 = vmatpush1.bf16.msra.mxu1 %v16643_v7 }
 0x418   : > { %2373 = vmatprep.subr.bf16.mxu1 %v16644_v1 }
 0x41b   : > { %2374 = vmatpush1.bf16.msra.mxu1 %v16645_v3 }
 0x41c   : > { %2375 = vmatprep.subr.bf16.mxu1 %v16646_v12  ;;  %v16670_v12 = vld [vmem:[#allocation106_spill] sm:$0xff] }
 0x41f   : > { %2376 = vmatpush1.bf16.msra.mxu1 %v16647_v56  ;;  %v16669_v56 = vld [vmem:[#allocation104_spill] sm:$0xff] }
 0x420   : > { %2377 = vmatprep.subr.bf16.mxu1 %v14848_v9 }
 0x423   : > { %2378 = vmatpush1.bf16.msra.mxu1 %v14852_v31 }
 0x424   : > { %2379 = vmatprep.subr.bf16.mxu1 %v14856_v41 }
 0x427   : > { %2380 = vmatpush1.bf16.msra.mxu1 %v14860_v60 }
 0x428   : > { %2381 = vmatprep.subr.bf16.mxu1 %v14864_v46 }
 0x42b   : > { %2382 = vmatpush2.bf16.msra.mxu1 %v14868_v52 }
 0x42c   : > { %2383 = vmatprep.subr.bf16.mxu1 %v14872_v57 }
 0x42f   : > { %2384 = vmatpush2.bf16.msra.mxu1 %v14876_v4  ;;  %v14904_v4 = vld [vmem:[%s13752_s23 + $0x1ec] ss:$24 sps:$4 sm:$0xff]  }
 0x430   : > { %2385 = vmatprep.subr.bf16.mxu1 %v14880_v42  ;;  %v14900_v42 = vld [vmem:[%s13752_s23 + $0x218] ss:$24 sps:$4 sm:$0xff]   ;;  %16662 = vst [vmem:[#allocation76_spill] sm:$0xff] %v14904_v4 }
 0x431   : > { %16661 = vst [vmem:[#allocation75_spill] sm:$0xff] %v14900_v42 }
 0x433   : > { %2386 = vmatpush2.bf16.msra.mxu1 %v14884_v14  ;;  %v14908_v14 = vld [vmem:[%s13752_s23 + $0x1e8] ss:$24 sps:$4 sm:$0xff]  }
 0x434   : > { %2387 = vmatprep.subr.bf16.mxu1 %v14888_v50  ;;  %16663 = vst [vmem:[#allocation77_spill] sm:$0xff] %v14908_v14  ;;  %v14912_v50 = vld [vmem:[%s13752_s23 + $0x1bc] ss:$24 sps:$4 sm:$0xff]  }
 0x435   : > { %16664 = vst [vmem:[#allocation78_spill] sm:$0xff] %v14912_v50 }
 0x437   : > { %2388 = vmatpush2.bf16.msra.mxu1 %v14892_v33  ;;  %v14916_v33 = vld [vmem:[%s13752_s23 + $0x1b8] ss:$24 sps:$4 sm:$0xff]  }
 0x438   : > { %2389 = vmatprep.subr.bf16.mxu1 %v14896_v5  ;;  %16665 = vst [vmem:[#allocation79_spill] sm:$0xff] %v14916_v33  ;;  %v14920_v5 = vld [vmem:[%s13752_s23 + $0x18c] ss:$24 sps:$4 sm:$0xff]  }
 0x439   : > { %16666 = vst [vmem:[#allocation81_spill] sm:$0xff] %v14920_v5 }
 0x43b   : > { %2390 = vmatpush2.bf16.msra.mxu1 %v14900_v42  ;;  %v14924_v42 = vld [vmem:[%s13752_s23 + $0x188] ss:$24 sps:$4 sm:$0xff]  }
 0x43c   : > { %2391 = vmatprep.subr.bf16.mxu1 %v14904_v4  ;;  %16667 = vst [vmem:[#allocation83_spill] sm:$0xff] %v14924_v42  ;;  %v16668_v4 = vld [vmem:[#allocation56_spill] sm:$0xff] }
 0x43f   : > { %2392 = vmatpush2.bf16.msra.mxu1 %v14908_v14 }
 0x440   : > { %2393 = vmatprep.subr.bf16.mxu1 %v14912_v50 }
 0x443   : > { %2394 = vmatpush2.bf16.msra.mxu1 %v14916_v33 }
 0x444   : > { %2395 = vmatprep.subr.bf16.mxu1 %v14920_v5 }
 0x447   : > { %2396 = vmatpush2.bf16.msra.mxu1 %v14924_v42 }
 0x448   : > { %2499 = vmatprep.subr.bf16.mxu1 %v16668_v4  ;;  %v14935_v4 = vld [vmem:[%s16482_s16] sm:$0xff] }
 0x449   : > { %16671 = vst [vmem:[#allocation85_spill] sm:$0xff] %v14935_v4  ;;  %vm2489_vm4 = vcmp.eq.s32.totalorder %v14935_v4, 3 }
 0x48a   : > { %v2183_v57 = vpop.f32.mrf.mxu1  ;;  %v2224_v14 = vpop.f32.mrf.mxu0 }
 0x48b   : > { %v2184_v33 = vadd.f32 %v2183_v57, %v14462_v25 }
 0x48c   : > { %v2185_v52 = vpop.f32.mrf.mxu1  ;;  %v2226_v46 = vpop.f32.mrf.mxu0 }
 0x48d   : > { %v2186_v9 = vadd.f32 %v2185_v52, %v14465_v23  ;;  %v2272_v5 = vadd.f32 %v2184_v33, %v16669_v56  ;;  %v16672_v52 = vld [vmem:[#allocation145_spill] sm:$0xff]  ;;  %v16673_v56 = vld [vmem:[#allocation118_spill] sm:$0xff] }
 0x48e   : > { %v2187_v60 = vpop.f32.mrf.mxu1  ;;  %v2228_v50 = vpop.f32.mrf.mxu0  ;;  %v2227_v33 = vadd.f32 %v2226_v46, %v16672_v52  ;;  %v16675_v46 = vld [vmem:[#allocation146_spill] sm:$0xff] }
 0x48f   : > { %v2273_v3 = vadd.f32 %v2186_v9, %v16670_v12  ;;  %v10783_v1 = vmul.f32 -1.442695, %v2272_v5  ;;  %v16674_v5 = vld [vmem:[#allocation120_spill] sm:$0xff] }
 0x490   : > { %v2188_v41 = vpop.f32.mrf.mxu1  ;;  %v2229_v31 = vpop.f32.mrf.mxu0  ;;  %v2275_v9 = vadd.f32 %v2227_v33, %v16674_v5 }
 0x491   : > { %v10784_v60 = vmul.f32 -1.442695, %v2273_v3  ;;  %v2490_v41 = vsel %vm2489_vm4, 1, %v16480_v45  ;;  %12190 = vpow2.f32 %v10783_v1  ;;  %v2225_v31 = vadd.f32 %v2224_v14, %v14475_v18 }
 0x492   : > { %2492 = vperm.xlu1 %11985, %v2490_v41   ;;  %v10786_v50 = vmul.f32 -1.442695, %v2275_v9 }
 0x493   : > { %12192 = vpow2.f32 %v10784_v60  ;;  %v2274_v12 = vadd.f32 %v2225_v31, %v16673_v56 }
 0x495   : > { %v10785_v57 = vmul.f32 -1.442695, %v2274_v12 }
 0x497   : > { %12194 = vpow2.f32 %v10785_v57 }
 0x498   : > { %12196 = vpow2.f32 %v10786_v50  ;;  %v16677_v50 = vld [vmem:[#allocation121_spill] sm:$0xff] }
 0x49e   : > { %v12191_v23 = vpop.eup %12190 }
 0x49f   : > { %v2288_v4 = vadd.f32 1.0, %v12191_v23  ;;  %v16676_v23 = vld [vmem:[#allocation119_spill] sm:$0xff] }
 0x4a0   : > { %v12193_v25 = vpop.eup %12192 }
 0x4a1   : > { %v2289_v3 = vadd.f32 1.0, %v12193_v25  ;;  %12198 = vrcp.f32 %v2288_v4 }
 0x4a3   : > { %12200 = vrcp.f32 %v2289_v3 }
 0x4a4   : > { %v12195_v1 = vpop.eup %12194 }
 0x4a5   : > { %v12197_v41 = vpop.eup %12196  ;;  %v2290_v14 = vadd.f32 1.0, %v12195_v1 }
 0x4a6   : > { %v2291_v18 = vadd.f32 1.0, %v12197_v41 }
 0x4a7   : > { %12202 = vrcp.f32 %v2290_v14 }
 0x4a8   : > { %12204 = vrcp.f32 %v2291_v18 }
 0x4ae   : > { %v12199_v31 = vpop.eup %12198 }
 0x4b0   : > { %v12201_v5 = vpop.eup %12200 }
 0x4b4   : > { %v12203_v1 = vpop.eup %12202 }
 0x4b5   : > { %v12205_v41 = vpop.eup %12204 }
 0x4b6   : > { %v2307_v14 = vsub.f32 1.0, %v12205_v41 }
 0x4ca   : > { %v2265_v60 = vpop.f32.mrf.mxu1 }
 0x4cb   : > { %v2266_v52 = vadd.f32 %v2265_v60, %v16675_v46  ;;  %v2306_v60 = vsub.f32 1.0, %v12203_v1 }
 0x4cc   : > { %v2267_v56 = vpop.f32.mrf.mxu1 }
 0x4cd   : > { %v2300_v33 = vmul.f32 %v12199_v31, %v2266_v52  ;;  %v2268_v12 = vadd.f32 %v2267_v56, %v14491_v29  ;;  %v2310_v31 = vmul.f32 %v12203_v1, %v14672_v10  ;;  %v14992_v1 = vld [vmem:[%s13752_s23 + $0xd0] ss:$24 sps:$4 sm:$0xff]   ;;  %v15046_v10 = vld [vmem:[%s13752_s23 + $0x2b4] ss:$24 sps:$4 sm:$0xff]  }
 0x4ce   : > { %v2269_v9 = vpop.f32.mrf.mxu1  ;;  %16681 = vst [vmem:[#allocation116_spill] sm:$0xff] %v15046_v10 }
 0x4cf   : > { %v2302_v25 = vadd.f32 %v2300_v33, %v16676_v23  ;;  %v2301_v4 = vmul.f32 %v12201_v5, %v2268_v12  ;;  %v2311_v33 = vmul.f32 %v12205_v41, %v14674_v47  ;;  %v14996_v41 = vld [vmem:[%s13752_s23 + $0xa4] ss:$24 sps:$4 sm:$0xff]   ;;  %v15042_v47 = vld [vmem:[%s13752_s23 + $0x2e0] ss:$24 sps:$4 sm:$0xff]  }
 0x4d0   : > { %v2270_v57 = vpop.f32.mrf.mxu1 }
 0x4d1   : > { %12206 = vtanh.f32 %v2302_v25  ;;  %v2303_v3 = vadd.f32 %v2301_v4, %v16677_v50  ;;  %v14966_v25 = vld [vmem:[%s13752_s23 + $0x134] ss:$24 sps:$4 sm:$0xff]   ;;  %v14972_v4 = vld [vmem:[%s13752_s23 + $0x130] ss:$24 sps:$4 sm:$0xff]   ;;  %v14976_v57 = vld [vmem:[%s13752_s23 + $0x104] ss:$24 sps:$4 sm:$0xff]  }
 0x4d2   : > { %v14982_v50 = vld [vmem:[%s13752_s23 + $0x100] ss:$24 sps:$4 sm:$0xff]  }
 0x4d3   : > { %12208 = vtanh.f32 %v2303_v3  ;;  %v14986_v3 = vld [vmem:[%s13752_s23 + $0xd4] ss:$24 sps:$4 sm:$0xff]  }
 0x4de   : > { %v12207_v46 = vpop.eup %12206 }
 0x4df   : > { %v2308_v52 = vmul.f32 %v12207_v46, %v2306_v60  ;;  %v14962_v46 = vld [vmem:[%s13752_s23 + $0x160] ss:$24 sps:$4 sm:$0xff]  }
 0x4e0   : > { %v12209_v56 = vpop.eup %12208  ;;  %v15002_v60 = vld [vmem:[%s13752_s23 + $0xa0] ss:$24 sps:$4 sm:$0xff]  }
 0x4e1   : > { %v2309_v18 = vmul.f32 %v12209_v56, %v2307_v14  ;;  %v14949_v12 = vadd.f32 %v2310_v31, %v2308_v52  ;;  %v15006_v14 = vld [vmem:[%s13752_s23 + $0x74] ss:$24 sps:$4 sm:$0xff]   ;;  %v15012_v52 = vld [vmem:[%s13752_s23 + $0x70] ss:$24 sps:$4 sm:$0xff]   ;;  %v15016_v31 = vld [vmem:[%s13752_s23 + $0x44] ss:$24 sps:$4 sm:$0xff]  }
 0x4e2   : > { %v15022_v56 = vld [vmem:[%s13752_s23 + $0x40] ss:$24 sps:$4 sm:$0xff]  }
 0x4e3   : > { %16678 = vst [vmem:[#allocation100_spill] sm:$0xff] %v14949_v12  ;;  %v14951_v5 = vadd.f32 %v2311_v33, %v2309_v18  ;;  %v14957_v23 = vpack.c.bf16 %v14949_v12, %v14949_v12  ;;  %v15026_v18 = vld [vmem:[%s13752_s23 + $0x14] ss:$24 sps:$4 sm:$0xff]   ;;  %v15032_v33 = vld [vmem:[%s13752_s23 + $0x10] ss:$24 sps:$4 sm:$0xff]  }
 0x4e5   : > { %16679 = vst [vmem:[#allocation102_spill] sm:$0xff] %v14951_v5  ;;  %v2323_v9 = vpack.c.bf16 %v14951_v5, %v14951_v5 }
 0x4e7   : > { %2356 = vmatprep.mubr.bf16.mxu0 %v2323_v9  ;;  %2397 = vmatprep.mubr.bf16.mxu1 %v2323_v9 }
 0x4e8   : > { %2357 = vmatmul.mubr.bf16.vlgmr.msra.gmra.mxu0 %v14957_v23  ;;  %2398 = vmatmul.mubr.bf16.vlgmr.msra.gmra.mxu1 %v14957_v23 }
 0x4e9   : > { %2407 = vmatpush1.bf16.msra.mxu0 %v14962_v46  ;;  %2438 = vmatprep.mubr.bf16.mxu0 %v2323_v9  ;;  %v15036_v9 = vld [vmem:[%s13752_s23 + $0x2e4] ss:$24 sps:$4 sm:$0xff]  }
 0x4ea   : > { %2408 = vmatprep.subr.bf16.mxu0 %v14966_v25  ;;  %2500 = vmatpush1.bf16.msra.mxu1 %v14514_v36  ;;  %16680 = vst [vmem:[#allocation114_spill] sm:$0xff] %v15036_v9 }
 0x4eb   : > { %2501 = vmatprep.subr.bf16.mxu1 %v14518_v51 }
 0x4ed   : > { %2409 = vmatpush1.bf16.msra.mxu0 %v14972_v4 }
 0x4ee   : > { %2410 = vmatprep.subr.bf16.mxu0 %v14976_v57  ;;  %2502 = vmatpush1.bf16.msra.mxu1 %v14524_v21 }
 0x4ef   : > { %2503 = vmatprep.subr.bf16.mxu1 %v14692_v62 }
 0x4f1   : > { %2411 = vmatpush1.bf16.msra.mxu0 %v14982_v50 }
 0x4f2   : > { %2412 = vmatprep.subr.bf16.mxu0 %v14986_v3  ;;  %2504 = vmatpush1.bf16.msra.mxu1 %v14698_v43 }
 0x4f3   : > { %2505 = vmatprep.subr.bf16.mxu1 %v14702_v16 }
 0x4f5   : > { %2413 = vmatpush1.bf16.msra.mxu0 %v14992_v1 }
 0x4f6   : > { %2414 = vmatprep.subr.bf16.mxu0 %v14996_v41  ;;  %2506 = vmatpush1.bf16.msra.mxu1 %v14708_v0 }
 0x4f7   : > { %2507 = vmatprep.subr.bf16.mxu1 %v14712_v49 }
 0x4f9   : > { %2415 = vmatpush1.bf16.msra.mxu0 %v15002_v60 }
 0x4fa   : > { %2416 = vmatprep.subr.bf16.mxu0 %v15006_v14  ;;  %2508 = vmatpush1.bf16.msra.mxu1 %v14718_v53 }
 0x4fb   : > { %2509 = vmatprep.subr.bf16.mxu1 %v14722_v59 }
 0x4fd   : > { %2417 = vmatpush1.bf16.msra.mxu0 %v15012_v52 }
 0x4fe   : > { %2418 = vmatprep.subr.bf16.mxu0 %v15016_v31  ;;  %2510 = vmatpush1.bf16.msra.mxu1 %v14728_v63 }
 0x4ff   : > { %2511 = vmatprep.subr.bf16.mxu1 %v14732_v2 }
 0x501   : > { %2419 = vmatpush1.bf16.msra.mxu0 %v15022_v56 }
 0x502   : > { %2420 = vmatprep.subr.bf16.mxu0 %v15026_v18  ;;  %2512 = vmatpush1.bf16.msra.mxu1 %v14738_v54 }
 0x503   : > { %2513 = vmatprep.subr.bf16.mxu1 %v14742_v61 }
 0x505   : > { %2421 = vmatpush1.bf16.msra.mxu0 %v15032_v33 }
 0x506   : > { %2422 = vmatprep.subr.bf16.mxu0 %v15036_v9  ;;  %2514 = vmatpush1.bf16.msra.mxu1 %v14748_v6  ;;  %v15052_v9 = vld [vmem:[%s13752_s23 + $0x2b0] ss:$24 sps:$4 sm:$0xff]   ;;  %v15056_v6 = vld [vmem:[%s13752_s23 + $0x284] ss:$24 sps:$4 sm:$0xff]  }
 0x507   : > { %2515 = vmatprep.subr.bf16.mxu1 %v14752_v8  ;;  %16682 = vst [vmem:[#allocation115_spill] sm:$0xff] %v15056_v6 }
 0x509   : > { %2423 = vmatpush2.bf16.msra.mxu0 %v15042_v47 }
 0x50a   : > { %2424 = vmatprep.subr.bf16.mxu0 %v15046_v10  ;;  %2516 = vmatpush2.bf16.msra.mxu1 %v14758_v11  ;;  %v15062_v10 = vld [vmem:[%s13752_s23 + $0x280] ss:$24 sps:$4 sm:$0xff]   ;;  %v15066_v11 = vld [vmem:[%s13752_s23 + $0x254] ss:$24 sps:$4 sm:$0xff]  }
 0x50b   : > { %2517 = vmatprep.subr.bf16.mxu1 %v14762_v13  ;;  %16683 = vst [vmem:[#allocation117_spill] sm:$0xff] %v15066_v11 }
 0x50d   : > { %2425 = vmatpush2.bf16.msra.mxu0 %v15052_v9 }
 0x50e   : > { %2426 = vmatprep.subr.bf16.mxu0 %v15056_v6  ;;  %2518 = vmatpush2.bf16.msra.mxu1 %v14768_v15  ;;  %v15072_v6 = vld [vmem:[%s13752_s23 + $0x250] ss:$24 sps:$4 sm:$0xff]   ;;  %v15076_v15 = vld [vmem:[%s13752_s23 + $0x224] ss:$24 sps:$4 sm:$0xff]  }
 0x50f   : > { %2519 = vmatprep.subr.bf16.mxu1 %v14772_v17  ;;  %16684 = vst [vmem:[#allocation104_spill] sm:$0xff] %v15072_v6  ;;  %16685 = vst [vmem:[#allocation106_spill] sm:$0xff] %v15076_v15 }
 0x511   : > { %2427 = vmatpush2.bf16.msra.mxu0 %v15062_v10 }
 0x512   : > { %2428 = vmatprep.subr.bf16.mxu0 %v15066_v11  ;;  %2520 = vmatpush2.bf16.msra.mxu1 %v14778_v20  ;;  %v15082_v11 = vld [vmem:[%s13752_s23 + $0x220] ss:$24 sps:$4 sm:$0xff]   ;;  %v15086_v20 = vld [vmem:[%s13752_s23 + $0x1f4] ss:$24 sps:$4 sm:$0xff]  }
 0x513   : > { %2521 = vmatprep.subr.bf16.mxu1 %v14782_v22  ;;  %16686 = vst [vmem:[#allocation118_spill] sm:$0xff] %v15082_v11  ;;  %16687 = vst [vmem:[#allocation120_spill] sm:$0xff] %v15086_v20 }
 0x515   : > { %2429 = vmatpush2.bf16.msra.mxu0 %v15072_v6  ;;  %v15092_v6 = vld [vmem:[%s13752_s23 + $0x1f0] ss:$24 sps:$4 sm:$0xff]  }
 0x516   : > { %2430 = vmatprep.subr.bf16.mxu0 %v15076_v15  ;;  %2522 = vmatpush2.bf16.msra.mxu1 %v14788_v24  ;;  %16688 = vst [vmem:[#allocation119_spill] sm:$0xff] %v15092_v6  ;;  %v15096_v24 = vld [vmem:[%s13752_s23 + $0x1c4] ss:$24 sps:$4 sm:$0xff]  }
 0x517   : > { %2523 = vmatprep.subr.bf16.mxu1 %v14792_v26  ;;  %16689 = vst [vmem:[#allocation121_spill] sm:$0xff] %v15096_v24 }
 0x519   : > { %2431 = vmatpush2.bf16.msra.mxu0 %v15082_v11  ;;  %v15102_v11 = vld [vmem:[%s13752_s23 + $0x1c0] ss:$24 sps:$4 sm:$0xff]  }
 0x51a   : > { %2432 = vmatprep.subr.bf16.mxu0 %v15086_v20  ;;  %2524 = vmatpush2.bf16.msra.mxu1 %v14798_v58  ;;  %16690 = vst [vmem:[#allocation149_spill] sm:$0xff] %v15102_v11  ;;  %v15106_v20 = vld [vmem:[%s13752_s23 + $0x194] ss:$24 sps:$4 sm:$0xff]  }
 0x51b   : > { %2525 = vmatprep.subr.bf16.mxu1 %v14802_v30  ;;  %16691 = vst [vmem:[#allocation150_spill] sm:$0xff] %v15106_v20 }
 0x51d   : > { %2433 = vmatpush2.bf16.msra.mxu0 %v15092_v6  ;;  %v15112_v6 = vld [vmem:[%s13752_s23 + $0x190] ss:$24 sps:$4 sm:$0xff]  }
 0x51e   : > { %2434 = vmatprep.subr.bf16.mxu0 %v15096_v24  ;;  %2526 = vmatpush2.bf16.msra.mxu1 %v14808_v27  ;;  %16692 = vst [vmem:[#allocation151_spill] sm:$0xff] %v15112_v6 }
 0x51f   : > { %2527 = vmatprep.subr.bf16.mxu1 %v14812_v34  ;;  %v16720_v34 = vld [vmem:[#allocation111_spill] sm:$0xff] }
 0x521   : > { %2435 = vmatpush2.bf16.msra.mxu0 %v15102_v11  ;;  %v16719_v11 = vld [vmem:[#allocation108_spill] sm:$0xff] }
 0x522   : > { %2436 = vmatprep.subr.bf16.mxu0 %v15106_v20  ;;  %2528 = vmatpush2.bf16.msra.mxu1 %v14818_v32  ;;  %v16717_v32 = vld [vmem:[#allocation142_spill] sm:$0xff]  ;;  %v16718_v20 = vld [vmem:[#allocation143_spill] sm:$0xff] }
 0x523   : > { %2529 = vmatprep.subr.bf16.mxu1 %v14822_v28 }
 0x525   : > { %2437 = vmatpush2.bf16.msra.mxu0 %v15112_v6 }
 0x526   : > { %2540 = vmatprep.subr.bf16.mxu0 %v14582_v19  ;;  %2530 = vmatpush2.bf16.msra.mxu1 %v14828_v40  ;;  %v16693_v19 = vld [vmem:[#allocation50_spill] sm:$0xff]  ;;  %v16694_v40 = vld [vmem:[#allocation51_spill] sm:$0xff] }
 0x527   : > { %2581 = vmatprep.subr.bf16.mxu1 %v14832_v55  ;;  %v16695_v55 = vld [vmem:[#allocation52_spill] sm:$0xff] }
 0x528   : > { %2439 = vmatmul.mubr.bf16.vlgmr.msra.gmra.mxu0 %v14957_v23  ;;  %v16696_v23 = vld [vmem:[#allocation54_spill] sm:$0xff] }
 0x529   : > { %2541 = vmatpush1.bf16.msra.mxu0 %v14589_v37  ;;  %v16697_v37 = vld [vmem:[#allocation86_spill] sm:$0xff] }
 0x52a   : > { %2542 = vmatprep.subr.bf16.mxu0 %v14593_v35  ;;  %v16698_v35 = vld [vmem:[#allocation53_spill] sm:$0xff] }
 0x52d   : > { %2543 = vmatpush1.bf16.msra.mxu0 %v16639_v39  ;;  %v16699_v39 = vld [vmem:[#allocation55_spill] sm:$0xff] }
 0x52e   : > { %2544 = vmatprep.subr.bf16.mxu0 %v16640_v38  ;;  %v16700_v38 = vld [vmem:[#allocation57_spill] sm:$0xff] }
 0x531   : > { %2545 = vmatpush1.bf16.msra.mxu0 %v16641_v44  ;;  %v16701_v44 = vld [vmem:[#allocation59_spill] sm:$0xff] }
 0x532   : > { %2546 = vmatprep.subr.bf16.mxu0 %v16642_v48  ;;  %v16702_v48 = vld [vmem:[#allocation61_spill] sm:$0xff] }
 0x535   : > { %2547 = vmatpush1.bf16.msra.mxu0 %v16643_v7  ;;  %v16703_v7 = vld [vmem:[#allocation63_spill] sm:$0xff] }
 0x536   : > { %2548 = vmatprep.subr.bf16.mxu0 %v16693_v19  ;;  %v16704_v19 = vld [vmem:[#allocation65_spill] sm:$0xff] }
 0x539   : > { %2549 = vmatpush1.bf16.msra.mxu0 %v16694_v40  ;;  %v16705_v40 = vld [vmem:[#allocation67_spill] sm:$0xff] }
 0x53a   : > { %2550 = vmatprep.subr.bf16.mxu0 %v16695_v55  ;;  %v16706_v55 = vld [vmem:[#allocation69_spill] sm:$0xff] }
 0x53d   : > { %2551 = vmatpush1.bf16.msra.mxu0 %v16696_v23  ;;  %v16707_v23 = vld [vmem:[#allocation70_spill] sm:$0xff] }
 0x53e   : > { %2552 = vmatprep.subr.bf16.mxu0 %v16697_v37  ;;  %v16708_v37 = vld [vmem:[#allocation72_spill] sm:$0xff] }
 0x541   : > { %2553 = vmatpush1.bf16.msra.mxu0 %v16698_v35  ;;  %v16709_v35 = vld [vmem:[#allocation74_spill] sm:$0xff] }
 0x542   : > { %2554 = vmatprep.subr.bf16.mxu0 %v16699_v39  ;;  %v16710_v39 = vld [vmem:[#allocation75_spill] sm:$0xff] }
 0x545   : > { %2555 = vmatpush1.bf16.msra.mxu0 %v16700_v38  ;;  %v16711_v38 = vld [vmem:[#allocation76_spill] sm:$0xff] }
 0x546   : > { %2556 = vmatprep.subr.bf16.mxu0 %v16701_v44  ;;  %v16712_v44 = vld [vmem:[#allocation77_spill] sm:$0xff] }
 0x549   : > { %2557 = vmatpush2.bf16.msra.mxu0 %v16702_v48  ;;  %v16713_v48 = vld [vmem:[#allocation78_spill] sm:$0xff] }
 0x54a   : > { %2558 = vmatprep.subr.bf16.mxu0 %v16703_v7  ;;  %v16714_v7 = vld [vmem:[#allocation79_spill] sm:$0xff] }
 0x54d   : > { %2559 = vmatpush2.bf16.msra.mxu0 %v16704_v19  ;;  %v16715_v19 = vld [vmem:[#allocation81_spill] sm:$0xff] }
 0x54e   : > { %2560 = vmatprep.subr.bf16.mxu0 %v16705_v40 }
 0x551   : > { %2561 = vmatpush2.bf16.msra.mxu0 %v16706_v55  ;;  %v16716_v55 = vld [vmem:[#allocation56_spill] sm:$0xff] }
 0x552   : > { %2562 = vmatprep.subr.bf16.mxu0 %v16707_v23 }
 0x555   : > { %2563 = vmatpush2.bf16.msra.mxu0 %v16708_v37 }
 0x556   : > { %2564 = vmatprep.subr.bf16.mxu0 %v16709_v35 }
 0x559   : > { %2565 = vmatpush2.bf16.msra.mxu0 %v16710_v39 }
 0x55a   : > { %2566 = vmatprep.subr.bf16.mxu0 %v16711_v38 }
 0x55d   : > { %2567 = vmatpush2.bf16.msra.mxu0 %v16712_v44 }
 0x55e   : > { %2568 = vmatprep.subr.bf16.mxu0 %v16713_v48 }
 0x561   : > { %2569 = vmatpush2.bf16.msra.mxu0 %v16714_v7 }
 0x562   : > { %2570 = vmatprep.subr.bf16.mxu0 %v16715_v19 }
 0x565   : > { %2571 = vmatpush2.bf16.msra.mxu0 %v14924_v42  ;;  %v16721_v42 = vld [vmem:[#allocation85_spill] sm:$0xff] }
 0x566   : > { %2674 = vmatprep.subr.bf16.mxu0 %v16716_v55  ;;  %vm2664_vm5 = vcmp.eq.s32.totalorder %v16721_v42, 4  ;;  %vm2839_vm6 = vcmp.eq.s32.totalorder %v16721_v42, 5  ;;  %vm3014_vm7 = vcmp.eq.s32.totalorder %v16721_v42, 6 }
 0x567   : > { %v2665_v24 = vsel %vm2664_vm5, 1, %v16480_v45 }
 0x568   : > { %2667 = vperm.xlu0 %11984, %v2665_v24  }
 0x5a8   : > { %v2358_v23 = vpop.f32.mrf.mxu0  ;;  %v2399_v37 = vpop.f32.mrf.mxu1 }
 0x5a9   : > { %v2359_v44 = vadd.f32 %v2358_v23, %v16717_v32  ;;  %v16724_v23 = vld [vmem:[#allocation122_spill] sm:$0xff] }
 0x5aa   : > { %v2360_v40 = vpop.f32.mrf.mxu0  ;;  %v2401_v35 = vpop.f32.mrf.mxu1 }
 0x5ab   : > { %v2361_v48 = vadd.f32 %v2360_v40, %v16718_v20  ;;  %v2447_v7 = vadd.f32 %v2359_v44, %v16719_v11  ;;  %v16725_v40 = vld [vmem:[#allocation124_spill] sm:$0xff] }
 0x5ac   : > { %v2362_v6 = vpop.f32.mrf.mxu0  ;;  %v2403_v39 = vpop.f32.mrf.mxu1 }
 0x5ad   : > { %v2448_v19 = vadd.f32 %v2361_v48, %v16720_v34  ;;  %v10787_v27 = vmul.f32 -1.442695, %v2447_v7  ;;  %v16722_v6 = vld [vmem:[#allocation144_spill] sm:$0xff] }
 0x5ae   : > { %v2363_v28 = vpop.f32.mrf.mxu0  ;;  %v2404_v38 = vpop.f32.mrf.mxu1  ;;  %v2400_v39 = vadd.f32 %v2399_v37, %v16722_v6 }
 0x5af   : > { %v10788_v55 = vmul.f32 -1.442695, %v2448_v19  ;;  %12210 = vpow2.f32 %v10787_v27  ;;  %v16723_v28 = vld [vmem:[#allocation145_spill] sm:$0xff] }
 0x5b0   : > { %v2402_v38 = vadd.f32 %v2401_v35, %v16723_v28  ;;  %v2449_v32 = vadd.f32 %v2400_v39, %v16724_v23  ;;  %v16726_v35 = vld [vmem:[#allocation146_spill] sm:$0xff] }
 0x5b1   : > { %12212 = vpow2.f32 %v10788_v55 }
 0x5b2   : > { %v2450_v20 = vadd.f32 %v2402_v38, %v16725_v40  ;;  %v10789_v11 = vmul.f32 -1.442695, %v2449_v32 }
 0x5b4   : > { %v10790_v44 = vmul.f32 -1.442695, %v2450_v20  ;;  %12214 = vpow2.f32 %v10789_v11  ;;  %v16727_v11 = vld [vmem:[#allocation123_spill] sm:$0xff] }
 0x5b6   : > { %12216 = vpow2.f32 %v10790_v44 }
 0x5bc   : > { %v12211_v34 = vpop.eup %12210 }
 0x5bd   : > { %v2463_v7 = vadd.f32 1.0, %v12211_v34 }
 0x5be   : > { %v12213_v48 = vpop.eup %12212 }
 0x5bf   : > { %v2464_v19 = vadd.f32 1.0, %v12213_v48  ;;  %12218 = vrcp.f32 %v2463_v7  ;;  %v16728_v7 = vld [vmem:[#allocation125_spill] sm:$0xff] }
 0x5c1   : > { %12220 = vrcp.f32 %v2464_v19  ;;  %v12215_v24 = vpop.eup %12214 }
 0x5c2   : > { %v2465_v37 = vadd.f32 1.0, %v12215_v24 }
 0x5c3   : > { %v12217_v27 = vpop.eup %12216 }
 0x5c4   : > { %v2466_v6 = vadd.f32 1.0, %v12217_v27  ;;  %12222 = vrcp.f32 %v2465_v37 }
 0x5c6   : > { %12224 = vrcp.f32 %v2466_v6 }
 0x5cc   : > { %v12219_v39 = vpop.eup %12218 }
 0x5ce   : > { %v12221_v38 = vpop.eup %12220 }
 0x5d1   : > { %v12223_v24 = vpop.eup %12222 }
 0x5d3   : > { %v12225_v27 = vpop.eup %12224 }
 0x5d4   : > { %v2482_v45 = vsub.f32 1.0, %v12225_v27  ;;  %v2486_v6 = vmul.f32 %v12225_v27, %v14951_v5  ;;  %v16743_v27 = vld [vmem:[#allocation119_spill] sm:$0xff] }
 0x5d5   : > { %v16751_v5 = vld [vmem:[#allocation151_spill] sm:$0xff] }
 0x5e8   : > { %v2440_v55 = vpop.f32.mrf.mxu0 }
 0x5e9   : > { %v2441_v28 = vadd.f32 %v2440_v55, %v16726_v35  ;;  %v2481_v55 = vsub.f32 1.0, %v12223_v24 }
 0x5ea   : > { %v2442_v23 = vpop.f32.mrf.mxu0 }
 0x5eb   : > { %v2475_v32 = vmul.f32 %v12219_v39, %v2441_v28  ;;  %v2443_v20 = vadd.f32 %v2442_v23, %v14491_v29  ;;  %v2485_v28 = vmul.f32 %v12223_v24, %v14949_v12  ;;  %v16742_v24 = vld [vmem:[#allocation120_spill] sm:$0xff]  ;;  %v16752_v12 = vld [vmem:[#allocation87_spill] sm:$0xff] }
 0x5ec   : > { %v2444_v40 = vpop.f32.mrf.mxu0 }
 0x5ed   : > { %v2477_v44 = vadd.f32 %v2475_v32, %v16727_v11  ;;  %v2476_v34 = vmul.f32 %v12221_v38, %v2443_v20  ;;  %v16736_v11 = vld [vmem:[#allocation66_spill] sm:$0xff] }
 0x5ee   : > { %v2445_v48 = vpop.f32.mrf.mxu0 }
 0x5ef   : > { %12226 = vtanh.f32 %v2477_v44  ;;  %v2478_v19 = vadd.f32 %v2476_v34, %v16728_v7  ;;  %v16737_v44 = vld [vmem:[#allocation117_spill] sm:$0xff]  ;;  %v16738_v34 = vld [vmem:[#allocation68_spill] sm:$0xff]  ;;  %v16740_v7 = vld [vmem:[#allocation71_spill] sm:$0xff] }
 0x5f0   : > { %v16739_v48 = vld [vmem:[#allocation104_spill] sm:$0xff] }
 0x5f1   : > { %12228 = vtanh.f32 %v2478_v19  ;;  %v16741_v19 = vld [vmem:[#allocation118_spill] sm:$0xff] }
 0x5fc   : > { %v12227_v35 = vpop.eup %12226 }
 0x5fd   : > { %v2483_v37 = vmul.f32 %v12227_v35, %v2481_v55  ;;  %v16735_v35 = vld [vmem:[#allocation115_spill] sm:$0xff]  ;;  %v16744_v55 = vld [vmem:[#allocation121_spill] sm:$0xff] }
 0x5fe   : > { %v12229_v39 = vpop.eup %12228 }
 0x5ff   : > { %v2484_v23 = vmul.f32 %v12229_v39, %v2482_v45  ;;  %v15167_v40 = vadd.f32 %v2485_v28, %v2483_v37  ;;  %v16731_v45 = vld [vmem:[#allocation114_spill] sm:$0xff]  ;;  %v16745_v37 = vld [vmem:[#allocation93_spill] sm:$0xff] }
 0x600   : > { %v16746_v28 = vld [vmem:[#allocation94_spill] sm:$0xff]  ;;  %v16747_v39 = vld [vmem:[#allocation149_spill] sm:$0xff] }
 0x601   : > { %16729 = vst [vmem:[#allocation108_spill] sm:$0xff] %v15167_v40  ;;  %v15169_v32 = vadd.f32 %v2486_v6, %v2484_v23  ;;  %v15175_v38 = vpack.c.bf16 %v15167_v40, %v15167_v40  ;;  %v16748_v23 = vld [vmem:[#allocation150_spill] sm:$0xff]  ;;  %v16749_v6 = vld [vmem:[#allocation80_spill] sm:$0xff] }
 0x603   : > { %16730 = vst [vmem:[#allocation111_spill] sm:$0xff] %v15169_v32  ;;  %v2498_v20 = vpack.c.bf16 %v15169_v32, %v15169_v32 }
 0x605   : > { %2531 = vmatprep.mubr.bf16.mxu1 %v2498_v20  ;;  %2572 = vmatprep.mubr.bf16.mxu0 %v2498_v20 }
 0x606   : > { %2532 = vmatmul.mubr.bf16.vlgmr.msra.gmra.mxu1 %v15175_v38  ;;  %2573 = vmatmul.mubr.bf16.vlgmr.msra.gmra.mxu0 %v15175_v38 }
 0x607   : > { %2582 = vmatpush1.bf16.msra.mxu1 %v14962_v46  ;;  %2613 = vmatprep.mubr.bf16.mxu1 %v2498_v20  ;;  %v16750_v20 = vld [vmem:[#allocation82_spill] sm:$0xff] }
 0x608   : > { %2583 = vmatprep.subr.bf16.mxu1 %v14966_v25  ;;  %2675 = vmatpush1.bf16.msra.mxu0 %v14514_v36  ;;  %v16732_v36 = vld [vmem:[#allocation62_spill] sm:$0xff] }
 0x609   : > { %2676 = vmatprep.subr.bf16.mxu0 %v14518_v51  ;;  %v16733_v51 = vld [vmem:[#allocation116_spill] sm:$0xff] }
 0x60b   : > { %2584 = vmatpush1.bf16.msra.mxu1 %v14972_v4 }
 0x60c   : > { %2585 = vmatprep.subr.bf16.mxu1 %v14976_v57  ;;  %2677 = vmatpush1.bf16.msra.mxu0 %v14524_v21  ;;  %v16734_v21 = vld [vmem:[#allocation64_spill] sm:$0xff] }
 0x60d   : > { %2678 = vmatprep.subr.bf16.mxu0 %v14692_v62 }
 0x60f   : > { %2586 = vmatpush1.bf16.msra.mxu1 %v14982_v50 }
 0x610   : > { %2587 = vmatprep.subr.bf16.mxu1 %v14986_v3  ;;  %2679 = vmatpush1.bf16.msra.mxu0 %v14698_v43 }
 0x611   : > { %2680 = vmatprep.subr.bf16.mxu0 %v14702_v16 }
 0x613   : > { %2588 = vmatpush1.bf16.msra.mxu1 %v14992_v1 }
 0x614   : > { %2589 = vmatprep.subr.bf16.mxu1 %v14996_v41  ;;  %2681 = vmatpush1.bf16.msra.mxu0 %v14708_v0 }
 0x615   : > { %2682 = vmatprep.subr.bf16.mxu0 %v14712_v49 }
 0x617   : > { %2590 = vmatpush1.bf16.msra.mxu1 %v15002_v60 }
 0x618   : > { %2591 = vmatprep.subr.bf16.mxu1 %v15006_v14  ;;  %2683 = vmatpush1.bf16.msra.mxu0 %v14718_v53 }
 0x619   : > { %2684 = vmatprep.subr.bf16.mxu0 %v14722_v59 }
 0x61b   : > { %2592 = vmatpush1.bf16.msra.mxu1 %v15012_v52 }
 0x61c   : > { %2593 = vmatprep.subr.bf16.mxu1 %v15016_v31  ;;  %2685 = vmatpush1.bf16.msra.mxu0 %v14728_v63 }
 0x61d   : > { %2686 = vmatprep.subr.bf16.mxu0 %v14732_v2 }
 0x61f   : > { %2594 = vmatpush1.bf16.msra.mxu1 %v15022_v56 }
 0x620   : > { %2595 = vmatprep.subr.bf16.mxu1 %v15026_v18  ;;  %2687 = vmatpush1.bf16.msra.mxu0 %v14738_v54 }
 0x621   : > { %2688 = vmatprep.subr.bf16.mxu0 %v14742_v61 }
 0x623   : > { %2596 = vmatpush1.bf16.msra.mxu1 %v15032_v33 }
 0x624   : > { %2597 = vmatprep.subr.bf16.mxu1 %v16731_v45  ;;  %2689 = vmatpush1.bf16.msra.mxu0 %v16732_v36 }
 0x625   : > { %2690 = vmatprep.subr.bf16.mxu0 %v14752_v8 }
 0x627   : > { %2598 = vmatpush2.bf16.msra.mxu1 %v15042_v47 }
 0x628   : > { %2599 = vmatprep.subr.bf16.mxu1 %v16733_v51  ;;  %2691 = vmatpush2.bf16.msra.mxu0 %v16734_v21 }
 0x629   : > { %2692 = vmatprep.subr.bf16.mxu0 %v14762_v13 }
 0x62b   : > { %2600 = vmatpush2.bf16.msra.mxu1 %v15052_v9 }
 0x62c   : > { %2601 = vmatprep.subr.bf16.mxu1 %v16735_v35  ;;  %2693 = vmatpush2.bf16.msra.mxu0 %v16736_v11 }
 0x62d   : > { %2694 = vmatprep.subr.bf16.mxu0 %v14772_v17 }
 0x62f   : > { %2602 = vmatpush2.bf16.msra.mxu1 %v15062_v10 }
 0x630   : > { %2603 = vmatprep.subr.bf16.mxu1 %v16737_v44  ;;  %2695 = vmatpush2.bf16.msra.mxu0 %v16738_v34 }
 0x631   : > { %2696 = vmatprep.subr.bf16.mxu0 %v14782_v22 }
 0x633   : > { %2604 = vmatpush2.bf16.msra.mxu1 %v16739_v48 }
 0x634   : > { %2605 = vmatprep.subr.bf16.mxu1 %v15076_v15  ;;  %2697 = vmatpush2.bf16.msra.mxu0 %v16740_v7  ;;  %v16789_v7 = vld [vmem:[#allocation97_spill] sm:$0xff]  ;;  %v16790_v15 = vld [vmem:[#allocation98_spill] sm:$0xff] }
 0x635   : > { %2698 = vmatprep.subr.bf16.mxu0 %v14792_v26  ;;  %v16788_v26 = vld [vmem:[#allocation143_spill] sm:$0xff] }
 0x637   : > { %2606 = vmatpush2.bf16.msra.mxu1 %v16741_v19  ;;  %v16787_v19 = vld [vmem:[#allocation142_spill] sm:$0xff] }
 0x638   : > { %2607 = vmatprep.subr.bf16.mxu1 %v16742_v24  ;;  %2699 = vmatpush2.bf16.msra.mxu0 %v14798_v58 }
 0x639   : > { %2700 = vmatprep.subr.bf16.mxu0 %v14802_v30  ;;  %v16753_v30 = vld [vmem:[#allocation95_spill] sm:$0xff] }
 0x63b   : > { %2608 = vmatpush2.bf16.msra.mxu1 %v16743_v27  ;;  %v16754_v27 = vld [vmem:[#allocation84_spill] sm:$0xff] }
 0x63c   : > { %2609 = vmatprep.subr.bf16.mxu1 %v16744_v55  ;;  %2701 = vmatpush2.bf16.msra.mxu0 %v16745_v37  ;;  %v16755_v37 = vld [vmem:[#allocation88_spill] sm:$0xff] }
 0x63d   : > { %2702 = vmatprep.subr.bf16.mxu0 %v16746_v28  ;;  %v16756_v28 = vld [vmem:[#allocation45_spill] sm:$0xff] }
 0x63f   : > { %2610 = vmatpush2.bf16.msra.mxu1 %v16747_v39  ;;  %v16757_v39 = vld [vmem:[#allocation89_spill] sm:$0xff] }
 0x640   : > { %2611 = vmatprep.subr.bf16.mxu1 %v16748_v23  ;;  %2703 = vmatpush2.bf16.msra.mxu0 %v16749_v6  ;;  %v16758_v23 = vld [vmem:[#allocation46_spill] sm:$0xff]  ;;  %v16759_v6 = vld [vmem:[#allocation47_spill] sm:$0xff] }
 0x641   : > { %2704 = vmatprep.subr.bf16.mxu0 %v16750_v20  ;;  %v16760_v20 = vld [vmem:[#allocation48_spill] sm:$0xff] }
 0x643   : > { %2612 = vmatpush2.bf16.msra.mxu1 %v16751_v5  ;;  %v16761_v5 = vld [vmem:[#allocation49_spill] sm:$0xff] }
 0x644   : > { %2715 = vmatprep.subr.bf16.mxu1 %v16752_v12  ;;  %2705 = vmatpush2.bf16.msra.mxu0 %v16753_v30  ;;  %v16762_v12 = vld [vmem:[#allocation50_spill] sm:$0xff]  ;;  %v16763_v30 = vld [vmem:[#allocation51_spill] sm:$0xff] }
 0x645   : > { %2756 = vmatprep.subr.bf16.mxu0 %v16754_v27  ;;  %v16764_v27 = vld [vmem:[#allocation52_spill] sm:$0xff] }
 0x646   : > { %2614 = vmatmul.mubr.bf16.vlgmr.msra.gmra.mxu1 %v15175_v38  ;;  %v16765_v38 = vld [vmem:[#allocation54_spill] sm:$0xff] }
 0x647   : > { %2716 = vmatpush1.bf16.msra.mxu1 %v16755_v37  ;;  %v16766_v37 = vld [vmem:[#allocation86_spill] sm:$0xff] }
 0x648   : > { %2717 = vmatprep.subr.bf16.mxu1 %v16756_v28  ;;  %v16767_v28 = vld [vmem:[#allocation53_spill] sm:$0xff] }
 0x64b   : > { %2718 = vmatpush1.bf16.msra.mxu1 %v16757_v39  ;;  %v16768_v39 = vld [vmem:[#allocation55_spill] sm:$0xff] }
 0x64c   : > { %2719 = vmatprep.subr.bf16.mxu1 %v16758_v23  ;;  %v16769_v23 = vld [vmem:[#allocation57_spill] sm:$0xff] }
 0x64f   : > { %2720 = vmatpush1.bf16.msra.mxu1 %v16759_v6  ;;  %v16770_v6 = vld [vmem:[#allocation59_spill] sm:$0xff] }
 0x650   : > { %2721 = vmatprep.subr.bf16.mxu1 %v16760_v20  ;;  %v16771_v20 = vld [vmem:[#allocation61_spill] sm:$0xff] }
 0x653   : > { %2722 = vmatpush1.bf16.msra.mxu1 %v16761_v5  ;;  %v16772_v5 = vld [vmem:[#allocation63_spill] sm:$0xff] }
 0x654   : > { %2723 = vmatprep.subr.bf16.mxu1 %v16762_v12  ;;  %v16773_v12 = vld [vmem:[#allocation65_spill] sm:$0xff] }
 0x657   : > { %2724 = vmatpush1.bf16.msra.mxu1 %v16763_v30  ;;  %v16774_v30 = vld [vmem:[#allocation67_spill] sm:$0xff] }
 0x658   : > { %2725 = vmatprep.subr.bf16.mxu1 %v16764_v27  ;;  %v16775_v27 = vld [vmem:[#allocation69_spill] sm:$0xff] }
 0x65b   : > { %2726 = vmatpush1.bf16.msra.mxu1 %v16765_v38  ;;  %v16776_v38 = vld [vmem:[#allocation70_spill] sm:$0xff] }
 0x65c   : > { %2727 = vmatprep.subr.bf16.mxu1 %v16766_v37  ;;  %v16777_v37 = vld [vmem:[#allocation72_spill] sm:$0xff] }
 0x65f   : > { %2728 = vmatpush1.bf16.msra.mxu1 %v16767_v28  ;;  %v16778_v28 = vld [vmem:[#allocation74_spill] sm:$0xff] }
 0x660   : > { %2729 = vmatprep.subr.bf16.mxu1 %v16768_v39  ;;  %v16779_v39 = vld [vmem:[#allocation75_spill] sm:$0xff] }
 0x663   : > { %2730 = vmatpush1.bf16.msra.mxu1 %v16769_v23  ;;  %v16780_v23 = vld [vmem:[#allocation76_spill] sm:$0xff] }
 0x664   : > { %2731 = vmatprep.subr.bf16.mxu1 %v16770_v6  ;;  %v16781_v6 = vld [vmem:[#allocation77_spill] sm:$0xff] }
 0x667   : > { %2732 = vmatpush2.bf16.msra.mxu1 %v16771_v20  ;;  %v16782_v20 = vld [vmem:[#allocation78_spill] sm:$0xff] }
 0x668   : > { %2733 = vmatprep.subr.bf16.mxu1 %v16772_v5  ;;  %v16783_v5 = vld [vmem:[#allocation79_spill] sm:$0xff] }
 0x66b   : > { %2734 = vmatpush2.bf16.msra.mxu1 %v16773_v12  ;;  %v16784_v12 = vld [vmem:[#allocation81_spill] sm:$0xff] }
 0x66c   : > { %2735 = vmatprep.subr.bf16.mxu1 %v16774_v30  ;;  %v16785_v30 = vld [vmem:[#allocation83_spill] sm:$0xff] }
 0x66f   : > { %2736 = vmatpush2.bf16.msra.mxu1 %v16775_v27  ;;  %v16786_v27 = vld [vmem:[#allocation56_spill] sm:$0xff] }
 0x670   : > { %2737 = vmatprep.subr.bf16.mxu1 %v16776_v38 }
 0x673   : > { %2738 = vmatpush2.bf16.msra.mxu1 %v16777_v37 }
 0x674   : > { %2739 = vmatprep.subr.bf16.mxu1 %v16778_v28 }
 0x677   : > { %2740 = vmatpush2.bf16.msra.mxu1 %v16779_v39 }
 0x678   : > { %2741 = vmatprep.subr.bf16.mxu1 %v16780_v23 }
 0x67b   : > { %2742 = vmatpush2.bf16.msra.mxu1 %v16781_v6 }
 0x67c   : > { %2743 = vmatprep.subr.bf16.mxu1 %v16782_v20 }
 0x67f   : > { %2744 = vmatpush2.bf16.msra.mxu1 %v16783_v5 }
 0x680   : > { %2745 = vmatprep.subr.bf16.mxu1 %v16784_v12 }
 0x683   : > { %2746 = vmatpush2.bf16.msra.mxu1 %v16785_v30  ;;  %v16791_v30 = vmov 0  }
 0x684   : > { %2849 = vmatprep.subr.bf16.mxu1 %v16786_v27  ;;  %v2840_v22 = vsel %vm2839_vm6, 1, %v16791_v30 }
 0x685   : > { %2842 = vperm.xlu1 %11985, %v2840_v22  }
 0x6c6   : > { %v2533_v38 = vpop.f32.mrf.mxu1  ;;  %v2574_v37 = vpop.f32.mrf.mxu0 }
 0x6c7   : > { %v2534_v6 = vadd.f32 %v2533_v38, %v16787_v19  ;;  %v16794_v38 = vld [vmem:[#allocation126_spill] sm:$0xff] }
 0x6c8   : > { %v2535_v55 = vpop.f32.mrf.mxu1  ;;  %v2576_v28 = vpop.f32.mrf.mxu0 }
 0x6c9   : > { %v2536_v20 = vadd.f32 %v2535_v55, %v16788_v26  ;;  %v2622_v5 = vadd.f32 %v2534_v6, %v16789_v7  ;;  %v16795_v55 = vld [vmem:[#allocation128_spill] sm:$0xff] }
 0x6ca   : > { %v2537_v58 = vpop.f32.mrf.mxu1  ;;  %v2578_v39 = vpop.f32.mrf.mxu0 }
 0x6cb   : > { %v2623_v12 = vadd.f32 %v2536_v20, %v16790_v15  ;;  %v10791_v48 = vmul.f32 -1.442695, %v2622_v5  ;;  %v16792_v58 = vld [vmem:[#allocation144_spill] sm:$0xff] }
 0x6cc   : > { %v2538_v24 = vpop.f32.mrf.mxu1  ;;  %v2579_v23 = vpop.f32.mrf.mxu0  ;;  %v2575_v39 = vadd.f32 %v2574_v37, %v16792_v58 }
 0x6cd   : > { %v10792_v27 = vmul.f32 -1.442695, %v2623_v12  ;;  %12230 = vpow2.f32 %v10791_v48  ;;  %v16793_v24 = vld [vmem:[#allocation145_spill] sm:$0xff] }
 0x6ce   : > { %v2577_v23 = vadd.f32 %v2576_v28, %v16793_v24  ;;  %v2624_v19 = vadd.f32 %v2575_v39, %v16794_v38  ;;  %v16796_v28 = vld [vmem:[#allocation146_spill] sm:$0xff] }
 0x6cf   : > { %12232 = vpow2.f32 %v10792_v27 }
 0x6d0   : > { %v2625_v26 = vadd.f32 %v2577_v23, %v16795_v55  ;;  %v10793_v7 = vmul.f32 -1.442695, %v2624_v19 }
 0x6d2   : > { %v10794_v6 = vmul.f32 -1.442695, %v2625_v26  ;;  %12234 = vpow2.f32 %v10793_v7  ;;  %v16797_v7 = vld [vmem:[#allocation127_spill] sm:$0xff] }
 0x6d4   : > { %12236 = vpow2.f32 %v10794_v6 }
 0x6da   : > { %v12231_v15 = vpop.eup %12230 }
 0x6db   : > { %v2638_v5 = vadd.f32 1.0, %v12231_v15 }
 0x6dc   : > { %v12233_v20 = vpop.eup %12232 }
 0x6dd   : > { %v2639_v12 = vadd.f32 1.0, %v12233_v20  ;;  %12238 = vrcp.f32 %v2638_v5  ;;  %v16798_v5 = vld [vmem:[#allocation129_spill] sm:$0xff] }
 0x6df   : > { %12240 = vrcp.f32 %v2639_v12  ;;  %v12235_v22 = vpop.eup %12234 }
 0x6e0   : > { %v2640_v37 = vadd.f32 1.0, %v12235_v22 }
 0x6e1   : > { %v12237_v48 = vpop.eup %12236 }
 0x6e2   : > { %v2641_v58 = vadd.f32 1.0, %v12237_v48  ;;  %12242 = vrcp.f32 %v2640_v37 }
 0x6e4   : > { %12244 = vrcp.f32 %v2641_v58 }
 0x6ea   : > { %v12239_v39 = vpop.eup %12238 }
 0x6ec   : > { %v12241_v23 = vpop.eup %12240 }
 0x6ef   : > { %v12243_v22 = vpop.eup %12242 }
 0x6f1   : > { %v12245_v48 = vpop.eup %12244 }
 0x6f2   : > { %v2657_v30 = vsub.f32 1.0, %v12245_v48 }
 0x706   : > { %v2615_v27 = vpop.f32.mrf.mxu1 }
 0x707   : > { %v2616_v24 = vadd.f32 %v2615_v27, %v16796_v28  ;;  %v2656_v27 = vsub.f32 1.0, %v12243_v22 }
 0x708   : > { %v2617_v38 = vpop.f32.mrf.mxu1 }
 0x709   : > { %v2650_v19 = vmul.f32 %v12239_v39, %v2616_v24  ;;  %v2618_v26 = vadd.f32 %v2617_v38, %v14491_v29  ;;  %v2660_v24 = vmul.f32 %v12243_v22, %v15167_v40  ;;  %v2661_v38 = vmul.f32 %v12245_v48, %v15169_v32  ;;  %v15390_v22 = vld [vmem:[%s13752_s23 + $0x128] ss:$24 sps:$4 sm:$0xff]   ;;  %v15394_v48 = vld [vmem:[%s13752_s23 + $0xfc] ss:$24 sps:$4 sm:$0xff]  }
 0x70a   : > { %v2619_v55 = vpop.f32.mrf.mxu1 }
 0x70b   : > { %v2652_v6 = vadd.f32 %v2650_v19, %v16797_v7  ;;  %v2651_v15 = vmul.f32 %v12241_v23, %v2618_v26  ;;  %v15317_v7 = vld [vmem:[%s13752_s23 + $0x120] ss:$24 sps:$4 sm:$0xff]  }
 0x70c   : > { %v2620_v20 = vpop.f32.mrf.mxu1 }
 0x70d   : > { %12246 = vtanh.f32 %v2652_v6  ;;  %v2653_v12 = vadd.f32 %v2651_v15, %v16798_v5  ;;  %v15375_v6 = vld [vmem:[%s13752_s23 + $0x15c] ss:$24 sps:$4 sm:$0xff]   ;;  %v16818_v20 = vld [vmem:[#allocation84_spill] sm:$0xff]  ;;  %v15382_v5 = vld [vmem:[%s13752_s23 + $0x158] ss:$24 sps:$4 sm:$0xff]  }
 0x70e   : > { %v16817_v15 = vld [vmem:[#allocation95_spill] sm:$0xff] }
 0x70f   : > { %12248 = vtanh.f32 %v2653_v12  ;;  %v15386_v12 = vld [vmem:[%s13752_s23 + $0x12c] ss:$24 sps:$4 sm:$0xff]  }
 0x71a   : > { %v12247_v28 = vpop.eup %12246 }
 0x71b   : > { %v2658_v37 = vmul.f32 %v12247_v28, %v2656_v27  ;;  %v15311_v28 = vld [vmem:[%s13752_s23 + $0x124] ss:$24 sps:$4 sm:$0xff]   ;;  %v15398_v27 = vld [vmem:[%s13752_s23 + $0xf8] ss:$24 sps:$4 sm:$0xff]  }
 0x71c   : > { %v12249_v39 = vpop.eup %12248 }
 0x71d   : > { %v2659_v58 = vmul.f32 %v12249_v39, %v2657_v30  ;;  %v15292_v19 = vadd.f32 %v2660_v24, %v2658_v37  ;;  %v15307_v30 = vld [vmem:[%s13752_s23 + $0x150] ss:$24 sps:$4 sm:$0xff]   ;;  %v15402_v37 = vld [vmem:[%s13752_s23 + $0xcc] ss:$24 sps:$4 sm:$0xff]   ;;  %v15410_v39 = vld [vmem:[%s13752_s23 + $0x9c] ss:$24 sps:$4 sm:$0xff]  }
 0x71e   : > { %16819 = vst [vmem:[#allocation85_spill] sm:$0xff] %v15402_v37  ;;  %v15406_v24 = vld [vmem:[%s13752_s23 + $0xc8] ss:$24 sps:$4 sm:$0xff]   ;;  %16821 = vst [vmem:[#allocation124_spill] sm:$0xff] %v15410_v39 }
 0x71f   : > { %v15294_v26 = vadd.f32 %v2661_v38, %v2659_v58  ;;  %v15300_v55 = vpack.c.bf16 %v15292_v19, %v15292_v19  ;;  %16820 = vst [vmem:[#allocation122_spill] sm:$0xff] %v15406_v24  ;;  %v15414_v58 = vld [vmem:[%s13752_s23 + $0x98] ss:$24 sps:$4 sm:$0xff]   ;;  %v15418_v38 = vld [vmem:[%s13752_s23 + $0x6c] ss:$24 sps:$4 sm:$0xff]  }
 0x720   : > { %16822 = vst [vmem:[#allocation123_spill] sm:$0xff] %v15414_v58  ;;  %16823 = vst [vmem:[#allocation125_spill] sm:$0xff] %v15418_v38 }
 0x721   : > { %v2673_v23 = vpack.c.bf16 %v15294_v26, %v15294_v26 }
 0x723   : > { %2706 = vmatprep.mubr.bf16.mxu0 %v2673_v23  ;;  %2747 = vmatprep.mubr.bf16.mxu1 %v2673_v23 }
 0x724   : > { %2707 = vmatmul.mubr.bf16.vlgmr.msra.gmra.mxu0 %v15300_v55  ;;  %2748 = vmatmul.mubr.bf16.vlgmr.msra.gmra.mxu1 %v15300_v55 }
 0x725   : > { %2757 = vmatpush1.bf16.msra.mxu0 %v14962_v46  ;;  %2788 = vmatprep.mubr.bf16.mxu0 %v2673_v23  ;;  %v15422_v23 = vld [vmem:[%s13752_s23 + $0x68] ss:$24 sps:$4 sm:$0xff]  }
 0x726   : > { %2758 = vmatprep.subr.bf16.mxu0 %v14966_v25  ;;  %2850 = vmatpush1.bf16.msra.mxu1 %v15307_v30  ;;  %16824 = vst [vmem:[#allocation114_spill] sm:$0xff] %v15422_v23 }
 0x727   : > { %2851 = vmatprep.subr.bf16.mxu1 %v15311_v28 }
 0x729   : > { %2759 = vmatpush1.bf16.msra.mxu0 %v14972_v4 }
 0x72a   : > { %2760 = vmatprep.subr.bf16.mxu0 %v14976_v57  ;;  %2852 = vmatpush1.bf16.msra.mxu1 %v15317_v7 }
 0x72b   : > { %2853 = vmatprep.subr.bf16.mxu1 %v14692_v62  ;;  %v16799_v62 = vld [vmem:[#allocation90_spill] sm:$0xff] }
 0x72d   : > { %2761 = vmatpush1.bf16.msra.mxu0 %v14982_v50 }
 0x72e   : > { %2762 = vmatprep.subr.bf16.mxu0 %v14986_v3  ;;  %2854 = vmatpush1.bf16.msra.mxu1 %v14698_v43  ;;  %v16800_v43 = vld [vmem:[#allocation104_spill] sm:$0xff] }
 0x72f   : > { %2855 = vmatprep.subr.bf16.mxu1 %v14702_v16  ;;  %v16801_v16 = vld [vmem:[#allocation106_spill] sm:$0xff] }
 0x731   : > { %2763 = vmatpush1.bf16.msra.mxu0 %v14992_v1 }
 0x732   : > { %2764 = vmatprep.subr.bf16.mxu0 %v14996_v41  ;;  %2856 = vmatpush1.bf16.msra.mxu1 %v14708_v0  ;;  %v16802_v0 = vld [vmem:[#allocation71_spill] sm:$0xff] }
 0x733   : > { %2857 = vmatprep.subr.bf16.mxu1 %v14712_v49  ;;  %v16803_v49 = vld [vmem:[#allocation91_spill] sm:$0xff] }
 0x735   : > { %2765 = vmatpush1.bf16.msra.mxu0 %v15002_v60 }
 0x736   : > { %2766 = vmatprep.subr.bf16.mxu0 %v15006_v14  ;;  %2858 = vmatpush1.bf16.msra.mxu1 %v14718_v53  ;;  %v16804_v53 = vld [vmem:[#allocation118_spill] sm:$0xff] }
 0x737   : > { %2859 = vmatprep.subr.bf16.mxu1 %v14722_v59  ;;  %v16805_v59 = vld [vmem:[#allocation120_spill] sm:$0xff] }
 0x739   : > { %2767 = vmatpush1.bf16.msra.mxu0 %v15012_v52 }
 0x73a   : > { %2768 = vmatprep.subr.bf16.mxu0 %v15016_v31  ;;  %2860 = vmatpush1.bf16.msra.mxu1 %v14728_v63  ;;  %v16806_v63 = vld [vmem:[#allocation73_spill] sm:$0xff] }
 0x73b   : > { %2861 = vmatprep.subr.bf16.mxu1 %v14732_v2  ;;  %v16807_v2 = vld [vmem:[#allocation92_spill] sm:$0xff] }
 0x73d   : > { %2769 = vmatpush1.bf16.msra.mxu0 %v15022_v56 }
 0x73e   : > { %2770 = vmatprep.subr.bf16.mxu0 %v15026_v18  ;;  %2862 = vmatpush1.bf16.msra.mxu1 %v14738_v54  ;;  %v16808_v54 = vld [vmem:[#allocation119_spill] sm:$0xff] }
 0x73f   : > { %2863 = vmatprep.subr.bf16.mxu1 %v14742_v61  ;;  %v16809_v61 = vld [vmem:[#allocation121_spill] sm:$0xff] }
 0x741   : > { %2771 = vmatpush1.bf16.msra.mxu0 %v15032_v33 }
 0x742   : > { %2772 = vmatprep.subr.bf16.mxu0 %v16731_v45  ;;  %2864 = vmatpush1.bf16.msra.mxu1 %v16732_v36  ;;  %v16813_v36 = vld [vmem:[#allocation150_spill] sm:$0xff] }
 0x743   : > { %2865 = vmatprep.subr.bf16.mxu1 %v14752_v8  ;;  %v16810_v8 = vld [vmem:[#allocation93_spill] sm:$0xff] }
 0x745   : > { %2773 = vmatpush2.bf16.msra.mxu0 %v15042_v47 }
 0x746   : > { %2774 = vmatprep.subr.bf16.mxu0 %v16733_v51  ;;  %2866 = vmatpush2.bf16.msra.mxu1 %v16734_v21  ;;  %v16814_v21 = vld [vmem:[#allocation80_spill] sm:$0xff] }
 0x747   : > { %2867 = vmatprep.subr.bf16.mxu1 %v14762_v13  ;;  %v16811_v13 = vld [vmem:[#allocation94_spill] sm:$0xff] }
 0x749   : > { %2775 = vmatpush2.bf16.msra.mxu0 %v15052_v9 }
 0x74a   : > { %2776 = vmatprep.subr.bf16.mxu0 %v16735_v35  ;;  %2868 = vmatpush2.bf16.msra.mxu1 %v16736_v11  ;;  %v16815_v11 = vld [vmem:[#allocation82_spill] sm:$0xff] }
 0x74b   : > { %2869 = vmatprep.subr.bf16.mxu1 %v14772_v17  ;;  %v16812_v17 = vld [vmem:[#allocation149_spill] sm:$0xff] }
 0x74d   : > { %2777 = vmatpush2.bf16.msra.mxu0 %v15062_v10 }
 0x74e   : > { %2778 = vmatprep.subr.bf16.mxu0 %v16737_v44  ;;  %2870 = vmatpush2.bf16.msra.mxu1 %v16738_v34  ;;  %v16816_v34 = vld [vmem:[#allocation151_spill] sm:$0xff] }
 0x74f   : > { %2871 = vmatprep.subr.bf16.mxu1 %v16799_v62  ;;  %v16826_v62 = vld [vmem:[#allocation53_spill] sm:$0xff] }
 0x751   : > { %2779 = vmatpush2.bf16.msra.mxu0 %v16800_v43 }
 0x752   : > { %2780 = vmatprep.subr.bf16.mxu0 %v16801_v16  ;;  %2872 = vmatpush2.bf16.msra.mxu1 %v16802_v0  ;;  %v16827_v0 = vld [vmem:[#allocation55_spill] sm:$0xff] }
 0x753   : > { %2873 = vmatprep.subr.bf16.mxu1 %v16803_v49  ;;  %v16828_v49 = vld [vmem:[#allocation57_spill] sm:$0xff] }
 0x755   : > { %2781 = vmatpush2.bf16.msra.mxu0 %v16804_v53 }
 0x756   : > { %2782 = vmatprep.subr.bf16.mxu0 %v16805_v59  ;;  %2874 = vmatpush2.bf16.msra.mxu1 %v16806_v63  ;;  %v16829_v63 = vld [vmem:[#allocation59_spill] sm:$0xff] }
 0x757   : > { %2875 = vmatprep.subr.bf16.mxu1 %v16807_v2  ;;  %v16830_v2 = vld [vmem:[#allocation61_spill] sm:$0xff] }
 0x759   : > { %2783 = vmatpush2.bf16.msra.mxu0 %v16808_v54 }
 0x75a   : > { %2784 = vmatprep.subr.bf16.mxu0 %v16809_v61  ;;  %2876 = vmatpush2.bf16.msra.mxu1 %v16810_v8  ;;  %v16831_v8 = vld [vmem:[#allocation63_spill] sm:$0xff] }
 0x75b   : > { %2877 = vmatprep.subr.bf16.mxu1 %v16811_v13  ;;  %v16832_v13 = vld [vmem:[#allocation65_spill] sm:$0xff] }
 0x75d   : > { %2785 = vmatpush2.bf16.msra.mxu0 %v16812_v17 }
 0x75e   : > { %2786 = vmatprep.subr.bf16.mxu0 %v16813_v36  ;;  %2878 = vmatpush2.bf16.msra.mxu1 %v16814_v21  ;;  %v16833_v21 = vld [vmem:[#allocation67_spill] sm:$0xff] }
 0x75f   : > { %2879 = vmatprep.subr.bf16.mxu1 %v16815_v11  ;;  %v16834_v11 = vld [vmem:[#allocation69_spill] sm:$0xff] }
 0x761   : > { %2787 = vmatpush2.bf16.msra.mxu0 %v16816_v34 }
 0x762   : > { %2890 = vmatprep.subr.bf16.mxu0 %v15375_v6  ;;  %2880 = vmatpush2.bf16.msra.mxu1 %v16817_v15  ;;  %v16835_v15 = vld [vmem:[#allocation70_spill] sm:$0xff] }
 0x763   : > { %2931 = vmatprep.subr.bf16.mxu1 %v16818_v20  ;;  %v16836_v20 = vld [vmem:[#allocation72_spill] sm:$0xff] }
 0x764   : > { %2789 = vmatmul.mubr.bf16.vlgmr.msra.gmra.mxu0 %v15300_v55  ;;  %v16825_v55 = vld [vmem:[#allocation86_spill] sm:$0xff] }
 0x765   : > { %2891 = vmatpush1.bf16.msra.mxu0 %v15382_v5 }
 0x766   : > { %2892 = vmatprep.subr.bf16.mxu0 %v15386_v12 }
 0x769   : > { %2893 = vmatpush1.bf16.msra.mxu0 %v15390_v22 }
 0x76a   : > { %2894 = vmatprep.subr.bf16.mxu0 %v15394_v48 }
 0x76d   : > { %2895 = vmatpush1.bf16.msra.mxu0 %v15398_v27 }
 0x76e   : > { %2896 = vmatprep.subr.bf16.mxu0 %v15402_v37 }
 0x771   : > { %2897 = vmatpush1.bf16.msra.mxu0 %v15406_v24 }
 0x772   : > { %2898 = vmatprep.subr.bf16.mxu0 %v15410_v39  ;;  %v16848_v39 = vld [vmem:[#allocation101_spill] sm:$0xff] }
 0x775   : > { %2899 = vmatpush1.bf16.msra.mxu0 %v15414_v58  ;;  %v16847_v58 = vld [vmem:[#allocation99_spill] sm:$0xff] }
 0x776   : > { %2900 = vmatprep.subr.bf16.mxu0 %v15418_v38  ;;  %v16846_v38 = vld [vmem:[#allocation143_spill] sm:$0xff] }
 0x779   : > { %2901 = vmatpush1.bf16.msra.mxu0 %v15422_v23  ;;  %v16845_v23 = vld [vmem:[#allocation142_spill] sm:$0xff] }
 0x77a   : > { %2902 = vmatprep.subr.bf16.mxu0 %v16825_v55  ;;  %v16837_v55 = vld [vmem:[#allocation74_spill] sm:$0xff] }
 0x77d   : > { %2903 = vmatpush1.bf16.msra.mxu0 %v16826_v62  ;;  %v16838_v62 = vld [vmem:[#allocation75_spill] sm:$0xff] }
 0x77e   : > { %2904 = vmatprep.subr.bf16.mxu0 %v16827_v0  ;;  %v16839_v0 = vld [vmem:[#allocation76_spill] sm:$0xff] }
 0x781   : > { %2905 = vmatpush1.bf16.msra.mxu0 %v16828_v49  ;;  %v16840_v49 = vld [vmem:[#allocation77_spill] sm:$0xff] }
 0x782   : > { %2906 = vmatprep.subr.bf16.mxu0 %v16829_v63  ;;  %v16841_v63 = vld [vmem:[#allocation78_spill] sm:$0xff] }
 0x785   : > { %2907 = vmatpush2.bf16.msra.mxu0 %v16830_v2  ;;  %v16842_v2 = vld [vmem:[#allocation79_spill] sm:$0xff] }
 0x786   : > { %2908 = vmatprep.subr.bf16.mxu0 %v16831_v8  ;;  %v16843_v8 = vld [vmem:[#allocation81_spill] sm:$0xff] }
 0x789   : > { %2909 = vmatpush2.bf16.msra.mxu0 %v16832_v13  ;;  %v16844_v13 = vld [vmem:[#allocation83_spill] sm:$0xff] }
 0x78a   : > { %2910 = vmatprep.subr.bf16.mxu0 %v16833_v21  ;;  %v12422_v21 = vld [vmem:[%s13752_s23 + $0x154] ss:$24 sps:$4 sm:$0xff]  }
 0x78d   : > { %2911 = vmatpush2.bf16.msra.mxu0 %v16834_v11 }
 0x78e   : > { %2912 = vmatprep.subr.bf16.mxu0 %v16835_v15 }
 0x791   : > { %2913 = vmatpush2.bf16.msra.mxu0 %v16836_v20 }
 0x792   : > { %2914 = vmatprep.subr.bf16.mxu0 %v16837_v55 }
 0x795   : > { %2915 = vmatpush2.bf16.msra.mxu0 %v16838_v62 }
 0x796   : > { %2916 = vmatprep.subr.bf16.mxu0 %v16839_v0 }
 0x799   : > { %2917 = vmatpush2.bf16.msra.mxu0 %v16840_v49 }
 0x79a   : > { %2918 = vmatprep.subr.bf16.mxu0 %v16841_v63 }
 0x79d   : > { %2919 = vmatpush2.bf16.msra.mxu0 %v16842_v2 }
 0x79e   : > { %2920 = vmatprep.subr.bf16.mxu0 %v16843_v8 }
 0x7a1   : > { %2921 = vmatpush2.bf16.msra.mxu0 %v16844_v13 }
 0x7a2   : > { %3024 = vmatprep.subr.bf16.mxu0 %v12422_v21  ;;  %v16849_v21 = vmov 0  }
 0x7a3   : > { %v3015_v37 = vsel %vm3014_vm7, 1, %v16849_v21 }
 0x7a4   : > { %3017 = vperm.xlu0 %11984, %v3015_v37  }
 0x7e4   : > { %v2708_v11 = vpop.f32.mrf.mxu0  ;;  %v2749_v15 = vpop.f32.mrf.mxu1 }
 0x7e5   : > { %v2709_v49 = vadd.f32 %v2708_v11, %v16845_v23  ;;  %v16852_v11 = vld [vmem:[#allocation130_spill] sm:$0xff] }
 0x7e6   : > { %v2710_v20 = vpop.f32.mrf.mxu0  ;;  %v2751_v55 = vpop.f32.mrf.mxu1 }
 0x7e7   : > { %v2711_v63 = vadd.f32 %v2710_v20, %v16846_v38  ;;  %v2797_v2 = vadd.f32 %v2709_v49, %v16847_v58  ;;  %v16853_v20 = vld [vmem:[#allocation132_spill] sm:$0xff] }
 0x7e8   : > { %v2712_v32 = vpop.f32.mrf.mxu0  ;;  %v2753_v62 = vpop.f32.mrf.mxu1 }
 0x7e9   : > { %v2798_v8 = vadd.f32 %v2711_v63, %v16848_v39  ;;  %v10795_v24 = vmul.f32 -1.442695, %v2797_v2  ;;  %v16850_v32 = vld [vmem:[#allocation144_spill] sm:$0xff] }
 0x7ea   : > { %v2713_v40 = vpop.f32.mrf.mxu0  ;;  %v2754_v0 = vpop.f32.mrf.mxu1  ;;  %v2750_v62 = vadd.f32 %v2749_v15, %v16850_v32 }
 0x7eb   : > { %v10796_v13 = vmul.f32 -1.442695, %v2798_v8  ;;  %12250 = vpow2.f32 %v10795_v24  ;;  %v16851_v40 = vld [vmem:[#allocation145_spill] sm:$0xff] }
 0x7ec   : > { %v2752_v0 = vadd.f32 %v2751_v55, %v16851_v40  ;;  %v2799_v23 = vadd.f32 %v2750_v62, %v16852_v11  ;;  %v16854_v55 = vld [vmem:[#allocation146_spill] sm:$0xff] }
 0x7ed   : > { %12252 = vpow2.f32 %v10796_v13 }
 0x7ee   : > { %v2800_v38 = vadd.f32 %v2752_v0, %v16853_v20  ;;  %v10797_v58 = vmul.f32 -1.442695, %v2799_v23 }
 0x7f0   : > { %v10798_v49 = vmul.f32 -1.442695, %v2800_v38  ;;  %12254 = vpow2.f32 %v10797_v58  ;;  %v16855_v58 = vld [vmem:[#allocation131_spill] sm:$0xff] }
 0x7f2   : > { %12256 = vpow2.f32 %v10798_v49 }
 0x7f8   : > { %v12251_v39 = vpop.eup %12250 }
 0x7f9   : > { %v2813_v42 = vadd.f32 1.0, %v12251_v39 }
 0x7fa   : > { %v12253_v63 = vpop.eup %12252 }
 0x7fb   : > { %v2814_v2 = vadd.f32 1.0, %v12253_v63  ;;  %12258 = vrcp.f32 %v2813_v42  ;;  %v16856_v42 = vld [vmem:[#allocation133_spill] sm:$0xff] }
 0x7fd   : > { %12260 = vrcp.f32 %v2814_v2  ;;  %v12255_v37 = vpop.eup %12254 }
 0x7fe   : > { %v2815_v15 = vadd.f32 1.0, %v12255_v37 }
 0x7ff   : > { %v12257_v24 = vpop.eup %12256 }
 0x800   : > { %v2816_v13 = vadd.f32 1.0, %v12257_v24  ;;  %12262 = vrcp.f32 %v2815_v15 }
 0x802   : > { %12264 = vrcp.f32 %v2816_v13 }
 0x808   : > { %v12259_v62 = vpop.eup %12258 }
 0x80a   : > { %v12261_v0 = vpop.eup %12260 }
 0x80d   : > { %v12263_v37 = vpop.eup %12262 }
 0x80f   : > { %v12265_v24 = vpop.eup %12264 }
 0x810   : > { %v2832_v32 = vsub.f32 1.0, %v12265_v24  ;;  %v2836_v13 = vmul.f32 %v12265_v24, %v15294_v26  ;;  %v12466_v24 = vld [vmem:[%s13752_s23 + $0x1ec] ss:$24 sps:$4 sm:$0xff]  }
 0x824   : > { %v2790_v8 = vpop.f32.mrf.mxu0 }
 0x825   : > { %v2791_v40 = vadd.f32 %v2790_v8, %v16854_v55  ;;  %v2831_v8 = vsub.f32 1.0, %v12263_v37 }
 0x826   : > { %v2792_v11 = vpop.f32.mrf.mxu0 }
 0x827   : > { %v2825_v23 = vmul.f32 %v12259_v62, %v2791_v40  ;;  %v2793_v38 = vadd.f32 %v2792_v11, %v14491_v29  ;;  %v2835_v40 = vmul.f32 %v12263_v37, %v15292_v19  ;;  %v12465_v37 = vld [vmem:[%s13752_s23 + $0x218] ss:$24 sps:$4 sm:$0xff]  }
 0x828   : > { %v2794_v20 = vpop.f32.mrf.mxu0 }
 0x829   : > { %v2827_v49 = vadd.f32 %v2825_v23, %v16855_v58  ;;  %v2826_v39 = vmul.f32 %v12261_v0, %v2793_v38  ;;  %v12459_v58 = vld [vmem:[%s13752_s23 + $0x2a8] ss:$24 sps:$4 sm:$0xff]  }
 0x82a   : > { %v2795_v63 = vpop.f32.mrf.mxu0 }
 0x82b   : > { %12266 = vtanh.f32 %v2827_v49  ;;  %v2828_v2 = vadd.f32 %v2826_v39, %v16856_v42  ;;  %v12460_v49 = vld [vmem:[%s13752_s23 + $0x27c] ss:$24 sps:$4 sm:$0xff]   ;;  %v12461_v39 = vld [vmem:[%s13752_s23 + $0x278] ss:$24 sps:$4 sm:$0xff]   ;;  %v12462_v63 = vld [vmem:[%s13752_s23 + $0x24c] ss:$24 sps:$4 sm:$0xff]  }
 0x82c   : > { %v12463_v42 = vld [vmem:[%s13752_s23 + $0x248] ss:$24 sps:$4 sm:$0xff]  }
 0x82d   : > { %12268 = vtanh.f32 %v2828_v2  ;;  %v12464_v2 = vld [vmem:[%s13752_s23 + $0x21c] ss:$24 sps:$4 sm:$0xff]  }
 0x838   : > { %v12267_v55 = vpop.eup %12266 }
 0x839   : > { %v2833_v15 = vmul.f32 %v12267_v55, %v2831_v8  ;;  %v12458_v55 = vld [vmem:[%s13752_s23 + $0x2ac] ss:$24 sps:$4 sm:$0xff]   ;;  %v12467_v8 = vld [vmem:[%s13752_s23 + $0x1e8] ss:$24 sps:$4 sm:$0xff]  }
 0x83a   : > { %v12269_v62 = vpop.eup %12268 }
 0x83b   : > { %v2834_v11 = vmul.f32 %v12269_v62, %v2832_v32  ;;  %v15462_v20 = vadd.f32 %v2835_v40, %v2833_v15  ;;  %v12423_v32 = vld [vmem:[%s13752_s23 + $0xf4] ss:$24 sps:$4 sm:$0xff]   ;;  %v12469_v40 = vld [vmem:[%s13752_s23 + $0x1b8] ss:$24 sps:$4 sm:$0xff]  }
 0x83c   : > { %v12468_v15 = vld [vmem:[%s13752_s23 + $0x1bc] ss:$24 sps:$4 sm:$0xff]   ;;  %v12470_v62 = vld [vmem:[%s13752_s23 + $0x18c] ss:$24 sps:$4 sm:$0xff]  }
 0x83d   : > { %v15464_v23 = vadd.f32 %v2836_v13, %v2834_v11  ;;  %v15470_v0 = vpack.c.bf16 %v15462_v20, %v15462_v20  ;;  %v12471_v11 = vld [vmem:[%s13752_s23 + $0x188] ss:$24 sps:$4 sm:$0xff]  }
 0x83f   : > { %v2848_v38 = vpack.c.bf16 %v15464_v23, %v15464_v23 }
 0x841   : > { %2881 = vmatprep.mubr.bf16.mxu1 %v2848_v38  ;;  %2922 = vmatprep.mubr.bf16.mxu0 %v2848_v38 }
 0x842   : > { %2882 = vmatmul.mubr.bf16.vlgmr.msra.gmra.mxu1 %v15470_v0  ;;  %2923 = vmatmul.mubr.bf16.vlgmr.msra.gmra.mxu0 %v15470_v0 }
 0x843   : > { %2932 = vmatpush1.bf16.msra.mxu1 %v14962_v46  ;;  %2963 = vmatprep.mubr.bf16.mxu1 %v2848_v38  ;;  %v12424_v46 = vld [vmem:[%s13752_s23 + $0xf0] ss:$24 sps:$4 sm:$0xff]  }
 0x844   : > { %2933 = vmatprep.subr.bf16.mxu1 %v14966_v25  ;;  %3025 = vmatpush1.bf16.msra.mxu0 %v15307_v30  ;;  %v12425_v25 = vld [vmem:[%s13752_s23 + $0xc4] ss:$24 sps:$4 sm:$0xff]   ;;  %v12446_v30 = vld [vmem:[%s13752_s23 + $0x1e0] ss:$24 sps:$4 sm:$0xff]  }
 0x845   : > { %3026 = vmatprep.subr.bf16.mxu0 %v15311_v28  ;;  %v12447_v28 = vld [vmem:[%s13752_s23 + $0x1b4] ss:$24 sps:$4 sm:$0xff]  }
 0x847   : > { %2934 = vmatpush1.bf16.msra.mxu1 %v14972_v4  ;;  %v12426_v4 = vld [vmem:[%s13752_s23 + $0xc0] ss:$24 sps:$4 sm:$0xff]  }
 0x848   : > { %2935 = vmatprep.subr.bf16.mxu1 %v14976_v57  ;;  %3027 = vmatpush1.bf16.msra.mxu0 %v15317_v7  ;;  %v12427_v57 = vld [vmem:[%s13752_s23 + $0x94] ss:$24 sps:$4 sm:$0xff]   ;;  %v12448_v7 = vld [vmem:[%s13752_s23 + $0x1b0] ss:$24 sps:$4 sm:$0xff]  }
 0x849   : > { %3028 = vmatprep.subr.bf16.mxu0 %v12423_v32 }
 0x84b   : > { %2936 = vmatpush1.bf16.msra.mxu1 %v14982_v50  ;;  %v12428_v50 = vld [vmem:[%s13752_s23 + $0x90] ss:$24 sps:$4 sm:$0xff]  }
 0x84c   : > { %2937 = vmatprep.subr.bf16.mxu1 %v14986_v3  ;;  %3029 = vmatpush1.bf16.msra.mxu0 %v12424_v46  ;;  %v12429_v3 = vld [vmem:[%s13752_s23 + $0x64] ss:$24 sps:$4 sm:$0xff]  }
 0x84d   : > { %3030 = vmatprep.subr.bf16.mxu0 %v12425_v25 }
 0x84f   : > { %2938 = vmatpush1.bf16.msra.mxu1 %v14992_v1  ;;  %v12430_v1 = vld [vmem:[%s13752_s23 + $0x60] ss:$24 sps:$4 sm:$0xff]  }
 0x850   : > { %2939 = vmatprep.subr.bf16.mxu1 %v14996_v41  ;;  %3031 = vmatpush1.bf16.msra.mxu0 %v12426_v4  ;;  %v12431_v41 = vld [vmem:[%s13752_s23 + $0x34] ss:$24 sps:$4 sm:$0xff]  }
 0x851   : > { %3032 = vmatprep.subr.bf16.mxu0 %v12427_v57 }
 0x853   : > { %2940 = vmatpush1.bf16.msra.mxu1 %v15002_v60  ;;  %v12432_v60 = vld [vmem:[%s13752_s23 + $0x30] ss:$24 sps:$4 sm:$0xff]  }
 0x854   : > { %2941 = vmatprep.subr.bf16.mxu1 %v15006_v14  ;;  %3033 = vmatpush1.bf16.msra.mxu0 %v12428_v50  ;;  %v12433_v14 = vld [vmem:[%s13752_s23 + $0x4] ss:$24 sps:$4 sm:$0xff]   ;;  %v16863_v50 = vld [vmem:[#allocation142_spill] sm:$0xff] }
 0x855   : > { %3034 = vmatprep.subr.bf16.mxu0 %v12429_v3 }
 0x857   : > { %2942 = vmatpush1.bf16.msra.mxu1 %v15012_v52  ;;  %v12434_v52 = vld [vmem:[%s13752_s23] ss:$24 sps:$4 sm:$0xff]  }
 0x858   : > { %2943 = vmatprep.subr.bf16.mxu1 %v15016_v31  ;;  %3035 = vmatpush1.bf16.msra.mxu0 %v12430_v1  ;;  %v12435_v31 = vld [vmem:[%s13752_s23 + $0x2d4] ss:$24 sps:$4 sm:$0xff]   ;;  %v16864_v1 = vld [vmem:[#allocation143_spill] sm:$0xff] }
 0x859   : > { %3036 = vmatprep.subr.bf16.mxu0 %v12431_v41 }
 0x85b   : > { %2944 = vmatpush1.bf16.msra.mxu1 %v15022_v56  ;;  %v12436_v56 = vld [vmem:[%s13752_s23 + $0x2d0] ss:$24 sps:$4 sm:$0xff]  }
 0x85c   : > { %2945 = vmatprep.subr.bf16.mxu1 %v15026_v18  ;;  %3037 = vmatpush1.bf16.msra.mxu0 %v12432_v60  ;;  %v12437_v18 = vld [vmem:[%s13752_s23 + $0x2a4] ss:$24 sps:$4 sm:$0xff]  }
 0x85d   : > { %3038 = vmatprep.subr.bf16.mxu0 %v12433_v14  ;;  %v16865_v60 = vld [vmem:[#allocation103_spill] sm:$0xff] }
 0x85f   : > { %2946 = vmatpush1.bf16.msra.mxu1 %v15032_v33  ;;  %v12438_v33 = vld [vmem:[%s13752_s23 + $0x2a0] ss:$24 sps:$4 sm:$0xff]  }
 0x860   : > { %2947 = vmatprep.subr.bf16.mxu1 %v16731_v45  ;;  %3039 = vmatpush1.bf16.msra.mxu0 %v12434_v52  ;;  %v12439_v45 = vld [vmem:[%s13752_s23 + $0x274] ss:$24 sps:$4 sm:$0xff]  }
 0x861   : > { %3040 = vmatprep.subr.bf16.mxu0 %v12435_v31  ;;  %v16866_v52 = vld [vmem:[#allocation105_spill] sm:$0xff] }
 0x863   : > { %2948 = vmatpush2.bf16.msra.mxu1 %v15042_v47  ;;  %v12440_v47 = vld [vmem:[%s13752_s23 + $0x270] ss:$24 sps:$4 sm:$0xff]  }
 0x864   : > { %2949 = vmatprep.subr.bf16.mxu1 %v16733_v51  ;;  %3041 = vmatpush2.bf16.msra.mxu0 %v12436_v56  ;;  %v12441_v51 = vld [vmem:[%s13752_s23 + $0x244] ss:$24 sps:$4 sm:$0xff]  }
 0x865   : > { %3042 = vmatprep.subr.bf16.mxu0 %v12437_v18  ;;  %v12472_v18 = vld [vmem:[%s16482_s16] sm:$0xff] }
 0x866   : > { %vm3189_vm8 = vcmp.eq.s32.totalorder %v12472_v18, 7  ;;  %v12480_v18 = vld [vmem:[%s13752_s23 + $0xa4] ss:$24 sps:$4 sm:$0xff]  }
 0x867   : > { %2950 = vmatpush2.bf16.msra.mxu1 %v15052_v9  ;;  %v12442_v9 = vld [vmem:[%s13752_s23 + $0x240] ss:$24 sps:$4 sm:$0xff]  }
 0x868   : > { %2951 = vmatprep.subr.bf16.mxu1 %v16735_v35  ;;  %3043 = vmatpush2.bf16.msra.mxu0 %v12438_v33  ;;  %v12443_v35 = vld [vmem:[%s13752_s23 + $0x214] ss:$24 sps:$4 sm:$0xff]  }
 0x869   : > { %3044 = vmatprep.subr.bf16.mxu0 %v12439_v45  ;;  %v3190_v45 = vsel %vm3189_vm8, 1, %v16849_v21 }
 0x86a   : > { %3192 = vperm.xlu1 %11985, %v3190_v45   ;;  %v12482_v45 = vld [vmem:[%s13752_s23 + $0x74] ss:$24 sps:$4 sm:$0xff]  }
 0x86b   : > { %2952 = vmatpush2.bf16.msra.mxu1 %v15062_v10  ;;  %v12444_v10 = vld [vmem:[%s13752_s23 + $0x210] ss:$24 sps:$4 sm:$0xff]  }
 0x86c   : > { %2953 = vmatprep.subr.bf16.mxu1 %v16737_v44  ;;  %3045 = vmatpush2.bf16.msra.mxu0 %v12440_v47  ;;  %v12445_v44 = vld [vmem:[%s13752_s23 + $0x1e4] ss:$24 sps:$4 sm:$0xff]  }
 0x86d   : > { %3046 = vmatprep.subr.bf16.mxu0 %v12441_v51  ;;  %v16867_v47 = vld [vmem:[#allocation144_spill] sm:$0xff] }
 0x86f   : > { %2954 = vmatpush2.bf16.msra.mxu1 %v16800_v43  ;;  %v12449_v43 = vld [vmem:[%s13752_s23 + $0x184] ss:$24 sps:$4 sm:$0xff]  }
 0x870   : > { %2955 = vmatprep.subr.bf16.mxu1 %v16801_v16  ;;  %3047 = vmatpush2.bf16.msra.mxu0 %v12442_v9  ;;  %v12450_v16 = vld [vmem:[%s13752_s23 + $0x180] ss:$24 sps:$4 sm:$0xff]   ;;  %v16868_v9 = vld [vmem:[#allocation145_spill] sm:$0xff] }
 0x871   : > { %3048 = vmatprep.subr.bf16.mxu0 %v12443_v35 }
 0x873   : > { %2956 = vmatpush2.bf16.msra.mxu1 %v16804_v53  ;;  %v12451_v53 = vld [vmem:[%s13752_s23 + $0x164] ss:$24 sps:$4 sm:$0xff]  }
 0x874   : > { %2957 = vmatprep.subr.bf16.mxu1 %v16805_v59  ;;  %3049 = vmatpush2.bf16.msra.mxu0 %v12444_v10  ;;  %v16857_v59 = vld [vmem:[#allocation85_spill] sm:$0xff]  ;;  %v16869_v10 = vld [vmem:[#allocation134_spill] sm:$0xff] }
 0x875   : > { %3050 = vmatprep.subr.bf16.mxu0 %v12445_v44 }
 0x877   : > { %2958 = vmatpush2.bf16.msra.mxu1 %v16808_v54  ;;  %v16858_v54 = vld [vmem:[#allocation122_spill] sm:$0xff] }
 0x878   : > { %2959 = vmatprep.subr.bf16.mxu1 %v16809_v61  ;;  %3051 = vmatpush2.bf16.msra.mxu0 %v12446_v30  ;;  %v16859_v61 = vld [vmem:[#allocation124_spill] sm:$0xff] }
 0x879   : > { %3052 = vmatprep.subr.bf16.mxu0 %v12447_v28  ;;  %v16870_v30 = vld [vmem:[#allocation136_spill] sm:$0xff] }
 0x87b   : > { %2960 = vmatpush2.bf16.msra.mxu1 %v16812_v17  ;;  %v16860_v17 = vld [vmem:[#allocation123_spill] sm:$0xff] }
 0x87c   : > { %2961 = vmatprep.subr.bf16.mxu1 %v16813_v36  ;;  %3053 = vmatpush2.bf16.msra.mxu0 %v12448_v7  ;;  %v16861_v36 = vld [vmem:[#allocation125_spill] sm:$0xff] }
 0x87d   : > { %3054 = vmatprep.subr.bf16.mxu0 %v12449_v43 }
 0x87f   : > { %2962 = vmatpush2.bf16.msra.mxu1 %v16816_v34  ;;  %v16862_v34 = vld [vmem:[#allocation114_spill] sm:$0xff] }
 0x880   : > { %3065 = vmatprep.subr.bf16.mxu1 %v15375_v6  ;;  %3055 = vmatpush2.bf16.msra.mxu0 %v12450_v16  ;;  %v12452_v6 = vld [vmem:[%s13752_s23 + $0x3c] ss:$24 sps:$4 sm:$0xff]  }
 0x881   : > { %3106 = vmatprep.subr.bf16.mxu0 %v12451_v53 }
 0x882   : > { %2964 = vmatmul.mubr.bf16.vlgmr.msra.gmra.mxu1 %v15470_v0 }
 0x883   : > { %3066 = vmatpush1.bf16.msra.mxu1 %v15382_v5  ;;  %v12453_v5 = vld [vmem:[%s13752_s23 + $0x38] ss:$24 sps:$4 sm:$0xff]  }
 0x884   : > { %3067 = vmatprep.subr.bf16.mxu1 %v15386_v12  ;;  %v12454_v12 = vld [vmem:[%s13752_s23 + $0xc] ss:$24 sps:$4 sm:$0xff]  }
 0x887   : > { %3068 = vmatpush1.bf16.msra.mxu1 %v15390_v22  ;;  %v12455_v22 = vld [vmem:[%s13752_s23 + $0x8] ss:$24 sps:$4 sm:$0xff]  }
 0x888   : > { %3069 = vmatprep.subr.bf16.mxu1 %v15394_v48  ;;  %v12456_v48 = vld [vmem:[%s13752_s23 + $0x2dc] ss:$24 sps:$4 sm:$0xff]  }
 0x88b   : > { %3070 = vmatpush1.bf16.msra.mxu1 %v15398_v27  ;;  %v12457_v27 = vld [vmem:[%s13752_s23 + $0x2d8] ss:$24 sps:$4 sm:$0xff]  }
 0x88c   : > { %3071 = vmatprep.subr.bf16.mxu1 %v16857_v59 }
 0x88f   : > { %3072 = vmatpush1.bf16.msra.mxu1 %v16858_v54 }
 0x890   : > { %3073 = vmatprep.subr.bf16.mxu1 %v16859_v61 }
 0x893   : > { %3074 = vmatpush1.bf16.msra.mxu1 %v16860_v17 }
 0x894   : > { %3075 = vmatprep.subr.bf16.mxu1 %v16861_v36 }
 0x897   : > { %3076 = vmatpush1.bf16.msra.mxu1 %v16862_v34 }
 0x898   : > { %3077 = vmatprep.subr.bf16.mxu1 %v12452_v6  ;;  %v16871_v6 = vld [vmem:[#allocation146_spill] sm:$0xff] }
 0x89b   : > { %3078 = vmatpush1.bf16.msra.mxu1 %v12453_v5 }
 0x89c   : > { %3079 = vmatprep.subr.bf16.mxu1 %v12454_v12 }
 0x89f   : > { %3080 = vmatpush1.bf16.msra.mxu1 %v12455_v22 }
 0x8a0   : > { %3081 = vmatprep.subr.bf16.mxu1 %v12456_v48 }
 0x8a3   : > { %3082 = vmatpush2.bf16.msra.mxu1 %v12457_v27 }
 0x8a4   : > { %3083 = vmatprep.subr.bf16.mxu1 %v12458_v55 }
 0x8a7   : > { %3084 = vmatpush2.bf16.msra.mxu1 %v12459_v58 }
 0x8a8   : > { %3085 = vmatprep.subr.bf16.mxu1 %v12460_v49  ;;  %v16872_v49 = vld [vmem:[#allocation135_spill] sm:$0xff] }
 0x8ab   : > { %3086 = vmatpush2.bf16.msra.mxu1 %v12461_v39 }
 0x8ac   : > { %3087 = vmatprep.subr.bf16.mxu1 %v12462_v63 }
 0x8af   : > { %3088 = vmatpush2.bf16.msra.mxu1 %v12463_v42 }
 0x8b0   : > { %3089 = vmatprep.subr.bf16.mxu1 %v12464_v2  ;;  %v16873_v2 = vld [vmem:[#allocation137_spill] sm:$0xff] }
 0x8b3   : > { %3090 = vmatpush2.bf16.msra.mxu1 %v12465_v37 }
 0x8b4   : > { %3091 = vmatprep.subr.bf16.mxu1 %v12466_v24 }
 0x8b7   : > { %3092 = vmatpush2.bf16.msra.mxu1 %v12467_v8 }
 0x8b8   : > { %3093 = vmatprep.subr.bf16.mxu1 %v12468_v15 }
 0x8bb   : > { %3094 = vmatpush2.bf16.msra.mxu1 %v12469_v40 }
 0x8bc   : > { %3095 = vmatprep.subr.bf16.mxu1 %v12470_v62 }
 0x8bf   : > { %3096 = vmatpush2.bf16.msra.mxu1 %v12471_v11 }
 0x902   : > { %v2883_v13 = vpop.f32.mrf.mxu1  ;;  %v2924_v38 = vpop.f32.mrf.mxu0 }
 0x903   : > { %v2884_v3 = vadd.f32 %v2883_v13, %v16863_v50  ;;  %v2925_v51 = vadd.f32 %v2924_v38, %v16867_v47 }
 0x904   : > { %v2885_v0 = vpop.f32.mrf.mxu1  ;;  %v2926_v32 = vpop.f32.mrf.mxu0 }
 0x905   : > { %v2886_v41 = vadd.f32 %v2885_v0, %v16864_v1  ;;  %v2972_v14 = vadd.f32 %v2884_v3, %v16865_v60  ;;  %v2927_v35 = vadd.f32 %v2926_v32, %v16868_v9  ;;  %v2974_v44 = vadd.f32 %v2925_v51, %v16869_v10  ;;  %v12473_v3 = vld [vmem:[%s13752_s23 + $0x160] ss:$24 sps:$4 sm:$0xff]   ;;  %v12475_v60 = vld [vmem:[%s13752_s23 + $0x130] ss:$24 sps:$4 sm:$0xff]  }
 0x906   : > { %v2887_v46 = vpop.f32.mrf.mxu1  ;;  %v2928_v25 = vpop.f32.mrf.mxu0  ;;  %v12483_v51 = vld [vmem:[%s13752_s23 + $0x70] ss:$24 sps:$4 sm:$0xff]   ;;  %v12485_v10 = vld [vmem:[%s13752_s23 + $0x40] ss:$24 sps:$4 sm:$0xff]  }
 0x907   : > { %v2973_v31 = vadd.f32 %v2886_v41, %v16866_v52  ;;  %v10799_v56 = vmul.f32 -1.442695, %v2972_v14  ;;  %v2975_v28 = vadd.f32 %v2927_v35, %v16870_v30  ;;  %v10801_v7 = vmul.f32 -1.442695, %v2974_v44  ;;  %v12474_v41 = vld [vmem:[%s13752_s23 + $0x134] ss:$24 sps:$4 sm:$0xff]  }
 0x908   : > { %v2888_v4 = vpop.f32.mrf.mxu1  ;;  %v2929_v57 = vpop.f32.mrf.mxu0  ;;  %v12476_v14 = vld [vmem:[%s13752_s23 + $0x104] ss:$24 sps:$4 sm:$0xff]   ;;  %v12477_v52 = vld [vmem:[%s13752_s23 + $0x100] ss:$24 sps:$4 sm:$0xff]   ;;  %v12486_v44 = vld [vmem:[%s13752_s23 + $0x14] ss:$24 sps:$4 sm:$0xff]  }
 0x909   : > { %v10800_v33 = vmul.f32 -1.442695, %v2973_v31  ;;  %12270 = vpow2.f32 %v10799_v56  ;;  %v10802_v43 = vmul.f32 -1.442695, %v2975_v28  ;;  %v12478_v31 = vld [vmem:[%s13752_s23 + $0xd4] ss:$24 sps:$4 sm:$0xff]  }
 0x90a   : > { %v12479_v56 = vld [vmem:[%s13752_s23 + $0xd0] ss:$24 sps:$4 sm:$0xff]   ;;  %v12484_v35 = vld [vmem:[%s13752_s23 + $0x44] ss:$24 sps:$4 sm:$0xff]  }
 0x90b   : > { %12272 = vpow2.f32 %v10800_v33  ;;  %v12481_v33 = vld [vmem:[%s13752_s23 + $0xa0] ss:$24 sps:$4 sm:$0xff]   ;;  %v12487_v30 = vld [vmem:[%s13752_s23 + $0x10] ss:$24 sps:$4 sm:$0xff]   ;;  %v12488_v28 = vld [vmem:[%s13752_s23 + $0x2e4] ss:$24 sps:$4 sm:$0xff]  }
 0x90c   : > { %12274 = vpow2.f32 %v10801_v7  ;;  %v12489_v7 = vld [vmem:[%s13752_s23 + $0x2e0] ss:$24 sps:$4 sm:$0xff]  }
 0x90d   : > { %12276 = vpow2.f32 %v10802_v43  ;;  %v12490_v43 = vld [vmem:[%s13752_s23 + $0x2b4] ss:$24 sps:$4 sm:$0xff]  }
 0x916   : > { %v12271_v16 = vpop.eup %12270 }
 0x917   : > { %v2988_v59 = vadd.f32 1.0, %v12271_v16  ;;  %v12491_v16 = vld [vmem:[%s13752_s23 + $0x2b0] ss:$24 sps:$4 sm:$0xff]  }
 0x918   : > { %v12273_v53 = vpop.eup %12272 }
 0x919   : > { %v2989_v54 = vadd.f32 1.0, %v12273_v53  ;;  %12278 = vrcp.f32 %v2988_v59  ;;  %v12275_v21 = vpop.eup %12274  ;;  %v12492_v53 = vld [vmem:[%s13752_s23 + $0x284] ss:$24 sps:$4 sm:$0xff]   ;;  %v12493_v59 = vld [vmem:[%s13752_s23 + $0x280] ss:$24 sps:$4 sm:$0xff]  }
 0x91a   : > { %v12277_v61 = vpop.eup %12276  ;;  %v2990_v17 = vadd.f32 1.0, %v12275_v21  ;;  %v12495_v21 = vld [vmem:[%s13752_s23 + $0x250] ss:$24 sps:$4 sm:$0xff]  }
 0x91b   : > { %12280 = vrcp.f32 %v2989_v54  ;;  %v2991_v34 = vadd.f32 1.0, %v12277_v61  ;;  %v12494_v54 = vld [vmem:[%s13752_s23 + $0x254] ss:$24 sps:$4 sm:$0xff]   ;;  %v12496_v61 = vld [vmem:[%s13752_s23 + $0x224] ss:$24 sps:$4 sm:$0xff]  }
 0x91c   : > { %12282 = vrcp.f32 %v2990_v17  ;;  %v12497_v17 = vld [vmem:[%s13752_s23 + $0x220] ss:$24 sps:$4 sm:$0xff]  }
 0x91d   : > { %12284 = vrcp.f32 %v2991_v34  ;;  %v12499_v34 = vld [vmem:[%s13752_s23 + $0x1f0] ss:$24 sps:$4 sm:$0xff]  }
 0x926   : > { %v12279_v12 = vpop.eup %12278 }
 0x928   : > { %v12281_v55 = vpop.eup %12280 }
 0x929   : > { %v12283_v24 = vpop.eup %12282 }
 0x92a   : > { %v12285_v8 = vpop.eup %12284  ;;  %v3006_v15 = vsub.f32 1.0, %v12283_v24  ;;  %v3010_v13 = vmul.f32 %v12283_v24, %v15462_v20 }
 0x92b   : > { %v3007_v62 = vsub.f32 1.0, %v12285_v8  ;;  %v3011_v32 = vmul.f32 %v12285_v8, %v15464_v23 }
 0x942   : > { %v2965_v36 = vpop.f32.mrf.mxu1 }
 0x943   : > { %v2966_v5 = vadd.f32 %v2965_v36, %v16871_v6  ;;  %v12498_v36 = vld [vmem:[%s13752_s23 + $0x1f4] ss:$24 sps:$4 sm:$0xff]  }
 0x944   : > { %v2967_v22 = vpop.f32.mrf.mxu1 }
 0x945   : > { %v3000_v48 = vmul.f32 %v12279_v12, %v2966_v5  ;;  %v2968_v27 = vadd.f32 %v2967_v22, %v14491_v29  ;;  %v12500_v5 = vld [vmem:[%s13752_s23 + $0x1c4] ss:$24 sps:$4 sm:$0xff]   ;;  %v12501_v12 = vld [vmem:[%s13752_s23 + $0x1c0] ss:$24 sps:$4 sm:$0xff]   ;;  %v12502_v22 = vld [vmem:[%s13752_s23 + $0x194] ss:$24 sps:$4 sm:$0xff]  }
 0x946   : > { %v2969_v58 = vpop.f32.mrf.mxu1 }
 0x947   : > { %v3002_v39 = vadd.f32 %v3000_v48, %v16872_v49  ;;  %v3001_v63 = vmul.f32 %v12281_v55, %v2968_v27  ;;  %v12503_v48 = vld [vmem:[%s13752_s23 + $0x190] ss:$24 sps:$4 sm:$0xff]   ;;  %s16875_s23 = sld [smem:[#allocation159_spill]] }
 0x948   : > { %v2970_v42 = vpop.f32.mrf.mxu1 }
 0x949   : > { %12286 = vtanh.f32 %v3002_v39  ;;  %v3003_v37 = vadd.f32 %v3001_v63, %v16873_v2 }
 0x94b   : > { %12288 = vtanh.f32 %v3003_v37 }
 0x94d   : > { %s15645_s29 = scalar_lea.vmem %s16875_s23, %s11717_s2 }
 0x956   : > { %v12287_v40 = vpop.eup %12286 }
 0x957   : > { %v3008_v11 = vmul.f32 %v12287_v40, %v3006_v15 }
 0x958   : > { %v12289_v38 = vpop.eup %12288 }
 0x959   : > { %v3009_v0 = vmul.f32 %v12289_v38, %v3007_v62  ;;  %v15588_v46 = vadd.f32 %v3010_v13, %v3008_v11 }
 0x95b   : > { %v15590_v25 = vadd.f32 %v3011_v32, %v3009_v0  ;;  %v15596_v57 = vpack.c.bf16 %v15588_v46, %v15588_v46 }
 0x95d   : > { %v3023_v4 = vpack.c.bf16 %v15590_v25, %v15590_v25 }
 0x95f   : > { %3056 = vmatprep.mubr.bf16.mxu0 %v3023_v4  ;;  %3097 = vmatprep.mubr.bf16.mxu1 %v3023_v4 }
 0x960   : > { %3057 = vmatmul.mubr.bf16.vlgmr.msra.gmra.mxu0 %v15596_v57  ;;  %3098 = vmatmul.mubr.bf16.vlgmr.msra.gmra.mxu1 %v15596_v57 }
 0x961   : > { %3107 = vmatpush1.bf16.msra.mxu0 %v12473_v3  ;;  %3138 = vmatprep.mubr.bf16.mxu0 %v3023_v4 }
 0x962   : > { %3108 = vmatprep.subr.bf16.mxu0 %v12474_v41 }
 0x965   : > { %3109 = vmatpush1.bf16.msra.mxu0 %v12475_v60 }
 0x966   : > { %3110 = vmatprep.subr.bf16.mxu0 %v12476_v14 }
 0x969   : > { %3111 = vmatpush1.bf16.msra.mxu0 %v12477_v52 }
 0x96a   : > { %3112 = vmatprep.subr.bf16.mxu0 %v12478_v31 }
 0x96d   : > { %3113 = vmatpush1.bf16.msra.mxu0 %v12479_v56 }
 0x96e   : > { %3114 = vmatprep.subr.bf16.mxu0 %v12480_v18 }
 0x971   : > { %3115 = vmatpush1.bf16.msra.mxu0 %v12481_v33 }
 0x972   : > { %3116 = vmatprep.subr.bf16.mxu0 %v12482_v45 }
 0x975   : > { %3117 = vmatpush1.bf16.msra.mxu0 %v12483_v51 }
 0x976   : > { %3118 = vmatprep.subr.bf16.mxu0 %v12484_v35 }
 0x979   : > { %3119 = vmatpush1.bf16.msra.mxu0 %v12485_v10 }
 0x97a   : > { %3120 = vmatprep.subr.bf16.mxu0 %v12486_v44 }
 0x97d   : > { %3121 = vmatpush1.bf16.msra.mxu0 %v12487_v30 }
 0x97e   : > { %3122 = vmatprep.subr.bf16.mxu0 %v12488_v28 }
 0x981   : > { %3123 = vmatpush2.bf16.msra.mxu0 %v12489_v7 }
 0x982   : > { %3124 = vmatprep.subr.bf16.mxu0 %v12490_v43 }
 0x985   : > { %3125 = vmatpush2.bf16.msra.mxu0 %v12491_v16 }
 0x986   : > { %3126 = vmatprep.subr.bf16.mxu0 %v12492_v53 }
 0x989   : > { %3127 = vmatpush2.bf16.msra.mxu0 %v12493_v59 }
 0x98a   : > { %3128 = vmatprep.subr.bf16.mxu0 %v12494_v54 }
 0x98d   : > { %3129 = vmatpush2.bf16.msra.mxu0 %v12495_v21 }
 0x98e   : > { %3130 = vmatprep.subr.bf16.mxu0 %v12496_v61 }
 0x991   : > { %3131 = vmatpush2.bf16.msra.mxu0 %v12497_v17 }
 0x992   : > { %3132 = vmatprep.subr.bf16.mxu0 %v12498_v36 }
 0x995   : > { %3133 = vmatpush2.bf16.msra.mxu0 %v12499_v34 }
 0x996   : > { %3134 = vmatprep.subr.bf16.mxu0 %v12500_v5 }
 0x999   : > { %3135 = vmatpush2.bf16.msra.mxu0 %v12501_v12 }
 0x99a   : > { %3136 = vmatprep.subr.bf16.mxu0 %v12502_v22 }
 0x99d   : > { %3137 = vmatpush2.bf16.msra.mxu0 %v12503_v48 }
 0x9a0   : > { %3139 = vmatmul.mubr.bf16.vlgmr.msra.gmra.mxu0 %v15596_v57 }
 0x9a1   : > { %13176 = shalt.err (!%p13173_p10)  }
 0x9a2   : > { %s13177_s30 = scalar_lea.vmem %s761_s19, 16384  ;;  %p13182_p5 = scmp.lt.s32.totalorder %s761_s19, %s761_s19 }
 0x9a3   : > { %p13178_p7 = scmp.ne.s32.totalorder %s761_s19, %s13177_s30  ;;  %p13183_p1 = scmp.lt.s32.totalorder %s13177_s30, %s13177_s30 }
 0x9a5   : > { %p13184_p6 = por %p13183_p1, %p13182_p5 }
 0x9a7   : > { %p13185_p12 = pnand %p13184_p6, %p13178_p7 }
 0x9a9   : > { %13188 = shalt.err (!%p13185_p12)  }
 0x9aa   : > { %763 = dma.hbm_to_vmem [thread:$0]  %s752_s4, 16384, %s761_s19, [#allocation5] }
 0x9ab   : > { %s16876_s2 = sld [smem:[#allocation161_spill]]  ;;  %s13327_s13 = smov [#allocation3]  }
 0x9ac   : > { %s775_s6 = sshll.u32 %s13327_s13, 4  ;;  %s11720_s23 = sshll.u32 %s13436_s25, 15  ;;  %s776_s6 = int_to_ptr.vmem [resolvable:$true] %s775_s6 }
 0x9b1   : > { %s766_s26 = scalar_lea.hbm %s16876_s2, %s11719_s1  ;;  %s13191_s15 = scalar_lea.hbm %s16876_s2, 131072 }
 0x9b2   : > { %s13189_s3 = scalar_lea.hbm %s766_s26, 65536  ;;  %p13192_p13 = scmp.lt.s32.totalorder %s766_s26, %s16876_s2 }
 0x9b3   : > { %p13190_p11 = scmp.ne.s32.totalorder %s766_s26, %s13189_s3  ;;  %p13193_p3 = scmp.lt.s32.totalorder %s13191_s15, %s13189_s3 }
 0x9b5   : > { %p13194_p8 = por %p13193_p3, %p13192_p13 }
 0x9b7   : > { %p13195_p2 = pnand %p13194_p8, %p13190_p11 }
 0x9b9   : > { %13198 = shalt.err (!%p13195_p2)  }
 0x9ba   : > { %s13199_s19 = scalar_lea.vmem %s776_s6, 65536  ;;  %p13204_p9 = scmp.lt.s32.totalorder %s776_s6, %s776_s6 }
 0x9bb   : > { %p13200_p0 = scmp.ne.s32.totalorder %s776_s6, %s13199_s19  ;;  %p13205_p4 = scmp.lt.s32.totalorder %s13199_s19, %s13199_s19 }
 0x9bd   : > { %p13206_p10 = por %p13205_p4, %p13204_p9 }
 0x9bf   : > { %p13207_p7 = pnand %p13206_p10, %p13200_p0 }
 0x9c1   : > { %13210 = shalt.err (!%p13207_p7)  }
 0x9c2   : > { %778 = dma.hbm_to_vmem [thread:$0]  %s766_s26, 65536, %s776_s6, [#allocation5 + $0x1] }
 0x9c3   : > { %s16877_s21 = sld [smem:[#allocation162_spill]]  ;;  %s13328_s11 = smov [#allocation4]  }
 0x9c4   : > { %s790_s17 = sshll.u32 %s13328_s11, 4  ;;  %s791_s17 = int_to_ptr.vmem [resolvable:$true] %s790_s17 }
 0x9c9   : > { %s16878_s28 = smov %s16877_s21  ;;  %s781_s13 = scalar_lea.hbm %s16877_s21, %s11720_s23 }
 0x9ca   : > { %s13211_s27 = scalar_lea.hbm %s781_s13, 32768  ;;  %s13213_s30 = scalar_lea.hbm %s16878_s28, 65536 }
 0x9cb   : > { %p13212_p5 = scmp.ne.s32.totalorder %s781_s13, %s13211_s27  ;;  %p13214_p1 = scmp.lt.s32.totalorder %s781_s13, %s16878_s28 }
 0x9cc   : > { %p13215_p6 = scmp.lt.s32.totalorder %s13213_s30, %s13211_s27 }
 0x9ce   : > { %p13216_p12 = por %p13215_p6, %p13214_p1 }
 0x9d0   : > { %p13217_p11 = pnand %p13216_p12, %p13212_p5 }
 0x9d2   : > { %13220 = shalt.err (!%p13217_p11)  }
 0x9d3   : > { %s13221_s26 = scalar_lea.vmem %s791_s17, 32768  ;;  %p13226_p3 = scmp.lt.s32.totalorder %s791_s17, %s791_s17 }
 0x9d4   : > { %p13222_p13 = scmp.ne.s32.totalorder %s791_s17, %s13221_s26  ;;  %p13227_p8 = scmp.lt.s32.totalorder %s13221_s26, %s13221_s26 }
 0x9d6   : > { %p13228_p2 = por %p13227_p8, %p13226_p3 }
 0x9d8   : > { %p13229_p0 = pnand %p13228_p2, %p13222_p13 }
 0x9da   : > { %13232 = shalt.err (!%p13229_p0)  }
 0x9db   : > { %793 = dma.hbm_to_vmem [thread:$0]  %s781_s13, 32768, %s791_s17, [#allocation5 + $0x2]  ;;  %v16879_v8 = vld [vmem:[#allocation107_spill] sm:$0xff]  ;;  %v16880_v40 = vld [vmem:[#allocation44_spill] sm:$0xff]  ;;  %v16881_v32 = vld [vmem:[#allocation138_spill] sm:$0xff]  ;;  %v1968_v16 = vpop.permute.xlu0 %1967  ;;  %v2318_v21 = vpop.permute.xlu1 %2317 }
 0x9dc   : > { %v16882_v57 = vld [vmem:[#allocation140_spill] sm:$0xff]  ;;  %v16883_v28 = vld [vmem:[#allocation139_spill] sm:$0xff]  ;;  %v16884_v59 = vld [vmem:[#allocation141_spill] sm:$0xff]  ;;  %vm1969_vm9 = vcmp.eq.s32.totalorder %v1968_v16, 1  ;;  %vm2319_vm11 = vcmp.eq.s32.totalorder %v2318_v21, 1  ;;  %s635_s5 = scalar_lea.vmem [#allocation15], %s15639_s18 }
 0x9dd   : > { %v16886_v22 = vld [vmem:[#allocation148_spill] sm:$0xff]  ;;  %s644_s2 = scalar_lea.vmem [#allocation16], %s15639_s18  ;;  %s16893_s6 = sshll.u32 %s13732_s0, 2 }
 0x9de   : > { %v1971_v48 = vsel %vm1969_vm9, %v16886_v22, 0.0  ;;  %s15715_s23 = scalar_lea.vmem [#allocation17], %s16893_s6  ;;  %s661_s19 = scalar_lea.vmem [#allocation18], %s13732_s0 }
 0x9df   : > { %v2493_v61 = vpop.permute.xlu1 %2492  ;;  %s15719_s4 = scalar_lea.vmem [#allocation19], %s15639_s18 }
 0x9e0   : > { %vm2494_vm12 = vcmp.eq.s32.totalorder %v2493_v61, 1 }
 0x9e3   : > { %v2843_v5 = vpop.permute.xlu1 %2842 }
 0x9e4   : > { %vm2844_vm14 = vcmp.eq.s32.totalorder %v2843_v5, 1 }
 0xa20   : > { %v3058_v27 = vpop.f32.mrf.mxu0  ;;  %v3099_v55 = vpop.f32.mrf.mxu1 }
 0xa21   : > { %v3059_v37 = vadd.f32 %v3058_v27, %v16863_v50  ;;  %v3100_v38 = vadd.f32 %v3099_v55, %v16867_v47  ;;  %v16887_v27 = vld [vmem:[#allocation58_spill] sm:$0xff] }
 0xa22   : > { %v3060_v58 = vpop.f32.mrf.mxu0  ;;  %v3101_v49 = vpop.f32.mrf.mxu1 }
 0xa23   : > { %v3061_v24 = vadd.f32 %v3060_v58, %v16864_v1  ;;  %v3147_v15 = vadd.f32 %v3059_v37, %v16879_v8  ;;  %v3102_v0 = vadd.f32 %v3101_v49, %v16868_v9  ;;  %v3149_v4 = vadd.f32 %v3100_v38, %v16881_v32  ;;  %v16888_v49 = vld [vmem:[#allocation60_spill] sm:$0xff]  ;;  %v16892_v32 = vld [vmem:[#allocation111_spill] sm:$0xff] }
 0xa24   : > { %v3062_v39 = vpop.f32.mrf.mxu0  ;;  %v3103_v63 = vpop.f32.mrf.mxu1 }
 0xa25   : > { %v3148_v62 = vadd.f32 %v3061_v24, %v16880_v40  ;;  %v10803_v11 = vmul.f32 -1.442695, %v3147_v15  ;;  %v3150_v3 = vadd.f32 %v3102_v0, %v16882_v57  ;;  %v10805_v41 = vmul.f32 -1.442695, %v3149_v4  ;;  %v16889_v63 = vld [vmem:[#allocation100_spill] sm:$0xff]  ;;  %v16890_v24 = vld [vmem:[#allocation102_spill] sm:$0xff] }
 0xa26   : > { %v3063_v42 = vpop.f32.mrf.mxu0  ;;  %v3104_v2 = vpop.f32.mrf.mxu1  ;;  %v16891_v15 = vld [vmem:[#allocation108_spill] sm:$0xff] }
 0xa27   : > { %v10804_v13 = vmul.f32 -1.442695, %v3148_v62  ;;  %12290 = vpow2.f32 %v10803_v11  ;;  %v10806_v50 = vmul.f32 -1.442695, %v3150_v3  ;;  %v3193_v62 = vpop.permute.xlu1 %3192 }
 0xa28   : > { %vm3194_vm0 = vcmp.eq.s32.totalorder %v3193_v62, 1 }
 0xa29   : > { %12292 = vpow2.f32 %v10804_v13 }
 0xa2a   : > { %12294 = vpow2.f32 %v10805_v41 }
 0xa2b   : > { %12296 = vpow2.f32 %v10806_v50 }
 0xa34   : > { %v12291_v60 = vpop.eup %12290 }
 0xa35   : > { %v3163_v14 = vadd.f32 1.0, %v12291_v60 }
 0xa36   : > { %v12293_v1 = vpop.eup %12292 }
 0xa37   : > { %v3164_v52 = vadd.f32 1.0, %v12293_v1  ;;  %12298 = vrcp.f32 %v3163_v14  ;;  %v12295_v31 = vpop.eup %12294 }
 0xa38   : > { %v12297_v56 = vpop.eup %12296  ;;  %v3165_v47 = vadd.f32 1.0, %v12295_v31 }
 0xa39   : > { %12300 = vrcp.f32 %v3164_v52  ;;  %v3166_v33 = vadd.f32 1.0, %v12297_v56 }
 0xa3a   : > { %12302 = vrcp.f32 %v3165_v47 }
 0xa3b   : > { %12304 = vrcp.f32 %v3166_v33 }
 0xa44   : > { %v12299_v45 = vpop.eup %12298 }
 0xa46   : > { %v12301_v44 = vpop.eup %12300 }
 0xa47   : > { %v12303_v36 = vpop.eup %12302 }
 0xa48   : > { %v12305_v12 = vpop.eup %12304  ;;  %v3181_v2 = vsub.f32 1.0, %v12303_v36  ;;  %v3185_v38 = vmul.f32 %v12303_v36, %v15588_v46 }
 0xa49   : > { %v3182_v11 = vsub.f32 1.0, %v12305_v12  ;;  %v3186_v50 = vmul.f32 %v12305_v12, %v15590_v25 }
 0xa60   : > { %v3140_v18 = vpop.f32.mrf.mxu0 }
 0xa61   : > { %v3141_v9 = vadd.f32 %v3140_v18, %v16871_v6  ;;  %v2143_v6 = vpop.permute.xlu0 %2142 }
 0xa62   : > { %v3142_v51 = vpop.f32.mrf.mxu0  ;;  %vm2144_vm10 = vcmp.eq.s32.totalorder %v2143_v6, 1 }
 0xa63   : > { %v3175_v35 = vmul.f32 %v12299_v45, %v3141_v9  ;;  %v3143_v10 = vadd.f32 %v3142_v51, %v14491_v29  ;;  %v16885_v29 = vld [vmem:[#allocation147_spill] sm:$0xff]  ;;  %v2146_v39 = vsel %vm2144_vm10, %v16888_v49, %v1971_v48 }
 0xa64   : > { %v3144_v30 = vpop.f32.mrf.mxu0  ;;  %v1970_v34 = vsel %vm1969_vm9, %v16885_v29, 0.0  ;;  %v2321_v8 = vsel %vm2319_vm11, %v16890_v24, %v2146_v39 }
 0xa65   : > { %v3177_v7 = vadd.f32 %v3175_v35, %v16883_v28  ;;  %v3176_v43 = vmul.f32 %v12301_v44, %v3143_v10  ;;  %v2668_v17 = vpop.permute.xlu0 %2667  ;;  %v2145_v55 = vsel %vm2144_vm10, %v16887_v27, %v1970_v34  ;;  %v2496_v4 = vsel %vm2494_vm12, %v16892_v32, %v2321_v8 }
 0xa66   : > { %v3145_v53 = vpop.f32.mrf.mxu0  ;;  %v2320_v42 = vsel %vm2319_vm11, %v16889_v63, %v2145_v55  ;;  %vm2669_vm13 = vcmp.eq.s32.totalorder %v2668_v17, 1 }
 0xa67   : > { %12306 = vtanh.f32 %v3177_v7  ;;  %v3178_v54 = vadd.f32 %v3176_v43, %v16884_v59  ;;  %v2495_v40 = vsel %vm2494_vm12, %v16891_v15, %v2320_v42  ;;  %v2671_v1 = vsel %vm2669_vm13, %v15294_v26, %v2496_v4 }
 0xa68   : > { %v2670_v57 = vsel %vm2669_vm13, %v15292_v19, %v2495_v40  ;;  %v2846_v52 = vsel %vm2844_vm14, %v15464_v23, %v2671_v1 }
 0xa69   : > { %12308 = vtanh.f32 %v3178_v54  ;;  %v3018_v58 = vpop.permute.xlu0 %3017  ;;  %v2845_v3 = vsel %vm2844_vm14, %v15462_v20, %v2670_v57 }
 0xa6a   : > { %vm3019_vm15 = vcmp.eq.s32.totalorder %v3018_v58, 1 }
 0xa6b   : > { %v3020_v14 = vsel %vm3019_vm15, %v15588_v46, %v2845_v3  ;;  %v3021_v20 = vsel %vm3019_vm15, %v15590_v25, %v2846_v52 }
 0xa74   : > { %v12307_v37 = vpop.eup %12306 }
 0xa75   : > { %v3183_v13 = vmul.f32 %v12307_v37, %v3181_v2 }
 0xa76   : > { %v12309_v0 = vpop.eup %12308 }
 0xa77   : > { %v3184_v41 = vmul.f32 %v12309_v0, %v3182_v11  ;;  %v3187_v60 = vadd.f32 %v3185_v38, %v3183_v13 }
 0xa79   : > { %v3188_v19 = vadd.f32 %v3186_v50, %v3184_v41  ;;  %v15707_v31 = vsel %vm3194_vm0, %v3187_v60, %v3020_v14 }
 0xa7b   : > { %v3196_v56 = vsel %vm3194_vm0, %v3188_v19, %v3021_v20 }
 0xa7c   : > { %13287 = dma.done.wait [#allocation5], 16384 }
 0xa7d   : > { %13288 = vsyncadd [#allocation5], 4294950912  ;;  %v15721_v26 = vpack.c.bf16 %v3196_v56, %v3196_v56  ;;  %v3259_v23 = vld [vmem:[#allocation2 + $0x1c0] sm:$0xff]  ;;  %v3260_v25 = vld [vmem:[#allocation2 + $0x1c8] sm:$0xff] }
 0xa7e   : > { %v3263_v46 = vld [vmem:[#allocation2 + $0x1e0] sm:$0xff]  ;;  %v3264_v18 = vld [vmem:[#allocation2 + $0x1e8] sm:$0xff] }
 0xa7f   : > { %4045 = vmatprep.mubr.bf16.mxu1 %v15721_v26  ;;  %4086 = vmatprep.mubr.bf16.mxu0 %v15721_v26  ;;  %v10864_v47 = vcombine.high %v3259_v23, %v3263_v46  ;;  %v10863_v33 = vcombine.low %v3259_v23, %v3263_v46  ;;  %v3251_v9 = vld [vmem:[#allocation2 + $0x180] sm:$0xff]  ;;  %v10866_v51 = vcombine.high %v3260_v25, %v3264_v18  ;;  %v3252_v44 = vld [vmem:[#allocation2 + $0x188] sm:$0xff] }
 0xa80   : > { %v3255_v45 = vld [vmem:[#allocation2 + $0x1a0] sm:$0xff]  ;;  %v10865_v35 = vcombine.low %v3260_v25, %v3264_v18  ;;  %v3256_v30 = vld [vmem:[#allocation2 + $0x1a8] sm:$0xff] }
 0xa81   : > { %v10856_v10 = vcombine.high %v3251_v9, %v3255_v45  ;;  %v3243_v28 = vld [vmem:[#allocation2 + $0x140] sm:$0xff]  ;;  %4013 = vmatprep.subr.bf16.mxu1 %v10864_v47  ;;  %v10858_v7 = vcombine.high %v3252_v44, %v3256_v30  ;;  %v3244_v16 = vld [vmem:[#allocation2 + $0x148] sm:$0xff]  ;;  %4054 = vmatprep.subr.bf16.mxu0 %v10866_v51  ;;  %v10855_v59 = vcombine.low %v3251_v9, %v3255_v45 }
 0xa82   : > { %v3247_v43 = vld [vmem:[#allocation2 + $0x160] sm:$0xff]  ;;  %v3248_v53 = vld [vmem:[#allocation2 + $0x168] sm:$0xff]  ;;  %4014 = vmatpush1.bf16.msra.mxu1 %v10863_v33  ;;  %4055 = vmatpush1.bf16.msra.mxu0 %v10865_v35  ;;  %v10857_v54 = vcombine.low %v3252_v44, %v3256_v30 }
 0xa83   : > { %4015 = vmatprep.subr.bf16.mxu1 %v10856_v10  ;;  %v10848_v21 = vcombine.high %v3243_v28, %v3247_v43  ;;  %4056 = vmatprep.subr.bf16.mxu0 %v10858_v7  ;;  %v10850_v6 = vcombine.high %v3244_v16, %v3248_v53  ;;  %v3235_v61 = vld [vmem:[#allocation2 + $0x100] sm:$0xff]  ;;  %v3236_v36 = vld [vmem:[#allocation2 + $0x108] sm:$0xff]  ;;  %v10847_v34 = vcombine.low %v3243_v28, %v3247_v43 }
 0xa84   : > { %v3239_v17 = vld [vmem:[#allocation2 + $0x120] sm:$0xff]  ;;  %v3240_v29 = vld [vmem:[#allocation2 + $0x128] sm:$0xff]  ;;  %v10849_v5 = vcombine.low %v3244_v16, %v3248_v53 }
 0xa85   : > { %v10840_v12 = vcombine.high %v3235_v61, %v3239_v17  ;;  %v10842_v22 = vcombine.high %v3236_v36, %v3240_v29  ;;  %v3227_v48 = vld [vmem:[#allocation2 + $0xc0] sm:$0xff]  ;;  %v3228_v55 = vld [vmem:[#allocation2 + $0xc8] sm:$0xff]  ;;  %v10839_v49 = vcombine.low %v3235_v61, %v3239_v17  ;;  %v10841_v39 = vcombine.low %v3236_v36, %v3240_v29 }
 0xa86   : > { %4016 = vmatpush1.bf16.msra.mxu1 %v10855_v59  ;;  %4057 = vmatpush1.bf16.msra.mxu0 %v10857_v54  ;;  %v3231_v27 = vld [vmem:[#allocation2 + $0xe0] sm:$0xff]  ;;  %v3232_v58 = vld [vmem:[#allocation2 + $0xe8] sm:$0xff] }
 0xa87   : > { %4017 = vmatprep.subr.bf16.mxu1 %v10848_v21  ;;  %4058 = vmatprep.subr.bf16.mxu0 %v10850_v6  ;;  %v10832_v63 = vcombine.high %v3227_v48, %v3231_v27  ;;  %v10834_v42 = vcombine.high %v3228_v55, %v3232_v58  ;;  %v3219_v2 = vld [vmem:[#allocation2 + $0x80] sm:$0xff]  ;;  %v3220_v24 = vld [vmem:[#allocation2 + $0x88] sm:$0xff]  ;;  %v10831_v15 = vcombine.low %v3227_v48, %v3231_v27 }
 0xa88   : > { %v3223_v37 = vld [vmem:[#allocation2 + $0xa0] sm:$0xff]  ;;  %v3224_v8 = vld [vmem:[#allocation2 + $0xa8] sm:$0xff]  ;;  %v10833_v40 = vcombine.low %v3228_v55, %v3232_v58 }
 0xa89   : > { %v10824_v62 = vcombine.high %v3219_v2, %v3223_v37  ;;  %v10826_v11 = vcombine.high %v3220_v24, %v3224_v8  ;;  %v3211_v13 = vld [vmem:[#allocation2 + $0x40] sm:$0xff]  ;;  %v3212_v0 = vld [vmem:[#allocation2 + $0x48] sm:$0xff]  ;;  %v10823_v4 = vcombine.low %v3219_v2, %v3223_v37  ;;  %v10825_v57 = vcombine.low %v3220_v24, %v3224_v8 }
 0xa8a   : > { %4018 = vmatpush1.bf16.msra.mxu1 %v10847_v34  ;;  %4059 = vmatpush1.bf16.msra.mxu0 %v10849_v5  ;;  %v3215_v38 = vld [vmem:[#allocation2 + $0x60] sm:$0xff]  ;;  %v3216_v32 = vld [vmem:[#allocation2 + $0x68] sm:$0xff] }
 0xa8b   : > { %4019 = vmatprep.subr.bf16.mxu1 %v10840_v12  ;;  %4060 = vmatprep.subr.bf16.mxu0 %v10842_v22  ;;  %v10816_v3 = vcombine.high %v3211_v13, %v3215_v38  ;;  %v10818_v41 = vcombine.high %v3212_v0, %v3216_v32  ;;  %v3203_v50 = vld [vmem:[#allocation2] sm:$0xff]  ;;  %v3204_v1 = vld [vmem:[#allocation2 + $0x8] sm:$0xff]  ;;  %v10815_v52 = vcombine.low %v3211_v13, %v3215_v38 }
 0xa8c   : > { %v3207_v60 = vld [vmem:[#allocation2 + $0x20] sm:$0xff]  ;;  %v3208_v14 = vld [vmem:[#allocation2 + $0x28] sm:$0xff]  ;;  %v10817_v19 = vcombine.low %v3212_v0, %v3216_v32 }
 0xa8d   : > { %v10808_v20 = vcombine.high %v3203_v50, %v3207_v60  ;;  %v10810_v56 = vcombine.high %v3204_v1, %v3208_v14  ;;  %v3323_v23 = vld [vmem:[#allocation2 + $0x3c0] sm:$0xff]  ;;  %v3324_v25 = vld [vmem:[#allocation2 + $0x3c8] sm:$0xff]  ;;  %v10807_v18 = vcombine.low %v3203_v50, %v3207_v60  ;;  %v10809_v33 = vcombine.low %v3204_v1, %v3208_v14 }
 0xa8e   : > { %4020 = vmatpush1.bf16.msra.mxu1 %v10839_v49  ;;  %4061 = vmatpush1.bf16.msra.mxu0 %v10841_v39  ;;  %v3327_v46 = vld [vmem:[#allocation2 + $0x3e0] sm:$0xff]  ;;  %v3328_v47 = vld [vmem:[#allocation2 + $0x3e8] sm:$0xff] }
 0xa8f   : > { %4021 = vmatprep.subr.bf16.mxu1 %v10832_v63  ;;  %4062 = vmatprep.subr.bf16.mxu0 %v10834_v42  ;;  %v10928_v9 = vcombine.high %v3323_v23, %v3327_v46  ;;  %v10930_v45 = vcombine.high %v3324_v25, %v3328_v47  ;;  %v3315_v51 = vld [vmem:[#allocation2 + $0x380] sm:$0xff]  ;;  %v3316_v10 = vld [vmem:[#allocation2 + $0x388] sm:$0xff]  ;;  %v10927_v30 = vcombine.low %v3323_v23, %v3327_v46 }
 0xa90   : > { %v3319_v35 = vld [vmem:[#allocation2 + $0x3a0] sm:$0xff]  ;;  %v3320_v44 = vld [vmem:[#allocation2 + $0x3a8] sm:$0xff]  ;;  %v10929_v28 = vcombine.low %v3324_v25, %v3328_v47  ;;  %v3261_v25 = vld [vmem:[#allocation2 + $0x1d0] sm:$0xff] }
 0xa91   : > { %v10920_v7 = vcombine.high %v3315_v51, %v3319_v35  ;;  %v10922_v43 = vcombine.high %v3316_v10, %v3320_v44  ;;  %v3307_v16 = vld [vmem:[#allocation2 + $0x340] sm:$0xff]  ;;  %v3308_v59 = vld [vmem:[#allocation2 + $0x348] sm:$0xff]  ;;  %v10919_v21 = vcombine.low %v3315_v51, %v3319_v35  ;;  %v10921_v6 = vcombine.low %v3316_v10, %v3320_v44  ;;  %v3265_v47 = vld [vmem:[#allocation2 + $0x1f0] sm:$0xff] }
 0xa92   : > { %4022 = vmatpush1.bf16.msra.mxu1 %v10831_v15  ;;  %4063 = vmatpush1.bf16.msra.mxu0 %v10833_v40  ;;  %v3311_v53 = vld [vmem:[#allocation2 + $0x360] sm:$0xff]  ;;  %v3312_v54 = vld [vmem:[#allocation2 + $0x368] sm:$0xff]  ;;  %v10868_v51 = vcombine.high %v3261_v25, %v3265_v47  ;;  %v3253_v10 = vld [vmem:[#allocation2 + $0x190] sm:$0xff] }
 0xa93   : > { %4023 = vmatprep.subr.bf16.mxu1 %v10824_v62  ;;  %4064 = vmatprep.subr.bf16.mxu0 %v10826_v11  ;;  %v10912_v61 = vcombine.high %v3307_v16, %v3311_v53  ;;  %v10914_v17 = vcombine.high %v3308_v59, %v3312_v54  ;;  %v3299_v36 = vld [vmem:[#allocation2 + $0x300] sm:$0xff]  ;;  %v3300_v34 = vld [vmem:[#allocation2 + $0x308] sm:$0xff]  ;;  %v10911_v12 = vcombine.low %v3307_v16, %v3311_v53  ;;  %v3257_v44 = vld [vmem:[#allocation2 + $0x1b0] sm:$0xff] }
 0xa94   : > { %v3303_v29 = vld [vmem:[#allocation2 + $0x320] sm:$0xff]  ;;  %v3304_v5 = vld [vmem:[#allocation2 + $0x328] sm:$0xff]  ;;  %v10913_v22 = vcombine.low %v3308_v59, %v3312_v54  ;;  %v10860_v53 = vcombine.high %v3253_v10, %v3257_v44  ;;  %v3245_v54 = vld [vmem:[#allocation2 + $0x150] sm:$0xff] }
 0xa95   : > { %v10904_v48 = vcombine.high %v3299_v36, %v3303_v29  ;;  %v10906_v27 = vcombine.high %v3300_v34, %v3304_v5  ;;  %v3291_v55 = vld [vmem:[#allocation2 + $0x2c0] sm:$0xff]  ;;  %v3292_v49 = vld [vmem:[#allocation2 + $0x2c8] sm:$0xff]  ;;  %v10903_v63 = vcombine.low %v3299_v36, %v3303_v29  ;;  %v10905_v42 = vcombine.low %v3300_v34, %v3304_v5  ;;  %v3237_v34 = vld [vmem:[#allocation2 + $0x110] sm:$0xff] }
 0xa96   : > { %4024 = vmatpush1.bf16.msra.mxu1 %v10823_v4  ;;  %4065 = vmatpush1.bf16.msra.mxu0 %v10825_v57  ;;  %v3295_v58 = vld [vmem:[#allocation2 + $0x2e0] sm:$0xff]  ;;  %v3296_v39 = vld [vmem:[#allocation2 + $0x2e8] sm:$0xff]  ;;  %v3241_v5 = vld [vmem:[#allocation2 + $0x130] sm:$0xff] }
 0xa97   : > { %4025 = vmatprep.subr.bf16.mxu1 %v10816_v3  ;;  %4066 = vmatprep.subr.bf16.mxu0 %v10818_v41  ;;  %v10896_v2 = vcombine.high %v3291_v55, %v3295_v58  ;;  %v10898_v37 = vcombine.high %v3292_v49, %v3296_v39  ;;  %v3283_v24 = vld [vmem:[#allocation2 + $0x280] sm:$0xff]  ;;  %v3284_v15 = vld [vmem:[#allocation2 + $0x288] sm:$0xff]  ;;  %v10895_v62 = vcombine.low %v3291_v55, %v3295_v58 }
 0xa98   : > { %v3287_v8 = vld [vmem:[#allocation2 + $0x2a0] sm:$0xff]  ;;  %v3288_v40 = vld [vmem:[#allocation2 + $0x2a8] sm:$0xff]  ;;  %v10897_v11 = vcombine.low %v3292_v49, %v3296_v39  ;;  %v10844_v55 = vcombine.high %v3237_v34, %v3241_v5  ;;  %v3229_v49 = vld [vmem:[#allocation2 + $0xd0] sm:$0xff] }
 0xa99   : > { %v10888_v13 = vcombine.high %v3283_v24, %v3287_v8  ;;  %v10890_v38 = vcombine.high %v3284_v15, %v3288_v40  ;;  %v3275_v0 = vld [vmem:[#allocation2 + $0x240] sm:$0xff]  ;;  %v3276_v4 = vld [vmem:[#allocation2 + $0x248] sm:$0xff]  ;;  %v10887_v3 = vcombine.low %v3283_v24, %v3287_v8  ;;  %v10889_v41 = vcombine.low %v3284_v15, %v3288_v40  ;;  %v3233_v39 = vld [vmem:[#allocation2 + $0xf0] sm:$0xff] }
 0xa9a   : > { %4026 = vmatpush1.bf16.msra.mxu1 %v10815_v52  ;;  %4067 = vmatpush1.bf16.msra.mxu0 %v10817_v19  ;;  %v3279_v32 = vld [vmem:[#allocation2 + $0x260] sm:$0xff]  ;;  %v3280_v57 = vld [vmem:[#allocation2 + $0x268] sm:$0xff]  ;;  %v10836_v24 = vcombine.high %v3229_v49, %v3233_v39  ;;  %v3221_v8 = vld [vmem:[#allocation2 + $0x90] sm:$0xff] }
 0xa9b   : > { %4027 = vmatprep.subr.bf16.mxu1 %v10808_v20  ;;  %4068 = vmatprep.subr.bf16.mxu0 %v10810_v56  ;;  %v10880_v50 = vcombine.high %v3275_v0, %v3279_v32  ;;  %v10882_v60 = vcombine.high %v3276_v4, %v3280_v57  ;;  %v3267_v1 = vld [vmem:[#allocation2 + $0x200] sm:$0xff]  ;;  %v3268_v52 = vld [vmem:[#allocation2 + $0x208] sm:$0xff]  ;;  %v10879_v20 = vcombine.low %v3275_v0, %v3279_v32  ;;  %v3225_v15 = vld [vmem:[#allocation2 + $0xb0] sm:$0xff] }
 0xa9c   : > { %v3271_v14 = vld [vmem:[#allocation2 + $0x220] sm:$0xff]  ;;  %v3272_v19 = vld [vmem:[#allocation2 + $0x228] sm:$0xff]  ;;  %v10881_v56 = vcombine.low %v3276_v4, %v3280_v57  ;;  %v3222_v40 = vld [vmem:[#allocation2 + $0x98] sm:$0xff] }
 0xa9d   : > { %v10872_v23 = vcombine.high %v3267_v1, %v3271_v14  ;;  %v10874_v46 = vcombine.high %v3268_v52, %v3272_v19  ;;  %v3213_v32 = vld [vmem:[#allocation2 + $0x50] sm:$0xff]  ;;  %v3214_v57 = vld [vmem:[#allocation2 + $0x58] sm:$0xff] }
 0xa9e   : > { %4028 = vmatpush1.bf16.msra.mxu1 %v10807_v18  ;;  %4069 = vmatpush1.bf16.msra.mxu0 %v10809_v33  ;;  %v3262_v18 = vld [vmem:[#allocation2 + $0x1d8] sm:$0xff]  ;;  %v3217_v4 = vld [vmem:[#allocation2 + $0x70] sm:$0xff] }
 0xa9f   : > { %4029 = vmatprep.subr.bf16.mxu1 %v10928_v9  ;;  %4070 = vmatprep.subr.bf16.mxu0 %v10930_v45  ;;  %v3266_v33 = vld [vmem:[#allocation2 + $0x1f8] sm:$0xff]  ;;  %v10871_v9 = vcombine.low %v3267_v1, %v3271_v14  ;;  %v10873_v45 = vcombine.low %v3268_v52, %v3272_v19  ;;  %v3205_v14 = vld [vmem:[#allocation2 + $0x10] sm:$0xff] }
 0xaa0   : > { %v10870_v35 = vcombine.high %v3262_v18, %v3266_v33  ;;  %v10869_v16 = vcombine.low %v3262_v18, %v3266_v33  ;;  %v3209_v52 = vld [vmem:[#allocation2 + $0x30] sm:$0xff]  ;;  %v3206_v19 = vld [vmem:[#allocation2 + $0x18] sm:$0xff] }
 0xaa1   : > { %v3329_v18 = vld [vmem:[#allocation2 + $0x3f0] sm:$0xff]  ;;  %v3326_v33 = vld [vmem:[#allocation2 + $0x3d8] sm:$0xff] }
 0xaa2   : > { %4030 = vmatpush2.bf16.msra.mxu1 %v10927_v30  ;;  %4071 = vmatpush2.bf16.msra.mxu0 %v10929_v28  ;;  %v15727_v30 = vpack.c.bf16 %v15707_v31, %v15707_v31  ;;  %v3254_v28 = vld [vmem:[#allocation2 + $0x198] sm:$0xff]  ;;  %v10859_v31 = vcombine.low %v3253_v10, %v3257_v44  ;;  %v3317_v44 = vld [vmem:[#allocation2 + $0x390] sm:$0xff] }
 0xaa3   : > { %4031 = vmatprep.subr.bf16.mxu1 %v10920_v7  ;;  %4072 = vmatprep.subr.bf16.mxu0 %v10922_v43  ;;  %v3258_v7 = vld [vmem:[#allocation2 + $0x1b8] sm:$0xff]  ;;  %v10867_v43 = vcombine.low %v3261_v25, %v3265_v47  ;;  %v3325_v47 = vld [vmem:[#allocation2 + $0x3d0] sm:$0xff] }
 0xaa4   : > { %v10862_v59 = vcombine.high %v3254_v28, %v3258_v7 }
 0xaa6   : > { %4032 = vmatpush2.bf16.msra.mxu1 %v10919_v21  ;;  %4073 = vmatpush2.bf16.msra.mxu0 %v10921_v6  ;;  %v3249_v21 = vld [vmem:[#allocation2 + $0x170] sm:$0xff]  ;;  %v3246_v6 = vld [vmem:[#allocation2 + $0x158] sm:$0xff] }
 0xaa7   : > { %4033 = vmatprep.subr.bf16.mxu1 %v10912_v61  ;;  %4074 = vmatprep.subr.bf16.mxu0 %v10914_v17  ;;  %v3250_v61 = vld [vmem:[#allocation2 + $0x178] sm:$0xff]  ;;  %v10861_v17 = vcombine.low %v3254_v28, %v3258_v7  ;;  %v10852_v36 = vcombine.high %v3245_v54, %v3249_v21  ;;  %v3321_v28 = vld [vmem:[#allocation2 + $0x3b0] sm:$0xff] }
 0xaa8   : > { %v10854_v29 = vcombine.high %v3246_v6, %v3250_v61  ;;  %v3318_v7 = vld [vmem:[#allocation2 + $0x398] sm:$0xff] }
 0xaaa   : > { %4034 = vmatpush2.bf16.msra.mxu1 %v10911_v12  ;;  %4075 = vmatpush2.bf16.msra.mxu0 %v10913_v22  ;;  %v3238_v12 = vld [vmem:[#allocation2 + $0x118] sm:$0xff] }
 0xaab   : > { %4035 = vmatprep.subr.bf16.mxu1 %v10904_v48  ;;  %4076 = vmatprep.subr.bf16.mxu0 %v10906_v27  ;;  %v3242_v22 = vld [vmem:[#allocation2 + $0x138] sm:$0xff]  ;;  %v10851_v48 = vcombine.low %v3245_v54, %v3249_v21  ;;  %v10853_v27 = vcombine.low %v3246_v6, %v3250_v61  ;;  %v3309_v21 = vld [vmem:[#allocation2 + $0x350] sm:$0xff] }
 0xaac   : > { %v10846_v58 = vcombine.high %v3238_v12, %v3242_v22  ;;  %v3313_v6 = vld [vmem:[#allocation2 + $0x370] sm:$0xff]  ;;  %v3310_v61 = vld [vmem:[#allocation2 + $0x358] sm:$0xff] }
 0xaae   : > { %4036 = vmatpush2.bf16.msra.mxu1 %v10903_v63  ;;  %4077 = vmatpush2.bf16.msra.mxu0 %v10905_v42  ;;  %v3230_v63 = vld [vmem:[#allocation2 + $0xd8] sm:$0xff] }
 0xaaf   : > { %4037 = vmatprep.subr.bf16.mxu1 %v10896_v2  ;;  %4078 = vmatprep.subr.bf16.mxu0 %v10898_v37  ;;  %v3234_v42 = vld [vmem:[#allocation2 + $0xf8] sm:$0xff]  ;;  %v10843_v2 = vcombine.low %v3237_v34, %v3241_v5  ;;  %v10845_v37 = vcombine.low %v3238_v12, %v3242_v22  ;;  %v3301_v5 = vld [vmem:[#allocation2 + $0x310] sm:$0xff] }
 0xab0   : > { %v3305_v12 = vld [vmem:[#allocation2 + $0x330] sm:$0xff]  ;;  %v3302_v22 = vld [vmem:[#allocation2 + $0x318] sm:$0xff] }
 0xab2   : > { %4038 = vmatpush2.bf16.msra.mxu1 %v10895_v62  ;;  %4079 = vmatpush2.bf16.msra.mxu0 %v10897_v11  ;;  %v3226_v62 = vld [vmem:[#allocation2 + $0xb8] sm:$0xff]  ;;  %v10835_v11 = vcombine.low %v3229_v49, %v3233_v39  ;;  %v3293_v39 = vld [vmem:[#allocation2 + $0x2d0] sm:$0xff] }
 0xab3   : > { %4039 = vmatprep.subr.bf16.mxu1 %v10888_v13  ;;  %4080 = vmatprep.subr.bf16.mxu0 %v10890_v38  ;;  %v10837_v13 = vcombine.low %v3230_v63, %v3234_v42  ;;  %v10828_v38 = vcombine.high %v3221_v8, %v3225_v15  ;;  %v10830_v0 = vcombine.high %v3222_v40, %v3226_v62 }
 0xab6   : > { %4040 = vmatpush2.bf16.msra.mxu1 %v10887_v3  ;;  %4081 = vmatpush2.bf16.msra.mxu0 %v10889_v41  ;;  %v3218_v3 = vld [vmem:[#allocation2 + $0x78] sm:$0xff]  ;;  %v10827_v41 = vcombine.low %v3221_v8, %v3225_v15  ;;  %v3285_v15 = vld [vmem:[#allocation2 + $0x290] sm:$0xff] }
 0xab7   : > { %4041 = vmatprep.subr.bf16.mxu1 %v10880_v50  ;;  %4082 = vmatprep.subr.bf16.mxu0 %v10882_v60  ;;  %v10829_v50 = vcombine.low %v3222_v40, %v3226_v62  ;;  %v10820_v60 = vcombine.high %v3213_v32, %v3217_v4  ;;  %v10822_v1 = vcombine.high %v3214_v57, %v3218_v3  ;;  %v3289_v40 = vld [vmem:[#allocation2 + $0x2b0] sm:$0xff]  ;;  %v3286_v62 = vld [vmem:[#allocation2 + $0x298] sm:$0xff] }
 0xaba   : > { %4042 = vmatpush2.bf16.msra.mxu1 %v10879_v20  ;;  %4083 = vmatpush2.bf16.msra.mxu0 %v10881_v56  ;;  %v3210_v20 = vld [vmem:[#allocation2 + $0x38] sm:$0xff]  ;;  %v10819_v56 = vcombine.low %v3213_v32, %v3217_v4  ;;  %v3277_v4 = vld [vmem:[#allocation2 + $0x250] sm:$0xff] }
 0xabb   : > { %4043 = vmatprep.subr.bf16.mxu1 %v10872_v23  ;;  %4084 = vmatprep.subr.bf16.mxu0 %v10874_v46  ;;  %v10821_v23 = vcombine.low %v3214_v57, %v3218_v3  ;;  %v10812_v46 = vcombine.high %v3205_v14, %v3209_v52  ;;  %v10814_v25 = vcombine.high %v3206_v19, %v3210_v20  ;;  %v3281_v57 = vld [vmem:[#allocation2 + $0x270] sm:$0xff]  ;;  %v3278_v3 = vld [vmem:[#allocation2 + $0x258] sm:$0xff] }
 0xabe   : > { %4044 = vmatpush2.bf16.msra.mxu1 %v10871_v9  ;;  %4085 = vmatpush2.bf16.msra.mxu0 %v10873_v45  ;;  %v3330_v9 = vld [vmem:[#allocation2 + $0x3f8] sm:$0xff]  ;;  %v10811_v45 = vcombine.low %v3205_v14, %v3209_v52  ;;  %v3269_v52 = vld [vmem:[#allocation2 + $0x210] sm:$0xff] }
 0xabf   : > { %4095 = vmatprep.subr.bf16.mxu1 %v10868_v51  ;;  %4136 = vmatprep.subr.bf16.mxu0 %v10870_v35  ;;  %v10813_v51 = vcombine.low %v3206_v19, %v3210_v20  ;;  %v10932_v35 = vcombine.high %v3325_v47, %v3329_v18  ;;  %v10934_v10 = vcombine.high %v3326_v33, %v3330_v9  ;;  %v3273_v19 = vld [vmem:[#allocation2 + $0x230] sm:$0xff]  ;;  %v3270_v20 = vld [vmem:[#allocation2 + $0x218] sm:$0xff] }
 0xac1   : > { %4046 = vmatmul.mubr.bf16.vlgmr.msra.gmra.mxu1 %v15727_v30  ;;  %4087 = vmatmul.mubr.bf16.vlgmr.msra.gmra.mxu0 %v15727_v30 }
 0xac2   : > { %4096 = vmatpush1.bf16.msra.mxu1 %v10867_v43  ;;  %4137 = vmatpush1.bf16.msra.mxu0 %v10869_v16  ;;  %v3322_v43 = vld [vmem:[#allocation2 + $0x3b8] sm:$0xff]  ;;  %v10931_v16 = vcombine.low %v3325_v47, %v3329_v18  ;;  %v10875_v18 = vcombine.low %v3269_v52, %v3273_v19 }
 0xac3   : > { %4097 = vmatprep.subr.bf16.mxu1 %v10860_v53  ;;  %4138 = vmatprep.subr.bf16.mxu0 %v10862_v59  ;;  %v10933_v53 = vcombine.low %v3326_v33, %v3330_v9  ;;  %v10924_v59 = vcombine.high %v3317_v44, %v3321_v28  ;;  %v10926_v54 = vcombine.high %v3318_v7, %v3322_v43  ;;  %v3331_v9 = vld [vmem:[%s635_s5] sm:$0xff] }
 0xac4   : > { %4127 = vmatprep.mubr.bf16.mxu1 %v15721_v26  ;;  %4168 = vmatprep.mubr.bf16.mxu0 %v15721_v26  ;;  %v10838_v26 = vcombine.high %v3230_v63, %v3234_v42  ;;  %v3297_v63 = vld [vmem:[#allocation2 + $0x2f0] sm:$0xff]  ;;  %v3294_v42 = vld [vmem:[#allocation2 + $0x2d8] sm:$0xff] }
 0xac6   : > { %4098 = vmatpush1.bf16.msra.mxu1 %v10859_v31  ;;  %4139 = vmatpush1.bf16.msra.mxu0 %v10861_v17  ;;  %v3314_v31 = vld [vmem:[#allocation2 + $0x378] sm:$0xff]  ;;  %v10923_v17 = vcombine.low %v3317_v44, %v3321_v28  ;;  %v16896_v44 = vld [vmem:[#allocation96_spill] sm:$0xff] }
 0xac7   : > { %4099 = vmatprep.subr.bf16.mxu1 %v10852_v36  ;;  %4140 = vmatprep.subr.bf16.mxu0 %v10854_v29  ;;  %v10925_v36 = vcombine.low %v3318_v7, %v3322_v43  ;;  %v10916_v29 = vcombine.high %v3309_v21, %v3313_v6  ;;  %v10918_v34 = vcombine.high %v3310_v61, %v3314_v31  ;;  %v16897_v43 = vld [vmem:[#allocation113_spill] sm:$0xff] }
 0xac8   : > { %v3340_v28 = vrot.slane %v3331_v9, %v16896_v44 }
 0xaca   : > { %4100 = vmatpush1.bf16.msra.mxu1 %v10851_v48  ;;  %4141 = vmatpush1.bf16.msra.mxu0 %v10853_v27  ;;  %v3306_v48 = vld [vmem:[#allocation2 + $0x338] sm:$0xff]  ;;  %v10915_v27 = vcombine.low %v3309_v21, %v3313_v6 }
 0xacb   : > { %4101 = vmatprep.subr.bf16.mxu1 %v10844_v55  ;;  %4142 = vmatprep.subr.bf16.mxu0 %v10846_v58  ;;  %v10917_v55 = vcombine.low %v3310_v61, %v3314_v31  ;;  %v10908_v58 = vcombine.high %v3301_v5, %v3305_v12  ;;  %v10910_v49 = vcombine.high %v3302_v22, %v3306_v48 }
 0xace   : > { %4102 = vmatpush1.bf16.msra.mxu1 %v10843_v2  ;;  %4143 = vmatpush1.bf16.msra.mxu0 %v10845_v37  ;;  %v3298_v2 = vld [vmem:[#allocation2 + $0x2f8] sm:$0xff]  ;;  %v10907_v37 = vcombine.low %v3301_v5, %v3305_v12 }
 0xacf   : > { %4103 = vmatprep.subr.bf16.mxu1 %v10836_v24  ;;  %4144 = vmatprep.subr.bf16.mxu0 %v10838_v26  ;;  %v10909_v24 = vcombine.low %v3302_v22, %v3306_v48  ;;  %v10900_v26 = vcombine.high %v3293_v39, %v3297_v63  ;;  %v10902_v8 = vcombine.high %v3294_v42, %v3298_v2 }
 0xad2   : > { %4104 = vmatpush1.bf16.msra.mxu1 %v10835_v11  ;;  %4145 = vmatpush1.bf16.msra.mxu0 %v10837_v13  ;;  %v3290_v11 = vld [vmem:[#allocation2 + $0x2b8] sm:$0xff]  ;;  %v10899_v13 = vcombine.low %v3293_v39, %v3297_v63 }
 0xad3   : > { %4105 = vmatprep.subr.bf16.mxu1 %v10828_v38  ;;  %4146 = vmatprep.subr.bf16.mxu0 %v10830_v0  ;;  %v10901_v38 = vcombine.low %v3294_v42, %v3298_v2  ;;  %v10892_v0 = vcombine.high %v3285_v15, %v3289_v40  ;;  %v10894_v32 = vcombine.high %v3286_v62, %v3290_v11  ;;  %v16899_v42 = vld [vmem:[#allocation109_spill] sm:$0xff] }
 0xad4   : > { %v3352_v2 = vrot.slane %v3331_v9, %v16899_v42 }
 0xad6   : > { %4106 = vmatpush1.bf16.msra.mxu1 %v10827_v41  ;;  %4147 = vmatpush1.bf16.msra.mxu0 %v10829_v50  ;;  %v3282_v41 = vld [vmem:[#allocation2 + $0x278] sm:$0xff]  ;;  %v10891_v50 = vcombine.low %v3285_v15, %v3289_v40 }
 0xad7   : > { %4107 = vmatprep.subr.bf16.mxu1 %v10820_v60  ;;  %4148 = vmatprep.subr.bf16.mxu0 %v10822_v1  ;;  %v10893_v60 = vcombine.low %v3286_v62, %v3290_v11  ;;  %v10884_v1 = vcombine.high %v3277_v4, %v3281_v57  ;;  %v10886_v14 = vcombine.high %v3278_v3, %v3282_v41 }
 0xada   : > { %4108 = vmatpush1.bf16.msra.mxu1 %v10819_v56  ;;  %4149 = vmatpush1.bf16.msra.mxu0 %v10821_v23  ;;  %v3274_v56 = vld [vmem:[#allocation2 + $0x238] sm:$0xff]  ;;  %v10883_v23 = vcombine.low %v3277_v4, %v3281_v57 }
 0xadb   : > { %4109 = vmatprep.subr.bf16.mxu1 %v10812_v46  ;;  %4150 = vmatprep.subr.bf16.mxu0 %v10814_v25  ;;  %v10885_v46 = vcombine.low %v3278_v3, %v3282_v41  ;;  %v10876_v25 = vcombine.high %v3269_v52, %v3273_v19  ;;  %v10878_v47 = vcombine.high %v3270_v20, %v3274_v56 }
 0xadc   : > { %v10877_v33 = vcombine.low %v3270_v20, %v3274_v56 }
 0xade   : > { %4110 = vmatpush1.bf16.msra.mxu1 %v10811_v45  ;;  %4151 = vmatpush1.bf16.msra.mxu0 %v10813_v51  ;;  %v16894_v45 = vld [vmem:[#allocation43_spill] sm:$0xff] }
 0xadf   : > { %4111 = vmatprep.subr.bf16.mxu1 %v10932_v35  ;;  %4152 = vmatprep.subr.bf16.mxu0 %v10934_v10  ;;  %v3336_v51 = vrot.slane %v3331_v9, %v16894_v45  ;;  %v16895_v35 = vld [vmem:[#allocation110_spill] sm:$0xff] }
 0xae0   : > { %v3344_v10 = vrot.slane %v3331_v9, %v16895_v35 }
 0xae2   : > { %4112 = vmatpush2.bf16.msra.mxu1 %v10931_v16  ;;  %4153 = vmatpush2.bf16.msra.mxu0 %v10933_v53  ;;  %v3348_v16 = vrot.slane %v3331_v9, %v16897_v43 }
 0xae3   : > { %4113 = vmatprep.subr.bf16.mxu1 %v10924_v59  ;;  %4154 = vmatprep.subr.bf16.mxu0 %v10926_v54 }
 0xae6   : > { %4114 = vmatpush2.bf16.msra.mxu1 %v10923_v17  ;;  %4155 = vmatpush2.bf16.msra.mxu0 %v10925_v36 }
 0xae7   : > { %4115 = vmatprep.subr.bf16.mxu1 %v10916_v29  ;;  %4156 = vmatprep.subr.bf16.mxu0 %v10918_v34 }
 0xaea   : > { %4116 = vmatpush2.bf16.msra.mxu1 %v10915_v27  ;;  %4157 = vmatpush2.bf16.msra.mxu0 %v10917_v55 }
 0xaeb   : > { %4117 = vmatprep.subr.bf16.mxu1 %v10908_v58  ;;  %4158 = vmatprep.subr.bf16.mxu0 %v10910_v49  ;;  %v16898_v49 = vld [vmem:[#allocation42_spill] sm:$0xff] }
 0xaec   : > { %v3359_v39 = vsub.s32 6, %v16898_v49  ;;  %v3363_v63 = vsub.s32 7, %v16898_v49 }
 0xaee   : > { %4118 = vmatpush2.bf16.msra.mxu1 %v10907_v37  ;;  %4159 = vmatpush2.bf16.msra.mxu0 %v10909_v24  ;;  %v3360_v37 = vrot.slane %v3331_v9, %v3359_v39  ;;  %v16900_v24 = vld [vmem:[#allocation112_spill] sm:$0xff]  ;;  %v3364_v15 = vrot.slane %v3331_v9, %v3363_v63 }
 0xaef   : > { %4119 = vmatprep.subr.bf16.mxu1 %v10900_v26  ;;  %4160 = vmatprep.subr.bf16.mxu0 %v10902_v8  ;;  %v3356_v26 = vrot.slane %v3331_v9, %v16900_v24 }
 0xaf2   : > { %4120 = vmatpush2.bf16.msra.mxu1 %v10899_v13  ;;  %4161 = vmatpush2.bf16.msra.mxu0 %v10901_v38 }
 0xaf3   : > { %4121 = vmatprep.subr.bf16.mxu1 %v10892_v0  ;;  %4162 = vmatprep.subr.bf16.mxu0 %v10894_v32 }
 0xaf6   : > { %4122 = vmatpush2.bf16.msra.mxu1 %v10891_v50  ;;  %4163 = vmatpush2.bf16.msra.mxu0 %v10893_v60 }
 0xaf7   : > { %4123 = vmatprep.subr.bf16.mxu1 %v10884_v1  ;;  %4164 = vmatprep.subr.bf16.mxu0 %v10886_v14 }
 0xafa   : > { %4124 = vmatpush2.bf16.msra.mxu1 %v10883_v23  ;;  %4165 = vmatpush2.bf16.msra.mxu0 %v10885_v46 }
 0xafb   : > { %4125 = vmatprep.subr.bf16.mxu1 %v10876_v25  ;;  %4166 = vmatprep.subr.bf16.mxu0 %v10878_v47 }
 0xafe   : > { %4126 = vmatpush2.bf16.msra.mxu1 %v10875_v18  ;;  %4167 = vmatpush2.bf16.msra.mxu0 %v10877_v33 }
 0xb01   : > { %4128 = vmatmul.mubr.bf16.vlgmr.msra.gmra.mxu1 %v15727_v30  ;;  %4169 = vmatmul.mubr.bf16.vlgmr.msra.gmra.mxu0 %v15727_v30 }
 0xb81   : > { %v4047_v7 = vpop.f32.mrf.mxu1  ;;  %v4088_v59 = vpop.f32.mrf.mxu0 }
 0xb82   : > { %v4048_v53 = vadd.f32 %v4047_v7, %v3336_v51  ;;  %v4089_v54 = vadd.f32 %v4088_v59, %v3344_v10 }
 0xb83   : > { %v4049_v21 = vpop.f32.mrf.mxu1  ;;  %v4090_v31 = vpop.f32.mrf.mxu0 }
 0xb84   : > { %v4177_v6 = vmax.f32 %v4048_v53, 0.0  ;;  %v4050_v61 = vadd.f32 %v4049_v21, %v3340_v28  ;;  %v4179_v17 = vmax.f32 %v4089_v54, 0.0  ;;  %v4091_v30 = vadd.f32 %v4090_v31, %v3348_v16 }
 0xb85   : > { %v4051_v36 = vpop.f32.mrf.mxu1  ;;  %v4092_v5 = vpop.f32.mrf.mxu0 }
 0xb86   : > { %v15741_v29 = vmin.f32 %v4177_v6, 6.0  ;;  %v4178_v34 = vmax.f32 %v4050_v61, 0.0  ;;  %v15743_v12 = vmin.f32 %v4179_v17, 6.0  ;;  %v4180_v22 = vmax.f32 %v4091_v30, 0.0 }
 0xb87   : > { %v4052_v48 = vpop.f32.mrf.mxu1  ;;  %v4093_v55 = vpop.f32.mrf.mxu0 }
 0xb88   : > { %v4186_v27 = vmin.f32 %v4178_v34, 6.0  ;;  %v4188_v58 = vmin.f32 %v4180_v22, 6.0 }
 0xbc1   : > { %v4129_v8 = vpop.f32.mrf.mxu1  ;;  %v4170_v62 = vpop.f32.mrf.mxu0 }
 0xbc2   : > { %v4130_v40 = vadd.f32 %v4129_v8, %v3352_v2  ;;  %v4171_v11 = vadd.f32 %v4170_v62, %v3360_v37 }
 0xbc3   : > { %v4131_v13 = vpop.f32.mrf.mxu1  ;;  %v4172_v32 = vpop.f32.mrf.mxu0 }
 0xbc4   : > { %v4181_v38 = vmax.f32 %v4130_v40, 0.0  ;;  %v4132_v0 = vadd.f32 %v4131_v13, %v3356_v26  ;;  %v4183_v4 = vmax.f32 %v4171_v11, 0.0  ;;  %v4173_v57 = vadd.f32 %v4172_v32, %v3364_v15 }
 0xbc5   : > { %v4133_v3 = vpop.f32.mrf.mxu1  ;;  %v4174_v60 = vpop.f32.mrf.mxu0 }
 0xbc6   : > { %v15753_v41 = vmin.f32 %v4181_v38, 6.0  ;;  %v4182_v50 = vmax.f32 %v4132_v0, 0.0  ;;  %v15755_v1 = vmin.f32 %v4183_v4, 6.0  ;;  %v4184_v14 = vmax.f32 %v4173_v57, 0.0 }
 0xbc7   : > { %v4134_v52 = vpop.f32.mrf.mxu1  ;;  %v4175_v20 = vpop.f32.mrf.mxu0 }
 0xbc8   : > { %v15757_v19 = vmin.f32 %v4182_v50, 6.0  ;;  %v15759_v56 = vmin.f32 %v4184_v14, 6.0 }
 0xbc9   : > { %13289 = dma.done.wait [#allocation5 + $0x1], 65536 }
 0xbca   : > { %13290 = vsyncadd [#allocation5 + $0x1], 4294901760  ;;  %v15761_v23 = vpack.c.bf16 %v4186_v27, %v4186_v27  ;;  %v15763_v46 = vpack.c.bf16 %v4188_v58, %v4188_v58  ;;  %v4261_v25 = vld [vmem:[#allocation3 + $0x1c0] sm:$0xff] }
 0xbcb   : > { %v4265_v47 = vld [vmem:[#allocation3 + $0x1e0] sm:$0xff] }
 0xbcc   : > { %7351 = vmatprep.mubr.bf16.mxu1 %v15761_v23  ;;  %7392 = vmatprep.mubr.bf16.mxu0 %v15763_v46  ;;  %v4389_v18 = vld [vmem:[#allocation3 + $0x5c0] sm:$0xff]  ;;  %v10992_v33 = vcombine.high %v4261_v25, %v4265_v47  ;;  %v10991_v51 = vcombine.low %v4261_v25, %v4265_v47 }
 0xbcd   : > { %v4393_v9 = vld [vmem:[#allocation3 + $0x5e0] sm:$0xff] }
 0xbce   : > { %v4253_v10 = vld [vmem:[#allocation3 + $0x180] sm:$0xff]  ;;  %v11120_v7 = vcombine.high %v4389_v18, %v4393_v9  ;;  %v11119_v16 = vcombine.low %v4389_v18, %v4393_v9  ;;  %7319 = vmatprep.subr.bf16.mxu1 %v10992_v33 }
 0xbcf   : > { %v4257_v28 = vld [vmem:[#allocation3 + $0x1a0] sm:$0xff]  ;;  %7320 = vmatpush1.bf16.msra.mxu1 %v10991_v51 }
 0xbd0   : > { %v10984_v53 = vcombine.high %v4253_v10, %v4257_v28  ;;  %v4381_v59 = vld [vmem:[#allocation3 + $0x580] sm:$0xff]  ;;  %7360 = vmatprep.subr.bf16.mxu0 %v11120_v7  ;;  %v10983_v30 = vcombine.low %v4253_v10, %v4257_v28 }
 0xbd1   : > { %v4385_v54 = vld [vmem:[#allocation3 + $0x5a0] sm:$0xff]  ;;  %7361 = vmatpush1.bf16.msra.mxu0 %v11119_v16 }
 0xbd2   : > { %v4245_v21 = vld [vmem:[#allocation3 + $0x140] sm:$0xff]  ;;  %v11112_v6 = vcombine.high %v4381_v59, %v4385_v54  ;;  %7321 = vmatprep.subr.bf16.mxu1 %v10984_v53  ;;  %v11111_v36 = vcombine.low %v4381_v59, %v4385_v54 }
 0xbd3   : > { %v4249_v61 = vld [vmem:[#allocation3 + $0x160] sm:$0xff]  ;;  %7322 = vmatpush1.bf16.msra.mxu1 %v10983_v30 }
 0xbd4   : > { %v4373_v31 = vld [vmem:[#allocation3 + $0x540] sm:$0xff]  ;;  %v10976_v34 = vcombine.high %v4245_v21, %v4249_v61  ;;  %7362 = vmatprep.subr.bf16.mxu0 %v11112_v6  ;;  %v10975_v58 = vcombine.low %v4245_v21, %v4249_v61 }
 0xbd5   : > { %v4377_v17 = vld [vmem:[#allocation3 + $0x560] sm:$0xff]  ;;  %7363 = vmatpush1.bf16.msra.mxu0 %v11111_v36 }
 0xbd6   : > { %v11104_v5 = vcombine.high %v4373_v31, %v4377_v17  ;;  %v4237_v22 = vld [vmem:[#allocation3 + $0x100] sm:$0xff]  ;;  %7323 = vmatprep.subr.bf16.mxu1 %v10976_v34  ;;  %v11103_v2 = vcombine.low %v4373_v31, %v4377_v17 }
 0xbd7   : > { %v4241_v48 = vld [vmem:[#allocation3 + $0x120] sm:$0xff]  ;;  %7324 = vmatpush1.bf16.msra.mxu1 %v10975_v58 }
 0xbd8   : > { %v4365_v27 = vld [vmem:[#allocation3 + $0x500] sm:$0xff]  ;;  %v10968_v37 = vcombine.high %v4237_v22, %v4241_v48  ;;  %7364 = vmatprep.subr.bf16.mxu0 %v11104_v5  ;;  %v10967_v11 = vcombine.low %v4237_v22, %v4241_v48 }
 0xbd9   : > { %v4369_v55 = vld [vmem:[#allocation3 + $0x520] sm:$0xff]  ;;  %7365 = vmatpush1.bf16.msra.mxu0 %v11103_v2 }
 0xbda   : > { %v11096_v26 = vcombine.high %v4365_v27, %v4369_v55  ;;  %v4229_v8 = vld [vmem:[#allocation3 + $0xc0] sm:$0xff]  ;;  %7325 = vmatprep.subr.bf16.mxu1 %v10968_v37  ;;  %v11095_v13 = vcombine.low %v4365_v27, %v4369_v55 }
 0xbdb   : > { %v4233_v15 = vld [vmem:[#allocation3 + $0xe0] sm:$0xff]  ;;  %7326 = vmatpush1.bf16.msra.mxu1 %v10967_v11 }
 0xbdc   : > { %v4357_v40 = vld [vmem:[#allocation3 + $0x4c0] sm:$0xff]  ;;  %v10960_v38 = vcombine.high %v4229_v8, %v4233_v15  ;;  %7366 = vmatprep.subr.bf16.mxu0 %v11096_v26  ;;  %v10959_v50 = vcombine.low %v4229_v8, %v4233_v15 }
 0xbdd   : > { %v4361_v62 = vld [vmem:[#allocation3 + $0x4e0] sm:$0xff]  ;;  %7367 = vmatpush1.bf16.msra.mxu0 %v11095_v13 }
 0xbde   : > { %v11088_v0 = vcombine.high %v4357_v40, %v4361_v62  ;;  %v4221_v32 = vld [vmem:[#allocation3 + $0x80] sm:$0xff]  ;;  %7327 = vmatprep.subr.bf16.mxu1 %v10960_v38  ;;  %v11087_v60 = vcombine.low %v4357_v40, %v4361_v62 }
 0xbdf   : > { %v4225_v4 = vld [vmem:[#allocation3 + $0xa0] sm:$0xff]  ;;  %7328 = vmatpush1.bf16.msra.mxu1 %v10959_v50 }
 0xbe0   : > { %v4349_v57 = vld [vmem:[#allocation3 + $0x480] sm:$0xff]  ;;  %v10952_v14 = vcombine.high %v4221_v32, %v4225_v4  ;;  %7368 = vmatprep.subr.bf16.mxu0 %v11088_v0  ;;  %v10951_v33 = vcombine.low %v4221_v32, %v4225_v4 }
 0xbe1   : > { %v4353_v3 = vld [vmem:[#allocation3 + $0x4a0] sm:$0xff]  ;;  %7369 = vmatpush1.bf16.msra.mxu0 %v11087_v60 }
 0xbe2   : > { %v11080_v52 = vcombine.high %v4349_v57, %v4353_v3  ;;  %v4213_v20 = vld [vmem:[#allocation3 + $0x40] sm:$0xff]  ;;  %7329 = vmatprep.subr.bf16.mxu1 %v10952_v14  ;;  %v11079_v9 = vcombine.low %v4349_v57, %v4353_v3 }
 0xbe3   : > { %v4217_v25 = vld [vmem:[#allocation3 + $0x60] sm:$0xff]  ;;  %7330 = vmatpush1.bf16.msra.mxu1 %v10951_v33 }
 0xbe4   : > { %v4341_v47 = vld [vmem:[#allocation3 + $0x440] sm:$0xff]  ;;  %v10944_v51 = vcombine.high %v4213_v20, %v4217_v25  ;;  %7370 = vmatprep.subr.bf16.mxu0 %v11080_v52  ;;  %v10943_v59 = vcombine.low %v4213_v20, %v4217_v25 }
 0xbe5   : > { %v4345_v18 = vld [vmem:[#allocation3 + $0x460] sm:$0xff]  ;;  %7371 = vmatpush1.bf16.msra.mxu0 %v11079_v9 }
 0xbe6   : > { %v11072_v10 = vcombine.high %v4341_v47, %v4345_v18  ;;  %v4205_v28 = vld [vmem:[#allocation3] sm:$0xff]  ;;  %7331 = vmatprep.subr.bf16.mxu1 %v10944_v51  ;;  %v11071_v54 = vcombine.low %v4341_v47, %v4345_v18 }
 0xbe7   : > { %v4209_v7 = vld [vmem:[#allocation3 + $0x20] sm:$0xff]  ;;  %7332 = vmatpush1.bf16.msra.mxu1 %v10943_v59 }
 0xbe8   : > { %v4333_v16 = vld [vmem:[#allocation3 + $0x400] sm:$0xff]  ;;  %v10936_v21 = vcombine.high %v4205_v28, %v4209_v7  ;;  %7372 = vmatprep.subr.bf16.mxu0 %v11072_v10  ;;  %v10935_v36 = vcombine.low %v4205_v28, %v4209_v7 }
 0xbe9   : > { %v4337_v53 = vld [vmem:[#allocation3 + $0x420] sm:$0xff]  ;;  %7373 = vmatpush1.bf16.msra.mxu0 %v11071_v54 }
 0xbea   : > { %v11064_v6 = vcombine.high %v4333_v16, %v4337_v53  ;;  %v4325_v61 = vld [vmem:[#allocation3 + $0x3c0] sm:$0xff]  ;;  %7333 = vmatprep.subr.bf16.mxu1 %v10936_v21  ;;  %v11063_v34 = vcombine.low %v4333_v16, %v4337_v53 }
 0xbeb   : > { %v4329_v31 = vld [vmem:[#allocation3 + $0x3e0] sm:$0xff]  ;;  %7334 = vmatpush1.bf16.msra.mxu1 %v10935_v36 }
 0xbec   : > { %v4453_v17 = vld [vmem:[#allocation3 + $0x7c0] sm:$0xff]  ;;  %v11056_v5 = vcombine.high %v4325_v61, %v4329_v31  ;;  %7374 = vmatprep.subr.bf16.mxu0 %v11064_v6  ;;  %v11055_v2 = vcombine.low %v4325_v61, %v4329_v31 }
 0xbed   : > { %v4457_v30 = vld [vmem:[#allocation3 + $0x7e0] sm:$0xff]  ;;  %7375 = vmatpush1.bf16.msra.mxu0 %v11063_v34 }
 0xbee   : > { %v11184_v22 = vcombine.high %v4453_v17, %v4457_v30  ;;  %v4317_v48 = vld [vmem:[#allocation3 + $0x380] sm:$0xff]  ;;  %7335 = vmatprep.subr.bf16.mxu1 %v11056_v5  ;;  %v11183_v37 = vcombine.low %v4453_v17, %v4457_v30 }
 0xbef   : > { %v4321_v27 = vld [vmem:[#allocation3 + $0x3a0] sm:$0xff]  ;;  %7336 = vmatpush2.bf16.msra.mxu1 %v11055_v2 }
 0xbf0   : > { %v4445_v55 = vld [vmem:[#allocation3 + $0x780] sm:$0xff]  ;;  %v11048_v26 = vcombine.high %v4317_v48, %v4321_v27  ;;  %7376 = vmatprep.subr.bf16.mxu0 %v11184_v22  ;;  %v11047_v13 = vcombine.low %v4317_v48, %v4321_v27 }
 0xbf1   : > { %v4449_v58 = vld [vmem:[#allocation3 + $0x7a0] sm:$0xff]  ;;  %7377 = vmatpush2.bf16.msra.mxu0 %v11183_v37 }
 0xbf2   : > { %v11176_v8 = vcombine.high %v4445_v55, %v4449_v58  ;;  %v4309_v15 = vld [vmem:[#allocation3 + $0x340] sm:$0xff]  ;;  %7337 = vmatprep.subr.bf16.mxu1 %v11048_v26  ;;  %v11175_v38 = vcombine.low %v4445_v55, %v4449_v58 }
 0xbf3   : > { %v4313_v40 = vld [vmem:[#allocation3 + $0x360] sm:$0xff]  ;;  %7338 = vmatpush2.bf16.msra.mxu1 %v11047_v13 }
 0xbf4   : > { %v4437_v62 = vld [vmem:[#allocation3 + $0x740] sm:$0xff]  ;;  %v11040_v0 = vcombine.high %v4309_v15, %v4313_v40  ;;  %7378 = vmatprep.subr.bf16.mxu0 %v11176_v8  ;;  %v11039_v60 = vcombine.low %v4309_v15, %v4313_v40 }
 0xbf5   : > { %v4441_v11 = vld [vmem:[#allocation3 + $0x760] sm:$0xff]  ;;  %7379 = vmatpush2.bf16.msra.mxu0 %v11175_v38 }
 0xbf6   : > { %v11168_v32 = vcombine.high %v4437_v62, %v4441_v11  ;;  %v4301_v4 = vld [vmem:[#allocation3 + $0x300] sm:$0xff]  ;;  %7339 = vmatprep.subr.bf16.mxu1 %v11040_v0  ;;  %v11167_v14 = vcombine.low %v4437_v62, %v4441_v11 }
 0xbf7   : > { %v4305_v57 = vld [vmem:[#allocation3 + $0x320] sm:$0xff]  ;;  %7340 = vmatpush2.bf16.msra.mxu1 %v11039_v60 }
 0xbf8   : > { %v4429_v3 = vld [vmem:[#allocation3 + $0x700] sm:$0xff]  ;;  %v11032_v52 = vcombine.high %v4301_v4, %v4305_v57  ;;  %7380 = vmatprep.subr.bf16.mxu0 %v11168_v32  ;;  %v11031_v9 = vcombine.low %v4301_v4, %v4305_v57 }
 0xbf9   : > { %v4433_v50 = vld [vmem:[#allocation3 + $0x720] sm:$0xff]  ;;  %7381 = vmatpush2.bf16.msra.mxu0 %v11167_v14 }
 0xbfa   : > { %v11160_v20 = vcombine.high %v4429_v3, %v4433_v50  ;;  %v4293_v25 = vld [vmem:[#allocation3 + $0x2c0] sm:$0xff]  ;;  %7341 = vmatprep.subr.bf16.mxu1 %v11032_v52  ;;  %v11159_v51 = vcombine.low %v4429_v3, %v4433_v50  ;;  %v15769_v50 = vpack.c.bf16 %v15741_v29, %v15741_v29  ;;  %v15773_v52 = vpack.c.bf16 %v15743_v12, %v15743_v12 }
 0xbfb   : > { %v4297_v47 = vld [vmem:[#allocation3 + $0x2e0] sm:$0xff]  ;;  %7342 = vmatpush2.bf16.msra.mxu1 %v11031_v9  ;;  %v15777_v29 = vpack.c.bf16 %v15757_v19, %v15757_v19  ;;  %v15782_v12 = vpack.c.bf16 %v15759_v56, %v15759_v56 }
 0xbfc   : > { %v4421_v18 = vld [vmem:[#allocation3 + $0x6c0] sm:$0xff]  ;;  %v11024_v10 = vcombine.high %v4293_v25, %v4297_v47  ;;  %7382 = vmatprep.subr.bf16.mxu0 %v11160_v20  ;;  %v11023_v54 = vcombine.low %v4293_v25, %v4297_v47 }
 0xbfd   : > { %v4425_v33 = vld [vmem:[#allocation3 + $0x6e0] sm:$0xff]  ;;  %7383 = vmatpush2.bf16.msra.mxu0 %v11159_v51 }
 0xbfe   : > { %v11152_v28 = vcombine.high %v4421_v18, %v4425_v33  ;;  %v4285_v7 = vld [vmem:[#allocation3 + $0x280] sm:$0xff]  ;;  %7343 = vmatprep.subr.bf16.mxu1 %v11024_v10  ;;  %v11151_v21 = vcombine.low %v4421_v18, %v4425_v33 }
 0xbff   : > { %v4289_v16 = vld [vmem:[#allocation3 + $0x2a0] sm:$0xff]  ;;  %7344 = vmatpush2.bf16.msra.mxu1 %v11023_v54 }
 0xc00   : > { %v4413_v53 = vld [vmem:[#allocation3 + $0x680] sm:$0xff]  ;;  %v11016_v6 = vcombine.high %v4285_v7, %v4289_v16  ;;  %7384 = vmatprep.subr.bf16.mxu0 %v11152_v28  ;;  %v11015_v34 = vcombine.low %v4285_v7, %v4289_v16 }
 0xc01   : > { %v4417_v59 = vld [vmem:[#allocation3 + $0x6a0] sm:$0xff]  ;;  %7385 = vmatpush2.bf16.msra.mxu0 %v11151_v21 }
 0xc02   : > { %v11144_v61 = vcombine.high %v4413_v53, %v4417_v59  ;;  %v4277_v31 = vld [vmem:[#allocation3 + $0x240] sm:$0xff]  ;;  %7345 = vmatprep.subr.bf16.mxu1 %v11016_v6  ;;  %v11143_v5 = vcombine.low %v4413_v53, %v4417_v59 }
 0xc03   : > { %v4281_v17 = vld [vmem:[#allocation3 + $0x260] sm:$0xff]  ;;  %7346 = vmatpush2.bf16.msra.mxu1 %v11015_v34 }
 0xc04   : > { %v4405_v30 = vld [vmem:[#allocation3 + $0x640] sm:$0xff]  ;;  %v11008_v22 = vcombine.high %v4277_v31, %v4281_v17  ;;  %7386 = vmatprep.subr.bf16.mxu0 %v11144_v61  ;;  %v11007_v37 = vcombine.low %v4277_v31, %v4281_v17 }
 0xc05   : > { %v4409_v36 = vld [vmem:[#allocation3 + $0x660] sm:$0xff]  ;;  %7387 = vmatpush2.bf16.msra.mxu0 %v11143_v5 }
 0xc06   : > { %v11136_v48 = vcombine.high %v4405_v30, %v4409_v36  ;;  %v4269_v27 = vld [vmem:[#allocation3 + $0x200] sm:$0xff]  ;;  %7347 = vmatprep.subr.bf16.mxu1 %v11008_v22  ;;  %v11135_v26 = vcombine.low %v4405_v30, %v4409_v36 }
 0xc07   : > { %v4273_v55 = vld [vmem:[#allocation3 + $0x220] sm:$0xff]  ;;  %7348 = vmatpush2.bf16.msra.mxu1 %v11007_v37 }
 0xc08   : > { %v4397_v58 = vld [vmem:[#allocation3 + $0x600] sm:$0xff]  ;;  %v11000_v8 = vcombine.high %v4269_v27, %v4273_v55  ;;  %7388 = vmatprep.subr.bf16.mxu0 %v11136_v48  ;;  %v10999_v38 = vcombine.low %v4269_v27, %v4273_v55 }
 0xc09   : > { %v4401_v2 = vld [vmem:[#allocation3 + $0x620] sm:$0xff]  ;;  %7389 = vmatpush2.bf16.msra.mxu0 %v11135_v26 }
 0xc0a   : > { %v11128_v15 = vcombine.high %v4397_v58, %v4401_v2  ;;  %v4517_v40 = vld [vmem:[#allocation3 + $0x9c0] sm:$0xff]  ;;  %7349 = vmatprep.subr.bf16.mxu1 %v11000_v8  ;;  %v11127_v0 = vcombine.low %v4397_v58, %v4401_v2 }
 0xc0b   : > { %v4521_v62 = vld [vmem:[#allocation3 + $0x9e0] sm:$0xff]  ;;  %7350 = vmatpush2.bf16.msra.mxu1 %v10999_v38 }
 0xc0c   : > { %v4645_v11 = vld [vmem:[#allocation3 + $0xdc0] sm:$0xff]  ;;  %v11248_v32 = vcombine.high %v4517_v40, %v4521_v62  ;;  %7390 = vmatprep.subr.bf16.mxu0 %v11128_v15  ;;  %v11247_v20 = vcombine.low %v4517_v40, %v4521_v62 }
 0xc0d   : > { %v4649_v13 = vld [vmem:[#allocation3 + $0xde0] sm:$0xff]  ;;  %7391 = vmatpush2.bf16.msra.mxu0 %v11127_v0 }
 0xc0e   : > { %v11376_v4 = vcombine.high %v4645_v11, %v4649_v13  ;;  %v4509_v57 = vld [vmem:[#allocation3 + $0x980] sm:$0xff]  ;;  %7401 = vmatprep.subr.bf16.mxu1 %v11248_v32  ;;  %v11375_v25 = vcombine.low %v4645_v11, %v4649_v13  ;;  %7352 = vmatmul.mubr.bf16.vlgmr.msra.gmra.mxu1 %v15769_v50 }
 0xc0f   : > { %v4513_v3 = vld [vmem:[#allocation3 + $0x9a0] sm:$0xff]  ;;  %7402 = vmatpush1.bf16.msra.mxu1 %v11247_v20  ;;  %7433 = vmatprep.mubr.bf16.mxu1 %v15777_v29 }
 0xc10   : > { %v4637_v60 = vld [vmem:[#allocation3 + $0xd80] sm:$0xff]  ;;  %v11240_v47 = vcombine.high %v4509_v57, %v4513_v3  ;;  %7442 = vmatprep.subr.bf16.mxu0 %v11376_v4  ;;  %7393 = vmatmul.mubr.bf16.vlgmr.msra.gmra.mxu0 %v15773_v52  ;;  %v11239_v28 = vcombine.low %v4509_v57, %v4513_v3 }
 0xc11   : > { %v4641_v14 = vld [vmem:[#allocation3 + $0xda0] sm:$0xff]  ;;  %7443 = vmatpush1.bf16.msra.mxu0 %v11375_v25  ;;  %7474 = vmatprep.mubr.bf16.mxu0 %v15782_v12 }
 0xc12   : > { %v11368_v18 = vcombine.high %v4637_v60, %v4641_v14  ;;  %v4501_v33 = vld [vmem:[#allocation3 + $0x940] sm:$0xff]  ;;  %7403 = vmatprep.subr.bf16.mxu1 %v11240_v47  ;;  %v11367_v7 = vcombine.low %v4637_v60, %v4641_v14 }
 0xc13   : > { %v4505_v9 = vld [vmem:[#allocation3 + $0x960] sm:$0xff]  ;;  %7404 = vmatpush1.bf16.msra.mxu1 %v11239_v28 }
 0xc14   : > { %v4629_v51 = vld [vmem:[#allocation3 + $0xd40] sm:$0xff]  ;;  %v11232_v16 = vcombine.high %v4501_v33, %v4505_v9  ;;  %7444 = vmatprep.subr.bf16.mxu0 %v11368_v18  ;;  %v11231_v56 = vcombine.low %v4501_v33, %v4505_v9 }
 0xc15   : > { %v4633_v10 = vld [vmem:[#allocation3 + $0xd60] sm:$0xff]  ;;  %7445 = vmatpush1.bf16.msra.mxu0 %v11367_v7 }
 0xc16   : > { %v11360_v53 = vcombine.high %v4629_v51, %v4633_v10  ;;  %v4493_v19 = vld [vmem:[#allocation3 + $0x900] sm:$0xff]  ;;  %7405 = vmatprep.subr.bf16.mxu1 %v11232_v16  ;;  %v11359_v6 = vcombine.low %v4629_v51, %v4633_v10 }
 0xc17   : > { %v4497_v59 = vld [vmem:[#allocation3 + $0x920] sm:$0xff]  ;;  %7406 = vmatpush1.bf16.msra.mxu1 %v11231_v56 }
 0xc18   : > { %v4621_v54 = vld [vmem:[#allocation3 + $0xd00] sm:$0xff]  ;;  %v11224_v61 = vcombine.high %v4493_v19, %v4497_v59  ;;  %7446 = vmatprep.subr.bf16.mxu0 %v11360_v53  ;;  %v11223_v5 = vcombine.low %v4493_v19, %v4497_v59 }
 0xc19   : > { %v4625_v21 = vld [vmem:[#allocation3 + $0xd20] sm:$0xff]  ;;  %7447 = vmatpush1.bf16.msra.mxu0 %v11359_v6 }
 0xc1a   : > { %v11352_v31 = vcombine.high %v4621_v54, %v4625_v21  ;;  %v4485_v17 = vld [vmem:[#allocation3 + $0x8c0] sm:$0xff]  ;;  %7407 = vmatprep.subr.bf16.mxu1 %v11224_v61  ;;  %v11351_v22 = vcombine.low %v4621_v54, %v4625_v21 }
 0xc1b   : > { %v4489_v30 = vld [vmem:[#allocation3 + $0x8e0] sm:$0xff]  ;;  %7408 = vmatpush1.bf16.msra.mxu1 %v11223_v5 }
 0xc1c   : > { %v4613_v36 = vld [vmem:[#allocation3 + $0xcc0] sm:$0xff]  ;;  %v11216_v48 = vcombine.high %v4485_v17, %v4489_v30  ;;  %7448 = vmatprep.subr.bf16.mxu0 %v11352_v31  ;;  %v11215_v26 = vcombine.low %v4485_v17, %v4489_v30 }
 0xc1d   : > { %v4617_v34 = vld [vmem:[#allocation3 + $0xce0] sm:$0xff]  ;;  %7449 = vmatpush1.bf16.msra.mxu0 %v11351_v22 }
 0xc1e   : > { %v11344_v27 = vcombine.high %v4613_v36, %v4617_v34  ;;  %v4477_v55 = vld [vmem:[#allocation3 + $0x880] sm:$0xff]  ;;  %7409 = vmatprep.subr.bf16.mxu1 %v11216_v48  ;;  %v11343_v8 = vcombine.low %v4613_v36, %v4617_v34 }
 0xc1f   : > { %v4481_v58 = vld [vmem:[#allocation3 + $0x8a0] sm:$0xff]  ;;  %7410 = vmatpush1.bf16.msra.mxu1 %v11215_v26 }
 0xc20   : > { %v4605_v2 = vld [vmem:[#allocation3 + $0xc80] sm:$0xff]  ;;  %v11208_v15 = vcombine.high %v4477_v55, %v4481_v58  ;;  %7450 = vmatprep.subr.bf16.mxu0 %v11344_v27  ;;  %v11207_v0 = vcombine.low %v4477_v55, %v4481_v58 }
 0xc21   : > { %v4609_v37 = vld [vmem:[#allocation3 + $0xca0] sm:$0xff]  ;;  %7451 = vmatpush1.bf16.msra.mxu0 %v11343_v8 }
 0xc22   : > { %v11336_v40 = vcombine.high %v4605_v2, %v4609_v37  ;;  %v4469_v62 = vld [vmem:[#allocation3 + $0x840] sm:$0xff]  ;;  %7411 = vmatprep.subr.bf16.mxu1 %v11208_v15  ;;  %v11335_v32 = vcombine.low %v4605_v2, %v4609_v37 }
 0xc23   : > { %v4473_v11 = vld [vmem:[#allocation3 + $0x860] sm:$0xff]  ;;  %7412 = vmatpush1.bf16.msra.mxu1 %v11207_v0 }
 0xc24   : > { %v4597_v13 = vld [vmem:[#allocation3 + $0xc40] sm:$0xff]  ;;  %v11200_v4 = vcombine.high %v4469_v62, %v4473_v11  ;;  %7452 = vmatprep.subr.bf16.mxu0 %v11336_v40  ;;  %v11199_v25 = vcombine.low %v4469_v62, %v4473_v11 }
 0xc25   : > { %v4601_v38 = vld [vmem:[#allocation3 + $0xc60] sm:$0xff]  ;;  %7453 = vmatpush1.bf16.msra.mxu0 %v11335_v32 }
 0xc26   : > { %v11328_v57 = vcombine.high %v4597_v13, %v4601_v38  ;;  %v4461_v3 = vld [vmem:[#allocation3 + $0x800] sm:$0xff]  ;;  %7413 = vmatprep.subr.bf16.mxu1 %v11200_v4  ;;  %v11327_v47 = vcombine.low %v4597_v13, %v4601_v38 }
 0xc27   : > { %v4465_v60 = vld [vmem:[#allocation3 + $0x820] sm:$0xff]  ;;  %7414 = vmatpush1.bf16.msra.mxu1 %v11199_v25 }
 0xc28   : > { %v4589_v14 = vld [vmem:[#allocation3 + $0xc00] sm:$0xff]  ;;  %v11192_v18 = vcombine.high %v4461_v3, %v4465_v60  ;;  %7454 = vmatprep.subr.bf16.mxu0 %v11328_v57  ;;  %v11191_v7 = vcombine.low %v4461_v3, %v4465_v60 }
 0xc29   : > { %v4593_v20 = vld [vmem:[#allocation3 + $0xc20] sm:$0xff]  ;;  %7455 = vmatpush1.bf16.msra.mxu0 %v11327_v47 }
 0xc2a   : > { %v11320_v33 = vcombine.high %v4589_v14, %v4593_v20  ;;  %v4581_v9 = vld [vmem:[#allocation3 + $0xbc0] sm:$0xff]  ;;  %7415 = vmatprep.subr.bf16.mxu1 %v11192_v18  ;;  %v11319_v16 = vcombine.low %v4589_v14, %v4593_v20 }
 0xc2b   : > { %v4585_v51 = vld [vmem:[#allocation3 + $0xbe0] sm:$0xff]  ;;  %7416 = vmatpush1.bf16.msra.mxu1 %v11191_v7 }
 0xc2c   : > { %v4709_v10 = vld [vmem:[#allocation3 + $0xfc0] sm:$0xff]  ;;  %v11312_v53 = vcombine.high %v4581_v9, %v4585_v51  ;;  %7456 = vmatprep.subr.bf16.mxu0 %v11320_v33  ;;  %v11311_v6 = vcombine.low %v4581_v9, %v4585_v51 }
 0xc2d   : > { %v4713_v28 = vld [vmem:[#allocation3 + $0xfe0] sm:$0xff]  ;;  %7457 = vmatpush1.bf16.msra.mxu0 %v11319_v16 }
 0xc2e   : > { %v11440_v19 = vcombine.high %v4709_v10, %v4713_v28  ;;  %v4573_v59 = vld [vmem:[#allocation3 + $0xb80] sm:$0xff]  ;;  %7417 = vmatprep.subr.bf16.mxu1 %v11312_v53  ;;  %v11439_v61 = vcombine.low %v4709_v10, %v4713_v28 }
 0xc2f   : > { %v4577_v54 = vld [vmem:[#allocation3 + $0xba0] sm:$0xff]  ;;  %7418 = vmatpush2.bf16.msra.mxu1 %v11311_v6 }
 0xc30   : > { %v4701_v21 = vld [vmem:[#allocation3 + $0xf80] sm:$0xff]  ;;  %v11304_v31 = vcombine.high %v4573_v59, %v4577_v54  ;;  %7458 = vmatprep.subr.bf16.mxu0 %v11440_v19  ;;  %v11303_v22 = vcombine.low %v4573_v59, %v4577_v54 }
 0xc31   : > { %v4705_v56 = vld [vmem:[#allocation3 + $0xfa0] sm:$0xff]  ;;  %7459 = vmatpush2.bf16.msra.mxu0 %v11439_v61 }
 0xc32   : > { %v11432_v17 = vcombine.high %v4701_v21, %v4705_v56  ;;  %v4565_v30 = vld [vmem:[#allocation3 + $0xb40] sm:$0xff]  ;;  %7419 = vmatprep.subr.bf16.mxu1 %v11304_v31  ;;  %v11431_v48 = vcombine.low %v4701_v21, %v4705_v56 }
 0xc33   : > { %v4569_v36 = vld [vmem:[#allocation3 + $0xb60] sm:$0xff]  ;;  %7420 = vmatpush2.bf16.msra.mxu1 %v11303_v22  ;;  %v4394_v22 = vld [vmem:[#allocation3 + $0x5e8] sm:$0xff] }
 0xc34   : > { %v4693_v34 = vld [vmem:[#allocation3 + $0xf40] sm:$0xff]  ;;  %v11296_v27 = vcombine.high %v4565_v30, %v4569_v36  ;;  %7460 = vmatprep.subr.bf16.mxu0 %v11432_v17  ;;  %v11295_v8 = vcombine.low %v4565_v30, %v4569_v36  ;;  %v4262_v36 = vld [vmem:[#allocation3 + $0x1c8] sm:$0xff] }
 0xc35   : > { %v4697_v5 = vld [vmem:[#allocation3 + $0xf60] sm:$0xff]  ;;  %7461 = vmatpush2.bf16.msra.mxu0 %v11431_v48 }
 0xc36   : > { %v11424_v55 = vcombine.high %v4693_v34, %v4697_v5  ;;  %v4557_v58 = vld [vmem:[#allocation3 + $0xb00] sm:$0xff]  ;;  %7421 = vmatprep.subr.bf16.mxu1 %v11296_v27  ;;  %v11423_v15 = vcombine.low %v4693_v34, %v4697_v5  ;;  %v4266_v34 = vld [vmem:[#allocation3 + $0x1e8] sm:$0xff] }
 0xc37   : > { %v4561_v2 = vld [vmem:[#allocation3 + $0xb20] sm:$0xff]  ;;  %7422 = vmatpush2.bf16.msra.mxu1 %v11295_v8  ;;  %v4390_v5 = vld [vmem:[#allocation3 + $0x5c8] sm:$0xff] }
 0xc38   : > { %v4685_v37 = vld [vmem:[#allocation3 + $0xf00] sm:$0xff]  ;;  %v11288_v40 = vcombine.high %v4557_v58, %v4561_v2  ;;  %7462 = vmatprep.subr.bf16.mxu0 %v11424_v55  ;;  %v11287_v32 = vcombine.low %v4557_v58, %v4561_v2  ;;  %v10994_v55 = vcombine.high %v4262_v36, %v4266_v34  ;;  %v11122_v58 = vcombine.high %v4390_v5, %v4394_v22  ;;  %v4254_v2 = vld [vmem:[#allocation3 + $0x188] sm:$0xff] }
 0xc39   : > { %v4689_v26 = vld [vmem:[#allocation3 + $0xf20] sm:$0xff]  ;;  %7463 = vmatpush2.bf16.msra.mxu0 %v11423_v15  ;;  %v4382_v8 = vld [vmem:[#allocation3 + $0x588] sm:$0xff] }
 0xc3a   : > { %v11416_v62 = vcombine.high %v4685_v37, %v4689_v26  ;;  %v4549_v11 = vld [vmem:[#allocation3 + $0xac0] sm:$0xff]  ;;  %7423 = vmatprep.subr.bf16.mxu1 %v11288_v40  ;;  %v11415_v4 = vcombine.low %v4685_v37, %v4689_v26  ;;  %v4258_v37 = vld [vmem:[#allocation3 + $0x1a8] sm:$0xff]  ;;  %v15789_v26 = vpack.c.bf16 %v15753_v41, %v15753_v41  ;;  %v15793_v40 = vpack.c.bf16 %v15755_v1, %v15755_v1 }
 0xc3b   : > { %v4553_v13 = vld [vmem:[#allocation3 + $0xae0] sm:$0xff]  ;;  %7424 = vmatpush2.bf16.msra.mxu1 %v11287_v32  ;;  %v4386_v15 = vld [vmem:[#allocation3 + $0x5a8] sm:$0xff] }
 0xc3c   : > { %v4677_v38 = vld [vmem:[#allocation3 + $0xec0] sm:$0xff]  ;;  %v11280_v57 = vcombine.high %v4549_v11, %v4553_v13  ;;  %7464 = vmatprep.subr.bf16.mxu0 %v11416_v62  ;;  %v11279_v47 = vcombine.low %v4549_v11, %v4553_v13  ;;  %v10993_v62 = vcombine.low %v4262_v36, %v4266_v34  ;;  %v11121_v11 = vcombine.low %v4390_v5, %v4394_v22  ;;  %v4250_v32 = vld [vmem:[#allocation3 + $0x168] sm:$0xff] }
 0xc3d   : > { %v4681_v0 = vld [vmem:[#allocation3 + $0xee0] sm:$0xff]  ;;  %7465 = vmatpush2.bf16.msra.mxu0 %v11415_v4  ;;  %v10986_v13 = vcombine.high %v4254_v2, %v4258_v37  ;;  %v4374_v41 = vld [vmem:[#allocation3 + $0x548] sm:$0xff]  ;;  %v11113_v1 = vcombine.low %v4382_v8, %v4386_v15 }
 0xc3e   : > { %v11408_v3 = vcombine.high %v4677_v38, %v4681_v0  ;;  %v4541_v60 = vld [vmem:[#allocation3 + $0xa80] sm:$0xff]  ;;  %7425 = vmatprep.subr.bf16.mxu1 %v11280_v57  ;;  %v11407_v18 = vcombine.low %v4677_v38, %v4681_v0  ;;  %v11114_v38 = vcombine.high %v4382_v8, %v4386_v15  ;;  %v4246_v0 = vld [vmem:[#allocation3 + $0x148] sm:$0xff]  ;;  %v10985_v57 = vcombine.low %v4254_v2, %v4258_v37 }
 0xc3f   : > { %v4545_v14 = vld [vmem:[#allocation3 + $0xaa0] sm:$0xff]  ;;  %7426 = vmatpush2.bf16.msra.mxu1 %v11279_v47  ;;  %v4378_v4 = vld [vmem:[#allocation3 + $0x568] sm:$0xff] }
 0xc40   : > { %v4669_v20 = vld [vmem:[#allocation3 + $0xe80] sm:$0xff]  ;;  %v11272_v33 = vcombine.high %v4541_v60, %v4545_v14  ;;  %7466 = vmatprep.subr.bf16.mxu0 %v11408_v3  ;;  %v11271_v16 = vcombine.low %v4541_v60, %v4545_v14  ;;  %v10978_v3 = vcombine.high %v4246_v0, %v4250_v32  ;;  %v11106_v60 = vcombine.high %v4374_v41, %v4378_v4  ;;  %v4238_v14 = vld [vmem:[#allocation3 + $0x108] sm:$0xff] }
 0xc41   : > { %v4673_v25 = vld [vmem:[#allocation3 + $0xea0] sm:$0xff]  ;;  %7467 = vmatpush2.bf16.msra.mxu0 %v11407_v18  ;;  %v4370_v47 = vld [vmem:[#allocation3 + $0x528] sm:$0xff]  ;;  %v10977_v18 = vcombine.low %v4246_v0, %v4250_v32 }
 0xc42   : > { %v11400_v9 = vcombine.high %v4669_v20, %v4673_v25  ;;  %v4533_v51 = vld [vmem:[#allocation3 + $0xa40] sm:$0xff]  ;;  %7427 = vmatprep.subr.bf16.mxu1 %v11272_v33  ;;  %v11399_v53 = vcombine.low %v4669_v20, %v4673_v25  ;;  %v4242_v20 = vld [vmem:[#allocation3 + $0x128] sm:$0xff]  ;;  %v11105_v33 = vcombine.low %v4374_v41, %v4378_v4 }
 0xc43   : > { %v4537_v10 = vld [vmem:[#allocation3 + $0xa60] sm:$0xff]  ;;  %7428 = vmatpush2.bf16.msra.mxu1 %v11271_v16  ;;  %v4366_v25 = vld [vmem:[#allocation3 + $0x508] sm:$0xff] }
 0xc44   : > { %v4661_v28 = vld [vmem:[#allocation3 + $0xe40] sm:$0xff]  ;;  %v11264_v19 = vcombine.high %v4533_v51, %v4537_v10  ;;  %7468 = vmatprep.subr.bf16.mxu0 %v11400_v9  ;;  %v11263_v61 = vcombine.low %v4533_v51, %v4537_v10  ;;  %v10970_v9 = vcombine.high %v4238_v14, %v4242_v20  ;;  %v11098_v51 = vcombine.high %v4366_v25, %v4370_v47  ;;  %v4230_v10 = vld [vmem:[#allocation3 + $0xc8] sm:$0xff] }
 0xc45   : > { %v4665_v7 = vld [vmem:[#allocation3 + $0xe60] sm:$0xff]  ;;  %7469 = vmatpush2.bf16.msra.mxu0 %v11399_v53  ;;  %v4362_v16 = vld [vmem:[#allocation3 + $0x4e8] sm:$0xff]  ;;  %v10969_v53 = vcombine.low %v4238_v14, %v4242_v20 }
 0xc46   : > { %v11392_v59 = vcombine.high %v4661_v28, %v4665_v7  ;;  %v4525_v54 = vld [vmem:[#allocation3 + $0xa00] sm:$0xff]  ;;  %7429 = vmatprep.subr.bf16.mxu1 %v11264_v19  ;;  %v11391_v31 = vcombine.low %v4661_v28, %v4665_v7  ;;  %v4234_v28 = vld [vmem:[#allocation3 + $0xe8] sm:$0xff]  ;;  %v11097_v19 = vcombine.low %v4366_v25, %v4370_v47 }
 0xc47   : > { %v4529_v21 = vld [vmem:[#allocation3 + $0xa20] sm:$0xff]  ;;  %7430 = vmatpush2.bf16.msra.mxu1 %v11263_v61  ;;  %v4358_v7 = vld [vmem:[#allocation3 + $0x4c8] sm:$0xff] }
 0xc48   : > { %v4653_v56 = vld [vmem:[#allocation3 + $0xe00] sm:$0xff]  ;;  %v11256_v17 = vcombine.high %v4525_v54, %v4529_v21  ;;  %7470 = vmatprep.subr.bf16.mxu0 %v11392_v59  ;;  %v11255_v48 = vcombine.low %v4525_v54, %v4529_v21  ;;  %v10962_v59 = vcombine.high %v4230_v10, %v4234_v28  ;;  %v11090_v54 = vcombine.high %v4358_v7, %v4362_v16  ;;  %v4222_v21 = vld [vmem:[#allocation3 + $0x88] sm:$0xff] }
 0xc49   : > { %v4657_v6 = vld [vmem:[#allocation3 + $0xe20] sm:$0xff]  ;;  %7471 = vmatpush2.bf16.msra.mxu0 %v11391_v31  ;;  %v4354_v61 = vld [vmem:[#allocation3 + $0x4a8] sm:$0xff]  ;;  %v10961_v31 = vcombine.low %v4230_v10, %v4234_v28 }
 0xc4a   : > { %v11384_v30 = vcombine.high %v4653_v56, %v4657_v6  ;;  %7431 = vmatprep.subr.bf16.mxu1 %v11256_v17  ;;  %v11383_v27 = vcombine.low %v4653_v56, %v4657_v6  ;;  %v4226_v56 = vld [vmem:[#allocation3 + $0xa8] sm:$0xff]  ;;  %v11089_v17 = vcombine.low %v4358_v7, %v4362_v16 }
 0xc4b   : > { %7432 = vmatpush2.bf16.msra.mxu1 %v11255_v48  ;;  %v4350_v6 = vld [vmem:[#allocation3 + $0x488] sm:$0xff] }
 0xc4c   : > { %7472 = vmatprep.subr.bf16.mxu0 %v11384_v30  ;;  %7483 = vmatprep.subr.bf16.mxu1 %v10994_v55  ;;  %v10954_v30 = vcombine.high %v4222_v21, %v4226_v56  ;;  %v11082_v36 = vcombine.high %v4350_v6, %v4354_v61  ;;  %v4214_v34 = vld [vmem:[#allocation3 + $0x48] sm:$0xff]  ;;  %v11081_v55 = vcombine.low %v4350_v6, %v4354_v61 }
 0xc4d   : > { %7473 = vmatpush2.bf16.msra.mxu0 %v11383_v27  ;;  %v4218_v5 = vld [vmem:[#allocation3 + $0x68] sm:$0xff]  ;;  %v10953_v27 = vcombine.low %v4222_v21, %v4226_v56 }
 0xc4e   : > { %7524 = vmatprep.subr.bf16.mxu0 %v11122_v58  ;;  %7434 = vmatmul.mubr.bf16.vlgmr.msra.gmra.mxu1 %v15789_v26  ;;  %v4342_v22 = vld [vmem:[#allocation3 + $0x448] sm:$0xff]  ;;  %v10946_v58 = vcombine.high %v4214_v34, %v4218_v5 }
 0xc4f   : > { %7484 = vmatpush1.bf16.msra.mxu1 %v10993_v62  ;;  %7515 = vmatprep.mubr.bf16.mxu1 %v15761_v23  ;;  %v4346_v48 = vld [vmem:[#allocation3 + $0x468] sm:$0xff] }
 0xc50   : > { %7475 = vmatmul.mubr.bf16.vlgmr.msra.gmra.mxu0 %v15793_v40  ;;  %7485 = vmatprep.subr.bf16.mxu1 %v10986_v13  ;;  %v11074_v2 = vcombine.high %v4342_v22, %v4346_v48  ;;  %v4206_v37 = vld [vmem:[#allocation3 + $0x8] sm:$0xff]  ;;  %v11073_v13 = vcombine.low %v4342_v22, %v4346_v48 }
 0xc51   : > { %7525 = vmatpush1.bf16.msra.mxu0 %v11121_v11  ;;  %7556 = vmatprep.mubr.bf16.mxu0 %v15763_v46  ;;  %v4210_v8 = vld [vmem:[#allocation3 + $0x28] sm:$0xff]  ;;  %v10945_v11 = vcombine.low %v4214_v34, %v4218_v5 }
 0xc52   : > { %7526 = vmatprep.subr.bf16.mxu0 %v11114_v38  ;;  %v4334_v15 = vld [vmem:[#allocation3 + $0x408] sm:$0xff]  ;;  %v10938_v38 = vcombine.high %v4206_v37, %v4210_v8 }
 0xc53   : > { %7486 = vmatpush1.bf16.msra.mxu1 %v10985_v57  ;;  %v4338_v62 = vld [vmem:[#allocation3 + $0x428] sm:$0xff] }
 0xc54   : > { %7487 = vmatprep.subr.bf16.mxu1 %v10978_v3  ;;  %v11066_v0 = vcombine.high %v4334_v15, %v4338_v62  ;;  %v4326_v32 = vld [vmem:[#allocation3 + $0x3c8] sm:$0xff]  ;;  %v11065_v3 = vcombine.low %v4334_v15, %v4338_v62 }
 0xc55   : > { %7527 = vmatpush1.bf16.msra.mxu0 %v11113_v1  ;;  %v4330_v41 = vld [vmem:[#allocation3 + $0x3e8] sm:$0xff]  ;;  %v10937_v1 = vcombine.low %v4206_v37, %v4210_v8 }
 0xc56   : > { %7528 = vmatprep.subr.bf16.mxu0 %v11106_v60  ;;  %v4454_v4 = vld [vmem:[#allocation3 + $0x7c8] sm:$0xff]  ;;  %v11058_v60 = vcombine.high %v4326_v32, %v4330_v41 }
 0xc57   : > { %7488 = vmatpush1.bf16.msra.mxu1 %v10977_v18  ;;  %v4458_v57 = vld [vmem:[#allocation3 + $0x7e8] sm:$0xff] }
 0xc58   : > { %7489 = vmatprep.subr.bf16.mxu1 %v10970_v9  ;;  %v11186_v14 = vcombine.high %v4454_v4, %v4458_v57  ;;  %v4318_v20 = vld [vmem:[#allocation3 + $0x388] sm:$0xff]  ;;  %v11185_v9 = vcombine.low %v4454_v4, %v4458_v57 }
 0xc59   : > { %7529 = vmatpush1.bf16.msra.mxu0 %v11105_v33  ;;  %v4322_v25 = vld [vmem:[#allocation3 + $0x3a8] sm:$0xff]  ;;  %v11057_v33 = vcombine.low %v4326_v32, %v4330_v41 }
 0xc5a   : > { %7530 = vmatprep.subr.bf16.mxu0 %v11098_v51  ;;  %v4446_v47 = vld [vmem:[#allocation3 + $0x788] sm:$0xff]  ;;  %v11050_v51 = vcombine.high %v4318_v20, %v4322_v25 }
 0xc5b   : > { %7490 = vmatpush1.bf16.msra.mxu1 %v10969_v53  ;;  %v4450_v18 = vld [vmem:[#allocation3 + $0x7a8] sm:$0xff] }
 0xc5c   : > { %7491 = vmatprep.subr.bf16.mxu1 %v10962_v59  ;;  %v11178_v10 = vcombine.high %v4446_v47, %v4450_v18  ;;  %v4310_v28 = vld [vmem:[#allocation3 + $0x348] sm:$0xff]  ;;  %v11177_v59 = vcombine.low %v4446_v47, %v4450_v18 }
 0xc5d   : > { %7531 = vmatpush1.bf16.msra.mxu0 %v11097_v19  ;;  %v4314_v7 = vld [vmem:[#allocation3 + $0x368] sm:$0xff]  ;;  %v11049_v19 = vcombine.low %v4318_v20, %v4322_v25 }
 0xc5e   : > { %7532 = vmatprep.subr.bf16.mxu0 %v11090_v54  ;;  %v4438_v16 = vld [vmem:[#allocation3 + $0x748] sm:$0xff]  ;;  %v11042_v54 = vcombine.high %v4310_v28, %v4314_v7 }
 0xc5f   : > { %7492 = vmatpush1.bf16.msra.mxu1 %v10961_v31  ;;  %v4442_v53 = vld [vmem:[#allocation3 + $0x768] sm:$0xff] }
 0xc60   : > { %7493 = vmatprep.subr.bf16.mxu1 %v10954_v30  ;;  %v11170_v21 = vcombine.high %v4438_v16, %v4442_v53  ;;  %v4302_v56 = vld [vmem:[#allocation3 + $0x308] sm:$0xff]  ;;  %v11169_v30 = vcombine.low %v4438_v16, %v4442_v53 }
 0xc61   : > { %7533 = vmatpush1.bf16.msra.mxu0 %v11089_v17  ;;  %v4306_v6 = vld [vmem:[#allocation3 + $0x328] sm:$0xff]  ;;  %v11041_v17 = vcombine.low %v4310_v28, %v4314_v7 }
 0xc62   : > { %7534 = vmatprep.subr.bf16.mxu0 %v11082_v36  ;;  %v4430_v61 = vld [vmem:[#allocation3 + $0x708] sm:$0xff]  ;;  %v11034_v36 = vcombine.high %v4302_v56, %v4306_v6 }
 0xc63   : > { %7494 = vmatpush1.bf16.msra.mxu1 %v10953_v27  ;;  %v4434_v31 = vld [vmem:[#allocation3 + $0x728] sm:$0xff] }
 0xc64   : > { %7495 = vmatprep.subr.bf16.mxu1 %v10946_v58  ;;  %v11162_v34 = vcombine.high %v4430_v61, %v4434_v31  ;;  %v4294_v5 = vld [vmem:[#allocation3 + $0x2c8] sm:$0xff]  ;;  %v11161_v58 = vcombine.low %v4430_v61, %v4434_v31 }
 0xc65   : > { %7535 = vmatpush1.bf16.msra.mxu0 %v11081_v55  ;;  %v4298_v22 = vld [vmem:[#allocation3 + $0x2e8] sm:$0xff]  ;;  %v11033_v55 = vcombine.low %v4302_v56, %v4306_v6 }
 0xc66   : > { %7536 = vmatprep.subr.bf16.mxu0 %v11074_v2  ;;  %v4422_v48 = vld [vmem:[#allocation3 + $0x6c8] sm:$0xff]  ;;  %v11026_v2 = vcombine.high %v4294_v5, %v4298_v22 }
 0xc67   : > { %7496 = vmatpush1.bf16.msra.mxu1 %v10945_v11  ;;  %v4426_v27 = vld [vmem:[#allocation3 + $0x6e8] sm:$0xff] }
 0xc68   : > { %7497 = vmatprep.subr.bf16.mxu1 %v10938_v38  ;;  %v11154_v37 = vcombine.high %v4422_v48, %v4426_v27  ;;  %v4286_v8 = vld [vmem:[#allocation3 + $0x288] sm:$0xff]  ;;  %v11153_v38 = vcombine.low %v4422_v48, %v4426_v27 }
 0xc69   : > { %7537 = vmatpush1.bf16.msra.mxu0 %v11073_v13  ;;  %v4290_v15 = vld [vmem:[#allocation3 + $0x2a8] sm:$0xff]  ;;  %v11025_v13 = vcombine.low %v4294_v5, %v4298_v22 }
 0xc6a   : > { %7538 = vmatprep.subr.bf16.mxu0 %v11066_v0  ;;  %v4414_v62 = vld [vmem:[#allocation3 + $0x688] sm:$0xff]  ;;  %v11018_v0 = vcombine.high %v4286_v8, %v4290_v15 }
 0xc6b   : > { %7498 = vmatpush1.bf16.msra.mxu1 %v10937_v1  ;;  %v4418_v11 = vld [vmem:[#allocation3 + $0x6a8] sm:$0xff] }
 0xc6c   : > { %7499 = vmatprep.subr.bf16.mxu1 %v11058_v60  ;;  %v11146_v32 = vcombine.high %v4414_v62, %v4418_v11  ;;  %v4278_v41 = vld [vmem:[#allocation3 + $0x248] sm:$0xff]  ;;  %v11145_v60 = vcombine.low %v4414_v62, %v4418_v11 }
 0xc6d   : > { %7539 = vmatpush1.bf16.msra.mxu0 %v11065_v3  ;;  %v4282_v4 = vld [vmem:[#allocation3 + $0x268] sm:$0xff]  ;;  %v11017_v3 = vcombine.low %v4286_v8, %v4290_v15 }
 0xc6e   : > { %7540 = vmatprep.subr.bf16.mxu0 %v11186_v14  ;;  %v4406_v57 = vld [vmem:[#allocation3 + $0x648] sm:$0xff]  ;;  %v11010_v14 = vcombine.high %v4278_v41, %v4282_v4 }
 0xc6f   : > { %7500 = vmatpush2.bf16.msra.mxu1 %v11057_v33  ;;  %v4410_v1 = vld [vmem:[#allocation3 + $0x668] sm:$0xff] }
 0xc70   : > { %7501 = vmatprep.subr.bf16.mxu1 %v11050_v51  ;;  %v11138_v20 = vcombine.high %v4406_v57, %v4410_v1  ;;  %v4270_v25 = vld [vmem:[#allocation3 + $0x208] sm:$0xff]  ;;  %v11137_v51 = vcombine.low %v4406_v57, %v4410_v1 }
 0xc71   : > { %7541 = vmatpush2.bf16.msra.mxu0 %v11185_v9  ;;  %v4274_v47 = vld [vmem:[#allocation3 + $0x228] sm:$0xff]  ;;  %v11009_v9 = vcombine.low %v4278_v41, %v4282_v4 }
 0xc72   : > { %7542 = vmatprep.subr.bf16.mxu0 %v11178_v10  ;;  %v4398_v18 = vld [vmem:[#allocation3 + $0x608] sm:$0xff]  ;;  %v11002_v10 = vcombine.high %v4270_v25, %v4274_v47 }
 0xc73   : > { %7502 = vmatpush2.bf16.msra.mxu1 %v11049_v19  ;;  %v4402_v33 = vld [vmem:[#allocation3 + $0x628] sm:$0xff] }
 0xc74   : > { %7503 = vmatprep.subr.bf16.mxu1 %v11042_v54  ;;  %v11130_v28 = vcombine.high %v4398_v18, %v4402_v33  ;;  %v4518_v7 = vld [vmem:[#allocation3 + $0x9c8] sm:$0xff]  ;;  %v11129_v54 = vcombine.low %v4398_v18, %v4402_v33 }
 0xc75   : > { %7543 = vmatpush2.bf16.msra.mxu0 %v11177_v59  ;;  %v4522_v16 = vld [vmem:[#allocation3 + $0x9e8] sm:$0xff]  ;;  %v11001_v59 = vcombine.low %v4270_v25, %v4274_v47 }
 0xc76   : > { %7544 = vmatprep.subr.bf16.mxu0 %v11170_v21  ;;  %v4646_v53 = vld [vmem:[#allocation3 + $0xdc8] sm:$0xff]  ;;  %v11250_v21 = vcombine.high %v4518_v7, %v4522_v16 }
 0xc77   : > { %7504 = vmatpush2.bf16.msra.mxu1 %v11041_v17  ;;  %v4650_v19 = vld [vmem:[#allocation3 + $0xde8] sm:$0xff] }
 0xc78   : > { %7505 = vmatprep.subr.bf16.mxu1 %v11034_v36  ;;  %v11378_v56 = vcombine.high %v4646_v53, %v4650_v19  ;;  %v4510_v6 = vld [vmem:[#allocation3 + $0x988] sm:$0xff]  ;;  %v11377_v36 = vcombine.low %v4646_v53, %v4650_v19 }
 0xc79   : > { %7545 = vmatpush2.bf16.msra.mxu0 %v11169_v30  ;;  %v4514_v61 = vld [vmem:[#allocation3 + $0x9a8] sm:$0xff]  ;;  %v11249_v30 = vcombine.low %v4518_v7, %v4522_v16 }
 0xc7a   : > { %7546 = vmatprep.subr.bf16.mxu0 %v11162_v34  ;;  %v4638_v31 = vld [vmem:[#allocation3 + $0xd88] sm:$0xff]  ;;  %v11242_v34 = vcombine.high %v4510_v6, %v4514_v61 }
 0xc7b   : > { %7506 = vmatpush2.bf16.msra.mxu1 %v11033_v55  ;;  %v4642_v17 = vld [vmem:[#allocation3 + $0xda8] sm:$0xff] }
 0xc7c   : > { %7507 = vmatprep.subr.bf16.mxu1 %v11026_v2  ;;  %v11370_v5 = vcombine.high %v4638_v31, %v4642_v17  ;;  %v4502_v22 = vld [vmem:[#allocation3 + $0x948] sm:$0xff]  ;;  %v11369_v2 = vcombine.low %v4638_v31, %v4642_v17 }
 0xc7d   : > { %7547 = vmatpush2.bf16.msra.mxu0 %v11161_v58  ;;  %v4506_v48 = vld [vmem:[#allocation3 + $0x968] sm:$0xff]  ;;  %v11241_v58 = vcombine.low %v4510_v6, %v4514_v61 }
 0xc7e   : > { %7548 = vmatprep.subr.bf16.mxu0 %v11154_v37  ;;  %v4630_v27 = vld [vmem:[#allocation3 + $0xd48] sm:$0xff]  ;;  %v11234_v37 = vcombine.high %v4502_v22, %v4506_v48 }
 0xc7f   : > { %7508 = vmatpush2.bf16.msra.mxu1 %v11025_v13  ;;  %v4634_v55 = vld [vmem:[#allocation3 + $0xd68] sm:$0xff] }
 0xc80   : > { %7509 = vmatprep.subr.bf16.mxu1 %v11018_v0  ;;  %v11362_v8 = vcombine.high %v4630_v27, %v4634_v55  ;;  %v4494_v15 = vld [vmem:[#allocation3 + $0x908] sm:$0xff]  ;;  %v11361_v0 = vcombine.low %v4630_v27, %v4634_v55 }
 0xc81   : > { %7549 = vmatpush2.bf16.msra.mxu0 %v11153_v38  ;;  %v4498_v62 = vld [vmem:[#allocation3 + $0x928] sm:$0xff]  ;;  %v11233_v38 = vcombine.low %v4502_v22, %v4506_v48 }
 0xc82   : > { %7550 = vmatprep.subr.bf16.mxu0 %v11146_v32  ;;  %v4622_v11 = vld [vmem:[#allocation3 + $0xd08] sm:$0xff]  ;;  %v11226_v32 = vcombine.high %v4494_v15, %v4498_v62 }
 0xc83   : > { %7510 = vmatpush2.bf16.msra.mxu1 %v11017_v3  ;;  %v4626_v13 = vld [vmem:[#allocation3 + $0xd28] sm:$0xff] }
 0xc84   : > { %7511 = vmatprep.subr.bf16.mxu1 %v11010_v14  ;;  %v11354_v41 = vcombine.high %v4622_v11, %v4626_v13  ;;  %v4486_v4 = vld [vmem:[#allocation3 + $0x8c8] sm:$0xff]  ;;  %v11353_v14 = vcombine.low %v4622_v11, %v4626_v13 }
 0xc85   : > { %7551 = vmatpush2.bf16.msra.mxu0 %v11145_v60  ;;  %v4490_v57 = vld [vmem:[#allocation3 + $0x8e8] sm:$0xff]  ;;  %v11225_v60 = vcombine.low %v4494_v15, %v4498_v62 }
 0xc86   : > { %7552 = vmatprep.subr.bf16.mxu0 %v11138_v20  ;;  %v4614_v1 = vld [vmem:[#allocation3 + $0xcc8] sm:$0xff]  ;;  %v11218_v20 = vcombine.high %v4486_v4, %v4490_v57 }
 0xc87   : > { %7512 = vmatpush2.bf16.msra.mxu1 %v11009_v9  ;;  %v4618_v3 = vld [vmem:[#allocation3 + $0xce8] sm:$0xff] }
 0xc88   : > { %7513 = vmatprep.subr.bf16.mxu1 %v11002_v10  ;;  %v11346_v25 = vcombine.high %v4614_v1, %v4618_v3  ;;  %v4478_v47 = vld [vmem:[#allocation3 + $0x888] sm:$0xff]  ;;  %v11345_v10 = vcombine.low %v4614_v1, %v4618_v3 }
 0xc89   : > { %7553 = vmatpush2.bf16.msra.mxu0 %v11137_v51  ;;  %v4482_v18 = vld [vmem:[#allocation3 + $0x8a8] sm:$0xff]  ;;  %v11217_v51 = vcombine.low %v4486_v4, %v4490_v57 }
 0xc8a   : > { %7554 = vmatprep.subr.bf16.mxu0 %v11130_v28  ;;  %v4606_v33 = vld [vmem:[#allocation3 + $0xc88] sm:$0xff]  ;;  %v11210_v28 = vcombine.high %v4478_v47, %v4482_v18 }
 0xc8b   : > { %7514 = vmatpush2.bf16.msra.mxu1 %v11001_v59  ;;  %v4610_v9 = vld [vmem:[#allocation3 + $0xca8] sm:$0xff] }
 0xc8c   : > { %7565 = vmatprep.subr.bf16.mxu1 %v11250_v21  ;;  %v11338_v7 = vcombine.high %v4606_v33, %v4610_v9  ;;  %v4470_v16 = vld [vmem:[#allocation3 + $0x848] sm:$0xff]  ;;  %v11337_v21 = vcombine.low %v4606_v33, %v4610_v9 }
 0xc8d   : > { %7555 = vmatpush2.bf16.msra.mxu0 %v11129_v54  ;;  %v4474_v53 = vld [vmem:[#allocation3 + $0x868] sm:$0xff]  ;;  %v11209_v54 = vcombine.low %v4478_v47, %v4482_v18 }
 0xc8e   : > { %7606 = vmatprep.subr.bf16.mxu0 %v11378_v56  ;;  %7516 = vmatmul.mubr.bf16.vlgmr.msra.gmra.mxu1 %v15769_v50  ;;  %v4598_v19 = vld [vmem:[#allocation3 + $0xc48] sm:$0xff]  ;;  %v11202_v56 = vcombine.high %v4470_v16, %v4474_v53 }
 0xc8f   : > { %7566 = vmatpush1.bf16.msra.mxu1 %v11249_v30  ;;  %7597 = vmatprep.mubr.bf16.mxu1 %v15777_v29  ;;  %v4602_v59 = vld [vmem:[#allocation3 + $0xc68] sm:$0xff] }
 0xc90   : > { %7557 = vmatmul.mubr.bf16.vlgmr.msra.gmra.mxu0 %v15773_v52  ;;  %7567 = vmatprep.subr.bf16.mxu1 %v11242_v34  ;;  %v11330_v6 = vcombine.high %v4598_v19, %v4602_v59  ;;  %v4462_v61 = vld [vmem:[#allocation3 + $0x808] sm:$0xff]  ;;  %v11329_v34 = vcombine.low %v4598_v19, %v4602_v59 }
 0xc91   : > { %7607 = vmatpush1.bf16.msra.mxu0 %v11377_v36  ;;  %7638 = vmatprep.mubr.bf16.mxu0 %v15782_v12  ;;  %v4466_v31 = vld [vmem:[#allocation3 + $0x828] sm:$0xff]  ;;  %v11201_v36 = vcombine.low %v4470_v16, %v4474_v53 }
 0xc92   : > { %7608 = vmatprep.subr.bf16.mxu0 %v11370_v5  ;;  %v4590_v17 = vld [vmem:[#allocation3 + $0xc08] sm:$0xff]  ;;  %v11194_v5 = vcombine.high %v4462_v61, %v4466_v31 }
 0xc93   : > { %7568 = vmatpush1.bf16.msra.mxu1 %v11241_v58  ;;  %v4594_v30 = vld [vmem:[#allocation3 + $0xc28] sm:$0xff] }
 0xc94   : > { %7569 = vmatprep.subr.bf16.mxu1 %v11234_v37  ;;  %v11322_v22 = vcombine.high %v4590_v17, %v4594_v30  ;;  %v4582_v48 = vld [vmem:[#allocation3 + $0xbc8] sm:$0xff]  ;;  %v11321_v37 = vcombine.low %v4590_v17, %v4594_v30 }
 0xc95   : > { %7609 = vmatpush1.bf16.msra.mxu0 %v11369_v2  ;;  %v4586_v27 = vld [vmem:[#allocation3 + $0xbe8] sm:$0xff]  ;;  %v11193_v2 = vcombine.low %v4462_v61, %v4466_v31 }
 0xc96   : > { %7610 = vmatprep.subr.bf16.mxu0 %v11362_v8  ;;  %v4710_v55 = vld [vmem:[#allocation3 + $0xfc8] sm:$0xff]  ;;  %v11314_v8 = vcombine.high %v4582_v48, %v4586_v27 }
 0xc97   : > { %7570 = vmatpush1.bf16.msra.mxu1 %v11233_v38  ;;  %v4714_v58 = vld [vmem:[#allocation3 + $0xfe8] sm:$0xff] }
 0xc98   : > { %7571 = vmatprep.subr.bf16.mxu1 %v11226_v32  ;;  %v11442_v15 = vcombine.high %v4710_v55, %v4714_v58  ;;  %v4574_v62 = vld [vmem:[#allocation3 + $0xb88] sm:$0xff]  ;;  %v11441_v32 = vcombine.low %v4710_v55, %v4714_v58 }
 0xc99   : > { %7611 = vmatpush1.bf16.msra.mxu0 %v11361_v0  ;;  %v4578_v11 = vld [vmem:[#allocation3 + $0xba8] sm:$0xff]  ;;  %v11313_v0 = vcombine.low %v4582_v48, %v4586_v27 }
 0xc9a   : > { %7612 = vmatprep.subr.bf16.mxu0 %v11354_v41  ;;  %v4702_v13 = vld [vmem:[#allocation3 + $0xf88] sm:$0xff]  ;;  %v11306_v41 = vcombine.high %v4574_v62, %v4578_v11 }
 0xc9b   : > { %7572 = vmatpush1.bf16.msra.mxu1 %v11225_v60  ;;  %v4706_v38 = vld [vmem:[#allocation3 + $0xfa8] sm:$0xff] }
 0xc9c   : > { %7573 = vmatprep.subr.bf16.mxu1 %v11218_v20  ;;  %v11434_v4 = vcombine.high %v4702_v13, %v4706_v38  ;;  %v4566_v57 = vld [vmem:[#allocation3 + $0xb48] sm:$0xff]  ;;  %v11433_v20 = vcombine.low %v4702_v13, %v4706_v38 }
 0xc9d   : > { %7613 = vmatpush1.bf16.msra.mxu0 %v11353_v14  ;;  %v4570_v1 = vld [vmem:[#allocation3 + $0xb68] sm:$0xff]  ;;  %v11305_v14 = vcombine.low %v4574_v62, %v4578_v11 }
 0xc9e   : > { %7614 = vmatprep.subr.bf16.mxu0 %v11346_v25  ;;  %v4694_v3 = vld [vmem:[#allocation3 + $0xf48] sm:$0xff]  ;;  %v11298_v25 = vcombine.high %v4566_v57, %v4570_v1 }
 0xc9f   : > { %7574 = vmatpush1.bf16.msra.mxu1 %v11217_v51  ;;  %v4698_v60 = vld [vmem:[#allocation3 + $0xf68] sm:$0xff] }
 0xca0   : > { %7575 = vmatprep.subr.bf16.mxu1 %v11210_v28  ;;  %v11426_v47 = vcombine.high %v4694_v3, %v4698_v60  ;;  %v4558_v18 = vld [vmem:[#allocation3 + $0xb08] sm:$0xff]  ;;  %v11425_v28 = vcombine.low %v4694_v3, %v4698_v60  ;;  %v4267_v3 = vld [vmem:[#allocation3 + $0x1f0] sm:$0xff] }
 0xca1   : > { %7615 = vmatpush1.bf16.msra.mxu0 %v11345_v10  ;;  %v4562_v33 = vld [vmem:[#allocation3 + $0xb28] sm:$0xff]  ;;  %v11297_v10 = vcombine.low %v4566_v57, %v4570_v1  ;;  %v4263_v1 = vld [vmem:[#allocation3 + $0x1d0] sm:$0xff] }
 0xca2   : > { %7616 = vmatprep.subr.bf16.mxu0 %v11338_v7  ;;  %v4686_v9 = vld [vmem:[#allocation3 + $0xf08] sm:$0xff]  ;;  %v11290_v7 = vcombine.high %v4558_v18, %v4562_v33  ;;  %v4391_v60 = vld [vmem:[#allocation3 + $0x5d0] sm:$0xff] }
 0xca3   : > { %7576 = vmatpush1.bf16.msra.mxu1 %v11209_v54  ;;  %v4690_v51 = vld [vmem:[#allocation3 + $0xf28] sm:$0xff] }
 0xca4   : > { %7577 = vmatprep.subr.bf16.mxu1 %v11202_v56  ;;  %v11418_v16 = vcombine.high %v4686_v9, %v4690_v51  ;;  %v4550_v53 = vld [vmem:[#allocation3 + $0xac8] sm:$0xff]  ;;  %v11417_v56 = vcombine.low %v4686_v9, %v4690_v51  ;;  %v4255_v9 = vld [vmem:[#allocation3 + $0x190] sm:$0xff] }
 0xca5   : > { %7617 = vmatpush1.bf16.msra.mxu0 %v11337_v21  ;;  %v4554_v19 = vld [vmem:[#allocation3 + $0xae8] sm:$0xff]  ;;  %v11289_v21 = vcombine.low %v4558_v18, %v4562_v33  ;;  %v10996_v18 = vcombine.high %v4263_v1, %v4267_v3  ;;  %v4259_v51 = vld [vmem:[#allocation3 + $0x1b0] sm:$0xff] }
 0xca6   : > { %7618 = vmatprep.subr.bf16.mxu0 %v11330_v6  ;;  %v4678_v59 = vld [vmem:[#allocation3 + $0xec8] sm:$0xff]  ;;  %v11282_v6 = vcombine.high %v4550_v53, %v4554_v19 }
 0xca7   : > { %7578 = vmatpush1.bf16.msra.mxu1 %v11201_v36  ;;  %v4682_v54 = vld [vmem:[#allocation3 + $0xee8] sm:$0xff] }
 0xca8   : > { %7579 = vmatprep.subr.bf16.mxu1 %v11194_v5  ;;  %v11410_v61 = vcombine.high %v4678_v59, %v4682_v54  ;;  %v4542_v31 = vld [vmem:[#allocation3 + $0xa88] sm:$0xff]  ;;  %v11409_v5 = vcombine.low %v4678_v59, %v4682_v54 }
 0xca9   : > { %7619 = vmatpush1.bf16.msra.mxu0 %v11329_v34  ;;  %v4546_v17 = vld [vmem:[#allocation3 + $0xaa8] sm:$0xff]  ;;  %v11281_v34 = vcombine.low %v4550_v53, %v4554_v19  ;;  %v10988_v19 = vcombine.high %v4255_v9, %v4259_v51 }
 0xcaa   : > { %7620 = vmatprep.subr.bf16.mxu0 %v11322_v22  ;;  %v4670_v30 = vld [vmem:[#allocation3 + $0xe88] sm:$0xff]  ;;  %v11274_v22 = vcombine.high %v4542_v31, %v4546_v17 }
 0xcab   : > { %7580 = vmatpush1.bf16.msra.mxu1 %v11193_v2  ;;  %v4674_v36 = vld [vmem:[#allocation3 + $0xea8] sm:$0xff] }
 0xcac   : > { %7581 = vmatprep.subr.bf16.mxu1 %v11314_v8  ;;  %v11402_v48 = vcombine.high %v4670_v30, %v4674_v36  ;;  %v4534_v27 = vld [vmem:[#allocation3 + $0xa48] sm:$0xff]  ;;  %v11401_v8 = vcombine.low %v4670_v30, %v4674_v36  ;;  %v10987_v36 = vcombine.low %v4255_v9, %v4259_v51  ;;  %v4223_v9 = vld [vmem:[#allocation3 + $0x90] sm:$0xff] }
 0xcad   : > { %7621 = vmatpush1.bf16.msra.mxu0 %v11321_v37  ;;  %v4538_v55 = vld [vmem:[#allocation3 + $0xa68] sm:$0xff]  ;;  %v11273_v37 = vcombine.low %v4542_v31, %v4546_v17  ;;  %v4379_v31 = vld [vmem:[#allocation3 + $0x570] sm:$0xff] }
 0xcae   : > { %7622 = vmatprep.subr.bf16.mxu0 %v11442_v15  ;;  %v4662_v58 = vld [vmem:[#allocation3 + $0xe48] sm:$0xff]  ;;  %v11266_v15 = vcombine.high %v4534_v27, %v4538_v55  ;;  %v4227_v51 = vld [vmem:[#allocation3 + $0xb0] sm:$0xff] }
 0xcaf   : > { %7582 = vmatpush2.bf16.msra.mxu1 %v11313_v0  ;;  %v4666_v2 = vld [vmem:[#allocation3 + $0xe68] sm:$0xff] }
 0xcb0   : > { %7583 = vmatprep.subr.bf16.mxu1 %v11306_v41  ;;  %v11394_v62 = vcombine.high %v4662_v58, %v4666_v2  ;;  %v4526_v11 = vld [vmem:[#allocation3 + $0xa08] sm:$0xff]  ;;  %v11393_v41 = vcombine.low %v4662_v58, %v4666_v2  ;;  %v4239_v2 = vld [vmem:[#allocation3 + $0x110] sm:$0xff] }
 0xcb1   : > { %7623 = vmatpush2.bf16.msra.mxu0 %v11441_v32  ;;  %v4530_v13 = vld [vmem:[#allocation3 + $0xa28] sm:$0xff]  ;;  %v11265_v32 = vcombine.low %v4534_v27, %v4538_v55 }
 0xcb2   : > { %7624 = vmatprep.subr.bf16.mxu0 %v11434_v4  ;;  %v4654_v38 = vld [vmem:[#allocation3 + $0xe08] sm:$0xff]  ;;  %v11258_v4 = vcombine.high %v4526_v11, %v4530_v13 }
 0xcb3   : > { %7584 = vmatpush2.bf16.msra.mxu1 %v11305_v14  ;;  %v4658_v0 = vld [vmem:[#allocation3 + $0xe28] sm:$0xff]  ;;  %v4395_v14 = vld [vmem:[#allocation3 + $0x5f0] sm:$0xff] }
 0xcb4   : > { %7585 = vmatprep.subr.bf16.mxu1 %v11298_v25  ;;  %v11386_v57 = vcombine.high %v4654_v38, %v4658_v0  ;;  %v11385_v25 = vcombine.low %v4654_v38, %v4658_v0  ;;  %v11124_v33 = vcombine.high %v4391_v60, %v4395_v14  ;;  %v11123_v53 = vcombine.low %v4391_v60, %v4395_v14  ;;  %v4359_v60 = vld [vmem:[#allocation3 + $0x4d0] sm:$0xff] }
 0xcb5   : > { %7625 = vmatpush2.bf16.msra.mxu0 %v11433_v20  ;;  %v11257_v20 = vcombine.low %v4526_v11, %v4530_v13  ;;  %v4363_v14 = vld [vmem:[#allocation3 + $0x4f0] sm:$0xff] }
 0xcb6   : > { %7626 = vmatprep.subr.bf16.mxu0 %v11426_v47  ;;  %v15805_v47 = vld [vmem:[%s644_s2] sm:$0xff] }
 0xcb7   : > { %7586 = vmatpush2.bf16.msra.mxu1 %v11297_v10  ;;  %v4383_v10 = vld [vmem:[#allocation3 + $0x590] sm:$0xff]  ;;  %v4726_v59 = vrot.slane %v15805_v47, %v16896_v44 }
 0xcb8   : > { %7587 = vmatprep.subr.bf16.mxu1 %v11290_v7  ;;  %v4722_v7 = vrot.slane %v15805_v47, %v16894_v45 }
 0xcb9   : > { %7627 = vmatpush2.bf16.msra.mxu0 %v11425_v28  ;;  %v4387_v28 = vld [vmem:[#allocation3 + $0x5b0] sm:$0xff] }
 0xcba   : > { %7628 = vmatprep.subr.bf16.mxu0 %v11418_v16  ;;  %v10995_v16 = vcombine.low %v4263_v1, %v4267_v3  ;;  %v11116_v54 = vcombine.high %v4383_v10, %v4387_v28  ;;  %v4231_v1 = vld [vmem:[#allocation3 + $0xd0] sm:$0xff] }
 0xcbb   : > { %7588 = vmatpush2.bf16.msra.mxu1 %v11289_v21  ;;  %v4247_v21 = vld [vmem:[#allocation3 + $0x150] sm:$0xff] }
 0xcbc   : > { %7589 = vmatprep.subr.bf16.mxu1 %v11282_v6  ;;  %v4235_v3 = vld [vmem:[#allocation3 + $0xf0] sm:$0xff] }
 0xcbd   : > { %7629 = vmatpush2.bf16.msra.mxu0 %v11417_v56  ;;  %v4251_v56 = vld [vmem:[#allocation3 + $0x170] sm:$0xff] }
 0xcbe   : > { %7630 = vmatprep.subr.bf16.mxu0 %v11410_v61  ;;  %v4375_v61 = vld [vmem:[#allocation3 + $0x550] sm:$0xff]  ;;  %v10979_v38 = vcombine.low %v4247_v21, %v4251_v56 }
 0xcbf   : > { %7590 = vmatpush2.bf16.msra.mxu1 %v11281_v34  ;;  %v11108_v58 = vcombine.high %v4375_v61, %v4379_v31 }
 0xcc0   : > { %7591 = vmatprep.subr.bf16.mxu1 %v11274_v22  ;;  %v10980_v22 = vcombine.high %v4247_v21, %v4251_v56  ;;  %v4343_v21 = vld [vmem:[#allocation3 + $0x450] sm:$0xff] }
 0xcc1   : > { %7631 = vmatpush2.bf16.msra.mxu0 %v11409_v5  ;;  %v11115_v5 = vcombine.low %v4383_v10, %v4387_v28  ;;  %v4351_v10 = vld [vmem:[#allocation3 + $0x490] sm:$0xff] }
 0xcc2   : > { %7632 = vmatprep.subr.bf16.mxu0 %v11402_v48  ;;  %v4355_v28 = vld [vmem:[#allocation3 + $0x4b0] sm:$0xff] }
 0xcc3   : > { %7592 = vmatpush2.bf16.msra.mxu1 %v11273_v37  ;;  %v4243_v37 = vld [vmem:[#allocation3 + $0x130] sm:$0xff] }
 0xcc4   : > { %7593 = vmatprep.subr.bf16.mxu1 %v11266_v15  ;;  %v4367_v15 = vld [vmem:[#allocation3 + $0x510] sm:$0xff] }
 0xcc5   : > { %7633 = vmatpush2.bf16.msra.mxu0 %v11401_v8  ;;  %v4347_v56 = vld [vmem:[#allocation3 + $0x470] sm:$0xff] }
 0xcc6   : > { %7634 = vmatprep.subr.bf16.mxu0 %v11394_v62  ;;  %v4371_v62 = vld [vmem:[#allocation3 + $0x530] sm:$0xff] }
 0xcc7   : > { %7594 = vmatpush2.bf16.msra.mxu1 %v11265_v32  ;;  %v11107_v32 = vcombine.low %v4375_v61, %v4379_v31  ;;  %v11083_v61 = vcombine.low %v4351_v10, %v4355_v28 }
 0xcc8   : > { %7595 = vmatprep.subr.bf16.mxu1 %v11258_v4 }
 0xcc9   : > { %7635 = vmatpush2.bf16.msra.mxu0 %v11393_v41  ;;  %v10972_v41 = vcombine.high %v4239_v2, %v4243_v37 }
 0xcca   : > { %7636 = vmatprep.subr.bf16.mxu0 %v11386_v57  ;;  %v11100_v57 = vcombine.high %v4367_v15, %v4371_v62 }
 0xccb   : > { %7596 = vmatpush2.bf16.msra.mxu1 %v11257_v20  ;;  %v10971_v20 = vcombine.low %v4239_v2, %v4243_v37  ;;  %v4327_v2 = vld [vmem:[#allocation3 + $0x3d0] sm:$0xff] }
 0xccc   : > { %7647 = vmatprep.subr.bf16.mxu1 %v10996_v18  ;;  %v10964_v18 = vcombine.high %v4231_v1, %v4235_v3  ;;  %v4331_v37 = vld [vmem:[#allocation3 + $0x3f0] sm:$0xff] }
 0xccd   : > { %7637 = vmatpush2.bf16.msra.mxu0 %v11385_v25  ;;  %v11099_v25 = vcombine.low %v4367_v15, %v4371_v62  ;;  %v4459_v15 = vld [vmem:[#allocation3 + $0x7f0] sm:$0xff] }
 0xcce   : > { %7688 = vmatprep.subr.bf16.mxu0 %v11124_v33  ;;  %v7353_v6 = vpop.f32.mrf.mxu1  ;;  %7598 = vmatmul.mubr.bf16.vlgmr.msra.gmra.mxu1 %v15789_v26  ;;  %v11092_v33 = vcombine.high %v4359_v60, %v4363_v14 }
 0xccf   : > { %v7354_v17 = vadd.f32 %v7353_v6, %v4722_v7  ;;  %7648 = vmatpush1.bf16.msra.mxu1 %v10995_v16  ;;  %7679 = vmatprep.mubr.bf16.mxu1 %v15761_v23  ;;  %v10963_v7 = vcombine.low %v4231_v1, %v4235_v3  ;;  %v11091_v16 = vcombine.low %v4359_v60, %v4363_v14 }
 0xcd0   : > { %v7394_v30 = vpop.f32.mrf.mxu0  ;;  %7639 = vmatmul.mubr.bf16.vlgmr.msra.gmra.mxu0 %v15793_v40  ;;  %v7355_v34 = vpop.f32.mrf.mxu1  ;;  %7649 = vmatprep.subr.bf16.mxu1 %v10988_v19  ;;  %v11084_v19 = vcombine.high %v4351_v10, %v4355_v28  ;;  %v10955_v6 = vcombine.low %v4223_v9, %v4227_v51  ;;  %v11059_v1 = vcombine.low %v4327_v2, %v4331_v37 }
 0xcd1   : > { %7689 = vmatpush1.bf16.msra.mxu0 %v11123_v53  ;;  %v15813_v48 = vadd.f32 %v7394_v30, %v7354_v17  ;;  %v7356_v27 = vadd.f32 %v7355_v34, %v4726_v59  ;;  %7720 = vmatprep.mubr.bf16.mxu0 %v15763_v46  ;;  %v10956_v53 = vcombine.high %v4223_v9, %v4227_v51  ;;  %v4215_v59 = vld [vmem:[#allocation3 + $0x50] sm:$0xff] }
 0xcd2   : > { %v7396_v55 = vpop.f32.mrf.mxu0  ;;  %7690 = vmatprep.subr.bf16.mxu0 %v11116_v54  ;;  %v7357_v8 = vpop.f32.mrf.mxu1  ;;  %v4219_v54 = vld [vmem:[#allocation3 + $0x70] sm:$0xff]  ;;  %v11076_v17 = vcombine.high %v4343_v21, %v4347_v56 }
 0xcd3   : > { %v15817_v11 = vadd.f32 %v7396_v55, %v7356_v27  ;;  %7650 = vmatpush1.bf16.msra.mxu1 %v10987_v36  ;;  %v10948_v31 = vcombine.high %v4215_v59, %v4219_v54  ;;  %v4207_v30 = vld [vmem:[#allocation3 + $0x10] sm:$0xff]  ;;  %v11075_v27 = vcombine.low %v4343_v21, %v4347_v56 }
 0xcd4   : > { %v7398_v13 = vpop.f32.mrf.mxu0  ;;  %v7358_v0 = vpop.f32.mrf.mxu1  ;;  %7651 = vmatprep.subr.bf16.mxu1 %v10980_v22  ;;  %v4211_v36 = vld [vmem:[#allocation3 + $0x30] sm:$0xff]  ;;  %v10947_v22 = vcombine.low %v4215_v59, %v4219_v54 }
 0xcd5   : > { %7691 = vmatpush1.bf16.msra.mxu0 %v11115_v5  ;;  %v4335_v34 = vld [vmem:[#allocation3 + $0x410] sm:$0xff]  ;;  %v10940_v55 = vcombine.high %v4207_v30, %v4211_v36  ;;  %v10939_v62 = vcombine.low %v4207_v30, %v4211_v36 }
 0xcd6   : > { %v7399_v4 = vpop.f32.mrf.mxu0  ;;  %7692 = vmatprep.subr.bf16.mxu0 %v11108_v58  ;;  %v4339_v5 = vld [vmem:[#allocation3 + $0x430] sm:$0xff] }
 0xcd7   : > { %7652 = vmatpush1.bf16.msra.mxu1 %v10979_v38  ;;  %v11068_v58 = vcombine.high %v4335_v34, %v4339_v5  ;;  %v4455_v8 = vld [vmem:[#allocation3 + $0x7d0] sm:$0xff]  ;;  %v11067_v13 = vcombine.low %v4335_v34, %v4339_v5  ;;  %v11060_v38 = vcombine.high %v4327_v2, %v4331_v37 }
 0xcd8   : > { %7653 = vmatprep.subr.bf16.mxu1 %v10972_v41  ;;  %v11188_v0 = vcombine.high %v4455_v8, %v4459_v15  ;;  %v4323_v41 = vld [vmem:[#allocation3 + $0x3b0] sm:$0xff]  ;;  %v11187_v3 = vcombine.low %v4455_v8, %v4459_v15 }
 0xcd9   : > { %7693 = vmatpush1.bf16.msra.mxu0 %v11107_v32  ;;  %v4319_v32 = vld [vmem:[#allocation3 + $0x390] sm:$0xff] }
 0xcda   : > { %7694 = vmatprep.subr.bf16.mxu0 %v11100_v57  ;;  %v4447_v4 = vld [vmem:[#allocation3 + $0x790] sm:$0xff]  ;;  %v11052_v60 = vcombine.high %v4319_v32, %v4323_v41  ;;  %v11051_v9 = vcombine.low %v4319_v32, %v4323_v41 }
 0xcdb   : > { %7654 = vmatpush1.bf16.msra.mxu1 %v10971_v20  ;;  %v4451_v57 = vld [vmem:[#allocation3 + $0x7b0] sm:$0xff] }
 0xcdc   : > { %7655 = vmatprep.subr.bf16.mxu1 %v10964_v18  ;;  %v11180_v14 = vcombine.high %v4447_v4, %v4451_v57  ;;  %v4311_v20 = vld [vmem:[#allocation3 + $0x350] sm:$0xff]  ;;  %v11179_v51 = vcombine.low %v4447_v4, %v4451_v57 }
 0xcdd   : > { %7695 = vmatpush1.bf16.msra.mxu0 %v11099_v25  ;;  %v4315_v25 = vld [vmem:[#allocation3 + $0x370] sm:$0xff] }
 0xcde   : > { %7696 = vmatprep.subr.bf16.mxu0 %v11092_v33  ;;  %v4439_v18 = vld [vmem:[#allocation3 + $0x750] sm:$0xff]  ;;  %v11044_v10 = vcombine.high %v4311_v20, %v4315_v25  ;;  %v11043_v59 = vcombine.low %v4311_v20, %v4315_v25 }
 0xcdf   : > { %7656 = vmatpush1.bf16.msra.mxu1 %v10963_v7  ;;  %v4443_v33 = vld [vmem:[#allocation3 + $0x770] sm:$0xff] }
 0xce0   : > { %7657 = vmatprep.subr.bf16.mxu1 %v10956_v53  ;;  %v11172_v28 = vcombine.high %v4439_v18, %v4443_v33  ;;  %v4303_v7 = vld [vmem:[#allocation3 + $0x310] sm:$0xff]  ;;  %v11171_v54 = vcombine.low %v4439_v18, %v4443_v33 }
 0xce1   : > { %7697 = vmatpush1.bf16.msra.mxu0 %v11091_v16  ;;  %v4307_v16 = vld [vmem:[#allocation3 + $0x330] sm:$0xff] }
 0xce2   : > { %7698 = vmatprep.subr.bf16.mxu0 %v11084_v19  ;;  %v4431_v53 = vld [vmem:[#allocation3 + $0x710] sm:$0xff]  ;;  %v11036_v21 = vcombine.high %v4303_v7, %v4307_v16  ;;  %v11035_v30 = vcombine.low %v4303_v7, %v4307_v16 }
 0xce3   : > { %7658 = vmatpush1.bf16.msra.mxu1 %v10955_v6  ;;  %v4435_v19 = vld [vmem:[#allocation3 + $0x730] sm:$0xff] }
 0xce4   : > { %7659 = vmatprep.subr.bf16.mxu1 %v10948_v31  ;;  %v11164_v56 = vcombine.high %v4431_v53, %v4435_v19  ;;  %v4295_v6 = vld [vmem:[#allocation3 + $0x2d0] sm:$0xff]  ;;  %v11163_v36 = vcombine.low %v4431_v53, %v4435_v19 }
 0xce5   : > { %7699 = vmatpush1.bf16.msra.mxu0 %v11083_v61  ;;  %v4299_v61 = vld [vmem:[#allocation3 + $0x2f0] sm:$0xff] }
 0xce6   : > { %7700 = vmatprep.subr.bf16.mxu0 %v11076_v17  ;;  %v4423_v31 = vld [vmem:[#allocation3 + $0x6d0] sm:$0xff]  ;;  %v11028_v34 = vcombine.high %v4295_v6, %v4299_v61  ;;  %v11027_v2 = vcombine.low %v4295_v6, %v4299_v61 }
 0xce7   : > { %7660 = vmatpush1.bf16.msra.mxu1 %v10947_v22  ;;  %v4427_v17 = vld [vmem:[#allocation3 + $0x6f0] sm:$0xff] }
 0xce8   : > { %7661 = vmatprep.subr.bf16.mxu1 %v10940_v55  ;;  %v11156_v5 = vcombine.high %v4423_v31, %v4427_v17  ;;  %v4287_v22 = vld [vmem:[#allocation3 + $0x290] sm:$0xff]  ;;  %v11155_v37 = vcombine.low %v4423_v31, %v4427_v17 }
 0xce9   : > { %7701 = vmatpush1.bf16.msra.mxu0 %v11075_v27  ;;  %v4291_v27 = vld [vmem:[#allocation3 + $0x2b0] sm:$0xff] }
 0xcea   : > { %7702 = vmatprep.subr.bf16.mxu0 %v11068_v58  ;;  %v4415_v55 = vld [vmem:[#allocation3 + $0x690] sm:$0xff]  ;;  %v11020_v8 = vcombine.high %v4287_v22, %v4291_v27  ;;  %v11019_v32 = vcombine.low %v4287_v22, %v4291_v27 }
 0xceb   : > { %7662 = vmatpush1.bf16.msra.mxu1 %v10939_v62  ;;  %v4419_v58 = vld [vmem:[#allocation3 + $0x6b0] sm:$0xff] }
 0xcec   : > { %7663 = vmatprep.subr.bf16.mxu1 %v11060_v38  ;;  %v11148_v15 = vcombine.high %v4415_v55, %v4419_v58  ;;  %v4279_v62 = vld [vmem:[#allocation3 + $0x250] sm:$0xff]  ;;  %v11147_v41 = vcombine.low %v4415_v55, %v4419_v58 }
 0xced   : > { %7703 = vmatpush1.bf16.msra.mxu0 %v11067_v13  ;;  %v4283_v13 = vld [vmem:[#allocation3 + $0x270] sm:$0xff] }
 0xcee   : > { %7704 = vmatprep.subr.bf16.mxu0 %v11188_v0  ;;  %v4407_v38 = vld [vmem:[#allocation3 + $0x650] sm:$0xff]  ;;  %v11012_v4 = vcombine.high %v4279_v62, %v4283_v13  ;;  %v11011_v20 = vcombine.low %v4279_v62, %v4283_v13 }
 0xcef   : > { %7664 = vmatpush2.bf16.msra.mxu1 %v11059_v1  ;;  %v4411_v0 = vld [vmem:[#allocation3 + $0x670] sm:$0xff] }
 0xcf0   : > { %7665 = vmatprep.subr.bf16.mxu1 %v11052_v60  ;;  %v11140_v57 = vcombine.high %v4407_v38, %v4411_v0  ;;  %v4271_v1 = vld [vmem:[#allocation3 + $0x210] sm:$0xff]  ;;  %v11139_v25 = vcombine.low %v4407_v38, %v4411_v0 }
 0xcf1   : > { %7705 = vmatpush2.bf16.msra.mxu0 %v11187_v3  ;;  %v4275_v3 = vld [vmem:[#allocation3 + $0x230] sm:$0xff] }
 0xcf2   : > { %7706 = vmatprep.subr.bf16.mxu0 %v11180_v14  ;;  %v4399_v60 = vld [vmem:[#allocation3 + $0x610] sm:$0xff]  ;;  %v11004_v18 = vcombine.high %v4271_v1, %v4275_v3  ;;  %v11003_v7 = vcombine.low %v4271_v1, %v4275_v3 }
 0xcf3   : > { %7666 = vmatpush2.bf16.msra.mxu1 %v11051_v9  ;;  %v4403_v14 = vld [vmem:[#allocation3 + $0x630] sm:$0xff] }
 0xcf4   : > { %7667 = vmatprep.subr.bf16.mxu1 %v11044_v10  ;;  %v11132_v33 = vcombine.high %v4399_v60, %v4403_v14  ;;  %v4519_v9 = vld [vmem:[#allocation3 + $0x9d0] sm:$0xff]  ;;  %v11131_v16 = vcombine.low %v4399_v60, %v4403_v14 }
 0xcf5   : > { %7707 = vmatpush2.bf16.msra.mxu0 %v11179_v51  ;;  %v4523_v51 = vld [vmem:[#allocation3 + $0x9f0] sm:$0xff] }
 0xcf6   : > { %7708 = vmatprep.subr.bf16.mxu0 %v11172_v28  ;;  %v4647_v10 = vld [vmem:[#allocation3 + $0xdd0] sm:$0xff]  ;;  %v11252_v53 = vcombine.high %v4519_v9, %v4523_v51  ;;  %v11251_v6 = vcombine.low %v4519_v9, %v4523_v51 }
 0xcf7   : > { %7668 = vmatpush2.bf16.msra.mxu1 %v11043_v59  ;;  %v4651_v28 = vld [vmem:[#allocation3 + $0xdf0] sm:$0xff] }
 0xcf8   : > { %7669 = vmatprep.subr.bf16.mxu1 %v11036_v21  ;;  %v11380_v19 = vcombine.high %v4647_v10, %v4651_v28  ;;  %v4511_v59 = vld [vmem:[#allocation3 + $0x990] sm:$0xff]  ;;  %v11379_v61 = vcombine.low %v4647_v10, %v4651_v28 }
 0xcf9   : > { %7709 = vmatpush2.bf16.msra.mxu0 %v11171_v54  ;;  %v4515_v54 = vld [vmem:[#allocation3 + $0x9b0] sm:$0xff] }
 0xcfa   : > { %7710 = vmatprep.subr.bf16.mxu0 %v11164_v56  ;;  %v4639_v21 = vld [vmem:[#allocation3 + $0xd90] sm:$0xff]  ;;  %v11244_v31 = vcombine.high %v4511_v59, %v4515_v54  ;;  %v11243_v58 = vcombine.low %v4511_v59, %v4515_v54 }
 0xcfb   : > { %7670 = vmatpush2.bf16.msra.mxu1 %v11035_v30  ;;  %v4643_v56 = vld [vmem:[#allocation3 + $0xdb0] sm:$0xff] }
 0xcfc   : > { %7671 = vmatprep.subr.bf16.mxu1 %v11028_v34  ;;  %v11372_v17 = vcombine.high %v4639_v21, %v4643_v56  ;;  %v4503_v30 = vld [vmem:[#allocation3 + $0x950] sm:$0xff] }
 0xcfd   : > { %7711 = vmatpush2.bf16.msra.mxu0 %v11163_v36  ;;  %v4507_v36 = vld [vmem:[#allocation3 + $0x970] sm:$0xff] }
 0xcfe   : > { %7712 = vmatprep.subr.bf16.mxu0 %v11156_v5  ;;  %v4631_v5 = vld [vmem:[#allocation3 + $0xd50] sm:$0xff]  ;;  %v11235_v60 = vcombine.low %v4503_v30, %v4507_v36 }
 0xcff   : > { %7672 = vmatpush2.bf16.msra.mxu1 %v11027_v2  ;;  %v4635_v22 = vld [vmem:[#allocation3 + $0xd70] sm:$0xff] }
 0xd00   : > { %7673 = vmatprep.subr.bf16.mxu1 %v11020_v8  ;;  %v11236_v8 = vcombine.high %v4503_v30, %v4507_v36  ;;  %v11364_v38 = vcombine.high %v4631_v5, %v4635_v22  ;;  %v4495_v0 = vld [vmem:[#allocation3 + $0x910] sm:$0xff] }
 0xd01   : > { %7713 = vmatpush2.bf16.msra.mxu0 %v11155_v37  ;;  %v11371_v37 = vcombine.low %v4639_v21, %v4643_v56  ;;  %v4487_v51 = vld [vmem:[#allocation3 + $0x8d0] sm:$0xff] }
 0xd02   : > { %7714 = vmatprep.subr.bf16.mxu0 %v11148_v15  ;;  %v4491_v10 = vld [vmem:[#allocation3 + $0x8f0] sm:$0xff] }
 0xd03   : > { %7674 = vmatpush2.bf16.msra.mxu1 %v11019_v32  ;;  %v4499_v32 = vld [vmem:[#allocation3 + $0x930] sm:$0xff]  ;;  %v11220_v59 = vcombine.high %v4487_v51, %v4491_v10 }
 0xd04   : > { %7675 = vmatprep.subr.bf16.mxu1 %v11012_v4  ;;  %v4627_v4 = vld [vmem:[#allocation3 + $0xd30] sm:$0xff] }
 0xd05   : > { %7715 = vmatpush2.bf16.msra.mxu0 %v11147_v41  ;;  %v4623_v41 = vld [vmem:[#allocation3 + $0xd10] sm:$0xff] }
 0xd06   : > { %7716 = vmatprep.subr.bf16.mxu0 %v11140_v57  ;;  %v11356_v9 = vcombine.high %v4623_v41, %v4627_v4  ;;  %v4615_v28 = vld [vmem:[#allocation3 + $0xcd0] sm:$0xff] }
 0xd07   : > { %7676 = vmatpush2.bf16.msra.mxu1 %v11011_v20  ;;  %v11228_v20 = vcombine.high %v4495_v0, %v4499_v32  ;;  %v4479_v21 = vld [vmem:[#allocation3 + $0x890] sm:$0xff] }
 0xd08   : > { %7677 = vmatprep.subr.bf16.mxu1 %v11004_v18  ;;  %v4483_v56 = vld [vmem:[#allocation3 + $0x8b0] sm:$0xff] }
 0xd09   : > { %7717 = vmatpush2.bf16.msra.mxu0 %v11139_v25  ;;  %v11212_v30 = vcombine.high %v4479_v21, %v4483_v56 }
 0xd0a   : > { %7718 = vmatprep.subr.bf16.mxu0 %v11132_v33 }
 0xd0b   : > { %7678 = vmatpush2.bf16.msra.mxu1 %v11003_v7  ;;  %v4619_v7 = vld [vmem:[#allocation3 + $0xcf0] sm:$0xff] }
 0xd0c   : > { %7729 = vmatprep.subr.bf16.mxu1 %v11252_v53  ;;  %v11227_v53 = vcombine.low %v4495_v0, %v4499_v32  ;;  %v11348_v54 = vcombine.high %v4615_v28, %v4619_v7 }
 0xd0d   : > { %7719 = vmatpush2.bf16.msra.mxu0 %v11131_v16 }
 0xd0e   : > { %7770 = vmatprep.subr.bf16.mxu0 %v11380_v19  ;;  %v7435_v34 = vpop.f32.mrf.mxu1  ;;  %7680 = vmatmul.mubr.bf16.vlgmr.msra.gmra.mxu1 %v15769_v50  ;;  %v11355_v19 = vcombine.low %v4623_v41, %v4627_v4  ;;  %v4583_v41 = vld [vmem:[#allocation3 + $0xbd0] sm:$0xff] }
 0xd0f   : > { %v7436_v27 = vadd.f32 %v7435_v34, %v15813_v48  ;;  %7730 = vmatpush1.bf16.msra.mxu1 %v11251_v6  ;;  %7761 = vmatprep.mubr.bf16.mxu1 %v15777_v29  ;;  %v4607_v6 = vld [vmem:[#allocation3 + $0xc90] sm:$0xff] }
 0xd10   : > { %v7476_v55 = vpop.f32.mrf.mxu0  ;;  %7721 = vmatmul.mubr.bf16.vlgmr.msra.gmra.mxu0 %v15773_v52  ;;  %v7437_v2 = vpop.f32.mrf.mxu1  ;;  %7731 = vmatprep.subr.bf16.mxu1 %v11244_v31  ;;  %v11219_v31 = vcombine.low %v4487_v51, %v4491_v10  ;;  %v4471_v34 = vld [vmem:[#allocation3 + $0x850] sm:$0xff] }
 0xd11   : > { %7771 = vmatpush1.bf16.msra.mxu0 %v11379_v61  ;;  %v7477_v15 = vadd.f32 %v7476_v55, %v7436_v27  ;;  %v7438_v62 = vadd.f32 %v7437_v2, %v15817_v11  ;;  %7802 = vmatprep.mubr.bf16.mxu0 %v15782_v12  ;;  %v11363_v11 = vcombine.low %v4631_v5, %v4635_v22  ;;  %v4611_v61 = vld [vmem:[#allocation3 + $0xcb0] sm:$0xff] }
 0xd12   : > { %v7478_v13 = vpop.f32.mrf.mxu0  ;;  %7772 = vmatprep.subr.bf16.mxu0 %v11372_v17  ;;  %v7439_v48 = vpop.f32.mrf.mxu1  ;;  %v11347_v17 = vcombine.low %v4615_v28, %v4619_v7  ;;  %v11340_v36 = vcombine.high %v4607_v6, %v4611_v61  ;;  %v4475_v5 = vld [vmem:[#allocation3 + $0x870] sm:$0xff]  ;;  %v11211_v55 = vcombine.low %v4479_v21, %v4483_v56 }
 0xd13   : > { %v7975_v57 = vmax.f32 %v7477_v15, 0.0  ;;  %v7479_v1 = vadd.f32 %v7478_v13, %v7438_v62  ;;  %7732 = vmatpush1.bf16.msra.mxu1 %v11243_v58  ;;  %v4599_v22 = vld [vmem:[#allocation3 + $0xc50] sm:$0xff]  ;;  %v11339_v58 = vcombine.low %v4607_v6, %v4611_v61  ;;  %v11204_v2 = vcombine.high %v4471_v34, %v4475_v5 }
 0xd14   : > { %v7480_v3 = vpop.f32.mrf.mxu0  ;;  %v7440_v14 = vpop.f32.mrf.mxu1  ;;  %7733 = vmatprep.subr.bf16.mxu1 %v11236_v8  ;;  %v4603_v27 = vld [vmem:[#allocation3 + $0xc70] sm:$0xff] }
 0xd15   : > { %7773 = vmatpush1.bf16.msra.mxu0 %v11371_v37  ;;  %v15825_v25 = vmin.f32 %v7975_v57, 6.0  ;;  %v7976_v18 = vmax.f32 %v7479_v1, 0.0  ;;  %v11332_v37 = vcombine.high %v4599_v22, %v4603_v27  ;;  %v4463_v8 = vld [vmem:[#allocation3 + $0x810] sm:$0xff]  ;;  %v11331_v0 = vcombine.low %v4599_v22, %v4603_v27 }
 0xd16   : > { %v7481_v33 = vpop.f32.mrf.mxu0  ;;  %7774 = vmatprep.subr.bf16.mxu0 %v11364_v38  ;;  %v4467_v15 = vld [vmem:[#allocation3 + $0x830] sm:$0xff]  ;;  %v11203_v38 = vcombine.low %v4471_v34, %v4475_v5 }
 0xd17   : > { %v15827_v16 = vmin.f32 %v7976_v18, 6.0  ;;  %7734 = vmatpush1.bf16.msra.mxu1 %v11235_v60  ;;  %v4591_v62 = vld [vmem:[#allocation3 + $0xc10] sm:$0xff]  ;;  %v11196_v32 = vcombine.high %v4463_v8, %v4467_v15  ;;  %v11195_v3 = vcombine.low %v4463_v8, %v4467_v15 }
 0xd18   : > { %7735 = vmatprep.subr.bf16.mxu1 %v11228_v20  ;;  %v4595_v13 = vld [vmem:[#allocation3 + $0xc30] sm:$0xff] }
 0xd19   : > { %7775 = vmatpush1.bf16.msra.mxu0 %v11363_v11  ;;  %v11324_v48 = vcombine.high %v4591_v62, %v4595_v13  ;;  %v4587_v4 = vld [vmem:[#allocation3 + $0xbf0] sm:$0xff]  ;;  %v11323_v60 = vcombine.low %v4591_v62, %v4595_v13 }
 0xd1a   : > { %7776 = vmatprep.subr.bf16.mxu0 %v11356_v9  ;;  %v4711_v57 = vld [vmem:[#allocation3 + $0xfd0] sm:$0xff]  ;;  %v11316_v14 = vcombine.high %v4583_v41, %v4587_v4  ;;  %v11315_v51 = vcombine.low %v4583_v41, %v4587_v4 }
 0xd1b   : > { %7736 = vmatpush1.bf16.msra.mxu1 %v11227_v53  ;;  %v4715_v1 = vld [vmem:[#allocation3 + $0xff0] sm:$0xff] }
 0xd1c   : > { %7737 = vmatprep.subr.bf16.mxu1 %v11220_v59  ;;  %v11444_v11 = vcombine.high %v4711_v57, %v4715_v1  ;;  %v4575_v20 = vld [vmem:[#allocation3 + $0xb90] sm:$0xff]  ;;  %v11443_v10 = vcombine.low %v4711_v57, %v4715_v1 }
 0xd1d   : > { %7777 = vmatpush1.bf16.msra.mxu0 %v11355_v19  ;;  %v4579_v18 = vld [vmem:[#allocation3 + $0xbb0] sm:$0xff] }
 0xd1e   : > { %7778 = vmatprep.subr.bf16.mxu0 %v11348_v54  ;;  %v4703_v33 = vld [vmem:[#allocation3 + $0xf90] sm:$0xff]  ;;  %v11308_v28 = vcombine.high %v4575_v20, %v4579_v18  ;;  %v11307_v21 = vcombine.low %v4575_v20, %v4579_v18 }
 0xd1f   : > { %7738 = vmatpush1.bf16.msra.mxu1 %v11219_v31  ;;  %v4707_v9 = vld [vmem:[#allocation3 + $0xfb0] sm:$0xff] }
 0xd20   : > { %7739 = vmatprep.subr.bf16.mxu1 %v11212_v30  ;;  %v11436_v7 = vcombine.high %v4703_v33, %v4707_v9  ;;  %v4567_v53 = vld [vmem:[#allocation3 + $0xb50] sm:$0xff]  ;;  %v11435_v56 = vcombine.low %v4703_v33, %v4707_v9 }
 0xd21   : > { %7779 = vmatpush1.bf16.msra.mxu0 %v11347_v17  ;;  %v4571_v19 = vld [vmem:[#allocation3 + $0xb70] sm:$0xff] }
 0xd22   : > { %7780 = vmatprep.subr.bf16.mxu0 %v11340_v36  ;;  %v4695_v59 = vld [vmem:[#allocation3 + $0xf50] sm:$0xff]  ;;  %v11300_v6 = vcombine.high %v4567_v53, %v4571_v19  ;;  %v11299_v34 = vcombine.low %v4567_v53, %v4571_v19 }
 0xd23   : > { %7740 = vmatpush1.bf16.msra.mxu1 %v11211_v55  ;;  %v4699_v54 = vld [vmem:[#allocation3 + $0xf70] sm:$0xff] }
 0xd24   : > { %7741 = vmatprep.subr.bf16.mxu1 %v11204_v2  ;;  %v11428_v61 = vcombine.high %v4695_v59, %v4699_v54  ;;  %v4559_v31 = vld [vmem:[#allocation3 + $0xb10] sm:$0xff]  ;;  %v11427_v5 = vcombine.low %v4695_v59, %v4699_v54 }
 0xd25   : > { %7781 = vmatpush1.bf16.msra.mxu0 %v11339_v58  ;;  %v4563_v17 = vld [vmem:[#allocation3 + $0xb30] sm:$0xff] }
 0xd26   : > { %7782 = vmatprep.subr.bf16.mxu0 %v11332_v37  ;;  %v4687_v30 = vld [vmem:[#allocation3 + $0xf10] sm:$0xff]  ;;  %v11292_v22 = vcombine.high %v4559_v31, %v4563_v17  ;;  %v11291_v8 = vcombine.low %v4559_v31, %v4563_v17 }
 0xd27   : > { %7742 = vmatpush1.bf16.msra.mxu1 %v11203_v38  ;;  %v4691_v36 = vld [vmem:[#allocation3 + $0xf30] sm:$0xff] }
 0xd28   : > { %7743 = vmatprep.subr.bf16.mxu1 %v11196_v32  ;;  %v11420_v27 = vcombine.high %v4687_v30, %v4691_v36  ;;  %v4551_v55 = vld [vmem:[#allocation3 + $0xad0] sm:$0xff]  ;;  %v11419_v15 = vcombine.low %v4687_v30, %v4691_v36 }
 0xd29   : > { %7783 = vmatpush1.bf16.msra.mxu0 %v11331_v0  ;;  %v4555_v58 = vld [vmem:[#allocation3 + $0xaf0] sm:$0xff] }
 0xd2a   : > { %7784 = vmatprep.subr.bf16.mxu0 %v11324_v48  ;;  %v4679_v2 = vld [vmem:[#allocation3 + $0xed0] sm:$0xff]  ;;  %v11284_v62 = vcombine.high %v4551_v55, %v4555_v58  ;;  %v11283_v41 = vcombine.low %v4551_v55, %v4555_v58  ;;  %v4730_v55 = vrot.slane %v15805_v47, %v16895_v35 }
 0xd2b   : > { %7744 = vmatpush1.bf16.msra.mxu1 %v11195_v3  ;;  %v4683_v37 = vld [vmem:[#allocation3 + $0xef0] sm:$0xff] }
 0xd2c   : > { %7745 = vmatprep.subr.bf16.mxu1 %v11316_v14  ;;  %v11412_v13 = vcombine.high %v4679_v2, %v4683_v37  ;;  %v4543_v38 = vld [vmem:[#allocation3 + $0xa90] sm:$0xff]  ;;  %v11411_v4 = vcombine.low %v4679_v2, %v4683_v37 }
 0xd2d   : > { %7785 = vmatpush1.bf16.msra.mxu0 %v11323_v60  ;;  %v4547_v0 = vld [vmem:[#allocation3 + $0xab0] sm:$0xff] }
 0xd2e   : > { %7786 = vmatprep.subr.bf16.mxu0 %v11444_v11  ;;  %v4671_v32 = vld [vmem:[#allocation3 + $0xe90] sm:$0xff]  ;;  %v11276_v57 = vcombine.high %v4543_v38, %v4547_v0  ;;  %v11275_v20 = vcombine.low %v4543_v38, %v4547_v0  ;;  %v4376_v0 = vld [vmem:[#allocation3 + $0x558] sm:$0xff] }
 0xd2f   : > { %7746 = vmatpush2.bf16.msra.mxu1 %v11315_v51  ;;  %v4675_v48 = vld [vmem:[#allocation3 + $0xeb0] sm:$0xff] }
 0xd30   : > { %7747 = vmatprep.subr.bf16.mxu1 %v11308_v28  ;;  %v11404_v1 = vcombine.high %v4671_v32, %v4675_v48  ;;  %v4535_v3 = vld [vmem:[#allocation3 + $0xa50] sm:$0xff]  ;;  %v11403_v18 = vcombine.low %v4671_v32, %v4675_v48  ;;  %v4380_v32 = vld [vmem:[#allocation3 + $0x578] sm:$0xff] }
 0xd31   : > { %7787 = vmatpush2.bf16.msra.mxu0 %v11443_v10  ;;  %v4539_v60 = vld [vmem:[#allocation3 + $0xa70] sm:$0xff] }
 0xd32   : > { %7788 = vmatprep.subr.bf16.mxu0 %v11436_v7  ;;  %v4663_v14 = vld [vmem:[#allocation3 + $0xe50] sm:$0xff]  ;;  %v11268_v33 = vcombine.high %v4535_v3, %v4539_v60  ;;  %v11267_v53 = vcombine.low %v4535_v3, %v4539_v60 }
 0xd33   : > { %7748 = vmatpush2.bf16.msra.mxu1 %v11307_v21  ;;  %v4667_v11 = vld [vmem:[#allocation3 + $0xe70] sm:$0xff]  ;;  %v4264_v21 = vld [vmem:[#allocation3 + $0x1d8] sm:$0xff] }
 0xd34   : > { %7749 = vmatprep.subr.bf16.mxu1 %v11300_v6  ;;  %v11396_v9 = vcombine.high %v4663_v14, %v4667_v11  ;;  %v4527_v51 = vld [vmem:[#allocation3 + $0xa10] sm:$0xff]  ;;  %v11395_v19 = vcombine.low %v4663_v14, %v4667_v11  ;;  %v4392_v6 = vld [vmem:[#allocation3 + $0x5d8] sm:$0xff]  ;;  %v11110_v11 = vcombine.high %v4376_v0, %v4380_v32 }
 0xd35   : > { %7789 = vmatpush2.bf16.msra.mxu0 %v11435_v56  ;;  %v4531_v10 = vld [vmem:[#allocation3 + $0xa30] sm:$0xff]  ;;  %v4268_v56 = vld [vmem:[#allocation3 + $0x1f8] sm:$0xff] }
 0xd36   : > { %7790 = vmatprep.subr.bf16.mxu0 %v11428_v61  ;;  %v4655_v28 = vld [vmem:[#allocation3 + $0xe10] sm:$0xff]  ;;  %v11260_v59 = vcombine.high %v4527_v51, %v4531_v10  ;;  %v4396_v61 = vld [vmem:[#allocation3 + $0x5f8] sm:$0xff]  ;;  %v11259_v31 = vcombine.low %v4527_v51, %v4531_v10  ;;  %v10998_v30 = vcombine.high %v4264_v21, %v4268_v56  ;;  %v10997_v58 = vcombine.low %v4264_v21, %v4268_v56 }
 0xd37   : > { %7750 = vmatpush2.bf16.msra.mxu1 %v11299_v34  ;;  %v4659_v7 = vld [vmem:[#allocation3 + $0xe30] sm:$0xff]  ;;  %v11126_v36 = vcombine.high %v4392_v6, %v4396_v61  ;;  %v4256_v34 = vld [vmem:[#allocation3 + $0x198] sm:$0xff]  ;;  %v11125_v2 = vcombine.low %v4392_v6, %v4396_v61 }
 0xd38   : > { %7751 = vmatprep.subr.bf16.mxu1 %v11292_v22  ;;  %v11388_v54 = vcombine.high %v4655_v28, %v4659_v7  ;;  %v11387_v17 = vcombine.low %v4655_v28, %v4659_v7  ;;  %v4384_v22 = vld [vmem:[#allocation3 + $0x598] sm:$0xff] }
 0xd39   : > { %7791 = vmatpush2.bf16.msra.mxu0 %v11427_v5  ;;  %v4260_v5 = vld [vmem:[#allocation3 + $0x1b8] sm:$0xff] }
 0xd3a   : > { %7792 = vmatprep.subr.bf16.mxu0 %v11420_v27  ;;  %v4388_v27 = vld [vmem:[#allocation3 + $0x5b8] sm:$0xff]  ;;  %v10990_v37 = vcombine.high %v4256_v34, %v4260_v5 }
 0xd3b   : > { %7752 = vmatpush2.bf16.msra.mxu1 %v11291_v8  ;;  %v4734_v8 = vrot.slane %v15805_v47, %v16897_v43  ;;  %v4372_v51 = vld [vmem:[#allocation3 + $0x538] sm:$0xff] }
 0xd3c   : > { %7753 = vmatprep.subr.bf16.mxu1 %v11284_v62  ;;  %v4248_v62 = vld [vmem:[#allocation3 + $0x158] sm:$0xff] }
 0xd3d   : > { %7793 = vmatpush2.bf16.msra.mxu0 %v11419_v15  ;;  %v11118_v15 = vcombine.high %v4384_v22, %v4388_v27  ;;  %v4232_v56 = vld [vmem:[#allocation3 + $0xd8] sm:$0xff] }
 0xd3e   : > { %7794 = vmatprep.subr.bf16.mxu0 %v11412_v13  ;;  %v4252_v13 = vld [vmem:[#allocation3 + $0x178] sm:$0xff] }
 0xd3f   : > { %7754 = vmatpush2.bf16.msra.mxu1 %v11283_v41  ;;  %v10982_v3 = vcombine.high %v4248_v62, %v4252_v13  ;;  %v10981_v7 = vcombine.low %v4248_v62, %v4252_v13  ;;  %v4360_v6 = vld [vmem:[#allocation3 + $0x4d8] sm:$0xff] }
 0xd40   : > { %7755 = vmatprep.subr.bf16.mxu1 %v11276_v57  ;;  %v4364_v61 = vld [vmem:[#allocation3 + $0x4f8] sm:$0xff] }
 0xd41   : > { %7795 = vmatpush2.bf16.msra.mxu0 %v11411_v4  ;;  %v10989_v4 = vcombine.low %v4256_v34, %v4260_v5  ;;  %v4228_v34 = vld [vmem:[#allocation3 + $0xb8] sm:$0xff] }
 0xd42   : > { %7796 = vmatprep.subr.bf16.mxu0 %v11404_v1  ;;  %v11117_v1 = vcombine.low %v4384_v22, %v4388_v27  ;;  %v4352_v5 = vld [vmem:[#allocation3 + $0x498] sm:$0xff] }
 0xd43   : > { %7756 = vmatpush2.bf16.msra.mxu1 %v11275_v20  ;;  %v4240_v20 = vld [vmem:[#allocation3 + $0x118] sm:$0xff] }
 0xd44   : > { %7757 = vmatprep.subr.bf16.mxu1 %v11268_v33  ;;  %v4356_v22 = vld [vmem:[#allocation3 + $0x4b8] sm:$0xff] }
 0xd45   : > { %7797 = vmatpush2.bf16.msra.mxu0 %v11403_v18  ;;  %v4244_v18 = vld [vmem:[#allocation3 + $0x138] sm:$0xff] }
 0xd46   : > { %7798 = vmatprep.subr.bf16.mxu0 %v11396_v9  ;;  %v4368_v9 = vld [vmem:[#allocation3 + $0x518] sm:$0xff] }
 0xd47   : > { %7758 = vmatpush2.bf16.msra.mxu1 %v11267_v53  ;;  %v11102_v21 = vcombine.high %v4368_v9, %v4372_v51  ;;  %v4348_v62 = vld [vmem:[#allocation3 + $0x478] sm:$0xff] }
 0xd48   : > { %7759 = vmatprep.subr.bf16.mxu1 %v11260_v59  ;;  %v10974_v59 = vcombine.high %v4240_v20, %v4244_v18 }
 0xd49   : > { %7799 = vmatpush2.bf16.msra.mxu0 %v11395_v19  ;;  %v11109_v19 = vcombine.low %v4376_v0, %v4380_v32 }
 0xd4a   : > { %7800 = vmatprep.subr.bf16.mxu0 %v11388_v54 }
 0xd4b   : > { %7760 = vmatpush2.bf16.msra.mxu1 %v11259_v31  ;;  %v10973_v31 = vcombine.low %v4240_v20, %v4244_v18  ;;  %v4332_v20 = vld [vmem:[#allocation3 + $0x3f8] sm:$0xff] }
 0xd4c   : > { %7811 = vmatprep.subr.bf16.mxu1 %v10998_v30  ;;  %v11094_v30 = vcombine.high %v4360_v6, %v4364_v61  ;;  %v4456_v18 = vld [vmem:[#allocation3 + $0x7d8] sm:$0xff] }
 0xd4d   : > { %7801 = vmatpush2.bf16.msra.mxu0 %v11387_v17 }
 0xd4e   : > { %7852 = vmatprep.subr.bf16.mxu0 %v11126_v36  ;;  %v7517_v38 = vpop.f32.mrf.mxu1  ;;  %7762 = vmatmul.mubr.bf16.vlgmr.msra.gmra.mxu1 %v15789_v26  ;;  %v4224_v36 = vld [vmem:[#allocation3 + $0x98] sm:$0xff] }
 0xd4f   : > { %v7518_v48 = vadd.f32 %v7517_v38, %v4730_v55  ;;  %7812 = vmatpush1.bf16.msra.mxu1 %v10997_v58  ;;  %7843 = vmatprep.mubr.bf16.mxu1 %v15761_v23  ;;  %v4236_v23 = vld [vmem:[#allocation3 + $0xf8] sm:$0xff]  ;;  %v11093_v55 = vcombine.low %v4360_v6, %v4364_v61  ;;  %v10958_v58 = vcombine.high %v4224_v36, %v4228_v34 }
 0xd50   : > { %v7558_v41 = vpop.f32.mrf.mxu0  ;;  %7803 = vmatmul.mubr.bf16.vlgmr.msra.gmra.mxu0 %v15793_v40  ;;  %v7519_v57 = vpop.f32.mrf.mxu1  ;;  %7813 = vmatprep.subr.bf16.mxu1 %v10990_v37  ;;  %v10966_v17 = vcombine.high %v4232_v56, %v4236_v23  ;;  %v10965_v27 = vcombine.low %v4232_v56, %v4236_v23  ;;  %v4216_v37 = vld [vmem:[#allocation3 + $0x58] sm:$0xff]  ;;  %v10957_v13 = vcombine.low %v4224_v36, %v4228_v34 }
 0xd51   : > { %7853 = vmatpush1.bf16.msra.mxu0 %v11125_v2  ;;  %v15835_v47 = vadd.f32 %v7558_v41, %v7518_v48  ;;  %v7520_v60 = vadd.f32 %v7519_v57, %v4734_v8  ;;  %7884 = vmatprep.mubr.bf16.mxu0 %v15763_v46  ;;  %v11101_v46 = vcombine.low %v4368_v9, %v4372_v51  ;;  %v4220_v8 = vld [vmem:[#allocation3 + $0x78] sm:$0xff] }
 0xd52   : > { %v7560_v14 = vpop.f32.mrf.mxu0  ;;  %7854 = vmatprep.subr.bf16.mxu0 %v11118_v15  ;;  %v7521_v33 = vpop.f32.mrf.mxu1  ;;  %v11086_v2 = vcombine.high %v4352_v5, %v4356_v22  ;;  %v4344_v15 = vld [vmem:[#allocation3 + $0x458] sm:$0xff]  ;;  %v11085_v38 = vcombine.low %v4352_v5, %v4356_v22  ;;  %v10950_v0 = vcombine.high %v4216_v37, %v4220_v8 }
 0xd53   : > { %v15839_v10 = vadd.f32 %v7560_v14, %v7520_v60  ;;  %7814 = vmatpush1.bf16.msra.mxu1 %v10989_v4  ;;  %v11078_v32 = vcombine.high %v4344_v15, %v4348_v62  ;;  %v4208_v48 = vld [vmem:[#allocation3 + $0x18] sm:$0xff] }
 0xd54   : > { %v7562_v28 = vpop.f32.mrf.mxu0  ;;  %v7522_v53 = vpop.f32.mrf.mxu1  ;;  %7815 = vmatprep.subr.bf16.mxu1 %v10982_v3  ;;  %v4212_v41 = vld [vmem:[#allocation3 + $0x38] sm:$0xff]  ;;  %v11077_v3 = vcombine.low %v4344_v15, %v4348_v62 }
 0xd55   : > { %7855 = vmatpush1.bf16.msra.mxu0 %v11117_v1  ;;  %v4336_v4 = vld [vmem:[#allocation3 + $0x418] sm:$0xff]  ;;  %v10949_v1 = vcombine.low %v4216_v37, %v4220_v8  ;;  %v10942_v60 = vcombine.high %v4208_v48, %v4212_v41  ;;  %v10941_v9 = vcombine.low %v4208_v48, %v4212_v41 }
 0xd56   : > { %v7563_v54 = vpop.f32.mrf.mxu0  ;;  %7856 = vmatprep.subr.bf16.mxu0 %v11110_v11  ;;  %v4340_v57 = vld [vmem:[#allocation3 + $0x438] sm:$0xff] }
 0xd57   : > { %7816 = vmatpush1.bf16.msra.mxu1 %v10981_v7  ;;  %v11070_v14 = vcombine.high %v4336_v4, %v4340_v57  ;;  %v4328_v11 = vld [vmem:[#allocation3 + $0x3d8] sm:$0xff]  ;;  %v11069_v51 = vcombine.low %v4336_v4, %v4340_v57 }
 0xd58   : > { %7817 = vmatprep.subr.bf16.mxu1 %v10974_v59  ;;  %v4460_v33 = vld [vmem:[#allocation3 + $0x7f8] sm:$0xff]  ;;  %v11062_v28 = vcombine.high %v4328_v11, %v4332_v20 }
 0xd59   : > { %7857 = vmatpush1.bf16.msra.mxu0 %v11109_v19  ;;  %v11190_v7 = vcombine.high %v4456_v18, %v4460_v33  ;;  %v4320_v53 = vld [vmem:[#allocation3 + $0x398] sm:$0xff]  ;;  %v11189_v56 = vcombine.low %v4456_v18, %v4460_v33 }
 0xd5a   : > { %7858 = vmatprep.subr.bf16.mxu0 %v11102_v21  ;;  %v4324_v19 = vld [vmem:[#allocation3 + $0x3b8] sm:$0xff]  ;;  %v11061_v21 = vcombine.low %v4328_v11, %v4332_v20 }
 0xd5b   : > { %7818 = vmatpush1.bf16.msra.mxu1 %v10973_v31  ;;  %v4448_v59 = vld [vmem:[#allocation3 + $0x798] sm:$0xff]  ;;  %v11054_v23 = vcombine.high %v4320_v53, %v4324_v19 }
 0xd5c   : > { %7819 = vmatprep.subr.bf16.mxu1 %v10966_v17  ;;  %v4452_v54 = vld [vmem:[#allocation3 + $0x7b8] sm:$0xff] }
 0xd5d   : > { %7859 = vmatpush1.bf16.msra.mxu0 %v11101_v46  ;;  %v11182_v6 = vcombine.high %v4448_v59, %v4452_v54  ;;  %v4312_v61 = vld [vmem:[#allocation3 + $0x358] sm:$0xff]  ;;  %v11181_v36 = vcombine.low %v4448_v59, %v4452_v54 }
 0xd5e   : > { %7860 = vmatprep.subr.bf16.mxu0 %v11094_v30  ;;  %v4316_v31 = vld [vmem:[#allocation3 + $0x378] sm:$0xff]  ;;  %v11053_v30 = vcombine.low %v4320_v53, %v4324_v19 }
 0xd5f   : > { %7820 = vmatpush1.bf16.msra.mxu1 %v10965_v27  ;;  %v4440_v46 = vld [vmem:[#allocation3 + $0x758] sm:$0xff]  ;;  %v11046_v34 = vcombine.high %v4312_v61, %v4316_v31 }
 0xd60   : > { %7821 = vmatprep.subr.bf16.mxu1 %v10958_v58  ;;  %v4444_v17 = vld [vmem:[#allocation3 + $0x778] sm:$0xff] }
 0xd61   : > { %7861 = vmatpush1.bf16.msra.mxu0 %v11093_v55  ;;  %v11174_v5 = vcombine.high %v4440_v46, %v4444_v17  ;;  %v4304_v22 = vld [vmem:[#allocation3 + $0x318] sm:$0xff]  ;;  %v11173_v37 = vcombine.low %v4440_v46, %v4444_v17 }
 0xd62   : > { %7862 = vmatprep.subr.bf16.mxu0 %v11086_v2  ;;  %v4308_v27 = vld [vmem:[#allocation3 + $0x338] sm:$0xff]  ;;  %v11045_v2 = vcombine.low %v4312_v61, %v4316_v31 }
 0xd63   : > { %7822 = vmatpush1.bf16.msra.mxu1 %v10957_v13  ;;  %v4432_v55 = vld [vmem:[#allocation3 + $0x718] sm:$0xff]  ;;  %v11038_v8 = vcombine.high %v4304_v22, %v4308_v27 }
 0xd64   : > { %7823 = vmatprep.subr.bf16.mxu1 %v10950_v0  ;;  %v4436_v58 = vld [vmem:[#allocation3 + $0x738] sm:$0xff] }
 0xd65   : > { %7863 = vmatpush1.bf16.msra.mxu0 %v11085_v38  ;;  %v11166_v15 = vcombine.high %v4432_v55, %v4436_v58  ;;  %v4296_v62 = vld [vmem:[#allocation3 + $0x2d8] sm:$0xff]  ;;  %v11165_v48 = vcombine.low %v4432_v55, %v4436_v58 }
 0xd66   : > { %7864 = vmatprep.subr.bf16.mxu0 %v11078_v32  ;;  %v4300_v13 = vld [vmem:[#allocation3 + $0x2f8] sm:$0xff]  ;;  %v11037_v32 = vcombine.low %v4304_v22, %v4308_v27 }
 0xd67   : > { %7824 = vmatpush1.bf16.msra.mxu1 %v10949_v1  ;;  %v4424_v38 = vld [vmem:[#allocation3 + $0x6d8] sm:$0xff]  ;;  %v11030_v41 = vcombine.high %v4296_v62, %v4300_v13 }
 0xd68   : > { %7825 = vmatprep.subr.bf16.mxu1 %v10942_v60  ;;  %v4428_v0 = vld [vmem:[#allocation3 + $0x6f8] sm:$0xff] }
 0xd69   : > { %7865 = vmatpush1.bf16.msra.mxu0 %v11077_v3  ;;  %v11158_v4 = vcombine.high %v4424_v38, %v4428_v0  ;;  %v4288_v57 = vld [vmem:[#allocation3 + $0x298] sm:$0xff]  ;;  %v11157_v11 = vcombine.low %v4424_v38, %v4428_v0 }
 0xd6a   : > { %7866 = vmatprep.subr.bf16.mxu0 %v11070_v14  ;;  %v4292_v1 = vld [vmem:[#allocation3 + $0x2b8] sm:$0xff]  ;;  %v11029_v14 = vcombine.low %v4296_v62, %v4300_v13 }
 0xd6b   : > { %7826 = vmatpush1.bf16.msra.mxu1 %v10941_v9  ;;  %v4416_v3 = vld [vmem:[#allocation3 + $0x698] sm:$0xff]  ;;  %v11022_v20 = vcombine.high %v4288_v57, %v4292_v1 }
 0xd6c   : > { %7827 = vmatprep.subr.bf16.mxu1 %v11062_v28  ;;  %v4420_v60 = vld [vmem:[#allocation3 + $0x6b8] sm:$0xff] }
 0xd6d   : > { %7867 = vmatpush1.bf16.msra.mxu0 %v11069_v51  ;;  %v11150_v18 = vcombine.high %v4416_v3, %v4420_v60  ;;  %v4280_v33 = vld [vmem:[#allocation3 + $0x258] sm:$0xff]  ;;  %v11149_v53 = vcombine.low %v4416_v3, %v4420_v60 }
 0xd6e   : > { %7868 = vmatprep.subr.bf16.mxu0 %v11190_v7  ;;  %v4284_v9 = vld [vmem:[#allocation3 + $0x278] sm:$0xff]  ;;  %v11021_v7 = vcombine.low %v4288_v57, %v4292_v1 }
 0xd6f   : > { %7828 = vmatpush2.bf16.msra.mxu1 %v11061_v21  ;;  %v4408_v51 = vld [vmem:[#allocation3 + $0x658] sm:$0xff]  ;;  %v11014_v19 = vcombine.high %v4280_v33, %v4284_v9 }
 0xd70   : > { %7829 = vmatprep.subr.bf16.mxu1 %v11054_v23  ;;  %v4412_v28 = vld [vmem:[#allocation3 + $0x678] sm:$0xff] }
 0xd71   : > { %7869 = vmatpush2.bf16.msra.mxu0 %v11189_v56  ;;  %v11142_v59 = vcombine.high %v4408_v51, %v4412_v28  ;;  %v4272_v54 = vld [vmem:[#allocation3 + $0x218] sm:$0xff]  ;;  %v11141_v61 = vcombine.low %v4408_v51, %v4412_v28 }
 0xd72   : > { %7870 = vmatprep.subr.bf16.mxu0 %v11182_v6  ;;  %v4276_v21 = vld [vmem:[#allocation3 + $0x238] sm:$0xff]  ;;  %v11013_v6 = vcombine.low %v4280_v33, %v4284_v9 }
 0xd73   : > { %7830 = vmatpush2.bf16.msra.mxu1 %v11053_v30  ;;  %v4400_v56 = vld [vmem:[#allocation3 + $0x618] sm:$0xff]  ;;  %v11006_v31 = vcombine.high %v4272_v54, %v4276_v21 }
 0xd74   : > { %7831 = vmatprep.subr.bf16.mxu1 %v11046_v34  ;;  %v4404_v23 = vld [vmem:[#allocation3 + $0x638] sm:$0xff] }
 0xd75   : > { %7871 = vmatpush2.bf16.msra.mxu0 %v11181_v36  ;;  %v11134_v46 = vcombine.high %v4400_v56, %v4404_v23  ;;  %v4520_v17 = vld [vmem:[#allocation3 + $0x9d8] sm:$0xff]  ;;  %v11133_v22 = vcombine.low %v4400_v56, %v4404_v23 }
 0xd76   : > { %7872 = vmatprep.subr.bf16.mxu0 %v11174_v5  ;;  %v4524_v30 = vld [vmem:[#allocation3 + $0x9f8] sm:$0xff]  ;;  %v11005_v5 = vcombine.low %v4272_v54, %v4276_v21 }
 0xd77   : > { %7832 = vmatpush2.bf16.msra.mxu1 %v11045_v2  ;;  %v4648_v36 = vld [vmem:[#allocation3 + $0xdd8] sm:$0xff]  ;;  %v11254_v27 = vcombine.high %v4520_v17, %v4524_v30 }
 0xd78   : > { %7833 = vmatprep.subr.bf16.mxu1 %v11038_v8  ;;  %v4652_v34 = vld [vmem:[#allocation3 + $0xdf8] sm:$0xff] }
 0xd79   : > { %7873 = vmatpush2.bf16.msra.mxu0 %v11173_v37  ;;  %v11382_v55 = vcombine.high %v4648_v36, %v4652_v34  ;;  %v4512_v58 = vld [vmem:[#allocation3 + $0x998] sm:$0xff]  ;;  %v11381_v62 = vcombine.low %v4648_v36, %v4652_v34 }
 0xd7a   : > { %7874 = vmatprep.subr.bf16.mxu0 %v11166_v15  ;;  %v4516_v2 = vld [vmem:[#allocation3 + $0x9b8] sm:$0xff]  ;;  %v11253_v15 = vcombine.low %v4520_v17, %v4524_v30 }
 0xd7b   : > { %7834 = vmatpush2.bf16.msra.mxu1 %v11037_v32  ;;  %v4640_v37 = vld [vmem:[#allocation3 + $0xd98] sm:$0xff]  ;;  %v11246_v13 = vcombine.high %v4512_v58, %v4516_v2  ;;  %v11245_v3 = vcombine.low %v4512_v58, %v4516_v2 }
 0xd7c   : > { %7835 = vmatprep.subr.bf16.mxu1 %v11030_v41  ;;  %v4644_v8 = vld [vmem:[#allocation3 + $0xdb8] sm:$0xff] }
 0xd7d   : > { %7875 = vmatpush2.bf16.msra.mxu0 %v11165_v48  ;;  %v11374_v38 = vcombine.high %v4640_v37, %v4644_v8  ;;  %v4504_v0 = vld [vmem:[#allocation3 + $0x958] sm:$0xff] }
 0xd7e   : > { %7876 = vmatprep.subr.bf16.mxu0 %v11158_v4  ;;  %v4508_v32 = vld [vmem:[#allocation3 + $0x978] sm:$0xff] }
 0xd7f   : > { %7836 = vmatpush2.bf16.msra.mxu1 %v11029_v14  ;;  %v4632_v41 = vld [vmem:[#allocation3 + $0xd58] sm:$0xff]  ;;  %v11373_v14 = vcombine.low %v4640_v37, %v4644_v8 }
 0xd80   : > { %7837 = vmatprep.subr.bf16.mxu1 %v11022_v20  ;;  %v4636_v4 = vld [vmem:[#allocation3 + $0xd78] sm:$0xff] }
 0xd81   : > { %7877 = vmatpush2.bf16.msra.mxu0 %v11157_v11  ;;  %v11238_v11 = vcombine.high %v4504_v0, %v4508_v32  ;;  %v4496_v9 = vld [vmem:[#allocation3 + $0x918] sm:$0xff] }
 0xd82   : > { %7878 = vmatprep.subr.bf16.mxu0 %v11150_v18  ;;  %v4500_v51 = vld [vmem:[#allocation3 + $0x938] sm:$0xff] }
 0xd83   : > { %7838 = vmatpush2.bf16.msra.mxu1 %v11021_v7  ;;  %v4624_v28 = vld [vmem:[#allocation3 + $0xd18] sm:$0xff]  ;;  %v11230_v21 = vcombine.high %v4496_v9, %v4500_v51  ;;  %v11229_v30 = vcombine.low %v4496_v9, %v4500_v51 }
 0xd84   : > { %7839 = vmatprep.subr.bf16.mxu1 %v11014_v19  ;;  %v4612_v58 = vld [vmem:[#allocation3 + $0xcb8] sm:$0xff] }
 0xd85   : > { %7879 = vmatpush2.bf16.msra.mxu0 %v11149_v53  ;;  %v4712_v9 = vld [vmem:[#allocation3 + $0xfd8] sm:$0xff] }
 0xd86   : > { %7880 = vmatprep.subr.bf16.mxu0 %v11142_v59  ;;  %v11237_v59 = vcombine.low %v4504_v0, %v4508_v32  ;;  %v4604_v0 = vld [vmem:[#allocation3 + $0xc78] sm:$0xff] }
 0xd87   : > { %7840 = vmatpush2.bf16.msra.mxu1 %v11013_v6  ;;  %v4716_v51 = vld [vmem:[#allocation3 + $0xff8] sm:$0xff] }
 0xd88   : > { %7841 = vmatprep.subr.bf16.mxu1 %v11006_v31  ;;  %v4492_v31 = vld [vmem:[#allocation3 + $0x8f8] sm:$0xff] }
 0xd89   : > { %7881 = vmatpush2.bf16.msra.mxu0 %v11141_v61  ;;  %v4488_v61 = vld [vmem:[#allocation3 + $0x8d8] sm:$0xff] }
 0xd8a   : > { %7882 = vmatprep.subr.bf16.mxu0 %v11134_v46  ;;  %v4616_v46 = vld [vmem:[#allocation3 + $0xcd8] sm:$0xff]  ;;  %v11222_v34 = vcombine.high %v4488_v61, %v4492_v31  ;;  %v11221_v2 = vcombine.low %v4488_v61, %v4492_v31 }
 0xd8b   : > { %7842 = vmatpush2.bf16.msra.mxu1 %v11005_v5  ;;  %v4572_v61 = vld [vmem:[#allocation3 + $0xb78] sm:$0xff] }
 0xd8c   : > { %7893 = vmatprep.subr.bf16.mxu1 %v11254_v27  ;;  %v4484_v27 = vld [vmem:[#allocation3 + $0x8b8] sm:$0xff] }
 0xd8d   : > { %7883 = vmatpush2.bf16.msra.mxu0 %v11133_v22  ;;  %v4480_v22 = vld [vmem:[#allocation3 + $0x898] sm:$0xff] }
 0xd8e   : > { %7934 = vmatprep.subr.bf16.mxu0 %v11382_v55  ;;  %v7599_v48 = vpop.f32.mrf.mxu1  ;;  %7844 = vmatmul.mubr.bf16.vlgmr.msra.gmra.mxu1 %v15769_v50  ;;  %v11366_v50 = vcombine.high %v4632_v41, %v4636_v4  ;;  %v4608_v55 = vld [vmem:[#allocation3 + $0xc98] sm:$0xff]  ;;  %v11214_v8 = vcombine.high %v4480_v22, %v4484_v27  ;;  %v11213_v32 = vcombine.low %v4480_v22, %v4484_v27 }
 0xd8f   : > { %v7600_v57 = vadd.f32 %v7599_v48, %v15835_v47  ;;  %7894 = vmatpush1.bf16.msra.mxu1 %v11253_v15  ;;  %7925 = vmatprep.mubr.bf16.mxu1 %v15777_v29  ;;  %v11342_v15 = vcombine.high %v4608_v55, %v4612_v58  ;;  %v11341_v48 = vcombine.low %v4608_v55, %v4612_v58  ;;  %v4696_v31 = vld [vmem:[#allocation3 + $0xf58] sm:$0xff] }
 0xd90   : > { %v7640_v1 = vpop.f32.mrf.mxu0  ;;  %7885 = vmatmul.mubr.bf16.vlgmr.msra.gmra.mxu0 %v15773_v52  ;;  %v7601_v60 = vpop.f32.mrf.mxu1  ;;  %7895 = vmatprep.subr.bf16.mxu1 %v11246_v13  ;;  %v4628_v52 = vld [vmem:[#allocation3 + $0xd38] sm:$0xff] }
 0xd91   : > { %7935 = vmatpush1.bf16.msra.mxu0 %v11381_v62  ;;  %v7641_v20 = vadd.f32 %v7640_v1, %v7600_v57  ;;  %v7602_v18 = vadd.f32 %v7601_v60, %v15839_v10  ;;  %7966 = vmatprep.mubr.bf16.mxu0 %v15782_v12  ;;  %v11365_v10 = vcombine.low %v4632_v41, %v4636_v4  ;;  %v4620_v12 = vld [vmem:[#allocation3 + $0xcf8] sm:$0xff] }
 0xd92   : > { %v7642_v33 = vpop.f32.mrf.mxu0  ;;  %7936 = vmatprep.subr.bf16.mxu0 %v11374_v38  ;;  %v7603_v47 = vpop.f32.mrf.mxu1  ;;  %v11358_v29 = vcombine.high %v4624_v28, %v4628_v52  ;;  %v11357_v36 = vcombine.low %v4624_v28, %v4628_v52  ;;  %v11350_v5 = vcombine.high %v4616_v46, %v4620_v12  ;;  %v11349_v37 = vcombine.low %v4616_v46, %v4620_v12  ;;  %v4472_v62 = vld [vmem:[#allocation3 + $0x858] sm:$0xff] }
 0xd93   : > { %v7977_v7 = vmax.f32 %v7641_v20, 0.0  ;;  %v7643_v53 = vadd.f32 %v7642_v33, %v7602_v18  ;;  %7896 = vmatpush1.bf16.msra.mxu1 %v11245_v3  ;;  %v4476_v13 = vld [vmem:[#allocation3 + $0x878] sm:$0xff] }
 0xd94   : > { %v7644_v19 = vpop.f32.mrf.mxu0  ;;  %v7604_v54 = vpop.f32.mrf.mxu1  ;;  %7897 = vmatprep.subr.bf16.mxu1 %v11238_v11  ;;  %v4600_v38 = vld [vmem:[#allocation3 + $0xc58] sm:$0xff]  ;;  %v11206_v41 = vcombine.high %v4472_v62, %v4476_v13 }
 0xd95   : > { %7937 = vmatpush1.bf16.msra.mxu0 %v11373_v14  ;;  %v15847_v56 = vmin.f32 %v7977_v7, 6.0  ;;  %v7978_v23 = vmax.f32 %v7643_v53, 0.0  ;;  %v11334_v4 = vcombine.high %v4600_v38, %v4604_v0  ;;  %v4464_v57 = vld [vmem:[#allocation3 + $0x818] sm:$0xff]  ;;  %v11205_v14 = vcombine.low %v4472_v62, %v4476_v13 }
 0xd96   : > { %v7645_v6 = vpop.f32.mrf.mxu0  ;;  %7938 = vmatprep.subr.bf16.mxu0 %v11366_v50  ;;  %v4468_v1 = vld [vmem:[#allocation3 + $0x838] sm:$0xff]  ;;  %v11333_v11 = vcombine.low %v4600_v38, %v4604_v0  ;;  %v11446_v7 = vcombine.high %v4712_v9, %v4716_v51 }
 0xd97   : > { %v15849_v17 = vmin.f32 %v7978_v23, 6.0  ;;  %7898 = vmatpush1.bf16.msra.mxu1 %v11237_v59  ;;  %v4592_v3 = vld [vmem:[#allocation3 + $0xc18] sm:$0xff]  ;;  %v11198_v20 = vcombine.high %v4464_v57, %v4468_v1  ;;  %v11197_v47 = vcombine.low %v4464_v57, %v4468_v1 }
 0xd98   : > { %7899 = vmatprep.subr.bf16.mxu1 %v11230_v21  ;;  %v4596_v60 = vld [vmem:[#allocation3 + $0xc38] sm:$0xff]  ;;  %v11445_v21 = vcombine.low %v4712_v9, %v4716_v51 }
 0xd99   : > { %7939 = vmatpush1.bf16.msra.mxu0 %v11365_v10  ;;  %v11326_v18 = vcombine.high %v4592_v3, %v4596_v60  ;;  %v4584_v33 = vld [vmem:[#allocation3 + $0xbd8] sm:$0xff]  ;;  %v11325_v28 = vcombine.low %v4592_v3, %v4596_v60 }
 0xd9a   : > { %7940 = vmatprep.subr.bf16.mxu0 %v11358_v29  ;;  %v4588_v50 = vld [vmem:[#allocation3 + $0xbf8] sm:$0xff] }
 0xd9b   : > { %7900 = vmatpush1.bf16.msra.mxu1 %v11229_v30  ;;  %v11318_v52 = vcombine.high %v4584_v33, %v4588_v50  ;;  %v4576_v53 = vld [vmem:[#allocation3 + $0xb98] sm:$0xff]  ;;  %v11317_v10 = vcombine.low %v4584_v33, %v4588_v50 }
 0xd9c   : > { %7901 = vmatprep.subr.bf16.mxu1 %v11222_v34  ;;  %v4580_v19 = vld [vmem:[#allocation3 + $0xbb8] sm:$0xff] }
 0xd9d   : > { %7941 = vmatpush1.bf16.msra.mxu0 %v11357_v36  ;;  %v4704_v59 = vld [vmem:[#allocation3 + $0xf98] sm:$0xff]  ;;  %v11310_v23 = vcombine.high %v4576_v53, %v4580_v19  ;;  %v11309_v12 = vcombine.low %v4576_v53, %v4580_v19 }
 0xd9e   : > { %7942 = vmatprep.subr.bf16.mxu0 %v11350_v5  ;;  %v4708_v54 = vld [vmem:[#allocation3 + $0xfb8] sm:$0xff] }
 0xd9f   : > { %7902 = vmatpush1.bf16.msra.mxu1 %v11221_v2  ;;  %v11438_v6 = vcombine.high %v4704_v59, %v4708_v54  ;;  %v4568_v29 = vld [vmem:[#allocation3 + $0xb58] sm:$0xff]  ;;  %v11437_v30 = vcombine.low %v4704_v59, %v4708_v54 }
 0xda0   : > { %7903 = vmatprep.subr.bf16.mxu1 %v11214_v8  ;;  %v4700_v46 = vld [vmem:[#allocation3 + $0xf78] sm:$0xff]  ;;  %v11302_v36 = vcombine.high %v4568_v29, %v4572_v61  ;;  %v11301_v58 = vcombine.low %v4568_v29, %v4572_v61 }
 0xda1   : > { %7943 = vmatpush1.bf16.msra.mxu0 %v11349_v37  ;;  %v11430_v34 = vcombine.high %v4696_v31, %v4700_v46  ;;  %v4560_v5 = vld [vmem:[#allocation3 + $0xb18] sm:$0xff]  ;;  %v11429_v2 = vcombine.low %v4696_v31, %v4700_v46 }
 0xda2   : > { %7944 = vmatprep.subr.bf16.mxu0 %v11342_v15  ;;  %v4564_v22 = vld [vmem:[#allocation3 + $0xb38] sm:$0xff] }
 0xda3   : > { %7904 = vmatpush1.bf16.msra.mxu1 %v11213_v32  ;;  %v4688_v27 = vld [vmem:[#allocation3 + $0xf18] sm:$0xff]  ;;  %v11294_v37 = vcombine.high %v4560_v5, %v4564_v22  ;;  %v11293_v0 = vcombine.low %v4560_v5, %v4564_v22 }
 0xda4   : > { %7905 = vmatprep.subr.bf16.mxu1 %v11206_v41  ;;  %v4692_v55 = vld [vmem:[#allocation3 + $0xf38] sm:$0xff] }
 0xda5   : > { %7945 = vmatpush1.bf16.msra.mxu0 %v11341_v48  ;;  %v11422_v8 = vcombine.high %v4688_v27, %v4692_v55  ;;  %v4552_v15 = vld [vmem:[#allocation3 + $0xad8] sm:$0xff]  ;;  %v11421_v32 = vcombine.low %v4688_v27, %v4692_v55 }
 0xda6   : > { %7946 = vmatprep.subr.bf16.mxu0 %v11334_v4  ;;  %v4556_v62 = vld [vmem:[#allocation3 + $0xaf8] sm:$0xff] }
 0xda7   : > { %7906 = vmatpush1.bf16.msra.mxu1 %v11205_v14  ;;  %v4680_v13 = vld [vmem:[#allocation3 + $0xed8] sm:$0xff]  ;;  %v11286_v48 = vcombine.high %v4552_v15, %v4556_v62  ;;  %v11285_v60 = vcombine.low %v4552_v15, %v4556_v62 }
 0xda8   : > { %7907 = vmatprep.subr.bf16.mxu1 %v11198_v20  ;;  %v4684_v38 = vld [vmem:[#allocation3 + $0xef8] sm:$0xff] }
 0xda9   : > { %7947 = vmatpush1.bf16.msra.mxu0 %v11333_v11  ;;  %v11414_v41 = vcombine.high %v4680_v13, %v4684_v38  ;;  %v4544_v4 = vld [vmem:[#allocation3 + $0xa98] sm:$0xff]  ;;  %v11413_v14 = vcombine.low %v4680_v13, %v4684_v38 }
 0xdaa   : > { %7948 = vmatprep.subr.bf16.mxu0 %v11326_v18  ;;  %v4548_v57 = vld [vmem:[#allocation3 + $0xab8] sm:$0xff] }
 0xdab   : > { %7908 = vmatpush1.bf16.msra.mxu1 %v11197_v47  ;;  %v4672_v1 = vld [vmem:[#allocation3 + $0xe98] sm:$0xff]  ;;  %v11278_v11 = vcombine.high %v4544_v4, %v4548_v57  ;;  %v11277_v51 = vcombine.low %v4544_v4, %v4548_v57 }
 0xdac   : > { %7909 = vmatprep.subr.bf16.mxu1 %v11318_v52  ;;  %v4676_v3 = vld [vmem:[#allocation3 + $0xeb8] sm:$0xff] }
 0xdad   : > { %7949 = vmatpush1.bf16.msra.mxu0 %v11325_v28  ;;  %v11406_v20 = vcombine.high %v4672_v1, %v4676_v3  ;;  %v4536_v18 = vld [vmem:[#allocation3 + $0xa58] sm:$0xff]  ;;  %v11405_v47 = vcombine.low %v4672_v1, %v4676_v3 }
 0xdae   : > { %7950 = vmatprep.subr.bf16.mxu0 %v11446_v7  ;;  %v4540_v33 = vld [vmem:[#allocation3 + $0xa78] sm:$0xff] }
 0xdaf   : > { %7910 = vmatpush2.bf16.msra.mxu1 %v11317_v10  ;;  %v4664_v50 = vld [vmem:[#allocation3 + $0xe58] sm:$0xff]  ;;  %v11270_v28 = vcombine.high %v4536_v18, %v4540_v33  ;;  %v11269_v54 = vcombine.low %v4536_v18, %v4540_v33 }
 0xdb0   : > { %7911 = vmatprep.subr.bf16.mxu1 %v11310_v23  ;;  %v4668_v9 = vld [vmem:[#allocation3 + $0xe78] sm:$0xff] }
 0xdb1   : > { %7951 = vmatpush2.bf16.msra.mxu0 %v11445_v21  ;;  %v11398_v52 = vcombine.high %v4664_v50, %v4668_v9  ;;  %v4528_v7 = vld [vmem:[#allocation3 + $0xa18] sm:$0xff]  ;;  %v11397_v10 = vcombine.low %v4664_v50, %v4668_v9 }
 0xdb2   : > { %7952 = vmatprep.subr.bf16.mxu0 %v11438_v6  ;;  %v4532_v53 = vld [vmem:[#allocation3 + $0xa38] sm:$0xff] }
 0xdb3   : > { %7912 = vmatpush2.bf16.msra.mxu1 %v11309_v12  ;;  %v4656_v19 = vld [vmem:[#allocation3 + $0xe18] sm:$0xff]  ;;  %v11262_v21 = vcombine.high %v4528_v7, %v4532_v53  ;;  %v11261_v6 = vcombine.low %v4528_v7, %v4532_v53 }
 0xdb4   : > { %7913 = vmatprep.subr.bf16.mxu1 %v11302_v36  ;;  %v4660_v59 = vld [vmem:[#allocation3 + $0xe38] sm:$0xff] }
 0xdb5   : > { %7953 = vmatpush2.bf16.msra.mxu0 %v11437_v30  ;;  %v11390_v23 = vcombine.high %v4656_v19, %v4660_v59  ;;  %v11389_v29 = vcombine.low %v4656_v19, %v4660_v59  ;;  %v12504_v61 = vld [vmem:[%s644_s2] sm:$0xff] }
 0xdb6   : > { %7954 = vmatprep.subr.bf16.mxu0 %v11430_v34  ;;  %v4738_v31 = vrot.slane %v12504_v61, %v16899_v42  ;;  %v4742_v46 = vrot.slane %v12504_v61, %v16900_v24 }
 0xdb7   : > { %7914 = vmatpush2.bf16.msra.mxu1 %v11301_v58 }
 0xdb8   : > { %7915 = vmatprep.subr.bf16.mxu1 %v11294_v37 }
 0xdb9   : > { %7955 = vmatpush2.bf16.msra.mxu0 %v11429_v2 }
 0xdba   : > { %7956 = vmatprep.subr.bf16.mxu0 %v11422_v8 }
 0xdbb   : > { %7916 = vmatpush2.bf16.msra.mxu1 %v11293_v0 }
 0xdbc   : > { %7917 = vmatprep.subr.bf16.mxu1 %v11286_v48 }
 0xdbd   : > { %7957 = vmatpush2.bf16.msra.mxu0 %v11421_v32 }
 0xdbe   : > { %7958 = vmatprep.subr.bf16.mxu0 %v11414_v41 }
 0xdbf   : > { %7918 = vmatpush2.bf16.msra.mxu1 %v11285_v60 }
 0xdc0   : > { %7919 = vmatprep.subr.bf16.mxu1 %v11278_v11 }
 0xdc1   : > { %7959 = vmatpush2.bf16.msra.mxu0 %v11413_v14 }
 0xdc2   : > { %7960 = vmatprep.subr.bf16.mxu0 %v11406_v20 }
 0xdc3   : > { %7920 = vmatpush2.bf16.msra.mxu1 %v11277_v51  ;;  %v4746_v51 = vrot.slane %v12504_v61, %v3359_v39 }
 0xdc4   : > { %7921 = vmatprep.subr.bf16.mxu1 %v11270_v28 }
 0xdc5   : > { %7961 = vmatpush2.bf16.msra.mxu0 %v11405_v47  ;;  %v4750_v47 = vrot.slane %v12504_v61, %v3363_v63 }
 0xdc6   : > { %7962 = vmatprep.subr.bf16.mxu0 %v11398_v52 }
 0xdc7   : > { %7922 = vmatpush2.bf16.msra.mxu1 %v11269_v54 }
 0xdc8   : > { %7923 = vmatprep.subr.bf16.mxu1 %v11262_v21 }
 0xdc9   : > { %7963 = vmatpush2.bf16.msra.mxu0 %v11397_v10 }
 0xdca   : > { %7964 = vmatprep.subr.bf16.mxu0 %v11390_v23 }
 0xdcb   : > { %7924 = vmatpush2.bf16.msra.mxu1 %v11261_v6 }
 0xdcd   : > { %7965 = vmatpush2.bf16.msra.mxu0 %v11389_v29 }
 0xdce   : > { %v7681_v12 = vpop.f32.mrf.mxu1  ;;  %7926 = vmatmul.mubr.bf16.vlgmr.msra.gmra.mxu1 %v15789_v26 }
 0xdcf   : > { %v7682_v30 = vadd.f32 %v7681_v12, %v4738_v31 }
 0xdd0   : > { %v7722_v36 = vpop.f32.mrf.mxu0  ;;  %7967 = vmatmul.mubr.bf16.vlgmr.msra.gmra.mxu0 %v15793_v40  ;;  %v7683_v34 = vpop.f32.mrf.mxu1 }
 0xdd1   : > { %v7723_v5 = vadd.f32 %v7722_v36, %v7682_v30  ;;  %v7684_v22 = vadd.f32 %v7683_v34, %v4742_v46 }
 0xdd2   : > { %v7724_v27 = vpop.f32.mrf.mxu0  ;;  %v7685_v55 = vpop.f32.mrf.mxu1 }
 0xdd3   : > { %v7725_v58 = vadd.f32 %v7724_v27, %v7684_v22 }
 0xdd4   : > { %v7726_v2 = vpop.f32.mrf.mxu0  ;;  %v7686_v37 = vpop.f32.mrf.mxu1 }
 0xdd6   : > { %v7727_v8 = vpop.f32.mrf.mxu0 }
 0xe0e   : > { %v7763_v42 = vpop.f32.mrf.mxu1 }
 0xe0f   : > { %v7764_v15 = vadd.f32 %v7763_v42, %v7723_v5 }
 0xe10   : > { %v7804_v62 = vpop.f32.mrf.mxu0  ;;  %v7765_v24 = vpop.f32.mrf.mxu1 }
 0xe11   : > { %v7805_v13 = vadd.f32 %v7804_v62, %v7764_v15  ;;  %v7766_v38 = vadd.f32 %v7765_v24, %v7725_v58 }
 0xe12   : > { %v7806_v26 = vpop.f32.mrf.mxu0  ;;  %v7767_v0 = vpop.f32.mrf.mxu1 }
 0xe13   : > { %v7979_v32 = vmax.f32 %v7805_v13, 0.0  ;;  %v7807_v48 = vadd.f32 %v7806_v26, %v7766_v38 }
 0xe14   : > { %v7808_v40 = vpop.f32.mrf.mxu0  ;;  %v7768_v41 = vpop.f32.mrf.mxu1 }
 0xe15   : > { %v15857_v4 = vmin.f32 %v7979_v32, 6.0  ;;  %v7980_v57 = vmax.f32 %v7807_v48, 0.0 }
 0xe16   : > { %v7809_v1 = vpop.f32.mrf.mxu0 }
 0xe17   : > { %v15859_v3 = vmin.f32 %v7980_v57, 6.0 }
 0xe4e   : > { %v7845_v60 = vpop.f32.mrf.mxu1 }
 0xe4f   : > { %v7846_v28 = vadd.f32 %v7845_v60, %v4746_v51 }
 0xe50   : > { %v7886_v14 = vpop.f32.mrf.mxu0  ;;  %v7847_v11 = vpop.f32.mrf.mxu1 }
 0xe51   : > { %v7848_v52 = vadd.f32 %v7847_v11, %v4750_v47  ;;  %v7887_v7 = vadd.f32 %v7886_v14, %v7846_v28 }
 0xe52   : > { %v7888_v20 = vpop.f32.mrf.mxu0  ;;  %v7849_v18 = vpop.f32.mrf.mxu1 }
 0xe53   : > { %v7889_v19 = vadd.f32 %v7888_v20, %v7848_v52 }
 0xe54   : > { %v7890_v33 = vpop.f32.mrf.mxu0  ;;  %v7850_v50 = vpop.f32.mrf.mxu1 }
 0xe56   : > { %v7891_v9 = vpop.f32.mrf.mxu0 }
 0xe8e   : > { %v7927_v53 = vpop.f32.mrf.mxu1 }
 0xe8f   : > { %v7928_v59 = vadd.f32 %v7927_v53, %v7887_v7 }
 0xe90   : > { %v7968_v54 = vpop.f32.mrf.mxu0  ;;  %v7929_v10 = vpop.f32.mrf.mxu1 }
 0xe91   : > { %v7969_v21 = vadd.f32 %v7968_v54, %v7928_v59  ;;  %v7930_v23 = vadd.f32 %v7929_v10, %v7889_v19 }
 0xe92   : > { %v7970_v6 = vpop.f32.mrf.mxu0  ;;  %v7931_v29 = vpop.f32.mrf.mxu1 }
 0xe93   : > { %v7981_v31 = vmax.f32 %v7969_v21, 0.0  ;;  %v7971_v46 = vadd.f32 %v7970_v6, %v7930_v23 }
 0xe94   : > { %v7972_v12 = vpop.f32.mrf.mxu0  ;;  %v7932_v30 = vpop.f32.mrf.mxu1 }
 0xe95   : > { %v15865_v39 = vmin.f32 %v7981_v31, 6.0  ;;  %v7982_v49 = vmax.f32 %v7971_v46, 0.0 }
 0xe96   : > { %v7973_v63 = vpop.f32.mrf.mxu0 }
 0xe97   : > { %v15867_v61 = vmin.f32 %v7982_v49, 6.0 }
 0xe98   : > { %13291 = dma.done.wait [#allocation5 + $0x2], 32768 }
 0xe99   : > { %13292 = vsyncadd [#allocation5 + $0x2], 4294934528  ;;  %v15871_v36 = vpack.c.bf16 %v15827_v16, %v15827_v16  ;;  %v15875_v34 = vpack.c.bf16 %v15849_v17, %v15849_v17  ;;  %v12505_v5 = vld [vmem:[#allocation4 + $0xe4] ss:$16 sps:$4 sm:$0xff]   ;;  %v12509_v27 = vld [vmem:[#allocation4 + $0xe0] ss:$16 sps:$4 sm:$0xff]  }
 0xe9a   : > { %v12507_v22 = vld [vmem:[#allocation4 + $0x2e4] ss:$16 sps:$4 sm:$0xff]   ;;  %9560 = vmatprep.subr.bf16.mxu1 %v12505_v5  ;;  %v12510_v55 = vld [vmem:[#allocation4 + $0x2e0] ss:$16 sps:$4 sm:$0xff]   ;;  %p16901_p9 = scmp.ne.s32.totalorder %s13436_s25, 0 }
 0xe9b   : > { %9592 = vmatprep.mubr.bf16.mxu1 %v15871_v36  ;;  %9633 = vmatprep.mubr.bf16.mxu0 %v15875_v34  ;;  %v12511_v58 = vld [vmem:[#allocation4 + $0xc4] ss:$16 sps:$4 sm:$0xff]   ;;  %v12515_v16 = vld [vmem:[#allocation4 + $0xc0] ss:$16 sps:$4 sm:$0xff]  }
 0xe9c   : > { %9601 = vmatprep.subr.bf16.mxu0 %v12507_v22  ;;  %9561 = vmatpush1.bf16.msra.mxu1 %v12509_v27  ;;  %v12513_v2 = vld [vmem:[#allocation4 + $0x2c4] ss:$16 sps:$4 sm:$0xff]   ;;  %v12516_v37 = vld [vmem:[#allocation4 + $0x2c0] ss:$16 sps:$4 sm:$0xff]  }
 0xe9d   : > { %9602 = vmatpush1.bf16.msra.mxu0 %v12510_v55  ;;  %9562 = vmatprep.subr.bf16.mxu1 %v12511_v58  ;;  %v12517_v17 = vld [vmem:[#allocation4 + $0xa4] ss:$16 sps:$4 sm:$0xff]   ;;  %v12521_v42 = vld [vmem:[#allocation4 + $0xa0] ss:$16 sps:$4 sm:$0xff]  }
 0xe9e   : > { %9603 = vmatprep.subr.bf16.mxu0 %v12513_v2  ;;  %v12519_v8 = vld [vmem:[#allocation4 + $0x2a4] ss:$16 sps:$4 sm:$0xff]   ;;  %v12522_v15 = vld [vmem:[#allocation4 + $0x2a0] ss:$16 sps:$4 sm:$0xff]  }
 0xe9f   : > { %v12523_v62 = vld [vmem:[#allocation4 + $0x84] ss:$16 sps:$4 sm:$0xff]   ;;  %v12527_v13 = vld [vmem:[#allocation4 + $0x80] ss:$16 sps:$4 sm:$0xff]  }
 0xea0   : > { %9563 = vmatpush1.bf16.msra.mxu1 %v12515_v16  ;;  %v12525_v24 = vld [vmem:[#allocation4 + $0x284] ss:$16 sps:$4 sm:$0xff]   ;;  %v12528_v38 = vld [vmem:[#allocation4 + $0x280] ss:$16 sps:$4 sm:$0xff]  }
 0xea1   : > { %9604 = vmatpush1.bf16.msra.mxu0 %v12516_v37  ;;  %9564 = vmatprep.subr.bf16.mxu1 %v12517_v17  ;;  %v12529_v26 = vld [vmem:[#allocation4 + $0x64] ss:$16 sps:$4 sm:$0xff]   ;;  %v12533_v32 = vld [vmem:[#allocation4 + $0x60] ss:$16 sps:$4 sm:$0xff]  }
 0xea2   : > { %9605 = vmatprep.subr.bf16.mxu0 %v12519_v8  ;;  %v12531_v0 = vld [vmem:[#allocation4 + $0x264] ss:$16 sps:$4 sm:$0xff]   ;;  %v12534_v48 = vld [vmem:[#allocation4 + $0x260] ss:$16 sps:$4 sm:$0xff]  }
 0xea3   : > { %v12535_v40 = vld [vmem:[#allocation4 + $0x44] ss:$16 sps:$4 sm:$0xff]   ;;  %v12539_v57 = vld [vmem:[#allocation4 + $0x40] ss:$16 sps:$4 sm:$0xff]  }
 0xea4   : > { %9565 = vmatpush1.bf16.msra.mxu1 %v12521_v42  ;;  %v12537_v41 = vld [vmem:[#allocation4 + $0x244] ss:$16 sps:$4 sm:$0xff]   ;;  %v12540_v1 = vld [vmem:[#allocation4 + $0x240] ss:$16 sps:$4 sm:$0xff]  }
 0xea5   : > { %9606 = vmatpush1.bf16.msra.mxu0 %v12522_v15  ;;  %9566 = vmatprep.subr.bf16.mxu1 %v12523_v62  ;;  %v12541_v60 = vld [vmem:[#allocation4 + $0x24] ss:$16 sps:$4 sm:$0xff]   ;;  %v12545_v11 = vld [vmem:[#allocation4 + $0x20] ss:$16 sps:$4 sm:$0xff]  }
 0xea6   : > { %9607 = vmatprep.subr.bf16.mxu0 %v12525_v24  ;;  %v12543_v14 = vld [vmem:[#allocation4 + $0x224] ss:$16 sps:$4 sm:$0xff]   ;;  %v12546_v20 = vld [vmem:[#allocation4 + $0x220] ss:$16 sps:$4 sm:$0xff]  }
 0xea7   : > { %v12547_v18 = vld [vmem:[#allocation4 + $0x4] ss:$16 sps:$4 sm:$0xff]   ;;  %v12551_v50 = vld [vmem:[#allocation4] ss:$16 sps:$4 sm:$0xff]  }
 0xea8   : > { %9567 = vmatpush1.bf16.msra.mxu1 %v12527_v13  ;;  %v12549_v33 = vld [vmem:[#allocation4 + $0x204] ss:$16 sps:$4 sm:$0xff]   ;;  %v12552_v9 = vld [vmem:[#allocation4 + $0x200] ss:$16 sps:$4 sm:$0xff]   ;;  %v15881_v13 = vpack.c.bf16 %v15825_v25, %v15825_v25  ;;  %v15893_v25 = vpack.c.bf16 %v15867_v61, %v15867_v61 }
 0xea9   : > { %9608 = vmatpush1.bf16.msra.mxu0 %v12528_v38  ;;  %9568 = vmatprep.subr.bf16.mxu1 %v12529_v26  ;;  %v12553_v51 = vld [vmem:[#allocation4 + $0x1e4] ss:$16 sps:$4 sm:$0xff]   ;;  %v12557_v28 = vld [vmem:[#allocation4 + $0x1e0] ss:$16 sps:$4 sm:$0xff]   ;;  %v15885_v38 = vpack.c.bf16 %v15847_v56, %v15847_v56 }
 0xeaa   : > { %9609 = vmatprep.subr.bf16.mxu0 %v12531_v0  ;;  %v12555_v47 = vld [vmem:[#allocation4 + $0x3e4] ss:$16 sps:$4 sm:$0xff]   ;;  %v12558_v52 = vld [vmem:[#allocation4 + $0x3e0] ss:$16 sps:$4 sm:$0xff]  }
 0xeab   : > { %v12559_v7 = vld [vmem:[#allocation4 + $0x1c4] ss:$16 sps:$4 sm:$0xff]   ;;  %v12563_v19 = vld [vmem:[#allocation4 + $0x1c0] ss:$16 sps:$4 sm:$0xff]  }
 0xeac   : > { %9569 = vmatpush1.bf16.msra.mxu1 %v12533_v32  ;;  %v12561_v53 = vld [vmem:[#allocation4 + $0x3c4] ss:$16 sps:$4 sm:$0xff]   ;;  %v12564_v59 = vld [vmem:[#allocation4 + $0x3c0] ss:$16 sps:$4 sm:$0xff]  }
 0xead   : > { %9610 = vmatpush1.bf16.msra.mxu0 %v12534_v48  ;;  %9570 = vmatprep.subr.bf16.mxu1 %v12535_v40  ;;  %v12565_v54 = vld [vmem:[#allocation4 + $0x1a4] ss:$16 sps:$4 sm:$0xff]   ;;  %v12569_v21 = vld [vmem:[#allocation4 + $0x1a0] ss:$16 sps:$4 sm:$0xff]   ;;  %v15889_v40 = vpack.c.bf16 %v15859_v3, %v15859_v3 }
 0xeae   : > { %9611 = vmatprep.subr.bf16.mxu0 %v12537_v41  ;;  %v12567_v10 = vld [vmem:[#allocation4 + $0x3a4] ss:$16 sps:$4 sm:$0xff]   ;;  %v12570_v23 = vld [vmem:[#allocation4 + $0x3a0] ss:$16 sps:$4 sm:$0xff]  }
 0xeaf   : > { %v12571_v6 = vld [vmem:[#allocation4 + $0x184] ss:$16 sps:$4 sm:$0xff]   ;;  %v12575_v31 = vld [vmem:[#allocation4 + $0x180] ss:$16 sps:$4 sm:$0xff]  }
 0xeb0   : > { %9571 = vmatpush1.bf16.msra.mxu1 %v12539_v57  ;;  %v12573_v29 = vld [vmem:[#allocation4 + $0x384] ss:$16 sps:$4 sm:$0xff]   ;;  %v12576_v46 = vld [vmem:[#allocation4 + $0x380] ss:$16 sps:$4 sm:$0xff]  }
 0xeb1   : > { %9612 = vmatpush1.bf16.msra.mxu0 %v12540_v1  ;;  %9572 = vmatprep.subr.bf16.mxu1 %v12541_v60  ;;  %v12577_v12 = vld [vmem:[#allocation4 + $0x164] ss:$16 sps:$4 sm:$0xff]   ;;  %v12581_v49 = vld [vmem:[#allocation4 + $0x160] ss:$16 sps:$4 sm:$0xff]  }
 0xeb2   : > { %9613 = vmatprep.subr.bf16.mxu0 %v12543_v14  ;;  %v12579_v30 = vld [vmem:[#allocation4 + $0x364] ss:$16 sps:$4 sm:$0xff]   ;;  %v12582_v63 = vld [vmem:[#allocation4 + $0x360] ss:$16 sps:$4 sm:$0xff]  }
 0xeb3   : > { %v12583_v5 = vld [vmem:[#allocation4 + $0x144] ss:$16 sps:$4 sm:$0xff]   ;;  %v12587_v27 = vld [vmem:[#allocation4 + $0x140] ss:$16 sps:$4 sm:$0xff]  }
 0xeb4   : > { %9573 = vmatpush1.bf16.msra.mxu1 %v12545_v11  ;;  %v12585_v22 = vld [vmem:[#allocation4 + $0x344] ss:$16 sps:$4 sm:$0xff]   ;;  %v12588_v55 = vld [vmem:[#allocation4 + $0x340] ss:$16 sps:$4 sm:$0xff]  }
 0xeb5   : > { %9614 = vmatpush1.bf16.msra.mxu0 %v12546_v20  ;;  %9574 = vmatprep.subr.bf16.mxu1 %v12547_v18  ;;  %v12589_v58 = vld [vmem:[#allocation4 + $0x124] ss:$16 sps:$4 sm:$0xff]   ;;  %v12593_v16 = vld [vmem:[#allocation4 + $0x120] ss:$16 sps:$4 sm:$0xff]  }
 0xeb6   : > { %9615 = vmatprep.subr.bf16.mxu0 %v12549_v33  ;;  %v12591_v2 = vld [vmem:[#allocation4 + $0x324] ss:$16 sps:$4 sm:$0xff]   ;;  %v12594_v37 = vld [vmem:[#allocation4 + $0x320] ss:$16 sps:$4 sm:$0xff]  }
 0xeb7   : > { %v12595_v17 = vld [vmem:[#allocation4 + $0x104] ss:$16 sps:$4 sm:$0xff]   ;;  %v12599_v42 = vld [vmem:[#allocation4 + $0x100] ss:$16 sps:$4 sm:$0xff]  }
 0xeb8   : > { %9575 = vmatpush1.bf16.msra.mxu1 %v12551_v50  ;;  %v12597_v8 = vld [vmem:[#allocation4 + $0x304] ss:$16 sps:$4 sm:$0xff]   ;;  %v12600_v15 = vld [vmem:[#allocation4 + $0x300] ss:$16 sps:$4 sm:$0xff]  }
 0xeb9   : > { %9616 = vmatpush1.bf16.msra.mxu0 %v12552_v9  ;;  %9576 = vmatprep.subr.bf16.mxu1 %v12553_v51  ;;  %v12603_v62 = vld [vmem:[#allocation4 + $0x4e4] ss:$16 sps:$4 sm:$0xff]   ;;  %v12601_v26 = vld [vmem:[#allocation4 + $0x4e0] ss:$16 sps:$4 sm:$0xff]  }
 0xeba   : > { %9617 = vmatprep.subr.bf16.mxu0 %v12555_v47  ;;  %v12606_v24 = vld [vmem:[#allocation4 + $0x6e4] ss:$16 sps:$4 sm:$0xff]   ;;  %v12604_v0 = vld [vmem:[#allocation4 + $0x6e0] ss:$16 sps:$4 sm:$0xff]  }
 0xebb   : > { %v12609_v32 = vld [vmem:[#allocation4 + $0x4c4] ss:$16 sps:$4 sm:$0xff]   ;;  %v12607_v56 = vld [vmem:[#allocation4 + $0x4c0] ss:$16 sps:$4 sm:$0xff]  }
 0xebc   : > { %9577 = vmatpush2.bf16.msra.mxu1 %v12557_v28  ;;  %v12612_v48 = vld [vmem:[#allocation4 + $0x6c4] ss:$16 sps:$4 sm:$0xff]   ;;  %v12610_v41 = vld [vmem:[#allocation4 + $0x6c0] ss:$16 sps:$4 sm:$0xff]  }
 0xebd   : > { %9618 = vmatpush2.bf16.msra.mxu0 %v12558_v52  ;;  %9578 = vmatprep.subr.bf16.mxu1 %v12559_v7  ;;  %v12615_v57 = vld [vmem:[#allocation4 + $0x4a4] ss:$16 sps:$4 sm:$0xff]   ;;  %v12613_v3 = vld [vmem:[#allocation4 + $0x4a0] ss:$16 sps:$4 sm:$0xff]  }
 0xebe   : > { %9619 = vmatprep.subr.bf16.mxu0 %v12561_v53  ;;  %v12618_v1 = vld [vmem:[#allocation4 + $0x6a4] ss:$16 sps:$4 sm:$0xff]   ;;  %v12616_v60 = vld [vmem:[#allocation4 + $0x6a0] ss:$16 sps:$4 sm:$0xff]  }
 0xebf   : > { %v12621_v61 = vld [vmem:[#allocation4 + $0x484] ss:$16 sps:$4 sm:$0xff]   ;;  %v12619_v11 = vld [vmem:[#allocation4 + $0x480] ss:$16 sps:$4 sm:$0xff]  }
 0xec0   : > { %9579 = vmatpush2.bf16.msra.mxu1 %v12563_v19  ;;  %v12624_v14 = vld [vmem:[#allocation4 + $0x684] ss:$16 sps:$4 sm:$0xff]   ;;  %v12622_v20 = vld [vmem:[#allocation4 + $0x680] ss:$16 sps:$4 sm:$0xff]  }
 0xec1   : > { %9620 = vmatpush2.bf16.msra.mxu0 %v12564_v59  ;;  %9580 = vmatprep.subr.bf16.mxu1 %v12565_v54  ;;  %v12627_v18 = vld [vmem:[#allocation4 + $0x464] ss:$16 sps:$4 sm:$0xff]   ;;  %v12625_v50 = vld [vmem:[#allocation4 + $0x460] ss:$16 sps:$4 sm:$0xff]  }
 0xec2   : > { %9621 = vmatprep.subr.bf16.mxu0 %v12567_v10  ;;  %v12630_v33 = vld [vmem:[#allocation4 + $0x664] ss:$16 sps:$4 sm:$0xff]   ;;  %v12628_v9 = vld [vmem:[#allocation4 + $0x660] ss:$16 sps:$4 sm:$0xff]  }
 0xec3   : > { %v12633_v51 = vld [vmem:[#allocation4 + $0x444] ss:$16 sps:$4 sm:$0xff]   ;;  %v12631_v28 = vld [vmem:[#allocation4 + $0x440] ss:$16 sps:$4 sm:$0xff]  }
 0xec4   : > { %9581 = vmatpush2.bf16.msra.mxu1 %v12569_v21  ;;  %v12636_v47 = vld [vmem:[#allocation4 + $0x644] ss:$16 sps:$4 sm:$0xff]   ;;  %v12634_v52 = vld [vmem:[#allocation4 + $0x640] ss:$16 sps:$4 sm:$0xff]  }
 0xec5   : > { %9622 = vmatpush2.bf16.msra.mxu0 %v12570_v23  ;;  %9582 = vmatprep.subr.bf16.mxu1 %v12571_v6  ;;  %v12639_v7 = vld [vmem:[#allocation4 + $0x424] ss:$16 sps:$4 sm:$0xff]   ;;  %v12637_v19 = vld [vmem:[#allocation4 + $0x420] ss:$16 sps:$4 sm:$0xff]  }
 0xec6   : > { %9623 = vmatprep.subr.bf16.mxu0 %v12573_v29  ;;  %v12642_v53 = vld [vmem:[#allocation4 + $0x624] ss:$16 sps:$4 sm:$0xff]   ;;  %v12640_v59 = vld [vmem:[#allocation4 + $0x620] ss:$16 sps:$4 sm:$0xff]  }
 0xec7   : > { %v12645_v54 = vld [vmem:[#allocation4 + $0x404] ss:$16 sps:$4 sm:$0xff]   ;;  %v12643_v21 = vld [vmem:[#allocation4 + $0x400] ss:$16 sps:$4 sm:$0xff]  }
 0xec8   : > { %9583 = vmatpush2.bf16.msra.mxu1 %v12575_v31  ;;  %v12648_v10 = vld [vmem:[#allocation4 + $0x604] ss:$16 sps:$4 sm:$0xff]   ;;  %v12646_v23 = vld [vmem:[#allocation4 + $0x600] ss:$16 sps:$4 sm:$0xff]  }
 0xec9   : > { %9624 = vmatpush2.bf16.msra.mxu0 %v12576_v46  ;;  %9584 = vmatprep.subr.bf16.mxu1 %v12577_v12  ;;  %v12651_v6 = vld [vmem:[#allocation4 + $0x5e4] ss:$16 sps:$4 sm:$0xff]   ;;  %v12649_v31 = vld [vmem:[#allocation4 + $0x5e0] ss:$16 sps:$4 sm:$0xff]  }
 0xeca   : > { %9625 = vmatprep.subr.bf16.mxu0 %v12579_v30  ;;  %v12654_v29 = vld [vmem:[#allocation4 + $0x7e4] ss:$16 sps:$4 sm:$0xff]   ;;  %v12652_v46 = vld [vmem:[#allocation4 + $0x7e0] ss:$16 sps:$4 sm:$0xff]  }
 0xecb   : > { %v12657_v12 = vld [vmem:[#allocation4 + $0x5c4] ss:$16 sps:$4 sm:$0xff]  }
 0xecc   : > { %9585 = vmatpush2.bf16.msra.mxu1 %v12581_v49  ;;  %v12660_v30 = vld [vmem:[#allocation4 + $0x7c4] ss:$16 sps:$4 sm:$0xff]   ;;  %v12655_v49 = vld [vmem:[#allocation4 + $0x5c0] ss:$16 sps:$4 sm:$0xff]  }
 0xecd   : > { %9626 = vmatpush2.bf16.msra.mxu0 %v12582_v63  ;;  %9586 = vmatprep.subr.bf16.mxu1 %v12583_v5  ;;  %v12658_v63 = vld [vmem:[#allocation4 + $0x7c0] ss:$16 sps:$4 sm:$0xff]   ;;  %v12663_v5 = vld [vmem:[#allocation4 + $0x5a4] ss:$16 sps:$4 sm:$0xff]  }
 0xece   : > { %9627 = vmatprep.subr.bf16.mxu0 %v12585_v22  ;;  %v12666_v22 = vld [vmem:[#allocation4 + $0x7a4] ss:$16 sps:$4 sm:$0xff]  }
 0xed0   : > { %9587 = vmatpush2.bf16.msra.mxu1 %v12587_v27  ;;  %v12661_v27 = vld [vmem:[#allocation4 + $0x5a0] ss:$16 sps:$4 sm:$0xff]  }
 0xed1   : > { %9628 = vmatpush2.bf16.msra.mxu0 %v12588_v55  ;;  %9588 = vmatprep.subr.bf16.mxu1 %v12589_v58  ;;  %v12664_v55 = vld [vmem:[#allocation4 + $0x7a0] ss:$16 sps:$4 sm:$0xff]   ;;  %v12669_v58 = vld [vmem:[#allocation4 + $0x584] ss:$16 sps:$4 sm:$0xff]  }
 0xed2   : > { %9629 = vmatprep.subr.bf16.mxu0 %v12591_v2  ;;  %v12672_v2 = vld [vmem:[#allocation4 + $0x784] ss:$16 sps:$4 sm:$0xff]  }
 0xed4   : > { %9589 = vmatpush2.bf16.msra.mxu1 %v12593_v16  ;;  %v12667_v16 = vld [vmem:[#allocation4 + $0x580] ss:$16 sps:$4 sm:$0xff]  }
 0xed5   : > { %9630 = vmatpush2.bf16.msra.mxu0 %v12594_v37  ;;  %9590 = vmatprep.subr.bf16.mxu1 %v12595_v17  ;;  %v12670_v37 = vld [vmem:[#allocation4 + $0x780] ss:$16 sps:$4 sm:$0xff]   ;;  %v12675_v17 = vld [vmem:[#allocation4 + $0x564] ss:$16 sps:$4 sm:$0xff]  }
 0xed6   : > { %9631 = vmatprep.subr.bf16.mxu0 %v12597_v8  ;;  %v12678_v8 = vld [vmem:[#allocation4 + $0x764] ss:$16 sps:$4 sm:$0xff]  }
 0xed8   : > { %9591 = vmatpush2.bf16.msra.mxu1 %v12599_v42  ;;  %v12673_v42 = vld [vmem:[#allocation4 + $0x560] ss:$16 sps:$4 sm:$0xff]  }
 0xed9   : > { %9632 = vmatpush2.bf16.msra.mxu0 %v12600_v15  ;;  %9642 = vmatprep.subr.bf16.mxu1 %v12603_v62  ;;  %v12676_v15 = vld [vmem:[#allocation4 + $0x760] ss:$16 sps:$4 sm:$0xff]   ;;  %v12681_v62 = vld [vmem:[#allocation4 + $0x544] ss:$16 sps:$4 sm:$0xff]  }
 0xeda   : > { %9683 = vmatprep.subr.bf16.mxu0 %v12606_v24  ;;  %v12684_v24 = vld [vmem:[#allocation4 + $0x744] ss:$16 sps:$4 sm:$0xff]  }
 0xedb   : > { %9593 = vmatmul.mubr.bf16.vlgmr.msra.gmra.mxu1 %v15881_v13 }
 0xedc   : > { %9634 = vmatmul.mubr.bf16.vlgmr.msra.gmra.mxu0 %v15885_v38  ;;  %9643 = vmatpush1.bf16.msra.mxu1 %v12601_v26  ;;  %v12679_v26 = vld [vmem:[#allocation4 + $0x540] ss:$16 sps:$4 sm:$0xff]  }
 0xedd   : > { %9684 = vmatpush1.bf16.msra.mxu0 %v12604_v0  ;;  %9644 = vmatprep.subr.bf16.mxu1 %v12609_v32  ;;  %v12682_v0 = vld [vmem:[#allocation4 + $0x740] ss:$16 sps:$4 sm:$0xff]   ;;  %v12687_v32 = vld [vmem:[#allocation4 + $0x524] ss:$16 sps:$4 sm:$0xff]  }
 0xede   : > { %9685 = vmatprep.subr.bf16.mxu0 %v12612_v48  ;;  %9674 = vmatprep.mubr.bf16.mxu1 %v15889_v40  ;;  %v12690_v48 = vld [vmem:[#allocation4 + $0x724] ss:$16 sps:$4 sm:$0xff]  }
 0xedf   : > { %9715 = vmatprep.mubr.bf16.mxu0 %v15893_v25 }
 0xee0   : > { %9645 = vmatpush1.bf16.msra.mxu1 %v12607_v56  ;;  %v12685_v56 = vld [vmem:[#allocation4 + $0x520] ss:$16 sps:$4 sm:$0xff]  }
 0xee1   : > { %9686 = vmatpush1.bf16.msra.mxu0 %v12610_v41  ;;  %9646 = vmatprep.subr.bf16.mxu1 %v12615_v57  ;;  %v12688_v41 = vld [vmem:[#allocation4 + $0x720] ss:$16 sps:$4 sm:$0xff]   ;;  %v12693_v57 = vld [vmem:[#allocation4 + $0x504] ss:$16 sps:$4 sm:$0xff]  }
 0xee2   : > { %9687 = vmatprep.subr.bf16.mxu0 %v12618_v1  ;;  %v12696_v1 = vld [vmem:[#allocation4 + $0x704] ss:$16 sps:$4 sm:$0xff]  }
 0xee4   : > { %9647 = vmatpush1.bf16.msra.mxu1 %v12613_v3  ;;  %v12691_v3 = vld [vmem:[#allocation4 + $0x500] ss:$16 sps:$4 sm:$0xff]  }
 0xee5   : > { %9688 = vmatpush1.bf16.msra.mxu0 %v12616_v60  ;;  %9648 = vmatprep.subr.bf16.mxu1 %v12621_v61  ;;  %v12694_v60 = vld [vmem:[#allocation4 + $0x700] ss:$16 sps:$4 sm:$0xff]   ;;  %v12699_v61 = vld [vmem:[#allocation4 + $0xec] ss:$16 sps:$4 sm:$0xff]  }
 0xee6   : > { %9689 = vmatprep.subr.bf16.mxu0 %v12624_v14  ;;  %v12702_v14 = vld [vmem:[#allocation4 + $0x2ec] ss:$16 sps:$4 sm:$0xff]  }
 0xee8   : > { %9649 = vmatpush1.bf16.msra.mxu1 %v12619_v11  ;;  %v15901_v11 = vpack.c.bf16 %v15857_v4, %v15857_v4  ;;  %v12711_v4 = vld [vmem:[#allocation4 + $0xac] ss:$16 sps:$4 sm:$0xff]  }
 0xee9   : > { %9690 = vmatpush1.bf16.msra.mxu0 %v12622_v20  ;;  %9650 = vmatprep.subr.bf16.mxu1 %v12627_v18  ;;  %v15905_v20 = vpack.c.bf16 %v15865_v39, %v15865_v39  ;;  %v12697_v18 = vld [vmem:[#allocation4 + $0xe8] ss:$16 sps:$4 sm:$0xff]   ;;  %v12714_v39 = vld [vmem:[#allocation4 + $0x2ac] ss:$16 sps:$4 sm:$0xff]  }
 0xeea   : > { %9691 = vmatprep.subr.bf16.mxu0 %v12630_v33  ;;  %v12700_v33 = vld [vmem:[#allocation4 + $0x2e8] ss:$16 sps:$4 sm:$0xff]  }
 0xeec   : > { %9651 = vmatpush1.bf16.msra.mxu1 %v12625_v50  ;;  %v12705_v50 = vld [vmem:[#allocation4 + $0xcc] ss:$16 sps:$4 sm:$0xff]  }
 0xeed   : > { %9692 = vmatpush1.bf16.msra.mxu0 %v12628_v9  ;;  %9652 = vmatprep.subr.bf16.mxu1 %v12633_v51  ;;  %v12708_v9 = vld [vmem:[#allocation4 + $0x2cc] ss:$16 sps:$4 sm:$0xff]   ;;  %v12703_v51 = vld [vmem:[#allocation4 + $0xc8] ss:$16 sps:$4 sm:$0xff]  }
 0xeee   : > { %9693 = vmatprep.subr.bf16.mxu0 %v12636_v47  ;;  %v12706_v47 = vld [vmem:[#allocation4 + $0x2c8] ss:$16 sps:$4 sm:$0xff]  }
 0xef0   : > { %9653 = vmatpush1.bf16.msra.mxu1 %v12631_v28  ;;  %v12709_v28 = vld [vmem:[#allocation4 + $0xa8] ss:$16 sps:$4 sm:$0xff]  }
 0xef1   : > { %9694 = vmatpush1.bf16.msra.mxu0 %v12634_v52  ;;  %9654 = vmatprep.subr.bf16.mxu1 %v12639_v7  ;;  %v12712_v52 = vld [vmem:[#allocation4 + $0x2a8] ss:$16 sps:$4 sm:$0xff]   ;;  %v12717_v7 = vld [vmem:[#allocation4 + $0x8c] ss:$16 sps:$4 sm:$0xff]  }
 0xef2   : > { %9695 = vmatprep.subr.bf16.mxu0 %v12642_v53  ;;  %v12720_v53 = vld [vmem:[#allocation4 + $0x28c] ss:$16 sps:$4 sm:$0xff]  }
 0xef4   : > { %9655 = vmatpush1.bf16.msra.mxu1 %v12637_v19  ;;  %v12715_v19 = vld [vmem:[#allocation4 + $0x88] ss:$16 sps:$4 sm:$0xff]  }
 0xef5   : > { %9696 = vmatpush1.bf16.msra.mxu0 %v12640_v59  ;;  %9656 = vmatprep.subr.bf16.mxu1 %v12645_v54  ;;  %v12718_v59 = vld [vmem:[#allocation4 + $0x288] ss:$16 sps:$4 sm:$0xff]   ;;  %v12723_v54 = vld [vmem:[#allocation4 + $0x6c] ss:$16 sps:$4 sm:$0xff]  }
 0xef6   : > { %9697 = vmatprep.subr.bf16.mxu0 %v12648_v10  ;;  %v12726_v10 = vld [vmem:[#allocation4 + $0x26c] ss:$16 sps:$4 sm:$0xff]  }
 0xef8   : > { %9657 = vmatpush1.bf16.msra.mxu1 %v12643_v21  ;;  %v12721_v21 = vld [vmem:[#allocation4 + $0x68] ss:$16 sps:$4 sm:$0xff]  }
 0xef9   : > { %9698 = vmatpush1.bf16.msra.mxu0 %v12646_v23  ;;  %9658 = vmatprep.subr.bf16.mxu1 %v12651_v6  ;;  %v12732_v23 = vld [vmem:[#allocation4 + $0x24c] ss:$16 sps:$4 sm:$0xff]   ;;  %v12727_v6 = vld [vmem:[#allocation4 + $0x48] ss:$16 sps:$4 sm:$0xff]  }
 0xefa   : > { %9699 = vmatprep.subr.bf16.mxu0 %v12654_v29  ;;  %v12730_v29 = vld [vmem:[#allocation4 + $0x248] ss:$16 sps:$4 sm:$0xff]  }
 0xefc   : > { %9659 = vmatpush2.bf16.msra.mxu1 %v12649_v31  ;;  %v12735_v31 = vld [vmem:[#allocation4 + $0x2c] ss:$16 sps:$4 sm:$0xff]  }
 0xefd   : > { %9700 = vmatpush2.bf16.msra.mxu0 %v12652_v46  ;;  %9660 = vmatprep.subr.bf16.mxu1 %v12657_v12  ;;  %v12738_v46 = vld [vmem:[#allocation4 + $0x22c] ss:$16 sps:$4 sm:$0xff]   ;;  %v12733_v12 = vld [vmem:[#allocation4 + $0x28] ss:$16 sps:$4 sm:$0xff]  }
 0xefe   : > { %9701 = vmatprep.subr.bf16.mxu0 %v12660_v30  ;;  %v12736_v30 = vld [vmem:[#allocation4 + $0x228] ss:$16 sps:$4 sm:$0xff]  }
 0xf00   : > { %9661 = vmatpush2.bf16.msra.mxu1 %v12655_v49  ;;  %v12741_v49 = vld [vmem:[#allocation4 + $0xc] ss:$16 sps:$4 sm:$0xff]  }
 0xf01   : > { %9702 = vmatpush2.bf16.msra.mxu0 %v12658_v63  ;;  %9662 = vmatprep.subr.bf16.mxu1 %v12663_v5  ;;  %v12744_v63 = vld [vmem:[#allocation4 + $0x20c] ss:$16 sps:$4 sm:$0xff]   ;;  %v12739_v5 = vld [vmem:[#allocation4 + $0x8] ss:$16 sps:$4 sm:$0xff]  }
 0xf02   : > { %9703 = vmatprep.subr.bf16.mxu0 %v12666_v22  ;;  %v12742_v22 = vld [vmem:[#allocation4 + $0x208] ss:$16 sps:$4 sm:$0xff]  }
 0xf04   : > { %9663 = vmatpush2.bf16.msra.mxu1 %v12661_v27  ;;  %v12747_v27 = vld [vmem:[#allocation4 + $0x1ec] ss:$16 sps:$4 sm:$0xff]  }
 0xf05   : > { %9704 = vmatpush2.bf16.msra.mxu0 %v12664_v55  ;;  %9664 = vmatprep.subr.bf16.mxu1 %v12669_v58  ;;  %v12750_v55 = vld [vmem:[#allocation4 + $0x3ec] ss:$16 sps:$4 sm:$0xff]   ;;  %v12745_v58 = vld [vmem:[#allocation4 + $0x1e8] ss:$16 sps:$4 sm:$0xff]  }
 0xf06   : > { %9705 = vmatprep.subr.bf16.mxu0 %v12672_v2  ;;  %v12748_v2 = vld [vmem:[#allocation4 + $0x3e8] ss:$16 sps:$4 sm:$0xff]  }
 0xf08   : > { %9665 = vmatpush2.bf16.msra.mxu1 %v12667_v16  ;;  %v12753_v16 = vld [vmem:[#allocation4 + $0x1cc] ss:$16 sps:$4 sm:$0xff]  }
 0xf09   : > { %9706 = vmatpush2.bf16.msra.mxu0 %v12670_v37  ;;  %9666 = vmatprep.subr.bf16.mxu1 %v12675_v17  ;;  %v12756_v37 = vld [vmem:[#allocation4 + $0x3cc] ss:$16 sps:$4 sm:$0xff]   ;;  %v12751_v17 = vld [vmem:[#allocation4 + $0x1c8] ss:$16 sps:$4 sm:$0xff]  }
 0xf0a   : > { %9707 = vmatprep.subr.bf16.mxu0 %v12678_v8  ;;  %v12754_v8 = vld [vmem:[#allocation4 + $0x3c8] ss:$16 sps:$4 sm:$0xff]  }
 0xf0c   : > { %9667 = vmatpush2.bf16.msra.mxu1 %v12673_v42  ;;  %v12759_v42 = vld [vmem:[#allocation4 + $0x1ac] ss:$16 sps:$4 sm:$0xff]  }
 0xf0d   : > { %9708 = vmatpush2.bf16.msra.mxu0 %v12676_v15  ;;  %9668 = vmatprep.subr.bf16.mxu1 %v12681_v62  ;;  %v12762_v15 = vld [vmem:[#allocation4 + $0x3ac] ss:$16 sps:$4 sm:$0xff]   ;;  %v12757_v62 = vld [vmem:[#allocation4 + $0x1a8] ss:$16 sps:$4 sm:$0xff]  }
 0xf0e   : > { %9709 = vmatprep.subr.bf16.mxu0 %v12684_v24  ;;  %v12760_v24 = vld [vmem:[#allocation4 + $0x3a8] ss:$16 sps:$4 sm:$0xff]  }
 0xf10   : > { %9669 = vmatpush2.bf16.msra.mxu1 %v12679_v26  ;;  %v12765_v26 = vld [vmem:[#allocation4 + $0x18c] ss:$16 sps:$4 sm:$0xff]  }
 0xf11   : > { %9710 = vmatpush2.bf16.msra.mxu0 %v12682_v0  ;;  %9670 = vmatprep.subr.bf16.mxu1 %v12687_v32  ;;  %v12768_v0 = vld [vmem:[#allocation4 + $0x38c] ss:$16 sps:$4 sm:$0xff]   ;;  %v12763_v32 = vld [vmem:[#allocation4 + $0x188] ss:$16 sps:$4 sm:$0xff]  }
 0xf12   : > { %9711 = vmatprep.subr.bf16.mxu0 %v12690_v48  ;;  %v12766_v48 = vld [vmem:[#allocation4 + $0x388] ss:$16 sps:$4 sm:$0xff]  }
 0xf14   : > { %9671 = vmatpush2.bf16.msra.mxu1 %v12685_v56  ;;  %v12771_v56 = vld [vmem:[#allocation4 + $0x16c] ss:$16 sps:$4 sm:$0xff]  }
 0xf15   : > { %9712 = vmatpush2.bf16.msra.mxu0 %v12688_v41  ;;  %9672 = vmatprep.subr.bf16.mxu1 %v12693_v57  ;;  %v12774_v41 = vld [vmem:[#allocation4 + $0x36c] ss:$16 sps:$4 sm:$0xff]   ;;  %v12769_v57 = vld [vmem:[#allocation4 + $0x168] ss:$16 sps:$4 sm:$0xff]  }
 0xf16   : > { %9713 = vmatprep.subr.bf16.mxu0 %v12696_v1  ;;  %v12772_v1 = vld [vmem:[#allocation4 + $0x368] ss:$16 sps:$4 sm:$0xff]  }
 0xf18   : > { %9673 = vmatpush2.bf16.msra.mxu1 %v12691_v3  ;;  %v12777_v3 = vld [vmem:[#allocation4 + $0x14c] ss:$16 sps:$4 sm:$0xff]  }
 0xf19   : > { %9714 = vmatpush2.bf16.msra.mxu0 %v12694_v60  ;;  %9724 = vmatprep.subr.bf16.mxu1 %v12699_v61  ;;  %v12780_v60 = vld [vmem:[#allocation4 + $0x34c] ss:$16 sps:$4 sm:$0xff]   ;;  %v12775_v61 = vld [vmem:[#allocation4 + $0x148] ss:$16 sps:$4 sm:$0xff]  }
 0xf1a   : > { %9765 = vmatprep.subr.bf16.mxu0 %v12702_v14  ;;  %v12778_v14 = vld [vmem:[#allocation4 + $0x348] ss:$16 sps:$4 sm:$0xff]  }
 0xf1b   : > { %9675 = vmatmul.mubr.bf16.vlgmr.msra.gmra.mxu1 %v15901_v11 }
 0xf1c   : > { %9716 = vmatmul.mubr.bf16.vlgmr.msra.gmra.mxu0 %v15905_v20  ;;  %9725 = vmatpush1.bf16.msra.mxu1 %v12697_v18  ;;  %v12783_v18 = vld [vmem:[#allocation4 + $0x12c] ss:$16 sps:$4 sm:$0xff]  }
 0xf1d   : > { %9766 = vmatpush1.bf16.msra.mxu0 %v12700_v33  ;;  %9726 = vmatprep.subr.bf16.mxu1 %v12705_v50  ;;  %v12786_v33 = vld [vmem:[#allocation4 + $0x32c] ss:$16 sps:$4 sm:$0xff]   ;;  %v12781_v50 = vld [vmem:[#allocation4 + $0x128] ss:$16 sps:$4 sm:$0xff]  }
 0xf1e   : > { %9767 = vmatprep.subr.bf16.mxu0 %v12708_v9  ;;  %9756 = vmatprep.mubr.bf16.mxu1 %v15871_v36  ;;  %v12724_v36 = vld [vmem:[#allocation4 + $0x268] ss:$16 sps:$4 sm:$0xff]  }
 0xf1f   : > { %9797 = vmatprep.mubr.bf16.mxu0 %v15875_v34  ;;  %v12729_v34 = vld [vmem:[#allocation4 + $0x4c] ss:$16 sps:$4 sm:$0xff]   ;;  %v12784_v9 = vld [vmem:[#allocation4 + $0x328] ss:$16 sps:$4 sm:$0xff]  }
 0xf20   : > { %9727 = vmatpush1.bf16.msra.mxu1 %v12703_v51  ;;  %v12789_v51 = vld [vmem:[#allocation4 + $0x10c] ss:$16 sps:$4 sm:$0xff]  }
 0xf21   : > { %9768 = vmatpush1.bf16.msra.mxu0 %v12706_v47  ;;  %9728 = vmatprep.subr.bf16.mxu1 %v12711_v4  ;;  %v12792_v47 = vld [vmem:[#allocation4 + $0x30c] ss:$16 sps:$4 sm:$0xff]   ;;  %v12787_v4 = vld [vmem:[#allocation4 + $0x108] ss:$16 sps:$4 sm:$0xff]  }
 0xf22   : > { %9769 = vmatprep.subr.bf16.mxu0 %v12714_v39  ;;  %v12790_v39 = vld [vmem:[#allocation4 + $0x308] ss:$16 sps:$4 sm:$0xff]  }
 0xf24   : > { %9729 = vmatpush1.bf16.msra.mxu1 %v12709_v28  ;;  %v12795_v28 = vld [vmem:[#allocation4 + $0x4ec] ss:$16 sps:$4 sm:$0xff]  }
 0xf25   : > { %9770 = vmatpush1.bf16.msra.mxu0 %v12712_v52  ;;  %9730 = vmatprep.subr.bf16.mxu1 %v12717_v7  ;;  %v12798_v52 = vld [vmem:[#allocation4 + $0x6ec] ss:$16 sps:$4 sm:$0xff]   ;;  %v12793_v7 = vld [vmem:[#allocation4 + $0x4e8] ss:$16 sps:$4 sm:$0xff]  }
 0xf26   : > { %9771 = vmatprep.subr.bf16.mxu0 %v12720_v53  ;;  %v12796_v53 = vld [vmem:[#allocation4 + $0x6e8] ss:$16 sps:$4 sm:$0xff]  }
 0xf28   : > { %9731 = vmatpush1.bf16.msra.mxu1 %v12715_v19  ;;  %v12801_v19 = vld [vmem:[#allocation4 + $0x4cc] ss:$16 sps:$4 sm:$0xff]  }
 0xf29   : > { %9772 = vmatpush1.bf16.msra.mxu0 %v12718_v59  ;;  %9732 = vmatprep.subr.bf16.mxu1 %v12723_v54  ;;  %v12804_v59 = vld [vmem:[#allocation4 + $0x6cc] ss:$16 sps:$4 sm:$0xff]   ;;  %v12799_v54 = vld [vmem:[#allocation4 + $0x4c8] ss:$16 sps:$4 sm:$0xff]  }
 0xf2a   : > { %9773 = vmatprep.subr.bf16.mxu0 %v12726_v10  ;;  %v12802_v10 = vld [vmem:[#allocation4 + $0x6c8] ss:$16 sps:$4 sm:$0xff]  }
 0xf2c   : > { %9733 = vmatpush1.bf16.msra.mxu1 %v12721_v21  ;;  %v12807_v21 = vld [vmem:[#allocation4 + $0x4ac] ss:$16 sps:$4 sm:$0xff]  }
 0xf2d   : > { %9774 = vmatpush1.bf16.msra.mxu0 %v12724_v36  ;;  %9734 = vmatprep.subr.bf16.mxu1 %v12729_v34  ;;  %v12810_v36 = vld [vmem:[#allocation4 + $0x6ac] ss:$16 sps:$4 sm:$0xff]   ;;  %v12805_v34 = vld [vmem:[#allocation4 + $0x4a8] ss:$16 sps:$4 sm:$0xff]  }
 0xf2e   : > { %9775 = vmatprep.subr.bf16.mxu0 %v12732_v23  ;;  %v12808_v23 = vld [vmem:[#allocation4 + $0x6a8] ss:$16 sps:$4 sm:$0xff]  }
 0xf30   : > { %9735 = vmatpush1.bf16.msra.mxu1 %v12727_v6  ;;  %v12811_v6 = vld [vmem:[#allocation4 + $0x488] ss:$16 sps:$4 sm:$0xff]  }
 0xf31   : > { %9776 = vmatpush1.bf16.msra.mxu0 %v12730_v29  ;;  %9736 = vmatprep.subr.bf16.mxu1 %v12735_v31  ;;  %v12814_v29 = vld [vmem:[#allocation4 + $0x688] ss:$16 sps:$4 sm:$0xff]   ;;  %v12819_v31 = vld [vmem:[#allocation4 + $0x46c] ss:$16 sps:$4 sm:$0xff]  }
 0xf32   : > { %9777 = vmatprep.subr.bf16.mxu0 %v12738_v46  ;;  %v12822_v46 = vld [vmem:[#allocation4 + $0x66c] ss:$16 sps:$4 sm:$0xff]  }
 0xf34   : > { %9737 = vmatpush1.bf16.msra.mxu1 %v12733_v12  ;;  %v12825_v12 = vld [vmem:[#allocation4 + $0x44c] ss:$16 sps:$4 sm:$0xff]  }
 0xf35   : > { %9778 = vmatpush1.bf16.msra.mxu0 %v12736_v30  ;;  %9738 = vmatprep.subr.bf16.mxu1 %v12741_v49  ;;  %v12828_v30 = vld [vmem:[#allocation4 + $0x64c] ss:$16 sps:$4 sm:$0xff]   ;;  %v12823_v49 = vld [vmem:[#allocation4 + $0x448] ss:$16 sps:$4 sm:$0xff]  }
 0xf36   : > { %9779 = vmatprep.subr.bf16.mxu0 %v12744_v63  ;;  %v12826_v63 = vld [vmem:[#allocation4 + $0x648] ss:$16 sps:$4 sm:$0xff]  }
 0xf38   : > { %9739 = vmatpush1.bf16.msra.mxu1 %v12739_v5  ;;  %v12831_v5 = vld [vmem:[#allocation4 + $0x42c] ss:$16 sps:$4 sm:$0xff]  }
 0xf39   : > { %9780 = vmatpush1.bf16.msra.mxu0 %v12742_v22  ;;  %9740 = vmatprep.subr.bf16.mxu1 %v12747_v27  ;;  %v12834_v22 = vld [vmem:[#allocation4 + $0x62c] ss:$16 sps:$4 sm:$0xff]   ;;  %v12829_v27 = vld [vmem:[#allocation4 + $0x428] ss:$16 sps:$4 sm:$0xff]  }
 0xf3a   : > { %9781 = vmatprep.subr.bf16.mxu0 %v12750_v55  ;;  %v12832_v55 = vld [vmem:[#allocation4 + $0x628] ss:$16 sps:$4 sm:$0xff]  }
 0xf3c   : > { %9741 = vmatpush2.bf16.msra.mxu1 %v12745_v58  ;;  %v12837_v58 = vld [vmem:[#allocation4 + $0x40c] ss:$16 sps:$4 sm:$0xff]  }
 0xf3d   : > { %9782 = vmatpush2.bf16.msra.mxu0 %v12748_v2  ;;  %9742 = vmatprep.subr.bf16.mxu1 %v12753_v16  ;;  %v12840_v2 = vld [vmem:[#allocation4 + $0x60c] ss:$16 sps:$4 sm:$0xff]   ;;  %v12835_v16 = vld [vmem:[#allocation4 + $0x408] ss:$16 sps:$4 sm:$0xff]  }
 0xf3e   : > { %9783 = vmatprep.subr.bf16.mxu0 %v12756_v37  ;;  %v12838_v37 = vld [vmem:[#allocation4 + $0x608] ss:$16 sps:$4 sm:$0xff]  }
 0xf40   : > { %9743 = vmatpush2.bf16.msra.mxu1 %v12751_v17  ;;  %v12843_v17 = vld [vmem:[#allocation4 + $0x5ec] ss:$16 sps:$4 sm:$0xff]  }
 0xf41   : > { %9784 = vmatpush2.bf16.msra.mxu0 %v12754_v8  ;;  %9744 = vmatprep.subr.bf16.mxu1 %v12759_v42  ;;  %v12846_v8 = vld [vmem:[#allocation4 + $0x7ec] ss:$16 sps:$4 sm:$0xff]   ;;  %v12841_v42 = vld [vmem:[#allocation4 + $0x5e8] ss:$16 sps:$4 sm:$0xff]  }
 0xf42   : > { %9785 = vmatprep.subr.bf16.mxu0 %v12762_v15  ;;  %v12844_v15 = vld [vmem:[#allocation4 + $0x7e8] ss:$16 sps:$4 sm:$0xff]  }
 0xf44   : > { %9745 = vmatpush2.bf16.msra.mxu1 %v12757_v62  ;;  %v12849_v62 = vld [vmem:[#allocation4 + $0x5cc] ss:$16 sps:$4 sm:$0xff]  }
 0xf45   : > { %9786 = vmatpush2.bf16.msra.mxu0 %v12760_v24  ;;  %9746 = vmatprep.subr.bf16.mxu1 %v12765_v26  ;;  %v12852_v24 = vld [vmem:[#allocation4 + $0x7cc] ss:$16 sps:$4 sm:$0xff]   ;;  %v12847_v26 = vld [vmem:[#allocation4 + $0x5c8] ss:$16 sps:$4 sm:$0xff]  }
 0xf46   : > { %9787 = vmatprep.subr.bf16.mxu0 %v12768_v0  ;;  %v12850_v0 = vld [vmem:[#allocation4 + $0x7c8] ss:$16 sps:$4 sm:$0xff]  }
 0xf48   : > { %9747 = vmatpush2.bf16.msra.mxu1 %v12763_v32  ;;  %v12855_v32 = vld [vmem:[#allocation4 + $0x5ac] ss:$16 sps:$4 sm:$0xff]  }
 0xf49   : > { %9788 = vmatpush2.bf16.msra.mxu0 %v12766_v48  ;;  %9748 = vmatprep.subr.bf16.mxu1 %v12771_v56  ;;  %v12858_v48 = vld [vmem:[#allocation4 + $0x7ac] ss:$16 sps:$4 sm:$0xff]   ;;  %v12853_v56 = vld [vmem:[#allocation4 + $0x5a8] ss:$16 sps:$4 sm:$0xff]  }
 0xf4a   : > { %9789 = vmatprep.subr.bf16.mxu0 %v12774_v41  ;;  %v12856_v41 = vld [vmem:[#allocation4 + $0x7a8] ss:$16 sps:$4 sm:$0xff]  }
 0xf4c   : > { %9749 = vmatpush2.bf16.msra.mxu1 %v12769_v57  ;;  %v12861_v57 = vld [vmem:[#allocation4 + $0x58c] ss:$16 sps:$4 sm:$0xff]  }
 0xf4d   : > { %9790 = vmatpush2.bf16.msra.mxu0 %v12772_v1  ;;  %9750 = vmatprep.subr.bf16.mxu1 %v12777_v3  ;;  %v12864_v1 = vld [vmem:[#allocation4 + $0x78c] ss:$16 sps:$4 sm:$0xff]   ;;  %v12859_v3 = vld [vmem:[#allocation4 + $0x588] ss:$16 sps:$4 sm:$0xff]  }
 0xf4e   : > { %9791 = vmatprep.subr.bf16.mxu0 %v12780_v60  ;;  %v12862_v60 = vld [vmem:[#allocation4 + $0x788] ss:$16 sps:$4 sm:$0xff]  }
 0xf50   : > { %9751 = vmatpush2.bf16.msra.mxu1 %v12775_v61  ;;  %v12867_v61 = vld [vmem:[#allocation4 + $0x56c] ss:$16 sps:$4 sm:$0xff]  }
 0xf51   : > { %9792 = vmatpush2.bf16.msra.mxu0 %v12778_v14  ;;  %9752 = vmatprep.subr.bf16.mxu1 %v12783_v18  ;;  %v12870_v14 = vld [vmem:[#allocation4 + $0x76c] ss:$16 sps:$4 sm:$0xff]   ;;  %v12865_v18 = vld [vmem:[#allocation4 + $0x568] ss:$16 sps:$4 sm:$0xff]  }
 0xf52   : > { %9793 = vmatprep.subr.bf16.mxu0 %v12786_v33  ;;  %v12868_v33 = vld [vmem:[#allocation4 + $0x768] ss:$16 sps:$4 sm:$0xff]  }
 0xf54   : > { %9753 = vmatpush2.bf16.msra.mxu1 %v12781_v50  ;;  %v12873_v50 = vld [vmem:[#allocation4 + $0x54c] ss:$16 sps:$4 sm:$0xff]  }
 0xf55   : > { %9794 = vmatpush2.bf16.msra.mxu0 %v12784_v9  ;;  %9754 = vmatprep.subr.bf16.mxu1 %v12789_v51  ;;  %v12876_v9 = vld [vmem:[#allocation4 + $0x74c] ss:$16 sps:$4 sm:$0xff]   ;;  %v12871_v51 = vld [vmem:[#allocation4 + $0x548] ss:$16 sps:$4 sm:$0xff]  }
 0xf56   : > { %9795 = vmatprep.subr.bf16.mxu0 %v12792_v47  ;;  %v12874_v47 = vld [vmem:[#allocation4 + $0x748] ss:$16 sps:$4 sm:$0xff]  }
 0xf58   : > { %9755 = vmatpush2.bf16.msra.mxu1 %v12787_v4  ;;  %v12879_v4 = vld [vmem:[#allocation4 + $0x52c] ss:$16 sps:$4 sm:$0xff]  }
 0xf59   : > { %9796 = vmatpush2.bf16.msra.mxu0 %v12790_v39  ;;  %9806 = vmatprep.subr.bf16.mxu1 %v12795_v28  ;;  %v12882_v39 = vld [vmem:[#allocation4 + $0x72c] ss:$16 sps:$4 sm:$0xff]   ;;  %v12877_v28 = vld [vmem:[#allocation4 + $0x528] ss:$16 sps:$4 sm:$0xff]  }
 0xf5a   : > { %9847 = vmatprep.subr.bf16.mxu0 %v12798_v52  ;;  %v12880_v52 = vld [vmem:[#allocation4 + $0x728] ss:$16 sps:$4 sm:$0xff]  }
 0xf5b   : > { %9757 = vmatmul.mubr.bf16.vlgmr.msra.gmra.mxu1 %v15881_v13  ;;  %v12813_v13 = vld [vmem:[#allocation4 + $0x48c] ss:$16 sps:$4 sm:$0xff]  }
 0xf5c   : > { %9798 = vmatmul.mubr.bf16.vlgmr.msra.gmra.mxu0 %v15885_v38  ;;  %9807 = vmatpush1.bf16.msra.mxu1 %v12793_v7  ;;  %v12816_v38 = vld [vmem:[#allocation4 + $0x68c] ss:$16 sps:$4 sm:$0xff]  }
 0xf5d   : > { %9848 = vmatpush1.bf16.msra.mxu0 %v12796_v53  ;;  %9808 = vmatprep.subr.bf16.mxu1 %v12801_v19  ;;  %v12885_v7 = vld [vmem:[#allocation4 + $0x50c] ss:$16 sps:$4 sm:$0xff]   ;;  %v12883_v19 = vld [vmem:[#allocation4 + $0x508] ss:$16 sps:$4 sm:$0xff]  }
 0xf5e   : > { %9849 = vmatprep.subr.bf16.mxu0 %v12804_v59  ;;  %9838 = vmatprep.mubr.bf16.mxu1 %v15889_v40  ;;  %v12817_v40 = vld [vmem:[#allocation4 + $0x468] ss:$16 sps:$4 sm:$0xff]   ;;  %v12888_v53 = vld [vmem:[#allocation4 + $0x70c] ss:$16 sps:$4 sm:$0xff]  }
 0xf5f   : > { %9879 = vmatprep.mubr.bf16.mxu0 %v15893_v25  ;;  %v12820_v25 = vld [vmem:[#allocation4 + $0x668] ss:$16 sps:$4 sm:$0xff]  }
 0xf60   : > { %9809 = vmatpush1.bf16.msra.mxu1 %v12799_v54  ;;  %v12886_v59 = vld [vmem:[#allocation4 + $0x708] ss:$16 sps:$4 sm:$0xff]   ;;  %v8258_v54 = vld [vmem:[%s15715_s23] sm:$0xf] }
 0xf61   : > { %9850 = vmatpush1.bf16.msra.mxu0 %v12802_v10  ;;  %9810 = vmatprep.subr.bf16.mxu1 %v12807_v21  ;;  %v8263_v10 = vrot.slane %v8258_v54, %v16894_v45  ;;  %v8267_v21 = vrot.slane %v8258_v54, %v16896_v44 }
 0xf62   : > { %9851 = vmatprep.subr.bf16.mxu0 %v12810_v36 }
 0xf64   : > { %9811 = vmatpush1.bf16.msra.mxu1 %v12805_v34 }
 0xf65   : > { %9852 = vmatpush1.bf16.msra.mxu0 %v12808_v23  ;;  %9812 = vmatprep.subr.bf16.mxu1 %v12813_v13 }
 0xf66   : > { %9853 = vmatprep.subr.bf16.mxu0 %v12816_v38 }
 0xf68   : > { %9813 = vmatpush1.bf16.msra.mxu1 %v12811_v6 }
 0xf69   : > { %9854 = vmatpush1.bf16.msra.mxu0 %v12814_v29  ;;  %9814 = vmatprep.subr.bf16.mxu1 %v12819_v31 }
 0xf6a   : > { %9855 = vmatprep.subr.bf16.mxu0 %v12822_v46 }
 0xf6c   : > { %9815 = vmatpush1.bf16.msra.mxu1 %v12817_v40 }
 0xf6d   : > { %9856 = vmatpush1.bf16.msra.mxu0 %v12820_v25  ;;  %9816 = vmatprep.subr.bf16.mxu1 %v12825_v12 }
 0xf6e   : > { %9857 = vmatprep.subr.bf16.mxu0 %v12828_v30 }
 0xf70   : > { %9817 = vmatpush1.bf16.msra.mxu1 %v12823_v49 }
 0xf71   : > { %9858 = vmatpush1.bf16.msra.mxu0 %v12826_v63  ;;  %9818 = vmatprep.subr.bf16.mxu1 %v12831_v5 }
 0xf72   : > { %9859 = vmatprep.subr.bf16.mxu0 %v12834_v22 }
 0xf74   : > { %9819 = vmatpush1.bf16.msra.mxu1 %v12829_v27 }
 0xf75   : > { %9860 = vmatpush1.bf16.msra.mxu0 %v12832_v55  ;;  %9820 = vmatprep.subr.bf16.mxu1 %v12837_v58 }
 0xf76   : > { %9861 = vmatprep.subr.bf16.mxu0 %v12840_v2 }
 0xf78   : > { %9821 = vmatpush1.bf16.msra.mxu1 %v12835_v16 }
 0xf79   : > { %9862 = vmatpush1.bf16.msra.mxu0 %v12838_v37  ;;  %9822 = vmatprep.subr.bf16.mxu1 %v12843_v17 }
 0xf7a   : > { %9863 = vmatprep.subr.bf16.mxu0 %v12846_v8 }
 0xf7c   : > { %9823 = vmatpush2.bf16.msra.mxu1 %v12841_v42 }
 0xf7d   : > { %9864 = vmatpush2.bf16.msra.mxu0 %v12844_v15  ;;  %9824 = vmatprep.subr.bf16.mxu1 %v12849_v62 }
 0xf7e   : > { %9865 = vmatprep.subr.bf16.mxu0 %v12852_v24  ;;  %v8271_v24 = vrot.slane %v8258_v54, %v16895_v35 }
 0xf80   : > { %9825 = vmatpush2.bf16.msra.mxu1 %v12847_v26  ;;  %v8275_v26 = vrot.slane %v8258_v54, %v16897_v43 }
 0xf81   : > { %9866 = vmatpush2.bf16.msra.mxu0 %v12850_v0  ;;  %9826 = vmatprep.subr.bf16.mxu1 %v12855_v32 }
 0xf82   : > { %9867 = vmatprep.subr.bf16.mxu0 %v12858_v48 }
 0xf84   : > { %9827 = vmatpush2.bf16.msra.mxu1 %v12853_v56 }
 0xf85   : > { %9868 = vmatpush2.bf16.msra.mxu0 %v12856_v41  ;;  %9828 = vmatprep.subr.bf16.mxu1 %v12861_v57 }
 0xf86   : > { %9869 = vmatprep.subr.bf16.mxu0 %v12864_v1 }
 0xf88   : > { %9829 = vmatpush2.bf16.msra.mxu1 %v12859_v3 }
 0xf89   : > { %9870 = vmatpush2.bf16.msra.mxu0 %v12862_v60  ;;  %9830 = vmatprep.subr.bf16.mxu1 %v12867_v61 }
 0xf8a   : > { %9871 = vmatprep.subr.bf16.mxu0 %v12870_v14 }
 0xf8c   : > { %9831 = vmatpush2.bf16.msra.mxu1 %v12865_v18 }
 0xf8d   : > { %9872 = vmatpush2.bf16.msra.mxu0 %v12868_v33  ;;  %9832 = vmatprep.subr.bf16.mxu1 %v12873_v50 }
 0xf8e   : > { %9873 = vmatprep.subr.bf16.mxu0 %v12876_v9 }
 0xf90   : > { %9833 = vmatpush2.bf16.msra.mxu1 %v12871_v51 }
 0xf91   : > { %9874 = vmatpush2.bf16.msra.mxu0 %v12874_v47  ;;  %9834 = vmatprep.subr.bf16.mxu1 %v12879_v4 }
 0xf92   : > { %9875 = vmatprep.subr.bf16.mxu0 %v12882_v39 }
 0xf94   : > { %9835 = vmatpush2.bf16.msra.mxu1 %v12877_v28 }
 0xf95   : > { %9876 = vmatpush2.bf16.msra.mxu0 %v12880_v52  ;;  %9836 = vmatprep.subr.bf16.mxu1 %v12885_v7 }
 0xf96   : > { %9877 = vmatprep.subr.bf16.mxu0 %v12888_v53 }
 0xf98   : > { %9837 = vmatpush2.bf16.msra.mxu1 %v12883_v19 }
 0xf99   : > { %9878 = vmatpush2.bf16.msra.mxu0 %v12886_v59 }
 0xf9b   : > { %v9594_v36 = vpop.f32.mrf.mxu1  ;;  %9839 = vmatmul.mubr.bf16.vlgmr.msra.gmra.mxu1 %v15901_v11 }
 0xf9c   : > { %v9635_v34 = vpop.f32.mrf.mxu0  ;;  %9880 = vmatmul.mubr.bf16.vlgmr.msra.gmra.mxu0 %v15905_v20  ;;  %v9595_v23 = vadd.f32 %v9594_v36, %v8263_v10 }
 0xf9d   : > { %v9596_v13 = vpop.f32.mrf.mxu1 }
 0xf9e   : > { %v9637_v38 = vpop.f32.mrf.mxu0  ;;  %v9636_v6 = vadd.f32 %v9635_v34, %v9595_v23  ;;  %v9597_v29 = vadd.f32 %v9596_v13, %v8267_v21 }
 0xf9f   : > { %v9598_v31 = vpop.f32.mrf.mxu1 }
 0xfa0   : > { %v9639_v46 = vpop.f32.mrf.mxu0  ;;  %v9638_v40 = vadd.f32 %v9637_v38, %v9597_v29 }
 0xfa1   : > { %v9599_v25 = vpop.f32.mrf.mxu1 }
 0xfa2   : > { %v9640_v12 = vpop.f32.mrf.mxu0 }
 0xfdb   : > { %v9676_v30 = vpop.f32.mrf.mxu1 }
 0xfdc   : > { %v9717_v45 = vpop.f32.mrf.mxu0  ;;  %v9677_v49 = vadd.f32 %v9676_v30, %v9636_v6 }
 0xfdd   : > { %v9678_v44 = vpop.f32.mrf.mxu1 }
 0xfde   : > { %v9719_v63 = vpop.f32.mrf.mxu0  ;;  %v15920_v5 = vadd.f32 %v9717_v45, %v9677_v49  ;;  %v9679_v11 = vadd.f32 %v9678_v44, %v9638_v40 }
 0xfdf   : > { %v9680_v22 = vpop.f32.mrf.mxu1 }
 0xfe0   : > { %v9721_v20 = vpop.f32.mrf.mxu0  ;;  %v15922_v27 = vadd.f32 %v9719_v63, %v9679_v11 }
 0xfe1   : > { %v9681_v55 = vpop.f32.mrf.mxu1 }
 0xfe2   : > { %v9722_v58 = vpop.f32.mrf.mxu0 }
0x101b   : > { %v9758_v2 = vpop.f32.mrf.mxu1 }
0x101c   : > { %v9799_v16 = vpop.f32.mrf.mxu0  ;;  %v9759_v0 = vadd.f32 %v9758_v2, %v8271_v24 }
0x101d   : > { %v9760_v37 = vpop.f32.mrf.mxu1 }
0x101e   : > { %v9801_v17 = vpop.f32.mrf.mxu0  ;;  %v9761_v32 = vadd.f32 %v9760_v37, %v8275_v26  ;;  %v9800_v48 = vadd.f32 %v9799_v16, %v9759_v0 }
0x101f   : > { %v9762_v8 = vpop.f32.mrf.mxu1 }
0x1020   : > { %v9803_v42 = vpop.f32.mrf.mxu0  ;;  %v9802_v57 = vadd.f32 %v9801_v17, %v9761_v32 }
0x1021   : > { %v9763_v15 = vpop.f32.mrf.mxu1 }
0x1022   : > { %v9804_v62 = vpop.f32.mrf.mxu0 }
0x105b   : > { %v9840_v56 = vpop.f32.mrf.mxu1 }
0x105c   : > { %v9881_v41 = vpop.f32.mrf.mxu0  ;;  %v9841_v1 = vadd.f32 %v9840_v56, %v9800_v48 }
0x105d   : > { %v9842_v3 = vpop.f32.mrf.mxu1 }
0x105e   : > { %v9883_v60 = vpop.f32.mrf.mxu0  ;;  %v15926_v61 = vadd.f32 %v9881_v41, %v9841_v1  ;;  %v9843_v14 = vadd.f32 %v9842_v3, %v9802_v57  ;;  %9890 = sbr.rel (%p16901_p9) target bundleno = 4449 (0x1161), region = 128 }
0x105f   : > { %v9844_v18 = vpop.f32.mrf.mxu1 }
0x1060   : > { %v9885_v33 = vpop.f32.mrf.mxu0  ;;  %v15928_v50 = vadd.f32 %v9883_v60, %v9843_v14 }
0x1061   : > { %v9845_v9 = vpop.f32.mrf.mxu1 }
0x1062   : > { %v9886_v35 = vpop.f32.mrf.mxu0 }
0x1063   : > { %v9922_v43 = vld [vmem:[%s15645_s29 + $0xf8] sm:$0xff]  ;;  %10026 = vmatprep.mubr.f32.mxu0 %v15922_v27  ;;  %10096 = vmatprep.mubr.f32.mxu1 %v15928_v50  ;;  %v9921_v39 = vld [vmem:[%s15645_s29 + $0xf0] sm:$0xff]  ;;  %v9920_v53 = vld [vmem:[%s15645_s29 + $0xe8] sm:$0xff]  ;;  %vm10102_vm1 = vcmask 64512   ;;  %vm10107_vm2 = vcmask 130112  }
0x1064   : > { %v9954_v51 = vld [vmem:[%s15645_s29 + $0x1f8] sm:$0xff]  ;;  %11721 = vmatprep.subr.mxu0 %v9922_v43  ;;  %v9953_v28 = vld [vmem:[%s15645_s29 + $0x1f0] sm:$0xff]  ;;  %v9952_v19 = vld [vmem:[%s15645_s29 + $0x1e8] sm:$0xff] }
0x1065   : > { %v9906_v47 = vld [vmem:[%s15645_s29 + $0x78] sm:$0xff]  ;;  %11756 = vmatprep.subr.mxu1 %v9954_v51  ;;  %v9905_v52 = vld [vmem:[%s15645_s29 + $0x70] sm:$0xff]  ;;  %v9904_v59 = vld [vmem:[%s15645_s29 + $0x68] sm:$0xff] }
0x1066   : > { %v9938_v4 = vld [vmem:[%s15645_s29 + $0x178] sm:$0xff]  ;;  %11722 = vmatpush3.msra.mxu0 %v9906_v47  ;;  %v9937_v7 = vld [vmem:[%s15645_s29 + $0x170] sm:$0xff]  ;;  %v9936_v54 = vld [vmem:[%s15645_s29 + $0x168] sm:$0xff] }
0x1067   : > { %11757 = vmatpush3.msra.mxu1 %v9938_v4  ;;  %11723 = vmatprep.subr.mxu0 %v9921_v39  ;;  %v9919_v10 = vld [vmem:[%s15645_s29 + $0xe0] sm:$0xff]  ;;  %v9918_v23 = vld [vmem:[%s15645_s29 + $0xd8] sm:$0xff]  ;;  %v9917_v29 = vld [vmem:[%s15645_s29 + $0xd0] sm:$0xff] }
0x1068   : > { %11758 = vmatprep.subr.mxu1 %v9953_v28  ;;  %11724 = vmatpush3.msra.mxu0 %v9905_v52  ;;  %v9951_v21 = vld [vmem:[%s15645_s29 + $0x1e0] sm:$0xff]  ;;  %v9950_v13 = vld [vmem:[%s15645_s29 + $0x1d8] sm:$0xff]  ;;  %v9949_v31 = vld [vmem:[%s15645_s29 + $0x1d0] sm:$0xff] }
0x1069   : > { %11759 = vmatpush3.msra.mxu1 %v9937_v7  ;;  %11725 = vmatprep.subr.mxu0 %v9920_v53  ;;  %v9903_v36 = vld [vmem:[%s15645_s29 + $0x60] sm:$0xff]  ;;  %v9902_v38 = vld [vmem:[%s15645_s29 + $0x58] sm:$0xff]  ;;  %v9901_v46 = vld [vmem:[%s15645_s29 + $0x50] sm:$0xff] }
0x106a   : > { %11760 = vmatprep.subr.mxu1 %v9952_v19  ;;  %v9935_v34 = vld [vmem:[%s15645_s29 + $0x160] sm:$0xff]  ;;  %11726 = vmatpush3.msra.mxu0 %v9904_v59  ;;  %v9934_v6 = vld [vmem:[%s15645_s29 + $0x158] sm:$0xff]  ;;  %v9933_v40 = vld [vmem:[%s15645_s29 + $0x150] sm:$0xff] }
0x106b   : > { %11761 = vmatpush3.msra.mxu1 %v9936_v54  ;;  %11727 = vmatprep.subr.mxu0 %v9919_v10  ;;  %v9916_v25 = vld [vmem:[%s15645_s29 + $0xc8] sm:$0xff]  ;;  %v9915_v49 = vld [vmem:[%s15645_s29 + $0xc0] sm:$0xff]  ;;  %v9914_v22 = vld [vmem:[%s15645_s29 + $0xb8] sm:$0xff] }
0x106c   : > { %11762 = vmatprep.subr.mxu1 %v9951_v21  ;;  %11728 = vmatpush3.msra.mxu0 %v9903_v36  ;;  %v9948_v12 = vld [vmem:[%s15645_s29 + $0x1c8] sm:$0xff]  ;;  %v9947_v44 = vld [vmem:[%s15645_s29 + $0x1c0] sm:$0xff]  ;;  %v9946_v20 = vld [vmem:[%s15645_s29 + $0x1b8] sm:$0xff] }
0x106d   : > { %11763 = vmatpush3.msra.mxu1 %v9935_v34  ;;  %11729 = vmatprep.subr.mxu0 %v9918_v23  ;;  %v9900_v30 = vld [vmem:[%s15645_s29 + $0x48] sm:$0xff]  ;;  %v9899_v63 = vld [vmem:[%s15645_s29 + $0x40] sm:$0xff]  ;;  %v9898_v55 = vld [vmem:[%s15645_s29 + $0x38] sm:$0xff] }
0x106e   : > { %11764 = vmatprep.subr.mxu1 %v9950_v13  ;;  %11730 = vmatpush3.msra.mxu0 %v9902_v38  ;;  %v9932_v45 = vld [vmem:[%s15645_s29 + $0x148] sm:$0xff]  ;;  %v9931_v11 = vld [vmem:[%s15645_s29 + $0x140] sm:$0xff]  ;;  %v9930_v58 = vld [vmem:[%s15645_s29 + $0x138] sm:$0xff] }
0x106f   : > { %11765 = vmatpush3.msra.mxu1 %v9934_v6  ;;  %11731 = vmatprep.subr.mxu0 %v9917_v29  ;;  %v9913_v2 = vld [vmem:[%s15645_s29 + $0xb0] sm:$0xff]  ;;  %v9912_v8 = vld [vmem:[%s15645_s29 + $0xa8] sm:$0xff]  ;;  %v9911_v24 = vld [vmem:[%s15645_s29 + $0xa0] sm:$0xff] }
0x1070   : > { %11766 = vmatprep.subr.mxu1 %v9949_v31  ;;  %11732 = vmatpush3.msra.mxu0 %v9901_v46  ;;  %v9945_v16 = vld [vmem:[%s15645_s29 + $0x1b0] sm:$0xff]  ;;  %v9944_v42 = vld [vmem:[%s15645_s29 + $0x1a8] sm:$0xff]  ;;  %v9943_v26 = vld [vmem:[%s15645_s29 + $0x1a0] sm:$0xff] }
0x1071   : > { %11767 = vmatpush3.msra.mxu1 %v9933_v40  ;;  %11733 = vmatprep.subr.mxu0 %v9916_v25  ;;  %v9897_v37 = vld [vmem:[%s15645_s29 + $0x30] sm:$0xff]  ;;  %v9896_v15 = vld [vmem:[%s15645_s29 + $0x28] sm:$0xff]  ;;  %v9895_v0 = vld [vmem:[%s15645_s29 + $0x20] sm:$0xff] }
0x1072   : > { %11768 = vmatprep.subr.mxu1 %v9948_v12  ;;  %11734 = vmatpush3.msra.mxu0 %v9900_v30  ;;  %v9929_v17 = vld [vmem:[%s15645_s29 + $0x130] sm:$0xff]  ;;  %v9928_v62 = vld [vmem:[%s15645_s29 + $0x128] sm:$0xff]  ;;  %v9927_v32 = vld [vmem:[%s15645_s29 + $0x120] sm:$0xff] }
0x1073   : > { %11769 = vmatpush3.msra.mxu1 %v9932_v45  ;;  %11735 = vmatprep.subr.mxu0 %v9915_v49  ;;  %v9910_v48 = vld [vmem:[%s15645_s29 + $0x98] sm:$0xff]  ;;  %v9909_v1 = vld [vmem:[%s15645_s29 + $0x90] sm:$0xff]  ;;  %v9908_v18 = vld [vmem:[%s15645_s29 + $0x88] sm:$0xff] }
0x1074   : > { %11770 = vmatprep.subr.mxu1 %v9947_v44  ;;  %11736 = vmatpush3.msra.mxu0 %v9899_v63  ;;  %v9942_v56 = vld [vmem:[%s15645_s29 + $0x198] sm:$0xff]  ;;  %v9941_v3 = vld [vmem:[%s15645_s29 + $0x190] sm:$0xff]  ;;  %v9940_v33 = vld [vmem:[%s15645_s29 + $0x188] sm:$0xff] }
0x1075   : > { %11771 = vmatpush3.msra.mxu1 %v9931_v11  ;;  %11737 = vmatprep.subr.mxu0 %v9914_v22  ;;  %v9894_v41 = vld [vmem:[%s15645_s29 + $0x18] sm:$0xff]  ;;  %v9893_v60 = vld [vmem:[%s15645_s29 + $0x10] sm:$0xff]  ;;  %v9892_v9 = vld [vmem:[%s15645_s29 + $0x8] sm:$0xff] }
0x1076   : > { %11772 = vmatprep.subr.mxu1 %v9946_v20  ;;  %11738 = vmatpush3.msra.mxu0 %v9898_v55  ;;  %v9926_v57 = vld [vmem:[%s15645_s29 + $0x118] sm:$0xff]  ;;  %v9925_v14 = vld [vmem:[%s15645_s29 + $0x110] sm:$0xff]  ;;  %v9924_v35 = vld [vmem:[%s15645_s29 + $0x108] sm:$0xff] }
0x1077   : > { %11773 = vmatpush3.msra.mxu1 %v9930_v58  ;;  %11739 = vmatprep.subr.mxu0 %v9913_v2  ;;  %v9907_v43 = vld [vmem:[%s15645_s29 + $0x80] sm:$0xff] }
0x1078   : > { %11774 = vmatprep.subr.mxu1 %v9945_v16  ;;  %11740 = vmatpush3.msra.mxu0 %v9897_v37  ;;  %v9939_v51 = vld [vmem:[%s15645_s29 + $0x180] sm:$0xff] }
0x1079   : > { %11775 = vmatpush3.msra.mxu1 %v9929_v17  ;;  %11741 = vmatprep.subr.mxu0 %v9912_v8  ;;  %v9891_v47 = vld [vmem:[%s15645_s29] sm:$0xff] }
0x107a   : > { %11776 = vmatprep.subr.mxu1 %v9944_v42  ;;  %11742 = vmatpush3.msra.mxu0 %v9896_v15  ;;  %v9923_v4 = vld [vmem:[%s15645_s29 + $0x100] sm:$0xff] }
0x107b   : > { %11777 = vmatpush3.msra.mxu1 %v9928_v62  ;;  %11743 = vmatprep.subr.mxu0 %v9911_v24  ;;  %v11704_v52 = vld [vmem:[%s661_s19] ss:$0 sm:$0xff] }
0x107c   : > { %11778 = vmatprep.subr.mxu1 %v9943_v26  ;;  %11744 = vmatpush3.msra.mxu0 %v9895_v0 }
0x107d   : > { %11779 = vmatpush3.msra.mxu1 %v9927_v32  ;;  %11745 = vmatprep.subr.mxu0 %v9910_v48 }
0x107e   : > { %11780 = vmatprep.subr.mxu1 %v9942_v56  ;;  %11746 = vmatpush3.msra.mxu0 %v9894_v41 }
0x107f   : > { %11781 = vmatpush3.msra.mxu1 %v9926_v57  ;;  %11747 = vmatprep.subr.mxu0 %v9909_v1 }
0x1080   : > { %11782 = vmatprep.subr.mxu1 %v9941_v3  ;;  %11748 = vmatpush3.msra.mxu0 %v9893_v60 }
0x1081   : > { %11783 = vmatpush3.msra.mxu1 %v9925_v14  ;;  %11749 = vmatprep.subr.mxu0 %v9908_v18 }
0x1082   : > { %11784 = vmatprep.subr.mxu1 %v9940_v33  ;;  %11750 = vmatpush3.msra.mxu0 %v9892_v9 }
0x1083   : > { %11785 = vmatpush3.msra.mxu1 %v9924_v35  ;;  %11751 = vmatprep.subr.mxu0 %v9907_v43 }
0x1084   : > { %11786 = vmatprep.subr.mxu1 %v9939_v51  ;;  %11752 = vmatpush3.msra.mxu0 %v9891_v47 }
0x1085   : > { %11787 = vmatpush3.msra.mxu1 %v9923_v4  ;;  %10027 = vmatmul.mubr.f32.vlgmr.msra.gmra.mxu0 %v15920_v5 }
0x1086   : > { %10097 = vmatmul.mubr.f32.vlgmr.msra.gmra.mxu1 %v15926_v61 }
0x1145   : > { %v11753_v39 = vpop.f32.mrf.mxu0 }
0x1146   : > { %v11788_v28 = vpop.f32.mrf.mxu1 }
0x1147   : > { %v11754_v7 = vpop.f32.mrf.mxu0 }
0x1148   : > { %v11789_v53 = vpop.f32.mrf.mxu1  ;;  %v11755_v19 = vadd.f32 %v11754_v7, %v11753_v39 }
0x1149   : > { %v11790_v54 = vadd.f32 %v11789_v53, %v11788_v28 }
0x114a   : > { %v10029_v59 = vadd.f32 %v11755_v19, %v11704_v52 }
0x114c   : > { %v10099_v10 = vadd.f32 %v11790_v54, %v10029_v59 }
0x114e   : > { %10103 = vst.msk [vmem:[%s15719_s4] sm:$0xff] %vm10102_vm1, %v10099_v10  ;;  %v10104_v21 = vmul.f32 1.442695, %v10099_v10 }
0x1150   : > { %12889 = vpow2.f32 %v10104_v21 }
0x115d   : > { %v12890_v36 = vpop.eup %12889 }
0x115e   : > { %v10106_v34 = vadd.f32 1e-08, %v12890_v36 }
0x1160   : > { %10108 = vst.msk [vmem:[%s15719_s4] sm:$0xff] %vm10107_vm2, %v10106_v34 }
0x1161 PF: > { %p16902_p4 = scmp.eq.s32.totalorder %s13436_s25, 0 }
0x1163   : > { %10112 = sbr.rel (%p16902_p4) target bundleno = 4693 (0x1255), region = 132 }
0x1168   : > { %v10152_v23 = vld [vmem:[%s15645_s29 + $0xf8] sm:$0xff]  ;;  %v10151_v29 = vld [vmem:[%s15645_s29 + $0xf0] sm:$0xff]  ;;  %v10150_v25 = vld [vmem:[%s15645_s29 + $0xe8] sm:$0xff]  ;;  %v10114_v59 = vmax.f32 %v15922_v27, 0.0  ;;  %v10116_v21 = vmax.f32 %v15928_v50, 0.0  ;;  %vm10332_vm3 = vcmask 130048  }
0x1169   : > { %v10184_v13 = vld [vmem:[%s15645_s29 + $0x1f8] sm:$0xff]  ;;  %11791 = vmatprep.subr.mxu0 %v10152_v23  ;;  %v10183_v31 = vld [vmem:[%s15645_s29 + $0x1f0] sm:$0xff]  ;;  %v10182_v12 = vld [vmem:[%s15645_s29 + $0x1e8] sm:$0xff]  ;;  %v10113_v23 = vmax.f32 %v15920_v5, 0.0 }
0x116a   : > { %v10136_v38 = vld [vmem:[%s15645_s29 + $0x78] sm:$0xff]  ;;  %11826 = vmatprep.subr.mxu1 %v10184_v13  ;;  %v10135_v46 = vld [vmem:[%s15645_s29 + $0x70] sm:$0xff]  ;;  %v10134_v30 = vld [vmem:[%s15645_s29 + $0x68] sm:$0xff]  ;;  %v10115_v13 = vmax.f32 %v15926_v61, 0.0 }
0x116b   : > { %v10168_v6 = vld [vmem:[%s15645_s29 + $0x178] sm:$0xff]  ;;  %11792 = vmatpush3.msra.mxu0 %v10136_v38  ;;  %v10167_v40 = vld [vmem:[%s15645_s29 + $0x170] sm:$0xff]  ;;  %v10166_v45 = vld [vmem:[%s15645_s29 + $0x168] sm:$0xff] }
0x116c   : > { %11827 = vmatpush3.msra.mxu1 %v10168_v6  ;;  %11793 = vmatprep.subr.mxu0 %v10151_v29  ;;  %v10149_v49 = vld [vmem:[%s15645_s29 + $0xe0] sm:$0xff]  ;;  %v10148_v22 = vld [vmem:[%s15645_s29 + $0xd8] sm:$0xff]  ;;  %v10147_v2 = vld [vmem:[%s15645_s29 + $0xd0] sm:$0xff]  ;;  %v10119_v61 = vmin.f32 %v10115_v13, 6.0 }
0x116d   : > { %11828 = vmatprep.subr.mxu1 %v10183_v31  ;;  %11794 = vmatpush3.msra.mxu0 %v10135_v46  ;;  %v10181_v44 = vld [vmem:[%s15645_s29 + $0x1e0] sm:$0xff]  ;;  %v10180_v20 = vld [vmem:[%s15645_s29 + $0x1d8] sm:$0xff]  ;;  %v10179_v16 = vld [vmem:[%s15645_s29 + $0x1d0] sm:$0xff]  ;;  %v10118_v31 = vmin.f32 %v10114_v59, 6.0  ;;  %v10120_v46 = vmin.f32 %v10116_v21, 6.0 }
0x116e   : > { %11829 = vmatpush3.msra.mxu1 %v10167_v40  ;;  %11795 = vmatprep.subr.mxu0 %v10150_v25  ;;  %v10133_v63 = vld [vmem:[%s15645_s29 + $0x60] sm:$0xff]  ;;  %v10132_v55 = vld [vmem:[%s15645_s29 + $0x58] sm:$0xff]  ;;  %v10131_v37 = vld [vmem:[%s15645_s29 + $0x50] sm:$0xff]  ;;  %v10117_v40 = vmin.f32 %v10113_v23, 6.0 }
0x116f   : > { %11830 = vmatprep.subr.mxu1 %v10182_v12  ;;  %v10165_v11 = vld [vmem:[%s15645_s29 + $0x160] sm:$0xff]  ;;  %11796 = vmatpush3.msra.mxu0 %v10134_v30  ;;  %v10164_v58 = vld [vmem:[%s15645_s29 + $0x158] sm:$0xff]  ;;  %v10163_v17 = vld [vmem:[%s15645_s29 + $0x150] sm:$0xff] }
0x1170   : > { %11831 = vmatpush3.msra.mxu1 %v10166_v45  ;;  %11797 = vmatprep.subr.mxu0 %v10149_v49  ;;  %v10146_v8 = vld [vmem:[%s15645_s29 + $0xc8] sm:$0xff]  ;;  %v10145_v24 = vld [vmem:[%s15645_s29 + $0xc0] sm:$0xff]  ;;  %v10144_v48 = vld [vmem:[%s15645_s29 + $0xb8] sm:$0xff] }
0x1171   : > { %11832 = vmatprep.subr.mxu1 %v10181_v44  ;;  %11798 = vmatpush3.msra.mxu0 %v10133_v63  ;;  %v10178_v42 = vld [vmem:[%s15645_s29 + $0x1c8] sm:$0xff]  ;;  %v10177_v26 = vld [vmem:[%s15645_s29 + $0x1c0] sm:$0xff]  ;;  %v10176_v56 = vld [vmem:[%s15645_s29 + $0x1b8] sm:$0xff] }
0x1172   : > { %11833 = vmatpush3.msra.mxu1 %v10165_v11  ;;  %11799 = vmatprep.subr.mxu0 %v10148_v22  ;;  %v10130_v15 = vld [vmem:[%s15645_s29 + $0x48] sm:$0xff]  ;;  %v10129_v0 = vld [vmem:[%s15645_s29 + $0x40] sm:$0xff]  ;;  %v10128_v41 = vld [vmem:[%s15645_s29 + $0x38] sm:$0xff] }
0x1173   : > { %11834 = vmatprep.subr.mxu1 %v10180_v20  ;;  %11800 = vmatpush3.msra.mxu0 %v10132_v55  ;;  %v10162_v62 = vld [vmem:[%s15645_s29 + $0x148] sm:$0xff]  ;;  %v10161_v32 = vld [vmem:[%s15645_s29 + $0x140] sm:$0xff]  ;;  %v10160_v57 = vld [vmem:[%s15645_s29 + $0x138] sm:$0xff] }
0x1174   : > { %11835 = vmatpush3.msra.mxu1 %v10164_v58  ;;  %11801 = vmatprep.subr.mxu0 %v10147_v2  ;;  %v10143_v1 = vld [vmem:[%s15645_s29 + $0xb0] sm:$0xff]  ;;  %v10142_v18 = vld [vmem:[%s15645_s29 + $0xa8] sm:$0xff]  ;;  %v10141_v43 = vld [vmem:[%s15645_s29 + $0xa0] sm:$0xff] }
0x1175   : > { %11836 = vmatprep.subr.mxu1 %v10179_v16  ;;  %11802 = vmatpush3.msra.mxu0 %v10131_v37  ;;  %v10175_v3 = vld [vmem:[%s15645_s29 + $0x1b0] sm:$0xff]  ;;  %v10174_v33 = vld [vmem:[%s15645_s29 + $0x1a8] sm:$0xff]  ;;  %v10173_v51 = vld [vmem:[%s15645_s29 + $0x1a0] sm:$0xff] }
0x1176   : > { %11837 = vmatpush3.msra.mxu1 %v10163_v17  ;;  %11803 = vmatprep.subr.mxu0 %v10146_v8  ;;  %v10127_v60 = vld [vmem:[%s15645_s29 + $0x30] sm:$0xff]  ;;  %v10126_v9 = vld [vmem:[%s15645_s29 + $0x28] sm:$0xff]  ;;  %v10125_v47 = vld [vmem:[%s15645_s29 + $0x20] sm:$0xff] }
0x1177   : > { %11838 = vmatprep.subr.mxu1 %v10178_v42  ;;  %11804 = vmatpush3.msra.mxu0 %v10130_v15  ;;  %v10159_v14 = vld [vmem:[%s15645_s29 + $0x130] sm:$0xff]  ;;  %v10158_v35 = vld [vmem:[%s15645_s29 + $0x128] sm:$0xff]  ;;  %v10157_v4 = vld [vmem:[%s15645_s29 + $0x120] sm:$0xff] }
0x1178   : > { %11839 = vmatpush3.msra.mxu1 %v10162_v62  ;;  %11805 = vmatprep.subr.mxu0 %v10145_v24  ;;  %v10140_v39 = vld [vmem:[%s15645_s29 + $0x98] sm:$0xff]  ;;  %v10139_v53 = vld [vmem:[%s15645_s29 + $0x90] sm:$0xff]  ;;  %v10138_v36 = vld [vmem:[%s15645_s29 + $0x88] sm:$0xff] }
0x1179   : > { %11840 = vmatprep.subr.mxu1 %v10177_v26  ;;  %11806 = vmatpush3.msra.mxu0 %v10129_v0  ;;  %v10172_v28 = vld [vmem:[%s15645_s29 + $0x198] sm:$0xff]  ;;  %v10171_v19 = vld [vmem:[%s15645_s29 + $0x190] sm:$0xff]  ;;  %v10170_v34 = vld [vmem:[%s15645_s29 + $0x188] sm:$0xff] }
0x117a   : > { %11841 = vmatpush3.msra.mxu1 %v10161_v32  ;;  %11807 = vmatprep.subr.mxu0 %v10144_v48  ;;  %v10124_v52 = vld [vmem:[%s15645_s29 + $0x18] sm:$0xff]  ;;  %v10123_v54 = vld [vmem:[%s15645_s29 + $0x10] sm:$0xff]  ;;  %v10122_v27 = vld [vmem:[%s15645_s29 + $0x8] sm:$0xff] }
0x117b   : > { %11842 = vmatprep.subr.mxu1 %v10176_v56  ;;  %11808 = vmatpush3.msra.mxu0 %v10128_v41  ;;  %v10156_v7 = vld [vmem:[%s15645_s29 + $0x118] sm:$0xff]  ;;  %v10155_v10 = vld [vmem:[%s15645_s29 + $0x110] sm:$0xff]  ;;  %v10154_v38 = vld [vmem:[%s15645_s29 + $0x108] sm:$0xff] }
0x117c   : > { %11843 = vmatpush3.msra.mxu1 %v10160_v57  ;;  %11809 = vmatprep.subr.mxu0 %v10143_v1  ;;  %v10137_v6 = vld [vmem:[%s15645_s29 + $0x80] sm:$0xff] }
0x117d   : > { %11844 = vmatprep.subr.mxu1 %v10175_v3  ;;  %11810 = vmatpush3.msra.mxu0 %v10127_v60  ;;  %v10169_v29 = vld [vmem:[%s15645_s29 + $0x180] sm:$0xff] }
0x117e   : > { %11845 = vmatpush3.msra.mxu1 %v10159_v14  ;;  %11811 = vmatprep.subr.mxu0 %v10142_v18  ;;  %v10121_v50 = vld [vmem:[%s15645_s29] sm:$0xff] }
0x117f   : > { %11846 = vmatprep.subr.mxu1 %v10174_v33  ;;  %11812 = vmatpush3.msra.mxu0 %v10126_v9  ;;  %v10153_v5 = vld [vmem:[%s15645_s29 + $0x100] sm:$0xff] }
0x1180   : > { %11847 = vmatpush3.msra.mxu1 %v10158_v35  ;;  %11813 = vmatprep.subr.mxu0 %v10141_v43  ;;  %v11706_v30 = vld [vmem:[%s661_s19] ss:$0 sm:$0xff] }
0x1181   : > { %11848 = vmatprep.subr.mxu1 %v10173_v51  ;;  %11814 = vmatpush3.msra.mxu0 %v10125_v47 }
0x1182   : > { %11849 = vmatpush3.msra.mxu1 %v10157_v4  ;;  %11815 = vmatprep.subr.mxu0 %v10140_v39 }
0x1183   : > { %11850 = vmatprep.subr.mxu1 %v10172_v28  ;;  %11816 = vmatpush3.msra.mxu0 %v10124_v52 }
0x1184   : > { %11851 = vmatpush3.msra.mxu1 %v10156_v7  ;;  %11817 = vmatprep.subr.mxu0 %v10139_v53 }
0x1185   : > { %11852 = vmatprep.subr.mxu1 %v10171_v19  ;;  %11818 = vmatpush3.msra.mxu0 %v10123_v54 }
0x1186   : > { %11853 = vmatpush3.msra.mxu1 %v10155_v10  ;;  %11819 = vmatprep.subr.mxu0 %v10138_v36 }
0x1187   : > { %11854 = vmatprep.subr.mxu1 %v10170_v34  ;;  %11820 = vmatpush3.msra.mxu0 %v10122_v27 }
0x1188   : > { %11855 = vmatpush3.msra.mxu1 %v10154_v38  ;;  %11821 = vmatprep.subr.mxu0 %v10137_v6 }
0x1189   : > { %11856 = vmatprep.subr.mxu1 %v10169_v29  ;;  %11822 = vmatpush3.msra.mxu0 %v10121_v50 }
0x118a   : > { %10256 = vmatprep.mubr.f32.mxu0 %v10118_v31  ;;  %11857 = vmatpush3.msra.mxu1 %v10153_v5 }
0x118b   : > { %10326 = vmatprep.mubr.f32.mxu1 %v10120_v46  ;;  %10257 = vmatmul.mubr.f32.vlgmr.msra.gmra.mxu0 %v10117_v40 }
0x118c   : > { %10327 = vmatmul.mubr.f32.vlgmr.msra.gmra.mxu1 %v10119_v61 }
0x124b   : > { %v11823_v25 = vpop.f32.mrf.mxu0 }
0x124c   : > { %v11858_v12 = vpop.f32.mrf.mxu1 }
0x124d   : > { %v11824_v45 = vpop.f32.mrf.mxu0 }
0x124e   : > { %v11859_v49 = vpop.f32.mrf.mxu1  ;;  %v11825_v44 = vadd.f32 %v11824_v45, %v11823_v25 }
0x124f   : > { %v11860_v11 = vadd.f32 %v11859_v49, %v11858_v12 }
0x1250   : > { %v10259_v63 = vadd.f32 %v11825_v44, %v11706_v30 }
0x1252   : > { %v10329_v22 = vadd.f32 %v11860_v11, %v10259_v63 }
0x1254   : > { %10333 = vst.msk [vmem:[%s15719_s4] sm:$0xff] %vm10332_vm3, %v10329_v22 }
0x1255 PF: > { %s16903_s18 = sld [smem:[#allocation40_spill]]  ;;  %s11708_s29 = sshll.u32 %s13436_s25, 7 }
0x1256   : > { %s16904_s13 = sld [smem:[#allocation163_spill]]  ;;  %s10348_s17 = sshll.u32 %s15719_s4, 4  ;;  %s10349_s17 = int_to_ptr.vmem [resolvable:$true] %s10348_s17 }
0x1257   : > { %s10335_s27 = scalar_lea.sflag [#allocation8], %s13732_s0  ;;  %s13233_s3 = scalar_lea.vmem %s10349_s17, 128 }
0x1258   : > { %p13234_p10 = scmp.ne.s32.totalorder %s10349_s17, %s13233_s3  ;;  %s13329_s15 = smov [#allocation19]  }
0x1259   : > { %s13237_s30 = sshll.u32 %s13329_s15, 4  ;;  %s13238_s30 = int_to_ptr.vmem [resolvable:$false] %s13237_s30 }
0x125a   : > { %s13239_s26 = scalar_lea.vmem %s13238_s30, 256  ;;  %p13240_p6 = scmp.lt.s32.totalorder %s10349_s17, %s13238_s30 }
0x125b   : > { %p16905_p7 = scmp.ne.s32.totalorder %s16903_s18, 0  ;;  %p13241_p12 = scmp.lt.s32.totalorder %s13239_s26, %s13233_s3 }
0x125c   : > { %s10346_s11 = scalar_lea.hbm %s16904_s13, %s11708_s29 }
0x125d   : > { %p13235_p5 = pnand %p13234_p10, %p16905_p7  ;;  %p13242_p11 = por %p13241_p12, %p13240_p6 }
0x125f   : > { %p13236_p1 = pneg %p13235_p5 }
0x1261   : > { %p13243_p13 = pnand %p13242_p11, %p13236_p1 }
0x1263   : > { %13246 = shalt.err (!%p13243_p13)
}
0x1264   : > { %s13247_s25 = scalar_lea.hbm %s10346_s11, 128  ;;  %s13251_s2 = scalar_lea.hbm %s16904_s13, 256 }
0x1265   : > { %p13248_p3 = scmp.ne.s32.totalorder %s10346_s11, %s13247_s25  ;;  %p13252_p0 = scmp.lt.s32.totalorder %s10346_s11, %s16904_s13 }
0x1266   : > { %p13253_p9 = scmp.lt.s32.totalorder %s13251_s2, %s13247_s25 }
0x1267   : > { %p13249_p8 = pnand %p13248_p3, %p16905_p7 }
0x1268   : > { %p13254_p4 = por %p13253_p9, %p13252_p0 }
0x1269   : > { %p13250_p2 = pneg %p13249_p8 }
0x126b   : > { %p13255_p10 = pnand %p13254_p4, %p13250_p2 }
0x126d   : > { %13258 = shalt.err (!%p13255_p10)
}
0x126e   : > { %11900 = dma.vmem_to_hbm [thread:$0]  (%p16905_p7), %s10349_s17, 128, %s10346_s11, %s10335_s27  }
0x126f PF: > { %s16906_s19 = sld [smem:[#allocation35_spill]]  ;;  %p16909_p1 = scmp.ge.s32.totalorder %s13311_s24, 2 }
0x1270   : > { %s16907_s4 = sld [smem:[#allocation41_spill]] }
0x1275   : > { %s10360_s29 = sand.u32 1, %s16906_s19  }
0x1276   : > { %p16908_p5 = scmp.ne.s32.totalorder %s16907_s4, 0  ;;  %s10361_s1 = scalar_lea.sflag [#allocation8], %s10360_s29 }
0x1278   : > { %p11935_p6 = pnand %p16909_p1, %p16908_p5 }
0x127a   : > { %p11936_p12 = pneg %p11935_p6 }
0x127c   : > { %13294 = dma.done.wait (%p11936_p12), %s10361_s1, 128  }
0x127d   : > { %13296 = vsyncadd (%p11936_p12), %s10361_s1, 4294967168  ;;  %s16910_s24 = sld [smem:[#allocation37_spill]]  ;;  %s16913_s21 = smov %s13303_s22 }
0x127e   : > { %s16911_s3 = sld [smem:[#allocation36_spill]] }
0x127f   : > { %s16912_s23 = sld [smem:[#allocation38_spill]] }
0x1283   : > { %p28_p11 = scmp.ge.s32.totalorder %s16910_s24, 4  }
0x1284   : > { %s16914_s22 = smov %s16911_s3 }
0x1285   :  { %30 = sbr.rel (!%p28_p11) target bundleno = 18 (0x12), region = 231 }
0x128a   :  { %10366 = vsyncpa [#allocation7], 1 }
0x128b   :  { %10368 = vsyncpa [#allocation7 + $0x1], 1 }
0x128c   :  { %10369 = vsyncpa [#allocation10], 1 }
0x128d   :  { %10370 = vsyncpa [#allocation8], 1 }
0x128e   :  { %10372 = vsyncpa [#allocation8 + $0x1], 1 }
0x128f   :  { %10373 = vsyncmov [#allocation5] }
0x1292   :  { %s10374_s18 = vpop.sfrf %10373 }
0x1293   :  { %p11711_p7 = scmp.ne.s32.totalorder %s10374_s18, 0 }
0x1295   :  { %10378 = shalt.err (%p11711_p7)  }
0x1296   :  { %10380 = vsyncmov [#allocation5 + $0x1] }
0x1299   :  { %s10381_s11 = vpop.sfrf %10380 }
0x129a   :  { %p11712_p13 = scmp.ne.s32.totalorder %s10381_s11, 0 }
0x129c   :  { %10385 = shalt.err (%p11712_p13)  }
0x129d   :  { %10387 = vsyncmov [#allocation5 + $0x2] }
0x12a0   :  { %s10388_s17 = vpop.sfrf %10387 }
0x12a1   :  { %p11713_p3 = scmp.ne.s32.totalorder %s10388_s17, 0 }
0x12a3   :  { %10392 = shalt.err (%p11713_p3)  }

</bundles_post_ra>
